<compile_context>
chip_gen: v7x
topology: tpu7x:2x2x1
jax: 0.10.0
libtpu: 0.0.40
codegen_flags: <defaults>
</compile_context>

<pallas_src>
import jax
import jax.numpy as jnp
import numpy as np
from jax.experimental import pallas as pl
from jax.experimental.pallas import tpu as pltpu

BN_EPS = 1e-5


def _round_up(x, m):
    return (x + m - 1) // m * m


# ---------------------------------------------------------------------------
# Fused kernel: conv1(3x3)+bn1+relu -> VMEM slab -> conv2(3x3)+bn2
#               + (1x1 downsample | identity) residual + relu
# ---------------------------------------------------------------------------
def _make_fused_kernel(Wp, TH, c_pad, inplanes, has_downsample):
    M1 = (TH + 2) * Wp      # conv1 rows: TH output rows + 1 halo row above/below
    M = TH * Wp             # final output rows per tile
    SHIFT = 15              # slab coord offset: the M1-row slab store starts at
                            # sublane 16 (bf16 (16,128) tile aligned, unmasked)

    def kernel(xg_ref, mask_ref, w1_ref, w2o_ref, w2g_ref, b1_ref, b2_ref,
               *rest):
        if has_downsample:
            wd_ref, o_ref, slab_ref = rest
        else:
            o_ref, slab_ref = rest

        # ---- conv1 + bn1 + relu over TH+2 rows (incl. 1-row halo) ----------
        acc1 = jnp.zeros((M1, c_pad), jnp.float32)
        for kh in range(3):
            for kw in range(3):
                acc1 = acc1 + jnp.dot(
                    xg_ref[0, 0, pl.ds(kh * Wp + kw, M1), :],
                    w1_ref[kh * 3 + kw, :, :],
                    preferred_element_type=jnp.float32)
        # mask zeroes (a) the row-overrun garbage columns and (b) halo rows
        # that fall outside the image (they are conv2's zero padding).
        y1 = (jnp.maximum(acc1 + b1_ref[...], 0.0) * mask_ref[0]).astype(
            slab_ref.dtype)

        # out1 slab: slab[q + SHIFT] holds zero-padded out1 at flattened padded
        # coordinate q (row p ~ out1 row r0-1+p, col c ~ out1 col c-1); the
        # conv1 output's flat index m1 maps to q = m1 + 1.
        slab_ref[...] = jnp.zeros(slab_ref.shape, slab_ref.dtype)
        slab_ref[pl.ds(SHIFT + 1, M1), :] = y1          # 16-aligned store

        # ---- residual: 1x1 downsample (or identity) from the resident tile -
        if has_downsample:
            acc = jnp.dot(xg_ref[0, 0, pl.ds(2 * Wp + 1, M), :], wd_ref[...],
                          preferred_element_type=jnp.float32)
        else:
            # identity residual: plain VPU add of x's channels (no matmul).
            idv = xg_ref[0, 0, pl.ds(2 * Wp + 1, M), :inplanes]
            idv = idv.astype(jnp.float32)
            if c_pad > inplanes:
                idv = jnp.concatenate(
                    [idv, jnp.zeros((M, c_pad - inplanes), jnp.float32)],
                    axis=-1)
            acc = idv
        acc = acc + b2_ref[...]

        # ---- conv2 + bn2: out1 taps from the VMEM slab, g2 taps straight
        #      from the [x|g1|g2] tile via zero-extended weights --------------
        for kh in range(3):
            for kw in range(3):
                acc = acc + jnp.dot(
                    slab_ref[pl.ds(kh * Wp + kw + SHIFT, M), :],
                    w2o_ref[kh * 3 + kw, :, :],
                    preferred_element_type=jnp.float32)
                acc = acc + jnp.dot(
                    xg_ref[0, 0, pl.ds((kh + 1) * Wp + kw, M), :],
                    w2g_ref[kh * 3 + kw, :, :],
                    preferred_element_type=jnp.float32)

        o_ref[0, 0, :, :] = jnp.maximum(acc, 0.0).astype(o_ref.dtype)

    return kernel


# ---------------------------------------------------------------------------
# Per-chip sizing
# ---------------------------------------------------------------------------
def _vmem_budget_bytes():
    """~3/4 of physical VMEM, capped at 100 MiB (v5e/v6e: 128 MiB physical,
    v7x: 64 MiB -> ~48 MiB budget, leaving Mosaic headroom)."""
    cap = 64 * 1024 * 1024
    try:
        cap = int(pltpu.get_tpu_info().vmem_capacity_bytes)
    except Exception:
        pass
    return min(cap * 3 // 4, 100 * 1024 * 1024)


def _pick_tile_rows(H, W, c_in, c_pad, budget_bytes):
    """Largest divisor of H whose per-step working set fits the VMEM budget
    (bigger tiles amortize grid overhead and lift DMA efficiency)."""
    wp = _round_up(W + 2, 8)
    lane_cin = _round_up(max(c_in, 1), 128)          # physical lane padding
    ths = [d for d in range(H, 0, -1) if H % d == 0]
    for th in ths:
        l1 = (th + 5) * wp
        m1 = (th + 2) * wp
        m = th * wp
        est = (2 * l1 * lane_cin * 2                 # x/g blocks (double buf.)
               + 2 * m * c_pad * 2                   # out blocks (double buf.)
               + ((th + 3) * wp + 16) * c_pad * 2    # out1 slab scratch
               + 4 * m1 * c_pad * 4                  # f32 accumulators/spills
               + 2 * 9 * c_pad * c_pad * 2)          # conv2 weights (double buf.)
        if est <= budget_bytes // 2:
            return th
    return ths[-1]


# ---------------------------------------------------------------------------
# Wrapper: BN folding, channel padding, row tiling, pallas_call
# ---------------------------------------------------------------------------
def basic_block_geo_forward(x, g1, g2, params, inplanes, planes,
                            tile_rows=None):
    """x, g1, g2: NHWC.  Returns (N, H, W, planes) f32.  stride=1 only."""
    N, H, W, _ = x.shape
    geoplanes = g1.shape[-1]
    has_downsample = inplanes != planes              # stride fixed to 1
    cin1 = inplanes + geoplanes                      # conv1 / downsample K
    cin_all = inplanes + 2 * geoplanes               # [x|g1|g2] slab channels
    c_pad = _round_up(planes, 128)                   # lane-dense out channels
    wp = _round_up(W + 2, 8)                         # padded, 8-aligned width

    budget = _vmem_budget_bytes()
    TH = tile_rows if tile_rows is not None else _pick_tile_rows(
        H, W, cin_all, c_pad, budget)
    assert H % TH == 0, (H, TH)
    T = H // TH
    L1 = (TH + 5) * wp                               # x/g slab rows per tile
    M1 = (TH + 2) * wp                               # conv1 output rows
    M = TH * wp                                      # final output rows

    # ---- fold BN (inference mode) into weights / biases --------------------
    def fold(bn):
        s = bn["gamma"] / jnp.sqrt(bn["var"] + BN_EPS)
        return s, bn["beta"] - bn["mean"] * s

    s1, b1 = fold(params["bn1"])
    s2, b2 = fold(params["bn2"])
    w1 = (params["w1"] * s1).reshape(9, cin1, planes)
    w2 = (params["w2"] * s2).reshape(9, planes + geoplanes, planes)

    # Zero-extended, channel-padded weights (extra K rows / N cols are zero).
    w1k = jnp.zeros((9, cin_all, c_pad), jnp.float32
                    ).at[:, :cin1, :planes].set(w1)
    w2o = jnp.zeros((9, c_pad, c_pad), jnp.float32
                    ).at[:, :planes, :planes].set(w2[:, geoplanes:, :])
    w2g = jnp.zeros((9, cin_all, c_pad), jnp.float32
                    ).at[:, cin1:cin1 + geoplanes, :planes].set(
                        w2[:, :geoplanes, :])
    b1p = jnp.zeros((1, c_pad), jnp.float32).at[0, :planes].set(b1)

    if has_downsample:
        sd, bd = fold(params["bnd"])
        wdk = jnp.zeros((cin_all, c_pad), jnp.float32
                        ).at[:cin1, :planes].set(params["wd"][0, 0] * sd)
        b2p = jnp.zeros((1, c_pad), jnp.float32).at[0, :planes].set(b2 + bd)
    else:
        wdk = None
        b2p = jnp.zeros((1, c_pad), jnp.float32).at[0, :planes].set(b2)

    # ---- single tiled, padded activation slab [x | g1 | g2] ----------------
    xg = jnp.concatenate([x, g1, g2], axis=-1)       # (N, H, W, cin_all)
    xp = jnp.pad(xg, ((0, 0), (2, 3), (1, wp - W - 1), (0, 0)))
    xg_t = jnp.stack(
        [xp[:, t * TH:t * TH + TH + 5].reshape(N, L1, cin_all)
         for t in range(T)], axis=1).astype(jnp.bfloat16)  # (N, T, L1, cin_all)

    # Per-tile conv1 mask: zero the row-overrun columns and the halo rows that
    # fall outside the image (they become conv2's zero padding).
    mask_np = np.zeros((T, M1, 1), np.float32)
    for t in range(T):
        m2d = np.zeros((TH + 2, wp), np.float32)
        m2d[:, :W] = 1.0
        if t == 0:
            m2d[0, :] = 0.0
        if t == T - 1:
            m2d[TH + 1, :] = 0.0
        mask_np[t] = m2d.reshape(M1, 1)
    mask = jnp.asarray(mask_np)

    in_specs = [
        pl.BlockSpec((1, 1, L1, cin_all), lambda n, t: (n, t, 0, 0)),
        pl.BlockSpec((1, M1, 1), lambda n, t: (t, 0, 0)),
        # grid-invariant operands (constant index maps, VMEM-resident)
        pl.BlockSpec((9, cin_all, c_pad), lambda n, t: (0, 0, 0)),
        pl.BlockSpec((9, c_pad, c_pad), lambda n, t: (0, 0, 0)),
        pl.BlockSpec((9, cin_all, c_pad), lambda n, t: (0, 0, 0)),
        pl.BlockSpec((1, c_pad), lambda n, t: (0, 0)),
        pl.BlockSpec((1, c_pad), lambda n, t: (0, 0)),
    ]
    args = [xg_t, mask, w1k.astype(jnp.bfloat16), w2o.astype(jnp.bfloat16),
            w2g.astype(jnp.bfloat16), b1p, b2p]
    if has_downsample:
        in_specs.append(pl.BlockSpec((cin_all, c_pad), lambda n, t: (0, 0)))
        args.append(wdk.astype(jnp.bfloat16))

    slab_len = (TH + 3) * wp + 16
    kernel = _make_fused_kernel(wp, TH, c_pad, inplanes, has_downsample)

    out = pl.pallas_call(
        kernel,
        out_shape=jax.ShapeDtypeStruct((N, T, M, c_pad), jnp.bfloat16),
        grid=(N, T),
        in_specs=in_specs,
        out_specs=pl.BlockSpec((1, 1, M, c_pad), lambda n, t: (n, t, 0, 0)),
        scratch_shapes=[pltpu.VMEM((slab_len, c_pad), jnp.bfloat16)],
        compiler_params=pltpu.CompilerParams(
            dimension_semantics=("parallel", "parallel"),
            vmem_limit_bytes=budget,
        ),
    )(*args)

    out = out.reshape(N, T, TH, wp, c_pad)[:, :, :, :W, :planes]
    return out.reshape(N, H, W, planes).astype(jnp.float32)


# ---------------------------------------------------------------------------
# Parameter init + pure-JAX reference (for correctness check)
# ---------------------------------------------------------------------------
def init_params(key, inplanes, planes, geoplanes):
    cin1 = inplanes + geoplanes
    cin2 = planes + geoplanes
    keys = jax.random.split(key, 6)

    def bn_params(k, c):
        k1, k2, k3, k4 = jax.random.split(k, 4)
        return dict(
            gamma=jax.random.uniform(k1, (c,), jnp.float32, 0.5, 1.5),
            beta=0.1 * jax.random.normal(k2, (c,), jnp.float32),
            mean=0.1 * jax.random.normal(k3, (c,), jnp.float32),
            var=jax.random.uniform(k4, (c,), jnp.float32, 0.5, 1.5),
        )

    return dict(
        w1=0.2 * jax.random.normal(keys[0], (3, 3, cin1, planes), jnp.float32),
        w2=0.2 * jax.random.normal(keys[1], (3, 3, cin2, planes), jnp.float32),
        wd=0.2 * jax.random.normal(keys[2], (1, 1, cin1, planes), jnp.float32),
        bn1=bn_params(keys[3], planes),
        bn2=bn_params(keys[4], planes),
        bnd=bn_params(keys[5], planes),
    )


def reference_forward(x, g1, g2, params):
    def conv(inp, w, pad):
        return jax.lax.conv_general_dilated(
            inp, w, (1, 1), [(pad, pad), (pad, pad)],
            dimension_numbers=("NHWC", "HWIO", "NHWC"),
            precision=jax.lax.Precision.HIGHEST)

    def bn(y, bnp):
        s = bnp["gamma"] / jnp.sqrt(bnp["var"] + BN_EPS)
        return y * s + (bnp["beta"] - bnp["mean"] * s)

    x_cat = jnp.concatenate([x, g1], -1)
    out = jax.nn.relu(bn(conv(x_cat, params["w1"], 1), params["bn1"]))
    out = jnp.concatenate([g2, out], -1)
    out = bn(conv(out, params["w2"], 1), params["bn2"])
    identity = bn(conv(x_cat, params["wd"], 0), params["bnd"])
    return jax.nn.relu(out + identity)


if __name__ == "__main__":
    N, inplanes, planes, geoplanes, H, W = 2, 4, 8, 3, 16, 16
    key = jax.random.PRNGKey(0)
    kx, kg1, kg2, kp = jax.random.split(key, 4)

    # PyTorch-convention NCHW inputs, transposed to the kernel's NHWC layout.
    x_nchw = jax.random.normal(kx, (N, inplanes, H, W), jnp.float32)
    g1_nchw = jax.random.normal(kg1, (N, geoplanes, H, W), jnp.float32)
    g2_nchw = jax.random.normal(kg2, (N, geoplanes, H, W), jnp.float32)
    params = init_params(kp, inplanes, planes, geoplanes)

    x = jnp.transpose(x_nchw, (0, 2, 3, 1))
    g1 = jnp.transpose(g1_nchw, (0, 2, 3, 1))
    g2 = jnp.transpose(g2_nchw, (0, 2, 3, 1))

    ref = jax.block_until_ready(reference_forward(x, g1, g2, params))
    ref_np = np.asarray(ref, np.float32)
    scale = float(np.max(np.abs(ref_np)))

    # Run twice: auto-chosen tile height (per-chip heuristic) and an explicit
    # 2-tile split (exercises the inter-tile halo / boundary-masking path).
    for th in (None, 8):
        out = basic_block_geo_forward(x, g1, g2, params, inplanes, planes,
                                      tile_rows=th)
        out = jax.block_until_ready(out)
        assert out.shape == (N, H, W, planes), out.shape
        err = float(np.max(np.abs(np.asarray(out, np.float32) - ref_np)))
        # bf16 MXU operands / bf16 output store with f32 accumulation.
        if err > 3e-2 * scale + 1e-3:
            raise AssertionError(
                f"Pallas output mismatch (tile_rows={th}): max abs err="
                f"{err:.4g}, ref scale={scale:.4g}")
    print("KERNEL_OK")
</pallas_src>

<mosaic_0001>
module attributes {stable_mosaic.version = 11 : i64} {
  func.func @kernel(%arg0: i32, %arg1: i32, %arg2: memref<1x1x504x10xbf16, #tpu.memory_space<vmem>>, %arg3: memref<1x432x1xf32, #tpu.memory_space<vmem>>, %arg4: memref<9x10x128xbf16, #tpu.memory_space<vmem>>, %arg5: memref<9x128x128xbf16, #tpu.memory_space<vmem>>, %arg6: memref<9x10x128xbf16, #tpu.memory_space<vmem>>, %arg7: memref<1x128xf32, #tpu.memory_space<vmem>>, %arg8: memref<1x128xf32, #tpu.memory_space<vmem>>, %arg9: memref<10x128xbf16, #tpu.memory_space<vmem>>, %arg10: memref<1x1x384x128xbf16, #tpu.memory_space<vmem>>, %arg11: memref<472x128xbf16, #tpu.memory_space<vmem>>) attributes {dimension_semantics = [#tpu.dimension_semantics<parallel>, #tpu.dimension_semantics<parallel>], iteration_bounds = array<i64: 2, 1>, scalar_prefetch = 0 : i64, scratch_operands = 1 : i64, tpu.core_type = #tpu.core_type<tc>, window_params = [{transform_indices = @transform_0, window_bounds = array<i64: 1, 1, 504, 10>}, {transform_indices = @transform_1, window_bounds = array<i64: 1, 432, 1>}, {pipeline_mode = #tpu.pipeline_mode<synchronous>, transform_indices = @transform_2, window_bounds = array<i64: 9, 10, 128>}, {pipeline_mode = #tpu.pipeline_mode<synchronous>, transform_indices = @transform_3, window_bounds = array<i64: 9, 128, 128>}, {pipeline_mode = #tpu.pipeline_mode<synchronous>, transform_indices = @transform_4, window_bounds = array<i64: 9, 10, 128>}, {pipeline_mode = #tpu.pipeline_mode<synchronous>, transform_indices = @transform_5, window_bounds = array<i64: 1, 128>}, {pipeline_mode = #tpu.pipeline_mode<synchronous>, transform_indices = @transform_6, window_bounds = array<i64: 1, 128>}, {pipeline_mode = #tpu.pipeline_mode<synchronous>, transform_indices = @transform_7, window_bounds = array<i64: 10, 128>}, {transform_indices = @transform_8, window_bounds = array<i64: 1, 1, 384, 128>}]} {
    %cst = arith.constant 0.000000e+00 : f32
    %0 = vector.broadcast %cst : f32 to vector<432x128xf32>
    %c0 = arith.constant 0 : index
    %c0_0 = arith.constant 0 : index
    %c0_1 = arith.constant 0 : index
    %c0_2 = arith.constant 0 : index
    %1 = vector.load %arg2[%c0, %c0_0, %c0_1, %c0_2] : memref<1x1x504x10xbf16, #tpu.memory_space<vmem>>, vector<1x1x432x10xbf16>
    %2 = vector.shape_cast %1 : vector<1x1x432x10xbf16> to vector<432x10xbf16>
    %c0_3 = arith.constant 0 : index
    %c0_4 = arith.constant 0 : index
    %c0_5 = arith.constant 0 : index
    %3 = vector.load %arg4[%c0_3, %c0_4, %c0_5] : memref<9x10x128xbf16, #tpu.memory_space<vmem>>, vector<1x10x128xbf16>
    %4 = vector.shape_cast %3 : vector<1x10x128xbf16> to vector<10x128xbf16>
    %cst_6 = arith.constant dense<0.000000e+00> : vector<432x128xf32>
    %5 = tpu.matmul %2, %4, %cst_6 {dimension_numbers = #tpu.dot_dimension_numbers<[1], [0], [0], [1], [0, 0, 1, 1], [], []>} : vector<432x10xbf16>, vector<10x128xbf16>, vector<432x128xf32> -> vector<432x128xf32>
    %6 = arith.addf %0, %5 : vector<432x128xf32>
    %c0_7 = arith.constant 0 : index
    %c0_8 = arith.constant 0 : index
    %c1 = arith.constant 1 : index
    %c0_9 = arith.constant 0 : index
    %7 = vector.load %arg2[%c0_7, %c0_8, %c1, %c0_9] : memref<1x1x504x10xbf16, #tpu.memory_space<vmem>>, vector<1x1x432x10xbf16>
    %8 = vector.shape_cast %7 : vector<1x1x432x10xbf16> to vector<432x10xbf16>
    %c1_10 = arith.constant 1 : index
    %c0_11 = arith.constant 0 : index
    %c0_12 = arith.constant 0 : index
    %9 = vector.load %arg4[%c1_10, %c0_11, %c0_12] : memref<9x10x128xbf16, #tpu.memory_space<vmem>>, vector<1x10x128xbf16>
    %10 = vector.shape_cast %9 : vector<1x10x128xbf16> to vector<10x128xbf16>
    %cst_13 = arith.constant dense<0.000000e+00> : vector<432x128xf32>
    %11 = tpu.matmul %8, %10, %cst_13 {dimension_numbers = #tpu.dot_dimension_numbers<[1], [0], [0], [1], [0, 0, 1, 1], [], []>} : vector<432x10xbf16>, vector<10x128xbf16>, vector<432x128xf32> -> vector<432x128xf32>
    %12 = arith.addf %6, %11 : vector<432x128xf32>
    %c0_14 = arith.constant 0 : index
    %c0_15 = arith.constant 0 : index
    %c2 = arith.constant 2 : index
    %c0_16 = arith.constant 0 : index
    %13 = vector.load %arg2[%c0_14, %c0_15, %c2, %c0_16] : memref<1x1x504x10xbf16, #tpu.memory_space<vmem>>, vector<1x1x432x10xbf16>
    %14 = vector.shape_cast %13 : vector<1x1x432x10xbf16> to vector<432x10xbf16>
    %c2_17 = arith.constant 2 : index
    %c0_18 = arith.constant 0 : index
    %c0_19 = arith.constant 0 : index
    %15 = vector.load %arg4[%c2_17, %c0_18, %c0_19] : memref<9x10x128xbf16, #tpu.memory_space<vmem>>, vector<1x10x128xbf16>
    %16 = vector.shape_cast %15 : vector<1x10x128xbf16> to vector<10x128xbf16>
    %cst_20 = arith.constant dense<0.000000e+00> : vector<432x128xf32>
    %17 = tpu.matmul %14, %16, %cst_20 {dimension_numbers = #tpu.dot_dimension_numbers<[1], [0], [0], [1], [0, 0, 1, 1], [], []>} : vector<432x10xbf16>, vector<10x128xbf16>, vector<432x128xf32> -> vector<432x128xf32>
    %18 = arith.addf %12, %17 : vector<432x128xf32>
    %c0_21 = arith.constant 0 : index
    %c0_22 = arith.constant 0 : index
    %c24 = arith.constant 24 : index
    %c0_23 = arith.constant 0 : index
    %19 = vector.load %arg2[%c0_21, %c0_22, %c24, %c0_23] : memref<1x1x504x10xbf16, #tpu.memory_space<vmem>>, vector<1x1x432x10xbf16>
    %20 = vector.shape_cast %19 : vector<1x1x432x10xbf16> to vector<432x10xbf16>
    %c3 = arith.constant 3 : index
    %c0_24 = arith.constant 0 : index
    %c0_25 = arith.constant 0 : index
    %21 = vector.load %arg4[%c3, %c0_24, %c0_25] : memref<9x10x128xbf16, #tpu.memory_space<vmem>>, vector<1x10x128xbf16>
    %22 = vector.shape_cast %21 : vector<1x10x128xbf16> to vector<10x128xbf16>
    %cst_26 = arith.constant dense<0.000000e+00> : vector<432x128xf32>
    %23 = tpu.matmul %20, %22, %cst_26 {dimension_numbers = #tpu.dot_dimension_numbers<[1], [0], [0], [1], [0, 0, 1, 1], [], []>} : vector<432x10xbf16>, vector<10x128xbf16>, vector<432x128xf32> -> vector<432x128xf32>
    %24 = arith.addf %18, %23 : vector<432x128xf32>
    %c0_27 = arith.constant 0 : index
    %c0_28 = arith.constant 0 : index
    %c25 = arith.constant 25 : index
    %c0_29 = arith.constant 0 : index
    %25 = vector.load %arg2[%c0_27, %c0_28, %c25, %c0_29] : memref<1x1x504x10xbf16, #tpu.memory_space<vmem>>, vector<1x1x432x10xbf16>
    %26 = vector.shape_cast %25 : vector<1x1x432x10xbf16> to vector<432x10xbf16>
    %c4 = arith.constant 4 : index
    %c0_30 = arith.constant 0 : index
    %c0_31 = arith.constant 0 : index
    %27 = vector.load %arg4[%c4, %c0_30, %c0_31] : memref<9x10x128xbf16, #tpu.memory_space<vmem>>, vector<1x10x128xbf16>
    %28 = vector.shape_cast %27 : vector<1x10x128xbf16> to vector<10x128xbf16>
    %cst_32 = arith.constant dense<0.000000e+00> : vector<432x128xf32>
    %29 = tpu.matmul %26, %28, %cst_32 {dimension_numbers = #tpu.dot_dimension_numbers<[1], [0], [0], [1], [0, 0, 1, 1], [], []>} : vector<432x10xbf16>, vector<10x128xbf16>, vector<432x128xf32> -> vector<432x128xf32>
    %30 = arith.addf %24, %29 : vector<432x128xf32>
    %c0_33 = arith.constant 0 : index
    %c0_34 = arith.constant 0 : index
    %c26 = arith.constant 26 : index
    %c0_35 = arith.constant 0 : index
    %31 = vector.load %arg2[%c0_33, %c0_34, %c26, %c0_35] : memref<1x1x504x10xbf16, #tpu.memory_space<vmem>>, vector<1x1x432x10xbf16>
    %32 = vector.shape_cast %31 : vector<1x1x432x10xbf16> to vector<432x10xbf16>
    %c5 = arith.constant 5 : index
    %c0_36 = arith.constant 0 : index
    %c0_37 = arith.constant 0 : index
    %33 = vector.load %arg4[%c5, %c0_36, %c0_37] : memref<9x10x128xbf16, #tpu.memory_space<vmem>>, vector<1x10x128xbf16>
    %34 = vector.shape_cast %33 : vector<1x10x128xbf16> to vector<10x128xbf16>
    %cst_38 = arith.constant dense<0.000000e+00> : vector<432x128xf32>
    %35 = tpu.matmul %32, %34, %cst_38 {dimension_numbers = #tpu.dot_dimension_numbers<[1], [0], [0], [1], [0, 0, 1, 1], [], []>} : vector<432x10xbf16>, vector<10x128xbf16>, vector<432x128xf32> -> vector<432x128xf32>
    %36 = arith.addf %30, %35 : vector<432x128xf32>
    %c0_39 = arith.constant 0 : index
    %c0_40 = arith.constant 0 : index
    %c48 = arith.constant 48 : index
    %c0_41 = arith.constant 0 : index
    %37 = vector.load %arg2[%c0_39, %c0_40, %c48, %c0_41] : memref<1x1x504x10xbf16, #tpu.memory_space<vmem>>, vector<1x1x432x10xbf16>
    %38 = vector.shape_cast %37 : vector<1x1x432x10xbf16> to vector<432x10xbf16>
    %c6 = arith.constant 6 : index
    %c0_42 = arith.constant 0 : index
    %c0_43 = arith.constant 0 : index
    %39 = vector.load %arg4[%c6, %c0_42, %c0_43] : memref<9x10x128xbf16, #tpu.memory_space<vmem>>, vector<1x10x128xbf16>
    %40 = vector.shape_cast %39 : vector<1x10x128xbf16> to vector<10x128xbf16>
    %cst_44 = arith.constant dense<0.000000e+00> : vector<432x128xf32>
    %41 = tpu.matmul %38, %40, %cst_44 {dimension_numbers = #tpu.dot_dimension_numbers<[1], [0], [0], [1], [0, 0, 1, 1], [], []>} : vector<432x10xbf16>, vector<10x128xbf16>, vector<432x128xf32> -> vector<432x128xf32>
    %42 = arith.addf %36, %41 : vector<432x128xf32>
    %c0_45 = arith.constant 0 : index
    %c0_46 = arith.constant 0 : index
    %c49 = arith.constant 49 : index
    %c0_47 = arith.constant 0 : index
    %43 = vector.load %arg2[%c0_45, %c0_46, %c49, %c0_47] : memref<1x1x504x10xbf16, #tpu.memory_space<vmem>>, vector<1x1x432x10xbf16>
    %44 = vector.shape_cast %43 : vector<1x1x432x10xbf16> to vector<432x10xbf16>
    %c7 = arith.constant 7 : index
    %c0_48 = arith.constant 0 : index
    %c0_49 = arith.constant 0 : index
    %45 = vector.load %arg4[%c7, %c0_48, %c0_49] : memref<9x10x128xbf16, #tpu.memory_space<vmem>>, vector<1x10x128xbf16>
    %46 = vector.shape_cast %45 : vector<1x10x128xbf16> to vector<10x128xbf16>
    %cst_50 = arith.constant dense<0.000000e+00> : vector<432x128xf32>
    %47 = tpu.matmul %44, %46, %cst_50 {dimension_numbers = #tpu.dot_dimension_numbers<[1], [0], [0], [1], [0, 0, 1, 1], [], []>} : vector<432x10xbf16>, vector<10x128xbf16>, vector<432x128xf32> -> vector<432x128xf32>
    %48 = arith.addf %42, %47 : vector<432x128xf32>
    %c0_51 = arith.constant 0 : index
    %c0_52 = arith.constant 0 : index
    %c50 = arith.constant 50 : index
    %c0_53 = arith.constant 0 : index
    %49 = vector.load %arg2[%c0_51, %c0_52, %c50, %c0_53] : memref<1x1x504x10xbf16, #tpu.memory_space<vmem>>, vector<1x1x432x10xbf16>
    %50 = vector.shape_cast %49 : vector<1x1x432x10xbf16> to vector<432x10xbf16>
    %c8 = arith.constant 8 : index
    %c0_54 = arith.constant 0 : index
    %c0_55 = arith.constant 0 : index
    %51 = vector.load %arg4[%c8, %c0_54, %c0_55] : memref<9x10x128xbf16, #tpu.memory_space<vmem>>, vector<1x10x128xbf16>
    %52 = vector.shape_cast %51 : vector<1x10x128xbf16> to vector<10x128xbf16>
    %cst_56 = arith.constant dense<0.000000e+00> : vector<432x128xf32>
    %53 = tpu.matmul %50, %52, %cst_56 {dimension_numbers = #tpu.dot_dimension_numbers<[1], [0], [0], [1], [0, 0, 1, 1], [], []>} : vector<432x10xbf16>, vector<10x128xbf16>, vector<432x128xf32> -> vector<432x128xf32>
    %54 = arith.addf %48, %53 : vector<432x128xf32>
    %c0_57 = arith.constant 0 : index
    %c0_58 = arith.constant 0 : index
    %55 = vector.load %arg7[%c0_57, %c0_58] : memref<1x128xf32, #tpu.memory_space<vmem>>, vector<1x128xf32>
    %56 = vector.broadcast %55 : vector<1x128xf32> to vector<432x128xf32>
    %57 = arith.addf %54, %56 : vector<432x128xf32>
    %cst_59 = arith.constant 0.000000e+00 : f32
    %58 = vector.broadcast %cst_59 : f32 to vector<432x128xf32>
    %59 = arith.maximumf %57, %58 : vector<432x128xf32>
    %c0_60 = arith.constant 0 : index
    %c0_61 = arith.constant 0 : index
    %c0_62 = arith.constant 0 : index
    %60 = vector.load %arg3[%c0_60, %c0_61, %c0_62] : memref<1x432x1xf32, #tpu.memory_space<vmem>>, vector<1x432x1xf32>
    %61 = vector.shape_cast %60 : vector<1x432x1xf32> to vector<432x1xf32>
    %62 = vector.broadcast %61 : vector<432x1xf32> to vector<432x128xf32>
    %63 = arith.mulf %59, %62 : vector<432x128xf32>
    %64 = arith.truncf %63 : vector<432x128xf32> to vector<432x128xbf16>
    %cst_63 = arith.constant 0.000000e+00 : bf16
    %65 = vector.broadcast %cst_63 : bf16 to vector<472x128xbf16>
    %c0_64 = arith.constant 0 : index
    %c0_65 = arith.constant 0 : index
    %66 = vector.load %arg11[%c0_64, %c0_65] : memref<472x128xbf16, #tpu.memory_space<vmem>>, vector<472x128xbf16>
    tpu.vector_store %arg11[%c0_64, %c0_65], %65 {strides = array<i32>} : memref<472x128xbf16, #tpu.memory_space<vmem>>, vector<472x128xbf16>,
    %c16 = arith.constant 16 : index
    %c0_66 = arith.constant 0 : index
    %67 = vector.load %arg11[%c16, %c0_66] : memref<472x128xbf16, #tpu.memory_space<vmem>>, vector<432x128xbf16>
    tpu.vector_store %arg11[%c16, %c0_66], %64 {strides = array<i32>} : memref<472x128xbf16, #tpu.memory_space<vmem>>, vector<432x128xbf16>,
    %c0_67 = arith.constant 0 : index
    %c0_68 = arith.constant 0 : index
    %c49_69 = arith.constant 49 : index
    %c0_70 = arith.constant 0 : index
    %68 = vector.load %arg2[%c0_67, %c0_68, %c49_69, %c0_70] : memref<1x1x504x10xbf16, #tpu.memory_space<vmem>>, vector<1x1x384x10xbf16>
    %69 = vector.shape_cast %68 : vector<1x1x384x10xbf16> to vector<384x10xbf16>
    %c0_71 = arith.constant 0 : index
    %c0_72 = arith.constant 0 : index
    %70 = vector.load %arg9[%c0_71, %c0_72] : memref<10x128xbf16, #tpu.memory_space<vmem>>, vector<10x128xbf16>
    %cst_73 = arith.constant dense<0.000000e+00> : vector<384x128xf32>
    %71 = tpu.matmul %69, %70, %cst_73 {dimension_numbers = #tpu.dot_dimension_numbers<[1], [0], [0], [1], [0, 0, 1, 1], [], []>} : vector<384x10xbf16>, vector<10x128xbf16>, vector<384x128xf32> -> vector<384x128xf32>
    %c0_74 = arith.constant 0 : index
    %c0_75 = arith.constant 0 : index
    %72 = vector.load %arg8[%c0_74, %c0_75] : memref<1x128xf32, #tpu.memory_space<vmem>>, vector<1x128xf32>
    %73 = vector.broadcast %72 : vector<1x128xf32> to vector<384x128xf32>
    %74 = arith.addf %71, %73 : vector<384x128xf32>
    %c15 = arith.constant 15 : index
    %c0_76 = arith.constant 0 : index
    %75 = vector.load %arg11[%c15, %c0_76] : memref<472x128xbf16, #tpu.memory_space<vmem>>, vector<384x128xbf16>
    %c0_77 = arith.constant 0 : index
    %c0_78 = arith.constant 0 : index
    %c0_79 = arith.constant 0 : index
    %76 = vector.load %arg5[%c0_77, %c0_78, %c0_79] : memref<9x128x128xbf16, #tpu.memory_space<vmem>>, vector<1x128x128xbf16>
    %77 = vector.shape_cast %76 : vector<1x128x128xbf16> to vector<128x128xbf16>
    %cst_80 = arith.constant dense<0.000000e+00> : vector<384x128xf32>
    %78 = tpu.matmul %75, %77, %cst_80 {dimension_numbers = #tpu.dot_dimension_numbers<[1], [0], [0], [1], [0, 0, 1, 1], [], []>} : vector<384x128xbf16>, vector<128x128xbf16>, vector<384x128xf32> -> vector<384x128xf32>
    %79 = arith.addf %74, %78 : vector<384x128xf32>
    %c0_81 = arith.constant 0 : index
    %c0_82 = arith.constant 0 : index
    %c24_83 = arith.constant 24 : index
    %c0_84 = arith.constant 0 : index
    %80 = vector.load %arg2[%c0_81, %c0_82, %c24_83, %c0_84] : memref<1x1x504x10xbf16, #tpu.memory_space<vmem>>, vector<1x1x384x10xbf16>
    %81 = vector.shape_cast %80 : vector<1x1x384x10xbf16> to vector<384x10xbf16>
    %c0_85 = arith.constant 0 : index
    %c0_86 = arith.constant 0 : index
    %c0_87 = arith.constant 0 : index
    %82 = vector.load %arg6[%c0_85, %c0_86, %c0_87] : memref<9x10x128xbf16, #tpu.memory_space<vmem>>, vector<1x10x128xbf16>
    %83 = vector.shape_cast %82 : vector<1x10x128xbf16> to vector<10x128xbf16>
    %cst_88 = arith.constant dense<0.000000e+00> : vector<384x128xf32>
    %84 = tpu.matmul %81, %83, %cst_88 {dimension_numbers = #tpu.dot_dimension_numbers<[1], [0], [0], [1], [0, 0, 1, 1], [], []>} : vector<384x10xbf16>, vector<10x128xbf16>, vector<384x128xf32> -> vector<384x128xf32>
    %85 = arith.addf %79, %84 : vector<384x128xf32>
    %c16_89 = arith.constant 16 : index
    %c0_90 = arith.constant 0 : index
    %86 = vector.load %arg11[%c16_89, %c0_90] : memref<472x128xbf16, #tpu.memory_space<vmem>>, vector<384x128xbf16>
    %c1_91 = arith.constant 1 : index
    %c0_92 = arith.constant 0 : index
    %c0_93 = arith.constant 0 : index
    %87 = vector.load %arg5[%c1_91, %c0_92, %c0_93] : memref<9x128x128xbf16, #tpu.memory_space<vmem>>, vector<1x128x128xbf16>
    %88 = vector.shape_cast %87 : vector<1x128x128xbf16> to vector<128x128xbf16>
    %cst_94 = arith.constant dense<0.000000e+00> : vector<384x128xf32>
    %89 = tpu.matmul %86, %88, %cst_94 {dimension_numbers = #tpu.dot_dimension_numbers<[1], [0], [0], [1], [0, 0, 1, 1], [], []>} : vector<384x128xbf16>, vector<128x128xbf16>, vector<384x128xf32> -> vector<384x128xf32>
    %90 = arith.addf %85, %89 : vector<384x128xf32>
    %c0_95 = arith.constant 0 : index
    %c0_96 = arith.constant 0 : index
    %c25_97 = arith.constant 25 : index
    %c0_98 = arith.constant 0 : index
    %91 = vector.load %arg2[%c0_95, %c0_96, %c25_97, %c0_98] : memref<1x1x504x10xbf16, #tpu.memory_space<vmem>>, vector<1x1x384x10xbf16>
    %92 = vector.shape_cast %91 : vector<1x1x384x10xbf16> to vector<384x10xbf16>
    %c1_99 = arith.constant 1 : index
    %c0_100 = arith.constant 0 : index
    %c0_101 = arith.constant 0 : index
    %93 = vector.load %arg6[%c1_99, %c0_100, %c0_101] : memref<9x10x128xbf16, #tpu.memory_space<vmem>>, vector<1x10x128xbf16>
    %94 = vector.shape_cast %93 : vector<1x10x128xbf16> to vector<10x128xbf16>
    %cst_102 = arith.constant dense<0.000000e+00> : vector<384x128xf32>
    %95 = tpu.matmul %92, %94, %cst_102 {dimension_numbers = #tpu.dot_dimension_numbers<[1], [0], [0], [1], [0, 0, 1, 1], [], []>} : vector<384x10xbf16>, vector<10x128xbf16>, vector<384x128xf32> -> vector<384x128xf32>
    %96 = arith.addf %90, %95 : vector<384x128xf32>
    %c17 = arith.constant 17 : index
    %c0_103 = arith.constant 0 : index
    %97 = vector.load %arg11[%c17, %c0_103] : memref<472x128xbf16, #tpu.memory_space<vmem>>, vector<384x128xbf16>
    %c2_104 = arith.constant 2 : index
    %c0_105 = arith.constant 0 : index
    %c0_106 = arith.constant 0 : index
    %98 = vector.load %arg5[%c2_104, %c0_105, %c0_106] : memref<9x128x128xbf16, #tpu.memory_space<vmem>>, vector<1x128x128xbf16>
    %99 = vector.shape_cast %98 : vector<1x128x128xbf16> to vector<128x128xbf16>
    %cst_107 = arith.constant dense<0.000000e+00> : vector<384x128xf32>
    %100 = tpu.matmul %97, %99, %cst_107 {dimension_numbers = #tpu.dot_dimension_numbers<[1], [0], [0], [1], [0, 0, 1, 1], [], []>} : vector<384x128xbf16>, vector<128x128xbf16>, vector<384x128xf32> -> vector<384x128xf32>
    %101 = arith.addf %96, %100 : vector<384x128xf32>
    %c0_108 = arith.constant 0 : index
    %c0_109 = arith.constant 0 : index
    %c26_110 = arith.constant 26 : index
    %c0_111 = arith.constant 0 : index
    %102 = vector.load %arg2[%c0_108, %c0_109, %c26_110, %c0_111] : memref<1x1x504x10xbf16, #tpu.memory_space<vmem>>, vector<1x1x384x10xbf16>
    %103 = vector.shape_cast %102 : vector<1x1x384x10xbf16> to vector<384x10xbf16>
    %c2_112 = arith.constant 2 : index
    %c0_113 = arith.constant 0 : index
    %c0_114 = arith.constant 0 : index
    %104 = vector.load %arg6[%c2_112, %c0_113, %c0_114] : memref<9x10x128xbf16, #tpu.memory_space<vmem>>, vector<1x10x128xbf16>
    %105 = vector.shape_cast %104 : vector<1x10x128xbf16> to vector<10x128xbf16>
    %cst_115 = arith.constant dense<0.000000e+00> : vector<384x128xf32>
    %106 = tpu.matmul %103, %105, %cst_115 {dimension_numbers = #tpu.dot_dimension_numbers<[1], [0], [0], [1], [0, 0, 1, 1], [], []>} : vector<384x10xbf16>, vector<10x128xbf16>, vector<384x128xf32> -> vector<384x128xf32>
    %107 = arith.addf %101, %106 : vector<384x128xf32>
    %c39 = arith.constant 39 : index
    %c0_116 = arith.constant 0 : index
    %108 = vector.load %arg11[%c39, %c0_116] : memref<472x128xbf16, #tpu.memory_space<vmem>>, vector<384x128xbf16>
    %c3_117 = arith.constant 3 : index
    %c0_118 = arith.constant 0 : index
    %c0_119 = arith.constant 0 : index
    %109 = vector.load %arg5[%c3_117, %c0_118, %c0_119] : memref<9x128x128xbf16, #tpu.memory_space<vmem>>, vector<1x128x128xbf16>
    %110 = vector.shape_cast %109 : vector<1x128x128xbf16> to vector<128x128xbf16>
    %cst_120 = arith.constant dense<0.000000e+00> : vector<384x128xf32>
    %111 = tpu.matmul %108, %110, %cst_120 {dimension_numbers = #tpu.dot_dimension_numbers<[1], [0], [0], [1], [0, 0, 1, 1], [], []>} : vector<384x128xbf16>, vector<128x128xbf16>, vector<384x128xf32> -> vector<384x128xf32>
    %112 = arith.addf %107, %111 : vector<384x128xf32>
    %c0_121 = arith.constant 0 : index
    %c0_122 = arith.constant 0 : index
    %c48_123 = arith.constant 48 : index
    %c0_124 = arith.constant 0 : index
    %113 = vector.load %arg2[%c0_121, %c0_122, %c48_123, %c0_124] : memref<1x1x504x10xbf16, #tpu.memory_space<vmem>>, vector<1x1x384x10xbf16>
    %114 = vector.shape_cast %113 : vector<1x1x384x10xbf16> to vector<384x10xbf16>
    %c3_125 = arith.constant 3 : index
    %c0_126 = arith.constant 0 : index
    %c0_127 = arith.constant 0 : index
    %115 = vector.load %arg6[%c3_125, %c0_126, %c0_127] : memref<9x10x128xbf16, #tpu.memory_space<vmem>>, vector<1x10x128xbf16>
    %116 = vector.shape_cast %115 : vector<1x10x128xbf16> to vector<10x128xbf16>
    %cst_128 = arith.constant dense<0.000000e+00> : vector<384x128xf32>
    %117 = tpu.matmul %114, %116, %cst_128 {dimension_numbers = #tpu.dot_dimension_numbers<[1], [0], [0], [1], [0, 0, 1, 1], [], []>} : vector<384x10xbf16>, vector<10x128xbf16>, vector<384x128xf32> -> vector<384x128xf32>
    %118 = arith.addf %112, %117 : vector<384x128xf32>
    %c40 = arith.constant 40 : index
    %c0_129 = arith.constant 0 : index
    %119 = vector.load %arg11[%c40, %c0_129] : memref<472x128xbf16, #tpu.memory_space<vmem>>, vector<384x128xbf16>
    %c4_130 = arith.constant 4 : index
    %c0_131 = arith.constant 0 : index
    %c0_132 = arith.constant 0 : index
    %120 = vector.load %arg5[%c4_130, %c0_131, %c0_132] : memref<9x128x128xbf16, #tpu.memory_space<vmem>>, vector<1x128x128xbf16>
    %121 = vector.shape_cast %120 : vector<1x128x128xbf16> to vector<128x128xbf16>
    %cst_133 = arith.constant dense<0.000000e+00> : vector<384x128xf32>
    %122 = tpu.matmul %119, %121, %cst_133 {dimension_numbers = #tpu.dot_dimension_numbers<[1], [0], [0], [1], [0, 0, 1, 1], [], []>} : vector<384x128xbf16>, vector<128x128xbf16>, vector<384x128xf32> -> vector<384x128xf32>
    %123 = arith.addf %118, %122 : vector<384x128xf32>
    %c0_134 = arith.constant 0 : index
    %c0_135 = arith.constant 0 : index
    %c49_136 = arith.constant 49 : index
    %c0_137 = arith.constant 0 : index
    %124 = vector.load %arg2[%c0_134, %c0_135, %c49_136, %c0_137] : memref<1x1x504x10xbf16, #tpu.memory_space<vmem>>, vector<1x1x384x10xbf16>
    %125 = vector.shape_cast %124 : vector<1x1x384x10xbf16> to vector<384x10xbf16>
    %c4_138 = arith.constant 4 : index
    %c0_139 = arith.constant 0 : index
    %c0_140 = arith.constant 0 : index
    %126 = vector.load %arg6[%c4_138, %c0_139, %c0_140] : memref<9x10x128xbf16, #tpu.memory_space<vmem>>, vector<1x10x128xbf16>
    %127 = vector.shape_cast %126 : vector<1x10x128xbf16> to vector<10x128xbf16>
    %cst_141 = arith.constant dense<0.000000e+00> : vector<384x128xf32>
    %128 = tpu.matmul %125, %127, %cst_141 {dimension_numbers = #tpu.dot_dimension_numbers<[1], [0], [0], [1], [0, 0, 1, 1], [], []>} : vector<384x10xbf16>, vector<10x128xbf16>, vector<384x128xf32> -> vector<384x128xf32>
    %129 = arith.addf %123, %128 : vector<384x128xf32>
    %c41 = arith.constant 41 : index
    %c0_142 = arith.constant 0 : index
    %130 = vector.load %arg11[%c41, %c0_142] : memref<472x128xbf16, #tpu.memory_space<vmem>>, vector<384x128xbf16>
    %c5_143 = arith.constant 5 : index
    %c0_144 = arith.constant 0 : index
    %c0_145 = arith.constant 0 : index
    %131 = vector.load %arg5[%c5_143, %c0_144, %c0_145] : memref<9x128x128xbf16, #tpu.memory_space<vmem>>, vector<1x128x128xbf16>
    %132 = vector.shape_cast %131 : vector<1x128x128xbf16> to vector<128x128xbf16>
    %cst_146 = arith.constant dense<0.000000e+00> : vector<384x128xf32>
    %133 = tpu.matmul %130, %132, %cst_146 {dimension_numbers = #tpu.dot_dimension_numbers<[1], [0], [0], [1], [0, 0, 1, 1], [], []>} : vector<384x128xbf16>, vector<128x128xbf16>, vector<384x128xf32> -> vector<384x128xf32>
    %134 = arith.addf %129, %133 : vector<384x128xf32>
    %c0_147 = arith.constant 0 : index
    %c0_148 = arith.constant 0 : index
    %c50_149 = arith.constant 50 : index
    %c0_150 = arith.constant 0 : index
    %135 = vector.load %arg2[%c0_147, %c0_148, %c50_149, %c0_150] : memref<1x1x504x10xbf16, #tpu.memory_space<vmem>>, vector<1x1x384x10xbf16>
    %136 = vector.shape_cast %135 : vector<1x1x384x10xbf16> to vector<384x10xbf16>
    %c5_151 = arith.constant 5 : index
    %c0_152 = arith.constant 0 : index
    %c0_153 = arith.constant 0 : index
    %137 = vector.load %arg6[%c5_151, %c0_152, %c0_153] : memref<9x10x128xbf16, #tpu.memory_space<vmem>>, vector<1x10x128xbf16>
    %138 = vector.shape_cast %137 : vector<1x10x128xbf16> to vector<10x128xbf16>
    %cst_154 = arith.constant dense<0.000000e+00> : vector<384x128xf32>
    %139 = tpu.matmul %136, %138, %cst_154 {dimension_numbers = #tpu.dot_dimension_numbers<[1], [0], [0], [1], [0, 0, 1, 1], [], []>} : vector<384x10xbf16>, vector<10x128xbf16>, vector<384x128xf32> -> vector<384x128xf32>
    %140 = arith.addf %134, %139 : vector<384x128xf32>
    %c63 = arith.constant 63 : index
    %c0_155 = arith.constant 0 : index
    %141 = vector.load %arg11[%c63, %c0_155] : memref<472x128xbf16, #tpu.memory_space<vmem>>, vector<384x128xbf16>
    %c6_156 = arith.constant 6 : index
    %c0_157 = arith.constant 0 : index
    %c0_158 = arith.constant 0 : index
    %142 = vector.load %arg5[%c6_156, %c0_157, %c0_158] : memref<9x128x128xbf16, #tpu.memory_space<vmem>>, vector<1x128x128xbf16>
    %143 = vector.shape_cast %142 : vector<1x128x128xbf16> to vector<128x128xbf16>
    %cst_159 = arith.constant dense<0.000000e+00> : vector<384x128xf32>
    %144 = tpu.matmul %141, %143, %cst_159 {dimension_numbers = #tpu.dot_dimension_numbers<[1], [0], [0], [1], [0, 0, 1, 1], [], []>} : vector<384x128xbf16>, vector<128x128xbf16>, vector<384x128xf32> -> vector<384x128xf32>
    %145 = arith.addf %140, %144 : vector<384x128xf32>
    %c0_160 = arith.constant 0 : index
    %c0_161 = arith.constant 0 : index
    %c72 = arith.constant 72 : index
    %c0_162 = arith.constant 0 : index
    %146 = vector.load %arg2[%c0_160, %c0_161, %c72, %c0_162] : memref<1x1x504x10xbf16, #tpu.memory_space<vmem>>, vector<1x1x384x10xbf16>
    %147 = vector.shape_cast %146 : vector<1x1x384x10xbf16> to vector<384x10xbf16>
    %c6_163 = arith.constant 6 : index
    %c0_164 = arith.constant 0 : index
    %c0_165 = arith.constant 0 : index
    %148 = vector.load %arg6[%c6_163, %c0_164, %c0_165] : memref<9x10x128xbf16, #tpu.memory_space<vmem>>, vector<1x10x128xbf16>
    %149 = vector.shape_cast %148 : vector<1x10x128xbf16> to vector<10x128xbf16>
    %cst_166 = arith.constant dense<0.000000e+00> : vector<384x128xf32>
    %150 = tpu.matmul %147, %149, %cst_166 {dimension_numbers = #tpu.dot_dimension_numbers<[1], [0], [0], [1], [0, 0, 1, 1], [], []>} : vector<384x10xbf16>, vector<10x128xbf16>, vector<384x128xf32> -> vector<384x128xf32>
    %151 = arith.addf %145, %150 : vector<384x128xf32>
    %c64 = arith.constant 64 : index
    %c0_167 = arith.constant 0 : index
    %152 = vector.load %arg11[%c64, %c0_167] : memref<472x128xbf16, #tpu.memory_space<vmem>>, vector<384x128xbf16>
    %c7_168 = arith.constant 7 : index
    %c0_169 = arith.constant 0 : index
    %c0_170 = arith.constant 0 : index
    %153 = vector.load %arg5[%c7_168, %c0_169, %c0_170] : memref<9x128x128xbf16, #tpu.memory_space<vmem>>, vector<1x128x128xbf16>
    %154 = vector.shape_cast %153 : vector<1x128x128xbf16> to vector<128x128xbf16>
    %cst_171 = arith.constant dense<0.000000e+00> : vector<384x128xf32>
    %155 = tpu.matmul %152, %154, %cst_171 {dimension_numbers = #tpu.dot_dimension_numbers<[1], [0], [0], [1], [0, 0, 1, 1], [], []>} : vector<384x128xbf16>, vector<128x128xbf16>, vector<384x128xf32> -> vector<384x128xf32>
    %156 = arith.addf %151, %155 : vector<384x128xf32>
    %c0_172 = arith.constant 0 : index
    %c0_173 = arith.constant 0 : index
    %c73 = arith.constant 73 : index
    %c0_174 = arith.constant 0 : index
    %157 = vector.load %arg2[%c0_172, %c0_173, %c73, %c0_174] : memref<1x1x504x10xbf16, #tpu.memory_space<vmem>>, vector<1x1x384x10xbf16>
    %158 = vector.shape_cast %157 : vector<1x1x384x10xbf16> to vector<384x10xbf16>
    %c7_175 = arith.constant 7 : index
    %c0_176 = arith.constant 0 : index
    %c0_177 = arith.constant 0 : index
    %159 = vector.load %arg6[%c7_175, %c0_176, %c0_177] : memref<9x10x128xbf16, #tpu.memory_space<vmem>>, vector<1x10x128xbf16>
    %160 = vector.shape_cast %159 : vector<1x10x128xbf16> to vector<10x128xbf16>
    %cst_178 = arith.constant dense<0.000000e+00> : vector<384x128xf32>
    %161 = tpu.matmul %158, %160, %cst_178 {dimension_numbers = #tpu.dot_dimension_numbers<[1], [0], [0], [1], [0, 0, 1, 1], [], []>} : vector<384x10xbf16>, vector<10x128xbf16>, vector<384x128xf32> -> vector<384x128xf32>
    %162 = arith.addf %156, %161 : vector<384x128xf32>
    %c65 = arith.constant 65 : index
    %c0_179 = arith.constant 0 : index
    %163 = vector.load %arg11[%c65, %c0_179] : memref<472x128xbf16, #tpu.memory_space<vmem>>, vector<384x128xbf16>
    %c8_180 = arith.constant 8 : index
    %c0_181 = arith.constant 0 : index
    %c0_182 = arith.constant 0 : index
    %164 = vector.load %arg5[%c8_180, %c0_181, %c0_182] : memref<9x128x128xbf16, #tpu.memory_space<vmem>>, vector<1x128x128xbf16>
    %165 = vector.shape_cast %164 : vector<1x128x128xbf16> to vector<128x128xbf16>
    %cst_183 = arith.constant dense<0.000000e+00> : vector<384x128xf32>
    %166 = tpu.matmul %163, %165, %cst_183 {dimension_numbers = #tpu.dot_dimension_numbers<[1], [0], [0], [1], [0, 0, 1, 1], [], []>} : vector<384x128xbf16>, vector<128x128xbf16>, vector<384x128xf32> -> vector<384x128xf32>
    %167 = arith.addf %162, %166 : vector<384x128xf32>
    %c0_184 = arith.constant 0 : index
    %c0_185 = arith.constant 0 : index
    %c74 = arith.constant 74 : index
    %c0_186 = arith.constant 0 : index
    %168 = vector.load %arg2[%c0_184, %c0_185, %c74, %c0_186] : memref<1x1x504x10xbf16, #tpu.memory_space<vmem>>, vector<1x1x384x10xbf16>
    %169 = vector.shape_cast %168 : vector<1x1x384x10xbf16> to vector<384x10xbf16>
    %c8_187 = arith.constant 8 : index
    %c0_188 = arith.constant 0 : index
    %c0_189 = arith.constant 0 : index
    %170 = vector.load %arg6[%c8_187, %c0_188, %c0_189] : memref<9x10x128xbf16, #tpu.memory_space<vmem>>, vector<1x10x128xbf16>
    %171 = vector.shape_cast %170 : vector<1x10x128xbf16> to vector<10x128xbf16>
    %cst_190 = arith.constant dense<0.000000e+00> : vector<384x128xf32>
    %172 = tpu.matmul %169, %171, %cst_190 {dimension_numbers = #tpu.dot_dimension_numbers<[1], [0], [0], [1], [0, 0, 1, 1], [], []>} : vector<384x10xbf16>, vector<10x128xbf16>, vector<384x128xf32> -> vector<384x128xf32>
    %173 = arith.addf %167, %172 : vector<384x128xf32>
    %cst_191 = arith.constant 0.000000e+00 : f32
    %174 = vector.broadcast %cst_191 : f32 to vector<384x128xf32>
    %175 = arith.maximumf %173, %174 : vector<384x128xf32>
    %176 = arith.truncf %175 : vector<384x128xf32> to vector<384x128xbf16>
    %c0_192 = arith.constant 0 : index
    %c0_193 = arith.constant 0 : index
    %c0_194 = arith.constant 0 : index
    %c0_195 = arith.constant 0 : index
    %177 = vector.load %arg10[%c0_192, %c0_193, %c0_194, %c0_195] : memref<1x1x384x128xbf16, #tpu.memory_space<vmem>>, vector<1x1x384x128xbf16>
    %178 = vector.shape_cast %177 : vector<1x1x384x128xbf16> to vector<384x128xbf16>
    %179 = vector.shape_cast %176 : vector<384x128xbf16> to vector<1x1x384x128xbf16>
    tpu.vector_store %arg10[%c0_192, %c0_193, %c0_194, %c0_195], %179 {strides = array<i32>} : memref<1x1x384x128xbf16, #tpu.memory_space<vmem>>, vector<1x1x384x128xbf16>,
    return
  }
  func.func @transform_0(%arg0: i32, %arg1: i32) -> (i32, i32, i32, i32) {
    %c0_i32 = arith.constant 0 : i32
    %c0_i32_0 = arith.constant 0 : i32
    %c0_i32_1 = arith.constant 0 : i32
    return %arg0, %arg1, %c0_i32, %c0_i32_0 : i32, i32, i32, i32
  }
  func.func @transform_1(%arg0: i32, %arg1: i32) -> (i32, i32, i32) {
    %c0_i32 = arith.constant 0 : i32
    %c0_i32_0 = arith.constant 0 : i32
    %c0_i32_1 = arith.constant 0 : i32
    return %arg1, %c0_i32, %c0_i32_0 : i32, i32, i32
  }
  func.func @transform_2(%arg0: i32, %arg1: i32) -> (i32, i32, i32) {
    %c0_i32 = arith.constant 0 : i32
    %c0_i32_0 = arith.constant 0 : i32
    %c0_i32_1 = arith.constant 0 : i32
    %c0_i32_2 = arith.constant 0 : i32
    return %c0_i32, %c0_i32_0, %c0_i32_1 : i32, i32, i32
  }
  func.func @transform_3(%arg0: i32, %arg1: i32) -> (i32, i32, i32) {
    %c0_i32 = arith.constant 0 : i32
    %c0_i32_0 = arith.constant 0 : i32
    %c0_i32_1 = arith.constant 0 : i32
    %c0_i32_2 = arith.constant 0 : i32
    return %c0_i32, %c0_i32_0, %c0_i32_1 : i32, i32, i32
  }
  func.func @transform_4(%arg0: i32, %arg1: i32) -> (i32, i32, i32) {
    %c0_i32 = arith.constant 0 : i32
    %c0_i32_0 = arith.constant 0 : i32
    %c0_i32_1 = arith.constant 0 : i32
    %c0_i32_2 = arith.constant 0 : i32
    return %c0_i32, %c0_i32_0, %c0_i32_1 : i32, i32, i32
  }
  func.func @transform_5(%arg0: i32, %arg1: i32) -> (i32, i32) {
    %c0_i32 = arith.constant 0 : i32
    %c0_i32_0 = arith.constant 0 : i32
    %c0_i32_1 = arith.constant 0 : i32
    return %c0_i32, %c0_i32_0 : i32, i32
  }
  func.func @transform_6(%arg0: i32, %arg1: i32) -> (i32, i32) {
    %c0_i32 = arith.constant 0 : i32
    %c0_i32_0 = arith.constant 0 : i32
    %c0_i32_1 = arith.constant 0 : i32
    return %c0_i32, %c0_i32_0 : i32, i32
  }
  func.func @transform_7(%arg0: i32, %arg1: i32) -> (i32, i32) {
    %c0_i32 = arith.constant 0 : i32
    %c0_i32_0 = arith.constant 0 : i32
    %c0_i32_1 = arith.constant 0 : i32
    return %c0_i32, %c0_i32_0 : i32, i32
  }
  func.func @transform_8(%arg0: i32, %arg1: i32) -> (i32, i32, i32, i32) {
    %c0_i32 = arith.constant 0 : i32
    %c0_i32_0 = arith.constant 0 : i32
    %c0_i32_1 = arith.constant 0 : i32
    return %arg0, %arg1, %c0_i32, %c0_i32_0 : i32, i32, i32, i32
  }
}

</mosaic_0001>

<bundles_post_ra>
// kernel: tpu_custom_call.1
= control target key start
LH: loop header
LB: loop body
LE: loop exit
PB: predicated region body
PF: predicated region fallthrough
CT: control target
= control target key end

     0   :  { %13 = vsyncpa [#allocation4], 0  ;;  %s29589_s0 = inlined_call_operand.vmem [shape: bf16[2,1,504,10], index: 0, kind: input, shape index: {}]   ;;  %s29590_s1 = inlined_call_operand.vmem [shape: f32[1,432,1], index: 1, kind: input, shape index: {}]   ;;  %s29591_s2 = inlined_call_operand.vmem [shape: bf16[9,10,128], index: 2, kind: input, shape index: {}]   ;;  %s29592_s3 = inlined_call_operand.vmem [shape: bf16[9,128,128], index: 3, kind: input, shape index: {}]   ;;  %s29593_s4 = inlined_call_operand.vmem [shape: bf16[9,10,128], index: 4, kind: input, shape index: {}]   ;;  %s29594_s5 = inlined_call_operand.vmem [shape: f32[1,128], index: 5, kind: input, shape index: {}]   ;;  %s29595_s6 = inlined_call_operand.vmem [shape: f32[1,128], index: 6, kind: input, shape index: {}]   ;;  %s29596_s7 = inlined_call_operand.vmem [shape: bf16[10,128], index: 7, kind: input, shape index: {}]   ;;  %s29597_s8 = inlined_call_operand.hbm [shape: bf16[2,1,384,128], index: 8, kind: output, shape index: {}]  }
   0x1   :  { %15 = vsyncpa [#allocation4 + $0x1], 0  ;;  %s24143_s27 = smov 0   ;;  %s24145_s28 = smov 0  }
   0x2   :  { %s24147_s29 = smov 0   ;;  %s24149_s30 = smov 0  }
   0x3   :  { %s24151_s9 = smov 0   ;;  %s24153_s10 = smov 0  }
   0x4 LB: > { %s17627_s11 = sadd.s32 4294967295, %s24090_s10   ;;  %s17628_s12 = sadd.s32 4294967294, %s24090_s10   ;;  %s24090_s10 = sphi %s24153_s10, %s21_s10   ;;  %s24086_s9 = sphi %s24151_s9, %s30299_s9   ;;  %s24082_s30 = sphi %s24149_s30, %s30298_s30   ;;  %s24078_s29 = sphi %s24147_s29, %s30297_s29   ;;  %s24074_s28 = sphi %s24145_s28, %s30296_s28   ;;  %s24070_s27 = sphi %s24143_s27, %s30295_s27  }
   0x5   : > { %s33_s13 = sadd.s32 1, %s24086_s9  ;;  %s222_s14 = sadd.s32 1, %s24078_s29 }
   0x6   : > { %p35_p0 = scmp.ge.s32.totalorder %s33_s13, 2  ;;  %p232_p1 = scmp.ne.s32.totalorder %s24078_s29, %s24074_s28 }
   0x7   : > { %p233_p2 = scmp.eq.s32.totalorder %s17627_s11, 1  ;;  %p238_p3 = scmp.ne.s32.totalorder %s24074_s28, %s24070_s27 }
   0x8   : > { %s30301_s13 = smov (%p35_p0, %s33_s13), 0  ;;  %p239_p5 = scmp.eq.s32.totalorder %s17628_s12, 1 }
   0x9   : > { %p24183_p4 = por %p233_p2, %p232_p1  ;;  %s217_s16 = ssub.s32 %s24086_s9, %s30301_s13 }
   0xa   : > { %p17632_p6 = scmp.ge.s32.totalorder %s24090_s10, 1  ;;  %p220_p7 = scmp.eq.s32.totalorder %s217_s16, 0 }
   0xb   : > { %p24190_p8 = por %p239_p5, %p238_p3  ;;  %p295_p9 = scmp.lt.s32.totalorder %s24090_s10, 3 }
   0xc   : > { %s24196_s18 = scalar_select %p220_p7, %s24078_s29, %s222_s14  }
   0xd   : > { %p296_p10 = pnand %p17632_p6, %p295_p9 }
   0xf   : > { %299 = sbr.rel (%p296_p10) target bundleno = 3998 (0xf9e), region = 52 }
  0x16   : > { %vm859_vm0 = vcmask 1044480   ;;  %v29605_v0 = vmov 0.0   ;;  %v23240_v1 = vld [vmem:[%s29591_s2 + $0x8] sm:$0x1f]   ;;  %p338_p11 = scmp.lt.s32.totalorder %s24082_s30, 1  ;;  %vm24093_vm1 = vmmov 0  }
  0x17   : > { %20185 = vmatprep.subr.bf16.mxu0 %v29605_v0  ;;  %22251 = vmatprep.subr.bf16.mxu1 %v29605_v0  ;;  %v861_v2 = vsel %vm859_vm0, %v23240_v1, 0  ;;  %v23243_v11 = vld [vmem:[%s29591_s2] sm:$0x1f]   ;;  %vm551_vm2 = vsmask.f32 7424  ;;  %vm777_vm3 = vcmask 80896  }
  0x18   : > { %20187 = vmatprep.mubr.msk.bf16.mxu0 %vm24093_vm1, %v29605_v0  ;;  %21033 = vmatprep.mubr.msk.bf16.mxu1 %vm24093_vm1, %v29605_v0  ;;  %s339_s21 = scalar_select %p338_p11, %s24082_s30, 1  ;;  %v1172_v17 = vsel %vm859_vm0, %v23243_v11, 0  ;;  %vm1430_vm4 = vcmask 1046528   ;;  %vm7262_vm5 = vsmask.f32 4352 }
  0x19   : > { %20186 = vmatpush3.bf16.msra.mxu0 %v861_v2  ;;  %s335_s23 = sand.u32 1, %s24074_s28   ;;  %s23177_s11 = smul.u32 3072, %s24082_s30 }
  0x1a   : > { %20295 = vmatprep.subr.bf16.mxu0 %v29605_v0  ;;  %s23176_s22 = smul.u32 252, %s339_s21  ;;  %s29543_s30 = scalar_lea.sflag [#allocation4], %s335_s23 }
  0x1b   : > { %s23175_s24 = smul.u32 192, %s335_s23  ;;  %s29537_s19 = scalar_lea.hbm %s29597_s8, %s23177_s11 }
  0x1c   : > { %s24214_s25 = scalar_lea.vmem %s29589_s0, %s23176_s22  ;;  %s24095_s21 = smov [#allocation3]  }
  0x1d   : > { %v353_v3 = vld [vmem:[%s24214_s25] sm:$0xf]  ;;  %v354_v4 = vld [vmem:[%s24214_s25 + $0x4] sm:$0xf]  ;;  %v23242_v6 = vld [vmem:[%s24214_s25 + $0x8] sm:$0xff]   ;;  %s29462_s26 = scalar_lea.vmem [#allocation3], %s23175_s24 }
  0x1e   : > { %v24218_v5 = vcombine.low %v353_v3, %v354_v4  ;;  %v560_v9 = vshll.u32 %v23242_v6, 16  ;;  %v23244_v10 = vld [vmem:[%s24214_s25 + $0x10] sm:$0xff]   ;;  %v564_v15 = vshrl.u32 %v23242_v6, 16  ;;  %v23245_v19 = vld [vmem:[%s24214_s25 + $0x18] sm:$0xff]   ;;  %v23246_v22 = vld [vmem:[%s24214_s25 + $0x20] sm:$0xff]   ;;  %s17530_s12 = sshll.u32 %s29462_s26, 4  ;;  %s29532_s12 = int_to_ptr.vmem [resolvable:$true] %s17530_s12 }
  0x1f   : > { %v568_v16 = vshll.u32 %v23244_v10, 16  ;;  %v572_v23 = vshrl.u32 %v23244_v10, 16  ;;  %v576_v24 = vshll.u32 %v23245_v19, 16  ;;  %v24236_v25 = vld [vmem:[%s24214_s25 + $0x28] sm:$0xff]   ;;  %v24240_v27 = vld [vmem:[%s24214_s25 + $0x30] sm:$0xff]   ;;  %v24243_v28 = vld [vmem:[%s24214_s25 + $0x38] sm:$0xff]  }
  0x20   : > { %v553_v7 = vshrl.u32 %v24218_v5, 16  ;;  %v555_v8 = vshll.u32 %v24218_v5, 16  ;;  %v562_v13 = vrot.slane %v560_v9, 1  ;;  %v584_v29 = vshll.u32 %v23246_v22, 16  ;;  %v24246_v30 = vld [vmem:[%s24214_s25 + $0x40] sm:$0xff]   ;;  %v24253_v35 = vld [vmem:[%s24214_s25 + $0x48] sm:$0xff]  }
  0x21   : > { %v570_v21 = vrot.slane %v568_v16, 1  ;;  %v578_v32 = vrot.slane %v576_v24, 1  ;;  %v592_v33 = vshll.u32 %v24236_v25, 16  ;;  %v580_v34 = vshrl.u32 %v23245_v19, 16  ;;  %v24256_v36 = vld [vmem:[%s24214_s25 + $0x50] sm:$0xff]   ;;  %v24259_v38 = vld [vmem:[%s24214_s25 + $0x58] sm:$0xff]  }
  0x22   : > { %v557_v12 = vrot.slane %v555_v8, 1  ;;  %v566_v20 = vor.u32 %v564_v15, %v562_v13  ;;  %v588_v37 = vshrl.u32 %v23246_v22, 16  ;;  %v586_v39 = vrot.slane %v584_v29, 1  ;;  %v24272_v51 = vld [vmem:[%s24214_s25 + $0x60] sm:$0xff]   ;;  %v24288_v62 = vld [vmem:[%s24214_s25 + $0x68] sm:$0xff]   ;;  %v24295_v3 = vld [vmem:[%s24214_s25 + $0x70] sm:$0xff]  }
  0x23   : > { %v574_v31 = vor.u32 %v572_v23, %v570_v21  ;;  %v600_v40 = vshll.u32 %v24240_v27, 16  ;;  %v608_v41 = vshll.u32 %v24243_v28, 16  ;;  %v616_v42 = vshll.u32 %v24246_v30, 16  ;;  %v24301_v8 = vld [vmem:[%s24214_s25 + $0x78] sm:$0xff]   ;;  %s24012_s20 = scalar_lea.vmem %s29532_s12, 3072 }
  0x24   : > { %v558_v14 = vor.u32 %v557_v12, %v553_v7  ;;  %v571_v26 = vsel %vm551_vm2, %v566_v20, %v570_v21  ;;  %v594_v44 = vrot.slane %v592_v33, 1  ;;  %v596_v45 = vshrl.u32 %v24236_v25, 16  ;;  %p24013_p12 = scmp.ne.s32.totalorder %s29532_s12, %s24012_s20 }
  0x25   : > { %v579_v43 = vsel %vm551_vm2, %v574_v31, %v578_v32  ;;  %v604_v46 = vshrl.u32 %v24240_v27, 16  ;;  %v612_v47 = vshrl.u32 %v24243_v28, 16  ;;  %v624_v48 = vshll.u32 %v24253_v35, 16  ;;  %v24342_v31 = vld [vmem:[%s24214_s25 + $0x98] sm:$0xff]  }
  0x26   : > { %v563_v18 = vsel %vm551_vm2, %v558_v14, %v562_v13  ;;  %v632_v49 = vshll.u32 %v24256_v36, 16  ;;  %v640_v50 = vshll.u32 %v24259_v38, 16  ;;  %v602_v52 = vrot.slane %v600_v40, 1  ;;  %v24351_v40 = vld [vmem:[%s24214_s25 + $0xa0] sm:$0xff]   ;;  %p24014_p13 = pnand %p24013_p12, %p24183_p4 }
  0x27   : > { %20188 = vmatmul.mubr.msk.bf16.vlgmr.msra.gmra.mrb[0].mxu0 %vm777_vm3, %v563_v18  ;;  %v610_v53 = vrot.slane %v608_v41, 1  ;;  %v24274_v54 = vrot.slane %v616_v42, 1  ;;  %v620_v55 = vshrl.u32 %v24246_v30, 16  ;;  %v628_v56 = vshrl.u32 %v24253_v35, 16  ;;  %v24320_v18 = vld [vmem:[%s24214_s25 + $0x88] sm:$0xff]  }
  0x28   : > { %20296 = vmatpush3.bf16.msra.mxu0 %v1172_v17  ;;  %20191 = vmatprep.mubr.msk.bf16.mxu0 %vm24093_vm1, %v29605_v0  ;;  %v636_v57 = vshrl.u32 %v24256_v36, 16  ;;  %v582_v58 = vor.u32 %v580_v34, %v578_v32  ;;  %v24282_v59 = vrot.slane %v624_v48, 1  ;;  %v24284_v60 = vrot.slane %v632_v49, 1  ;;  %v24317_v17 = vld [vmem:[%s24214_s25 + $0x80] sm:$0xff]   ;;  %p24015_p0 = pneg %p24014_p13 }
  0x29   : > { %20405 = vmatprep.subr.bf16.mxu0 %v29605_v0  ;;  %v644_v61 = vshrl.u32 %v24259_v38, 16  ;;  %v24290_v63 = vrot.slane %v640_v50, 1  ;;  %v648_v1 = vshll.u32 %v24272_v51, 16  ;;  %v652_v2 = vshrl.u32 %v24272_v51, 16 }
  0x2a   : > { %v587_v4 = vsel %vm551_vm2, %v582_v58, %v586_v39  ;;  %v656_v6 = vshll.u32 %v24288_v62, 16  ;;  %v660_v7 = vshrl.u32 %v24288_v62, 16  ;;  %v590_v9 = vor.u32 %v588_v37, %v586_v39 }
  0x2b   : > { %v24306_v10 = vrot.slane %v648_v1, 1  ;;  %v664_v11 = vshll.u32 %v24295_v3, 16  ;;  %v668_v13 = vshrl.u32 %v24295_v3, 16  ;;  %v672_v16 = vshll.u32 %v24301_v8, 16 }
  0x2c   : > { %v24309_v12 = vrot.slane %v656_v6, 1  ;;  %v595_v14 = vsel %vm551_vm2, %v590_v9, %v594_v44  ;;  %v598_v19 = vor.u32 %v596_v45, %v594_v44  ;;  %v676_v21 = vshrl.u32 %v24301_v8, 16  ;;  %v24386_v6 = vld [vmem:[%s24214_s25 + $0xb8] sm:$0xff]  }
  0x2d   : > { %v24313_v15 = vrot.slane %v664_v11, 1  ;;  %v24325_v20 = vrot.slane %v672_v16, 1  ;;  %v680_v22 = vshll.u32 %v24317_v17, 16  ;;  %v684_v23 = vshrl.u32 %v24317_v17, 16 }
  0x2e   : > { %v603_v24 = vsel %vm551_vm2, %v598_v19, %v602_v52  ;;  %v688_v25 = vshll.u32 %v24320_v18, 16  ;;  %v692_v27 = vshrl.u32 %v24320_v18, 16  ;;  %v606_v28 = vor.u32 %v604_v46, %v602_v52  ;;  %v24377_v52 = vld [vmem:[%s24214_s25 + $0xb0] sm:$0xff]   ;;  %v24405_v19 = vld [vmem:[%s24214_s25 + $0xc8] sm:$0xff]  }
  0x2f   : > { %20192 = vmatmul.mubr.msk.bf16.gmra.mrb[4].mxu0 %vm777_vm3, %v571_v26  ;;  %v24333_v26 = vld [vmem:[%s24214_s25 + $0x90] sm:$0xff]   ;;  %v24339_v29 = vrot.slane %v680_v22, 1  ;;  %v704_v39 = vshll.u32 %v24342_v31, 16  ;;  %v614_v41 = vor.u32 %v612_v47, %v610_v53  ;;  %v708_v45 = vshrl.u32 %v24342_v31, 16 }
  0x30   : > { %20195 = vmatprep.mubr.msk.bf16.mxu0 %vm24093_vm1, %v29605_v0  ;;  %v24344_v32 = vrot.slane %v688_v25, 1  ;;  %v696_v33 = vshll.u32 %v24333_v26, 16  ;;  %v611_v34 = vsel %vm551_vm2, %v606_v28, %v610_v53  ;;  %v700_v37 = vshrl.u32 %v24333_v26, 16  ;;  %v23269_v25 = vld [vmem:[%s24214_s25 + $0xd8] ss:$0 sps:$4 sm:$0x11]  }
  0x31   : > { %v24361_v44 = vrot.slane %v704_v39, 1  ;;  %v619_v46 = vsel %vm551_vm2, %v614_v41, %v24274_v54  ;;  %v712_v48 = vshll.u32 %v24351_v40, 16  ;;  %v622_v47 = vor.u32 %v620_v55, %v24274_v54  ;;  %v24396_v55 = vld [vmem:[%s24214_s25 + $0xc0] sm:$0xff]  }
  0x32   : > { %v24356_v42 = vrot.slane %v696_v33, 1  ;;  %v716_v53 = vshrl.u32 %v24351_v40, 16  ;;  %v630_v30 = vor.u32 %v628_v56, %v24282_v59  ;;  %v736_v11 = vshll.u32 %v24386_v6, 16  ;;  %v24422_v33 = vld [vmem:[%s24214_s25 + $0xd0] sm:$0xff]  }
  0x33   : > { %v24374_v50 = vrot.slane %v712_v48, 1  ;;  %v627_v1 = vsel %vm551_vm2, %v622_v47, %v24282_v59  ;;  %v744_v16 = vshll.u32 %v24396_v55, 16  ;;  %v638_v35 = vor.u32 %v636_v57, %v24284_v60 }
  0x34   : > { %v732_v56 = vshrl.u32 %v24377_v52, 16  ;;  %v24414_v59 = vrot.slane %v736_v11, 1  ;;  %v740_v22 = vshrl.u32 %v24386_v6, 16  ;;  %v748_v57 = vshrl.u32 %v24396_v55, 16 }
  0x35   : > { %v24419_v28 = vrot.slane %v744_v16, 1  ;;  %v643_v36 = vsel %vm551_vm2, %v638_v35, %v24290_v63  ;;  %v768_v39 = vshll.u32 %v23269_v25, 16  ;;  %v646_v41 = vor.u32 %v644_v61, %v24290_v63 }
  0x36   : > { %v756_v48 = vshrl.u32 %v24405_v19, 16  ;;  %v654_v47 = vor.u32 %v652_v2, %v24306_v10  ;;  %v662_v61 = vor.u32 %v660_v7, %v24309_v12  ;;  %v670_v51 = vor.u32 %v668_v13, %v24313_v15 }
  0x37   : > { %20196 = vmatmul.mubr.msk.bf16.gmra.mrb[8].mxu0 %vm777_vm3, %v579_v43  ;;  %v24359_v43 = vld [vmem:[%s24214_s25 + $0xa8] sm:$0xff]   ;;  %v678_v62 = vor.u32 %v676_v21, %v24325_v20  ;;  %v686_v3 = vor.u32 %v684_v23, %v24339_v29  ;;  %v694_v8 = vor.u32 %v692_v27, %v24344_v32  ;;  %v702_v13 = vor.u32 %v700_v37, %v24356_v42 }
  0x38   : > { %20199 = vmatprep.mubr.msk.bf16.mxu0 %vm24093_vm1, %v29605_v0  ;;  %v720_v49 = vshll.u32 %v24359_v43, 16  ;;  %v724_v54 = vshrl.u32 %v24359_v43, 16  ;;  %v659_v38 = vsel %vm551_vm2, %v654_v47, %v24309_v12  ;;  %v667_v63 = vsel %vm551_vm2, %v662_v61, %v24313_v15  ;;  %v24625_v61 = vld [vmem:[%s24214_s25 + $0x30] sm:$0xff]  }
  0x39   : > { %v675_v2 = vsel %vm551_vm2, %v670_v51, %v24325_v20  ;;  %v683_v7 = vsel %vm551_vm2, %v678_v62, %v24339_v29  ;;  %v699_v12 = vsel %vm551_vm2, %v694_v8, %v24356_v42  ;;  %v707_v15 = vsel %vm551_vm2, %v702_v13, %v24361_v44  ;;  %v24647_v13 = vld [vmem:[%s24214_s25 + $0x40] sm:$0xff]  }
  0x3a   : > { %v24380_v58 = vrot.slane %v720_v49, 1  ;;  %v710_v17 = vor.u32 %v708_v45, %v24361_v44  ;;  %v718_v20 = vor.u32 %v716_v53, %v24374_v50  ;;  %v742_v31 = vor.u32 %v740_v22, %v24414_v59 }
  0x3b   : > { %v750_v37 = vor.u32 %v748_v57, %v24419_v28 }
  0x3c   : > { %v715_v18 = vsel %vm551_vm2, %v710_v17, %v24374_v50  ;;  %v723_v21 = vsel %vm551_vm2, %v718_v20, %v24380_v58  ;;  %v726_v23 = vor.u32 %v724_v54, %v24380_v58  ;;  %v23270_v50 = vld [vmem:[%s29591_s2 + $0x10] sm:$0x1f]  }
  0x3f   : > { %20200 = vmatmul.mubr.msk.bf16.gmra.mrb[12].mxu0 %vm777_vm3, %v587_v4  ;;  %v728_v4 = vshll.u32 %v24377_v52, 16  ;;  %v764_v52 = vshrl.u32 %v24422_v33, 16 }
  0x40   : > { %20203 = vmatprep.mubr.msk.bf16.mxu0 %vm24093_vm1, %v29605_v0 }
  0x41   : > { %v24398_v9 = vrot.slane %v728_v4, 1 }
  0x43   : > { %v731_v26 = vsel %vm551_vm2, %v726_v23, %v24398_v9  ;;  %v734_v27 = vor.u32 %v732_v56, %v24398_v9  ;;  %v24581_v56 = vld [vmem:[%s24214_s25 + $0x10] sm:$0xff]  }
  0x45   : > { %v739_v29 = vsel %vm551_vm2, %v734_v27, %v24414_v59 }
  0x47   : > { %20204 = vmatmul.mubr.msk.bf16.gmra.mrb[16].mxu0 %vm777_vm3, %v595_v14  ;;  %v635_v14 = vsel %vm551_vm2, %v630_v30, %v24284_v60  ;;  %v1573_v30 = vsel %vm859_vm0, %v23270_v50, 0 }
  0x48   : > { %20207 = vmatprep.mubr.msk.bf16.mxu0 %vm24093_vm1, %v29605_v0 }
  0x4f   : > { %20208 = vmatmul.mubr.msk.bf16.gmra.mrb[20].mxu0 %vm777_vm3, %v603_v24  ;;  %v752_v24 = vshll.u32 %v24405_v19, 16 }
  0x50   : > { %20211 = vmatprep.mubr.msk.bf16.mxu0 %vm24093_vm1, %v29605_v0 }
  0x51   : > { %v24427_v60 = vrot.slane %v752_v24, 1 }
  0x53   : > { %v755_v40 = vsel %vm551_vm2, %v750_v37, %v24427_v60  ;;  %v758_v42 = vor.u32 %v756_v48, %v24427_v60 }
  0x57   : > { %20212 = vmatmul.mubr.msk.bf16.gmra.mrb[24].mxu0 %vm777_vm3, %v611_v34  ;;  %v760_v34 = vshll.u32 %v24422_v33, 16 }
  0x58   : > { %20215 = vmatprep.mubr.msk.bf16.mxu0 %vm24093_vm1, %v29605_v0 }
  0x59   : > { %v762_v49 = vrot.slane %v760_v34, 1  ;;  %v24603_v34 = vld [vmem:[%s24214_s25 + $0x20] sm:$0xff]  }
  0x5b   : > { %v763_v43 = vsel %vm551_vm2, %v758_v42, %v762_v49  ;;  %v766_v44 = vor.u32 %v764_v52, %v762_v49  ;;  %v24614_v49 = vld [vmem:[%s24214_s25 + $0x28] sm:$0xff]  }
  0x5f   : > { %20216 = vmatmul.mubr.msk.bf16.gmra.mrb[28].mxu0 %vm777_vm3, %v619_v46  ;;  %v651_v46 = vsel %vm551_vm2, %v646_v41, %v24306_v10  ;;  %v691_v10 = vsel %vm551_vm2, %v686_v3, %v24344_v32  ;;  %v747_v32 = vsel %vm551_vm2, %v742_v31, %v24419_v28  ;;  %v24592_v28 = vld [vmem:[%s24214_s25 + $0x18] sm:$0xff]   ;;  %v24669_v31 = vld [vmem:[%s24214_s25 + $0x50] sm:$0xff]  }
  0x60   : > { %20219 = vmatprep.mubr.msk.bf16.mxu0 %vm24093_vm1, %v29605_v0 }
  0x67   : > { %20220 = vmatmul.mubr.msk.bf16.gmra.mrb[32].mxu0 %vm777_vm3, %v627_v1  ;;  %v770_v1 = vrot.slane %v768_v39, 1 }
  0x68   : > { %20223 = vmatprep.mubr.msk.bf16.mxu0 %vm24093_vm1, %v29605_v0 }
  0x69   : > { %v771_v45 = vsel %vm551_vm2, %v766_v44, %v770_v1 }
  0x6f   : > { %20224 = vmatmul.mubr.msk.bf16.gmra.mrb[36].mxu0 %vm777_vm3, %v635_v14  ;;  %v24570_v14 = vld [vmem:[%s24214_s25 + $0x8] sm:$0xff]  }
  0x70   : > { %20227 = vmatprep.mubr.msk.bf16.mxu0 %vm24093_vm1, %v29605_v0 }
  0x77   : > { %20228 = vmatmul.mubr.msk.bf16.gmra.mrb[40].mxu0 %vm777_vm3, %v643_v36 }
  0x78   : > { %20231 = vmatprep.mubr.msk.bf16.mxu0 %vm24093_vm1, %v29605_v0 }
  0x7f   : > { %20232 = vmatmul.mubr.msk.bf16.gmra.mrb[44].mxu0 %vm777_vm3, %v651_v46 }
  0x80   : > { %20235 = vmatprep.mubr.msk.bf16.mxu0 %vm24093_vm1, %v29605_v0 }
  0x87   : > { %20236 = vmatmul.mubr.msk.bf16.gmra.mrb[48].mxu0 %vm777_vm3, %v659_v38 }
  0x88   : > { %20239 = vmatprep.mubr.msk.bf16.mxu0 %vm24093_vm1, %v29605_v0 }
  0x8f   : > { %20240 = vmatmul.mubr.msk.bf16.gmra.mrb[52].mxu0 %vm777_vm3, %v667_v63 }
  0x90   : > { %20243 = vmatprep.mubr.msk.bf16.mxu0 %vm24093_vm1, %v29605_v0 }
  0x97   : > { %20244 = vmatmul.mubr.msk.bf16.gmra.mrb[56].mxu0 %vm777_vm3, %v675_v2 }
  0x98   : > { %20247 = vmatprep.mubr.msk.bf16.mxu0 %vm24093_vm1, %v29605_v0 }
  0x9f   : > { %20248 = vmatmul.mubr.msk.bf16.gmra.mrb[60].mxu0 %vm777_vm3, %v683_v7  ;;  %v24636_v7 = vld [vmem:[%s24214_s25 + $0x38] sm:$0xff]  }
  0xa0   : > { %20251 = vmatprep.mubr.msk.bf16.mxu0 %vm24093_vm1, %v29605_v0 }
  0xa7   : > { %20252 = vmatmul.mubr.msk.bf16.gmra.mrb[64].mxu0 %vm777_vm3, %v691_v10 }
  0xa8   : > { %20255 = vmatprep.mubr.msk.bf16.mxu0 %vm24093_vm1, %v29605_v0 }
  0xaf   : > { %20256 = vmatmul.mubr.msk.bf16.gmra.mrb[68].mxu0 %vm777_vm3, %v699_v12 }
  0xb0   : > { %20259 = vmatprep.mubr.msk.bf16.mxu0 %vm24093_vm1, %v29605_v0 }
  0xb7   : > { %20260 = vmatmul.mubr.msk.bf16.gmra.mrb[72].mxu0 %vm777_vm3, %v707_v15 }
  0xb8   : > { %20263 = vmatprep.mubr.msk.bf16.mxu0 %vm24093_vm1, %v29605_v0 }
  0xbf   : > { %20264 = vmatmul.mubr.msk.bf16.gmra.mrb[76].mxu0 %vm777_vm3, %v715_v18 }
  0xc0   : > { %20267 = vmatprep.mubr.msk.bf16.mxu0 %vm24093_vm1, %v29605_v0 }
  0xc7   : > { %20268 = vmatmul.mubr.msk.bf16.gmra.mrb[80].mxu0 %vm777_vm3, %v723_v21  ;;  %v24658_v21 = vld [vmem:[%s24214_s25 + $0x48] sm:$0xff]  }
  0xc8   : > { %20271 = vmatprep.mubr.msk.bf16.mxu0 %vm24093_vm1, %v29605_v0 }
  0xcf   : > { %20272 = vmatmul.mubr.msk.bf16.gmra.mrb[84].mxu0 %vm777_vm3, %v731_v26 }
  0xd0   : > { %20275 = vmatprep.mubr.msk.bf16.mxu0 %vm24093_vm1, %v29605_v0 }
  0xd7   : > { %20276 = vmatmul.mubr.msk.bf16.gmra.mrb[88].mxu0 %vm777_vm3, %v739_v29 }
  0xd8   : > { %20279 = vmatprep.mubr.msk.bf16.mxu0 %vm24093_vm1, %v29605_v0 }
  0xdf   : > { %20280 = vmatmul.mubr.msk.bf16.gmra.mrb[92].mxu0 %vm777_vm3, %v747_v32 }
  0xe0   : > { %20283 = vmatprep.mubr.msk.bf16.mxu0 %vm24093_vm1, %v29605_v0 }
  0xe7   : > { %20284 = vmatmul.mubr.msk.bf16.gmra.mrb[96].mxu0 %vm777_vm3, %v755_v40 }
  0xe8   : > { %20287 = vmatprep.mubr.msk.bf16.mxu0 %vm24093_vm1, %v29605_v0 }
  0xef   : > { %20288 = vmatmul.mubr.msk.bf16.gmra.mrb[100].mxu0 %vm777_vm3, %v763_v43  ;;  %v24680_v43 = vld [vmem:[%s24214_s25 + $0x58] sm:$0xff]  }
  0xf0   : > { %20291 = vmatprep.mubr.msk.bf16.mxu0 %vm24093_vm1, %v29605_v0 }
  0xf7   : > { %20292 = vmatmul.mubr.msk.bf16.gmra.mrb[104].mxu0 %vm777_vm3, %v771_v45 }
  0xf8   : > { %20297 = vmatprep.mubr.msk.bf16.mxu0 %vm24093_vm1, %v29605_v0 }
  0xfa   : > { %v24555_v53 = vpop.f32.mrb[0].mxu0 }
  0xfb   : > { %v20189_v58 = vpop.f32.mrb[1].mxu0 }
  0xfc   : > { %v24557_v4 = vpop.f32.mrb[2].mxu0 }
  0xfd   : > { %v20190_v6 = vpop.f32.mrb[3].mxu0 }
  0xfe   : > { %v24691_v6 = vld [vmem:[%s24214_s25 + $0x60] sm:$0xff]  }
  0xff   : > { %20298 = vmatmul.mubr.msk.bf16.vlgmr.msra.gmra.mrb[108].mxu0 %vm777_vm3, %v24218_v5 }
 0x100   : > { %20406 = vmatpush3.bf16.msra.mxu0 %v1573_v30  ;;  %20301 = vmatprep.mubr.msk.bf16.mxu0 %vm24093_vm1, %v29605_v0 }
 0x101   : > { %20515 = vmatprep.subr.bf16.mxu0 %v29605_v0 }
 0x102   : > { %v24565_v54 = vpop.f32.mrb[4].mxu0 }
 0x103   : > { %v20193_v55 = vpop.f32.mrb[5].mxu0 }
 0x104   : > { %v24567_v9 = vpop.f32.mrb[6].mxu0 }
 0x105   : > { %v20194_v11 = vpop.f32.mrb[7].mxu0 }
 0x107   : > { %20302 = vmatmul.mubr.msk.bf16.gmra.mrb[112].mxu0 %vm777_vm3, %v24570_v14 }
 0x108   : > { %20305 = vmatprep.mubr.msk.bf16.mxu0 %vm24093_vm1, %v29605_v0 }
 0x10a   : > { %v24576_v5 = vpop.f32.mrb[8].mxu0 }
 0x10b   : > { %v20197_v16 = vpop.f32.mrb[9].mxu0 }
 0x10c   : > { %v24578_v19 = vpop.f32.mrb[10].mxu0 }
 0x10d   : > { %v20198_v35 = vpop.f32.mrb[11].mxu0 }
 0x10e   : > { %v24702_v35 = vld [vmem:[%s24214_s25 + $0x68] sm:$0xff]  }
 0x10f   : > { %20306 = vmatmul.mubr.msk.bf16.gmra.mrb[116].mxu0 %vm777_vm3, %v24581_v56 }
 0x110   : > { %20309 = vmatprep.mubr.msk.bf16.mxu0 %vm24093_vm1, %v29605_v0 }
 0x112   : > { %v24587_v59 = vpop.f32.mrb[12].mxu0 }
 0x113   : > { %v20201_v22 = vpop.f32.mrb[13].mxu0 }
 0x114   : > { %v24589_v24 = vpop.f32.mrb[14].mxu0 }
 0x115   : > { %v20202_v25 = vpop.f32.mrb[15].mxu0 }
 0x117   : > { %20310 = vmatmul.mubr.msk.bf16.gmra.mrb[120].mxu0 %vm777_vm3, %v24592_v28 }
 0x118   : > { %20313 = vmatprep.mubr.msk.bf16.mxu0 %vm24093_vm1, %v29605_v0 }
 0x11a   : > { %v24598_v33 = vpop.f32.mrb[16].mxu0 }
 0x11b   : > { %v20205_v36 = vpop.f32.mrb[17].mxu0 }
 0x11c   : > { %v24600_v57 = vpop.f32.mrb[18].mxu0 }
 0x11d   : > { %v20206_v60 = vpop.f32.mrb[19].mxu0 }
 0x11f   : > { %20314 = vmatmul.mubr.msk.bf16.gmra.mrb[124].mxu0 %vm777_vm3, %v24603_v34 }
 0x120   : > { %20317 = vmatprep.mubr.msk.bf16.mxu0 %vm24093_vm1, %v29605_v0 }
 0x122   : > { %v24609_v39 = vpop.f32.mrb[20].mxu0 }
 0x123   : > { %v20209_v41 = vpop.f32.mrb[21].mxu0 }
 0x124   : > { %v24611_v46 = vpop.f32.mrb[22].mxu0  ;;  %v24713_v41 = vld [vmem:[%s24214_s25 + $0x70] sm:$0xff]  }
 0x125   : > { %v20210_v48 = vpop.f32.mrb[23].mxu0 }
 0x127   : > { %20318 = vmatmul.mubr.msk.bf16.gmra.mrb[128].mxu0 %vm777_vm3, %v24614_v49 }
 0x128   : > { %20321 = vmatprep.mubr.msk.bf16.mxu0 %vm24093_vm1, %v29605_v0 }
 0x12a   : > { %v24620_v47 = vpop.f32.mrb[24].mxu0 }
 0x12b   : > { %v20213_v52 = vpop.f32.mrb[25].mxu0 }
 0x12c   : > { %v24622_v1 = vpop.f32.mrb[26].mxu0 }
 0x12d   : > { %v20214_v38 = vpop.f32.mrb[27].mxu0 }
 0x12f   : > { %20322 = vmatmul.mubr.msk.bf16.gmra.mrb[132].mxu0 %vm777_vm3, %v24625_v61 }
 0x130   : > { %20325 = vmatprep.mubr.msk.bf16.mxu0 %vm24093_vm1, %v29605_v0 }
 0x132   : > { %v24631_v63 = vpop.f32.mrb[28].mxu0 }
 0x133   : > { %v20217_v51 = vpop.f32.mrb[29].mxu0 }
 0x134   : > { %v24633_v2 = vpop.f32.mrb[30].mxu0 }
 0x135   : > { %v20218_v62 = vpop.f32.mrb[31].mxu0 }
 0x136   : > { %v24724_v62 = vld [vmem:[%s24214_s25 + $0x78] sm:$0xff]  }
 0x137   : > { %20326 = vmatmul.mubr.msk.bf16.gmra.mrb[136].mxu0 %vm777_vm3, %v24636_v7 }
 0x138   : > { %20329 = vmatprep.mubr.msk.bf16.mxu0 %vm24093_vm1, %v29605_v0 }
 0x13a   : > { %v24642_v3 = vpop.f32.mrb[32].mxu0 }
 0x13b   : > { %v20221_v10 = vpop.f32.mrb[33].mxu0 }
 0x13c   : > { %v24644_v8 = vpop.f32.mrb[34].mxu0 }
 0x13d   : > { %v20222_v12 = vpop.f32.mrb[35].mxu0 }
 0x13f   : > { %20330 = vmatmul.mubr.msk.bf16.gmra.mrb[140].mxu0 %vm777_vm3, %v24647_v13 }
 0x140   : > { %20333 = vmatprep.mubr.msk.bf16.mxu0 %vm24093_vm1, %v29605_v0 }
 0x142   : > { %v24653_v15 = vpop.f32.mrb[36].mxu0 }
 0x143   : > { %v20225_v17 = vpop.f32.mrb[37].mxu0 }
 0x144   : > { %v24655_v18 = vpop.f32.mrb[38].mxu0 }
 0x145   : > { %v20226_v20 = vpop.f32.mrb[39].mxu0 }
 0x147   : > { %20334 = vmatmul.mubr.msk.bf16.gmra.mrb[144].mxu0 %vm777_vm3, %v24658_v21 }
 0x148   : > { %20337 = vmatprep.mubr.msk.bf16.mxu0 %vm24093_vm1, %v29605_v0 }
 0x14a   : > { %v24664_v23 = vpop.f32.mrb[40].mxu0 }
 0x14b   : > { %v20229_v26 = vpop.f32.mrb[41].mxu0 }
 0x14c   : > { %v24666_v27 = vpop.f32.mrb[42].mxu0  ;;  %v24735_v26 = vld [vmem:[%s24214_s25 + $0x80] sm:$0xff]  }
 0x14d   : > { %v20230_v29 = vpop.f32.mrb[43].mxu0 }
 0x14f   : > { %20338 = vmatmul.mubr.msk.bf16.gmra.mrb[148].mxu0 %vm777_vm3, %v24669_v31 }
 0x150   : > { %20341 = vmatprep.mubr.msk.bf16.mxu0 %vm24093_vm1, %v29605_v0 }
 0x152   : > { %v24675_v32 = vpop.f32.mrb[44].mxu0 }
 0x153   : > { %v20233_v37 = vpop.f32.mrb[45].mxu0 }
 0x154   : > { %v24677_v40 = vpop.f32.mrb[46].mxu0 }
 0x155   : > { %v20234_v42 = vpop.f32.mrb[47].mxu0 }
 0x157   : > { %20342 = vmatmul.mubr.msk.bf16.gmra.mrb[152].mxu0 %vm777_vm3, %v24680_v43 }
 0x158   : > { %20345 = vmatprep.mubr.msk.bf16.mxu0 %vm24093_vm1, %v29605_v0 }
 0x15a   : > { %v24686_v44 = vpop.f32.mrb[48].mxu0 }
 0x15b   : > { %v20237_v45 = vpop.f32.mrb[49].mxu0 }
 0x15c   : > { %v24688_v50 = vpop.f32.mrb[50].mxu0 }
 0x15d   : > { %v20238_v58 = vpop.f32.mrb[51].mxu0 }
 0x15e   : > { %v24746_v58 = vld [vmem:[%s24214_s25 + $0x88] sm:$0xff]  }
 0x15f   : > { %20346 = vmatmul.mubr.msk.bf16.gmra.mrb[156].mxu0 %vm777_vm3, %v24691_v6 }
 0x160   : > { %20349 = vmatprep.mubr.msk.bf16.mxu0 %vm24093_vm1, %v29605_v0 }
 0x162   : > { %v24697_v30 = vpop.f32.mrb[52].mxu0 }
 0x163   : > { %v20241_v55 = vpop.f32.mrb[53].mxu0 }
 0x164   : > { %v24699_v11 = vpop.f32.mrb[54].mxu0 }
 0x165   : > { %v20242_v16 = vpop.f32.mrb[55].mxu0 }
 0x167   : > { %20350 = vmatmul.mubr.msk.bf16.gmra.mrb[160].mxu0 %vm777_vm3, %v24702_v35 }
 0x168   : > { %20353 = vmatprep.mubr.msk.bf16.mxu0 %vm24093_vm1, %v29605_v0 }
 0x16a   : > { %v24708_v22 = vpop.f32.mrb[56].mxu0 }
 0x16b   : > { %v20245_v25 = vpop.f32.mrb[57].mxu0 }
 0x16c   : > { %v24710_v36 = vpop.f32.mrb[58].mxu0 }
 0x16d   : > { %v20246_v60 = vpop.f32.mrb[59].mxu0 }
 0x16f   : > { %20354 = vmatmul.mubr.msk.bf16.gmra.mrb[164].mxu0 %vm777_vm3, %v24713_v41 }
 0x170   : > { %20357 = vmatprep.mubr.msk.bf16.mxu0 %vm24093_vm1, %v29605_v0 }
 0x172   : > { %v24719_v48 = vpop.f32.mrb[60].mxu0 }
 0x173   : > { %v20249_v52 = vpop.f32.mrb[61].mxu0 }
 0x174   : > { %v24721_v38 = vpop.f32.mrb[62].mxu0  ;;  %v24757_v52 = vld [vmem:[%s24214_s25 + $0x90] sm:$0xff]  }
 0x175   : > { %v20250_v51 = vpop.f32.mrb[63].mxu0 }
 0x177   : > { %20358 = vmatmul.mubr.msk.bf16.gmra.mrb[168].mxu0 %vm777_vm3, %v24724_v62 }
 0x178   : > { %20361 = vmatprep.mubr.msk.bf16.mxu0 %vm24093_vm1, %v29605_v0 }
 0x17a   : > { %v24730_v10 = vpop.f32.mrb[64].mxu0 }
 0x17b   : > { %v20253_v12 = vpop.f32.mrb[65].mxu0 }
 0x17c   : > { %v24732_v17 = vpop.f32.mrb[66].mxu0 }
 0x17d   : > { %v20254_v20 = vpop.f32.mrb[67].mxu0 }
 0x17f   : > { %20362 = vmatmul.mubr.msk.bf16.gmra.mrb[172].mxu0 %vm777_vm3, %v24735_v26 }
 0x180   : > { %20365 = vmatprep.mubr.msk.bf16.mxu0 %vm24093_vm1, %v29605_v0 }
 0x182   : > { %v24741_v29 = vpop.f32.mrb[68].mxu0 }
 0x183   : > { %29736 = vst [vmem:[#allocation6_spill] sm:$0xff] %v24741_v29  ;;  %v20257_v37 = vpop.f32.mrb[69].mxu0  ;;  %v24847_v29 = vld [vmem:[%s24214_s25 + $0xd0] sm:$0xff]  }
 0x184   : > { %v24743_v42 = vpop.f32.mrb[70].mxu0  ;;  %29763 = vst [vmem:[#allocation33_spill] sm:$0xff] %v24847_v29 }
 0x185   : > { %29737 = vst [vmem:[#allocation7_spill] sm:$0xff] %v24743_v42  ;;  %v20258_v45 = vpop.f32.mrb[71].mxu0  ;;  %v23869_v42 = vld [vmem:[%s24214_s25 + $0x4] sm:$0xf] }
 0x186   : > { %v24768_v45 = vld [vmem:[%s24214_s25 + $0x98] sm:$0xff]  }
 0x187   : > { %20366 = vmatmul.mubr.msk.bf16.gmra.mrb[176].mxu0 %vm777_vm3, %v24746_v58  ;;  %29742 = vst [vmem:[#allocation12_spill] sm:$0xff] %v24768_v45 }
 0x188   : > { %20369 = vmatprep.mubr.msk.bf16.mxu0 %vm24093_vm1, %v29605_v0 }
 0x18a   : > { %v24752_v55 = vpop.f32.mrb[72].mxu0 }
 0x18b   : > { %29738 = vst [vmem:[#allocation8_spill] sm:$0xff] %v24752_v55  ;;  %v20261_v16 = vpop.f32.mrb[73].mxu0 }
 0x18c   : > { %v24754_v25 = vpop.f32.mrb[74].mxu0 }
 0x18d   : > { %29739 = vst [vmem:[#allocation9_spill] sm:$0xff] %v24754_v25  ;;  %v20262_v60 = vpop.f32.mrb[75].mxu0 }
 0x18f   : > { %20370 = vmatmul.mubr.msk.bf16.gmra.mrb[180].mxu0 %vm777_vm3, %v24757_v52 }
 0x190   : > { %20373 = vmatprep.mubr.msk.bf16.mxu0 %vm24093_vm1, %v29605_v0 }
 0x192   : > { %v24763_v51 = vpop.f32.mrb[76].mxu0 }
 0x193   : > { %29740 = vst [vmem:[#allocation10_spill] sm:$0xff] %v24763_v51  ;;  %v20265_v12 = vpop.f32.mrb[77].mxu0 }
 0x194   : > { %v24765_v20 = vpop.f32.mrb[78].mxu0  ;;  %v24779_v12 = vld [vmem:[%s24214_s25 + $0xa0] sm:$0xff]  }
 0x195   : > { %29741 = vst [vmem:[#allocation11_spill] sm:$0xff] %v24765_v20  ;;  %v20266_v37 = vpop.f32.mrb[79].mxu0  ;;  %29745 = vst [vmem:[#allocation15_spill] sm:$0xff] %v24779_v12 }
 0x197   : > { %20374 = vmatmul.mubr.msk.bf16.gmra.mrb[184].mxu0 %vm777_vm3, %v24768_v45 }
 0x198   : > { %20377 = vmatprep.mubr.msk.bf16.mxu0 %vm24093_vm1, %v29605_v0 }
 0x19a   : > { %v24774_v16 = vpop.f32.mrb[80].mxu0 }
 0x19b   : > { %29743 = vst [vmem:[#allocation13_spill] sm:$0xff] %v24774_v16  ;;  %v20269_v60 = vpop.f32.mrb[81].mxu0 }
 0x19c   : > { %v24776_v25 = vpop.f32.mrb[82].mxu0  ;;  %v24790_v60 = vld [vmem:[%s24214_s25 + $0xa8] sm:$0xff]  }
 0x19d   : > { %29744 = vst [vmem:[#allocation14_spill] sm:$0xff] %v24776_v25  ;;  %v20270_v51 = vpop.f32.mrb[83].mxu0  ;;  %29748 = vst [vmem:[#allocation18_spill] sm:$0xff] %v24790_v60 }
 0x19f   : > { %20378 = vmatmul.mubr.msk.bf16.gmra.mrb[188].mxu0 %vm777_vm3, %v24779_v12 }
 0x1a0   : > { %20381 = vmatprep.mubr.msk.bf16.mxu0 %vm24093_vm1, %v29605_v0 }
 0x1a2   : > { %v24785_v37 = vpop.f32.mrb[84].mxu0 }
 0x1a3   : > { %29746 = vst [vmem:[#allocation16_spill] sm:$0xff] %v24785_v37  ;;  %v20273_v20 = vpop.f32.mrb[85].mxu0 }
 0x1a4   : > { %v24787_v55 = vpop.f32.mrb[86].mxu0  ;;  %v24801_v20 = vld [vmem:[%s24214_s25 + $0xb0] sm:$0xff]  }
 0x1a5   : > { %29747 = vst [vmem:[#allocation17_spill] sm:$0xff] %v24787_v55  ;;  %v20274_v16 = vpop.f32.mrb[87].mxu0  ;;  %29751 = vst [vmem:[#allocation21_spill] sm:$0xff] %v24801_v20 }
 0x1a7   : > { %20382 = vmatmul.mubr.msk.bf16.gmra.mrb[192].mxu0 %vm777_vm3, %v24790_v60 }
 0x1a8   : > { %20385 = vmatprep.mubr.msk.bf16.mxu0 %vm24093_vm1, %v29605_v0 }
 0x1aa   : > { %v24796_v51 = vpop.f32.mrb[88].mxu0 }
 0x1ab   : > { %29749 = vst [vmem:[#allocation19_spill] sm:$0xff] %v24796_v51  ;;  %v20277_v25 = vpop.f32.mrb[89].mxu0 }
 0x1ac   : > { %v24798_v12 = vpop.f32.mrb[90].mxu0  ;;  %v24812_v25 = vld [vmem:[%s24214_s25 + $0xb8] sm:$0xff]  }
 0x1ad   : > { %29750 = vst [vmem:[#allocation20_spill] sm:$0xff] %v24798_v12  ;;  %v20278_v37 = vpop.f32.mrb[91].mxu0  ;;  %29754 = vst [vmem:[#allocation24_spill] sm:$0xff] %v24812_v25 }
 0x1af   : > { %20386 = vmatmul.mubr.msk.bf16.gmra.mrb[196].mxu0 %vm777_vm3, %v24801_v20 }
 0x1b0   : > { %20389 = vmatprep.mubr.msk.bf16.mxu0 %vm24093_vm1, %v29605_v0 }
 0x1b2   : > { %v24807_v16 = vpop.f32.mrb[92].mxu0 }
 0x1b3   : > { %29752 = vst [vmem:[#allocation22_spill] sm:$0xff] %v24807_v16  ;;  %v20281_v55 = vpop.f32.mrb[93].mxu0  ;;  %v24823_v16 = vld [vmem:[%s24214_s25 + $0xc0] sm:$0xff]  }
 0x1b4   : > { %v24809_v60 = vpop.f32.mrb[94].mxu0  ;;  %29757 = vst [vmem:[#allocation27_spill] sm:$0xff] %v24823_v16 }
 0x1b5   : > { %29753 = vst [vmem:[#allocation23_spill] sm:$0xff] %v24809_v60  ;;  %v20282_v51 = vpop.f32.mrb[95].mxu0 }
 0x1b7   : > { %20390 = vmatmul.mubr.msk.bf16.gmra.mrb[200].mxu0 %vm777_vm3, %v24812_v25 }
 0x1b8   : > { %20393 = vmatprep.mubr.msk.bf16.mxu0 %vm24093_vm1, %v29605_v0 }
 0x1ba   : > { %v24818_v37 = vpop.f32.mrb[96].mxu0 }
 0x1bb   : > { %29755 = vst [vmem:[#allocation25_spill] sm:$0xff] %v24818_v37  ;;  %v20285_v12 = vpop.f32.mrb[97].mxu0 }
 0x1bc   : > { %v24820_v20 = vpop.f32.mrb[98].mxu0  ;;  %v24834_v12 = vld [vmem:[%s24214_s25 + $0xc8] sm:$0xff]  }
 0x1bd   : > { %29756 = vst [vmem:[#allocation26_spill] sm:$0xff] %v24820_v20  ;;  %v20286_v55 = vpop.f32.mrb[99].mxu0  ;;  %29760 = vst [vmem:[#allocation30_spill] sm:$0xff] %v24834_v12 }
 0x1be   : > { %v1423_v55 = vld [vmem:[%s24214_s25] sm:$0xe] }
 0x1bf   : > { %20394 = vmatmul.mubr.msk.bf16.gmra.mrb[204].mxu0 %vm777_vm3, %v24823_v16 }
 0x1c0   : > { %20397 = vmatprep.mubr.msk.bf16.mxu0 %vm24093_vm1, %v29605_v0 }
 0x1c2   : > { %v24829_v51 = vpop.f32.mrb[100].mxu0 }
 0x1c3   : > { %29758 = vst [vmem:[#allocation28_spill] sm:$0xff] %v24829_v51  ;;  %v20289_v60 = vpop.f32.mrb[101].mxu0  ;;  %v17722_v51 = vcombine.low %v1423_v55, %v23869_v42 }
 0x1c4   : > { %v24831_v25 = vpop.f32.mrb[102].mxu0 }
 0x1c5   : > { %29759 = vst [vmem:[#allocation29_spill] sm:$0xff] %v24831_v25  ;;  %v20290_v37 = vpop.f32.mrb[103].mxu0  ;;  %v1432_v25 = vrot.slane %v24570_v14, 1  ;;  %v29764_v14 = vmov 0.0  }
 0x1c6   : > { %v1431_v37 = vrot.slane %v17722_v51, 1 }
 0x1c7   : > { %20398 = vmatmul.mubr.msk.bf16.gmra.mrb[208].mxu0 %vm777_vm3, %v24834_v12  ;;  %v1434_v12 = vrot.slane %v24581_v56, 1  ;;  %v1436_v56 = vrot.slane %v24592_v28, 1 }
 0x1c8   : > { %20401 = vmatprep.mubr.msk.bf16.mxu0 %vm24093_vm1, %v29605_v0 }
 0x1ca   : > { %v24841_v20 = vpop.f32.mrb[104].mxu0 }
 0x1cb   : > { %29761 = vst [vmem:[#allocation31_spill] sm:$0xff] %v24841_v20  ;;  %v20293_v16 = vpop.f32.mrb[105].mxu0  ;;  %v1433_v20 = vsel %vm1430_vm4, %v1431_v37, %v1432_v25 }
 0x1cc   : > { %v24843_v45 = vpop.f32.mrb[106].mxu0  ;;  %v23272_v16 = vld [vmem:[%s29591_s2 + $0x18] sm:$0x1f]  }
 0x1cd   : > { %29762 = vst [vmem:[#allocation32_spill] sm:$0xff] %v24843_v45  ;;  %v20294_v60 = vpop.f32.mrb[107].mxu0  ;;  %v2157_v51 = vsel %vm859_vm0, %v23272_v16, 0 }
 0x1cf   : > { %20402 = vmatmul.mubr.msk.bf16.gmra.mrb[212].mxu0 %vm777_vm3, %v24847_v29 }
 0x1d0   : > { %20407 = vmatprep.mubr.msk.bf16.mxu0 %vm24093_vm1, %v29605_v0 }
 0x1d2   : > { %v1208_v45 = vpop.f32.mrb[108].mxu0 }
 0x1d3   : > { %v24858_v42 = vadd.f32 %v1208_v45, %v24555_v53  ;;  %v20299_v55 = vpop.f32.mrb[109].mxu0 }
 0x1d4   : > { %v1211_v60 = vpop.f32.mrb[110].mxu0 }
 0x1d5   : > { %v24862_v29 = vadd.f32 %v1211_v60, %v24557_v4  ;;  %v20300_v0 = vpop.f32.mrb[111].mxu0 }
 0x1d6   : > { %v1435_v0 = vsel %vm1430_vm4, %v1432_v25, %v1434_v12 }
 0x1d7   : > { %20408 = vmatmul.mubr.msk.bf16.vlgmr.msra.gmra.mrb[216].mxu0 %vm777_vm3, %v1433_v20 }
 0x1d8   : > { %20516 = vmatpush3.bf16.msra.mxu0 %v2157_v51  ;;  %20411 = vmatprep.mubr.msk.bf16.mxu0 %vm24093_vm1, %v29764_v14 }
 0x1d9   : > { %20625 = vmatprep.subr.bf16.mxu0 %v29764_v14 }
 0x1da   : > { %v1216_v53 = vpop.f32.mrb[112].mxu0 }
 0x1db   : > { %v24871_v45 = vadd.f32 %v1216_v53, %v24565_v54  ;;  %v20303_v37 = vpop.f32.mrb[113].mxu0  ;;  %v1437_v53 = vsel %vm1430_vm4, %v1434_v12, %v1436_v56 }
 0x1dc   : > { %v1219_v4 = vpop.f32.mrb[114].mxu0  ;;  %v1438_v37 = vrot.slane %v24603_v34, 1 }
 0x1dd   : > { %v24875_v16 = vadd.f32 %v1219_v4, %v24567_v9  ;;  %v20304_v20 = vpop.f32.mrb[115].mxu0 }
 0x1de   : > { %v1439_v20 = vsel %vm1430_vm4, %v1436_v56, %v1438_v37 }
 0x1df   : > { %20412 = vmatmul.mubr.msk.bf16.gmra.mrb[220].mxu0 %vm777_vm3, %v1435_v0 }
 0x1e0   : > { %20415 = vmatprep.mubr.msk.bf16.mxu0 %vm24093_vm1, %v29764_v14 }
 0x1e2   : > { %v1224_v55 = vpop.f32.mrb[116].mxu0 }
 0x1e3   : > { %v24882_v60 = vadd.f32 %v1224_v55, %v24576_v5  ;;  %v20307_v54 = vpop.f32.mrb[117].mxu0  ;;  %v1440_v55 = vrot.slane %v24614_v49, 1 }
 0x1e4   : > { %v1227_v51 = vpop.f32.mrb[118].mxu0 }
 0x1e5   : > { %v24886_v25 = vadd.f32 %v1227_v51, %v24578_v19  ;;  %v20308_v9 = vpop.f32.mrb[119].mxu0 }
 0x1e6   : > { %v1442_v9 = vrot.slane %v24625_v61, 1 }
 0x1e7   : > { %20416 = vmatmul.mubr.msk.bf16.gmra.mrb[224].mxu0 %vm777_vm3, %v1437_v53  ;;  %v1441_v53 = vsel %vm1430_vm4, %v1438_v37, %v1440_v55 }
 0x1e8   : > { %20419 = vmatprep.mubr.msk.bf16.mxu0 %vm24093_vm1, %v29764_v14 }
 0x1ea   : > { %v1232_v28 = vpop.f32.mrb[120].mxu0 }
 0x1eb   : > { %v24893_v4 = vadd.f32 %v1232_v28, %v24587_v59  ;;  %v20311_v5 = vpop.f32.mrb[121].mxu0 }
 0x1ec   : > { %v1235_v0 = vpop.f32.mrb[122].mxu0 }
 0x1ed   : > { %v24897_v12 = vadd.f32 %v1235_v0, %v24589_v24  ;;  %v20312_v19 = vpop.f32.mrb[123].mxu0  ;;  %v1443_v0 = vsel %vm1430_vm4, %v1440_v55, %v1442_v9 }
 0x1ef   : > { %20420 = vmatmul.mubr.msk.bf16.gmra.mrb[228].mxu0 %vm777_vm3, %v1439_v20  ;;  %v1444_v20 = vrot.slane %v24636_v7, 1 }
 0x1f0   : > { %20423 = vmatprep.mubr.msk.bf16.mxu0 %vm24093_vm1, %v29764_v14 }
 0x1f2   : > { %v1240_v34 = vpop.f32.mrb[124].mxu0 }
 0x1f3   : > { %v24904_v54 = vadd.f32 %v1240_v34, %v24598_v33  ;;  %v20315_v59 = vpop.f32.mrb[125].mxu0 }
 0x1f4   : > { %v1243_v51 = vpop.f32.mrb[126].mxu0  ;;  %v1445_v59 = vsel %vm1430_vm4, %v1442_v9, %v1444_v20 }
 0x1f5   : > { %v24908_v56 = vadd.f32 %v1243_v51, %v24600_v57  ;;  %v20316_v24 = vpop.f32.mrb[127].mxu0  ;;  %v1446_v51 = vrot.slane %v24647_v13, 1 }
 0x1f7   : > { %20424 = vmatmul.mubr.msk.bf16.gmra.mrb[232].mxu0 %vm777_vm3, %v1441_v53 }
 0x1f8   : > { %20427 = vmatprep.mubr.msk.bf16.mxu0 %vm24093_vm1, %v29764_v14 }
 0x1fa   : > { %v1248_v49 = vpop.f32.mrb[128].mxu0 }
 0x1fb   : > { %v24915_v28 = vadd.f32 %v1248_v49, %v24609_v39  ;;  %v20319_v33 = vpop.f32.mrb[129].mxu0  ;;  %v1447_v49 = vsel %vm1430_vm4, %v1444_v20, %v1446_v51 }
 0x1fc   : > { %v1251_v5 = vpop.f32.mrb[130].mxu0  ;;  %v1448_v33 = vrot.slane %v24658_v21, 1 }
 0x1fd   : > { %v24919_v37 = vadd.f32 %v1251_v5, %v24611_v46  ;;  %v20320_v57 = vpop.f32.mrb[131].mxu0 }
 0x1fe   : > { %v1449_v57 = vsel %vm1430_vm4, %v1446_v51, %v1448_v33  ;;  %v1452_v51 = vrot.slane %v24680_v43, 1  ;;  %v1454_v43 = vrot.slane %v24691_v6, 1 }
 0x1ff   : > { %20428 = vmatmul.mubr.msk.bf16.gmra.mrb[236].mxu0 %vm777_vm3, %v1443_v0 }
 0x200   : > { %20431 = vmatprep.mubr.msk.bf16.mxu0 %vm24093_vm1, %v29764_v14 }
 0x202   : > { %v1256_v61 = vpop.f32.mrb[132].mxu0 }
 0x203   : > { %v24926_v19 = vadd.f32 %v1256_v61, %v24620_v47  ;;  %v20323_v39 = vpop.f32.mrb[133].mxu0  ;;  %v1450_v61 = vrot.slane %v24669_v31, 1 }
 0x204   : > { %v1259_v34 = vpop.f32.mrb[134].mxu0 }
 0x205   : > { %v24930_v55 = vadd.f32 %v1259_v34, %v24622_v1  ;;  %v20324_v46 = vpop.f32.mrb[135].mxu0 }
 0x207   : > { %20432 = vmatmul.mubr.msk.bf16.gmra.mrb[240].mxu0 %vm777_vm3, %v1445_v59  ;;  %v1451_v59 = vsel %vm1430_vm4, %v1448_v33, %v1450_v61 }
 0x208   : > { %20435 = vmatprep.mubr.msk.bf16.mxu0 %vm24093_vm1, %v29764_v14 }
 0x20a   : > { %v1264_v7 = vpop.f32.mrb[136].mxu0 }
 0x20b   : > { %v24937_v53 = vadd.f32 %v1264_v7, %v24631_v63  ;;  %v20327_v47 = vpop.f32.mrb[137].mxu0 }
 0x20c   : > { %v1267_v24 = vpop.f32.mrb[138].mxu0  ;;  %v1453_v47 = vsel %vm1430_vm4, %v1450_v61, %v1452_v51 }
 0x20d   : > { %v24941_v9 = vadd.f32 %v1267_v24, %v24633_v2  ;;  %v20328_v1 = vpop.f32.mrb[139].mxu0 }
 0x20f   : > { %20436 = vmatmul.mubr.msk.bf16.gmra.mrb[244].mxu0 %vm777_vm3, %v1447_v49 }
 0x210   : > { %20439 = vmatprep.mubr.msk.bf16.mxu0 %vm24093_vm1, %v29764_v14 }
 0x212   : > { %v1272_v13 = vpop.f32.mrb[140].mxu0 }
 0x213   : > { %v24948_v5 = vadd.f32 %v1272_v13, %v24642_v3  ;;  %v20331_v63 = vpop.f32.mrb[141].mxu0 }
 0x214   : > { %v1275_v0 = vpop.f32.mrb[142].mxu0  ;;  %v1455_v63 = vsel %vm1430_vm4, %v1452_v51, %v1454_v43 }
 0x215   : > { %v24952_v20 = vadd.f32 %v1275_v0, %v24644_v8  ;;  %v20332_v2 = vpop.f32.mrb[143].mxu0 }
 0x217   : > { %20440 = vmatmul.mubr.msk.bf16.gmra.mrb[248].mxu0 %vm777_vm3, %v1449_v57  ;;  %v1456_v57 = vrot.slane %v24702_v35, 1 }
 0x218   : > { %20443 = vmatprep.mubr.msk.bf16.mxu0 %vm24093_vm1, %v29764_v14 }
 0x21a   : > { %v1280_v21 = vpop.f32.mrb[144].mxu0 }
 0x21b   : > { %v24959_v39 = vadd.f32 %v1280_v21, %v24653_v15  ;;  %v20335_v3 = vpop.f32.mrb[145].mxu0  ;;  %v1457_v21 = vsel %vm1430_vm4, %v1454_v43, %v1456_v57 }
 0x21c   : > { %v1283_v34 = vpop.f32.mrb[146].mxu0 }
 0x21d   : > { %v24963_v46 = vadd.f32 %v1283_v34, %v24655_v18  ;;  %v20336_v8 = vpop.f32.mrb[147].mxu0  ;;  %v1458_v34 = vrot.slane %v24713_v41, 1 }
 0x21f   : > { %20444 = vmatmul.mubr.msk.bf16.gmra.mrb[252].mxu0 %vm777_vm3, %v1451_v59  ;;  %v1459_v51 = vsel %vm1430_vm4, %v1456_v57, %v1458_v34  ;;  %v1464_v57 = vrot.slane %v24746_v58, 1 }
 0x220   : > { %20447 = vmatprep.mubr.msk.bf16.mxu0 %vm24093_vm1, %v29764_v14 }
 0x222   : > { %v1288_v31 = vpop.f32.mrb[148].mxu0 }
 0x223   : > { %v24970_v7 = vadd.f32 %v1288_v31, %v24664_v23  ;;  %v20339_v15 = vpop.f32.mrb[149].mxu0 }
 0x224   : > { %v1291_v24 = vpop.f32.mrb[150].mxu0  ;;  %v1460_v15 = vrot.slane %v24724_v62, 1 }
 0x225   : > { %v24974_v49 = vadd.f32 %v1291_v24, %v24666_v27  ;;  %v20340_v18 = vpop.f32.mrb[151].mxu0 }
 0x226   : > { %v1461_v18 = vsel %vm1430_vm4, %v1458_v34, %v1460_v15  ;;  %v29765_v34 = vld [vmem:[#allocation6_spill] sm:$0xff] }
 0x227   : > { %20448 = vmatmul.mubr.msk.bf16.gmra.mrb[0].mxu0 %vm777_vm3, %v1453_v47 }
 0x228   : > { %20451 = vmatprep.mubr.msk.bf16.mxu0 %vm24093_vm1, %v29764_v14 }
 0x22a   : > { %v1296_v1 = vpop.f32.mrb[152].mxu0 }
 0x22b   : > { %v24981_v33 = vadd.f32 %v1296_v1, %v24675_v32  ;;  %v20343_v23 = vpop.f32.mrb[153].mxu0  ;;  %v1462_v1 = vrot.slane %v24735_v26, 1 }
 0x22c   : > { %v1299_v13 = vpop.f32.mrb[154].mxu0 }
 0x22d   : > { %v24985_v0 = vadd.f32 %v1299_v13, %v24677_v40  ;;  %v20344_v27 = vpop.f32.mrb[155].mxu0 }
 0x22f   : > { %20452 = vmatmul.mubr.msk.bf16.gmra.mrb[4].mxu0 %vm777_vm3, %v1455_v63  ;;  %v1463_v63 = vsel %vm1430_vm4, %v1460_v15, %v1462_v1  ;;  %v29767_v15 = vld [vmem:[#allocation12_spill] sm:$0xff] }
 0x230   : > { %20455 = vmatprep.mubr.msk.bf16.mxu0 %vm24093_vm1, %v29764_v14 }
 0x232   : > { %v1304_v6 = vpop.f32.mrb[156].mxu0 }
 0x233   : > { %v24992_v2 = vadd.f32 %v1304_v6, %v24686_v44  ;;  %v20347_v32 = vpop.f32.mrb[157].mxu0 }
 0x234   : > { %v1307_v61 = vpop.f32.mrb[158].mxu0 }
 0x235   : > { %v24996_v3 = vadd.f32 %v1307_v61, %v24688_v50  ;;  %v20348_v40 = vpop.f32.mrb[159].mxu0  ;;  %v1465_v61 = vsel %vm1430_vm4, %v1462_v1, %v1464_v57 }
 0x236   : > { %v1466_v40 = vrot.slane %v24757_v52, 1 }
 0x237   : > { %20456 = vmatmul.mubr.msk.bf16.gmra.mrb[8].mxu0 %vm777_vm3, %v1457_v21 }
 0x238   : > { %20459 = vmatprep.mubr.msk.bf16.mxu0 %vm24093_vm1, %v29764_v14 }
 0x23a   : > { %v1312_v35 = vpop.f32.mrb[160].mxu0 }
 0x23b   : > { %v25003_v59 = vadd.f32 %v1312_v35, %v24697_v30  ;;  %v20351_v44 = vpop.f32.mrb[161].mxu0 }
 0x23c   : > { %v1315_v8 = vpop.f32.mrb[162].mxu0 }
 0x23d   : > { %v25007_v31 = vadd.f32 %v1315_v8, %v24699_v11  ;;  %v20352_v50 = vpop.f32.mrb[163].mxu0  ;;  %v1467_v8 = vsel %vm1430_vm4, %v1464_v57, %v1466_v40 }
 0x23f   : > { %20460 = vmatmul.mubr.msk.bf16.gmra.mrb[12].mxu0 %vm777_vm3, %v1459_v51  ;;  %v29766_v51 = vld [vmem:[#allocation7_spill] sm:$0xff] }
 0x240   : > { %20463 = vmatprep.mubr.msk.bf16.mxu0 %vm24093_vm1, %v29764_v14 }
 0x242   : > { %v1320_v41 = vpop.f32.mrb[164].mxu0 }
 0x243   : > { %v25014_v47 = vadd.f32 %v1320_v41, %v24708_v22  ;;  %v20355_v30 = vpop.f32.mrb[165].mxu0  ;;  %v1468_v41 = vrot.slane %v29767_v15, 1 }
 0x244   : > { %v1323_v24 = vpop.f32.mrb[166].mxu0  ;;  %v29768_v30 = vld [vmem:[#allocation8_spill] sm:$0xff] }
 0x245   : > { %v25018_v43 = vadd.f32 %v1323_v24, %v24710_v36  ;;  %v20356_v11 = vpop.f32.mrb[167].mxu0  ;;  %v1469_v1 = vsel %vm1430_vm4, %v1466_v40, %v1468_v41  ;;  %v29772_v40 = vld [vmem:[#allocation11_spill] sm:$0xff] }
 0x247   : > { %20464 = vmatmul.mubr.msk.bf16.gmra.mrb[16].mxu0 %vm777_vm3, %v1461_v18 }
 0x248   : > { %20467 = vmatprep.mubr.msk.bf16.mxu0 %vm24093_vm1, %v29764_v14 }
 0x24a   : > { %v1328_v62 = vpop.f32.mrb[168].mxu0 }
 0x24b   : > { %v25025_v23 = vadd.f32 %v1328_v62, %v24719_v48  ;;  %v20359_v22 = vpop.f32.mrb[169].mxu0  ;;  %v29769_v62 = vld [vmem:[#allocation9_spill] sm:$0xff] }
 0x24c   : > { %v1331_v13 = vpop.f32.mrb[170].mxu0 }
 0x24d   : > { %v25029_v27 = vadd.f32 %v1331_v13, %v24721_v38  ;;  %v20360_v36 = vpop.f32.mrb[171].mxu0 }
 0x24f   : > { %20468 = vmatmul.mubr.msk.bf16.gmra.mrb[20].mxu0 %vm777_vm3, %v1463_v63  ;;  %v29770_v63 = vld [vmem:[#allocation15_spill] sm:$0xff] }
 0x250   : > { %20471 = vmatprep.mubr.msk.bf16.mxu0 %vm24093_vm1, %v29764_v14  ;;  %v1470_v36 = vrot.slane %v29770_v63, 1  ;;  %v29777_v63 = vld [vmem:[#allocation16_spill] sm:$0xff] }
 0x252   : > { %v1336_v26 = vpop.f32.mrb[172].mxu0 }
 0x253   : > { %v25036_v6 = vadd.f32 %v1336_v26, %v24730_v10  ;;  %v20363_v48 = vpop.f32.mrb[173].mxu0  ;;  %v29771_v26 = vld [vmem:[#allocation10_spill] sm:$0xff] }
 0x254   : > { %v1339_v32 = vpop.f32.mrb[174].mxu0 }
 0x255   : > { %v25040_v21 = vadd.f32 %v1339_v32, %v24732_v17  ;;  %v20364_v38 = vpop.f32.mrb[175].mxu0 }
 0x256   : > { %v1471_v38 = vsel %vm1430_vm4, %v1468_v41, %v1470_v36  ;;  %v29775_v41 = vld [vmem:[#allocation14_spill] sm:$0xff] }
 0x257   : > { %20472 = vmatmul.mubr.msk.bf16.gmra.mrb[24].mxu0 %vm777_vm3, %v1465_v61 }
 0x258   : > { %20475 = vmatprep.mubr.msk.bf16.mxu0 %vm24093_vm1, %v29764_v14 }
 0x25a   : > { %v1344_v58 = vpop.f32.mrb[176].mxu0 }
 0x25b   : > { %v25047_v35 = vadd.f32 %v1344_v58, %v29765_v34  ;;  %v20367_v10 = vpop.f32.mrb[177].mxu0 }
 0x25c   : > { %v1347_v44 = vpop.f32.mrb[178].mxu0  ;;  %v29773_v10 = vld [vmem:[#allocation18_spill] sm:$0xff] }
 0x25d   : > { %v25051_v50 = vadd.f32 %v1347_v44, %v29766_v51  ;;  %v20368_v17 = vpop.f32.mrb[179].mxu0  ;;  %v1472_v44 = vrot.slane %v29773_v10, 1  ;;  %v29774_v51 = vld [vmem:[#allocation13_spill] sm:$0xff] }
 0x25f   : > { %20476 = vmatmul.mubr.msk.bf16.gmra.mrb[28].mxu0 %vm777_vm3, %v1467_v8 }
 0x260   : > { %20479 = vmatprep.mubr.msk.bf16.mxu0 %vm24093_vm1, %v29764_v14 }
 0x262   : > { %v1352_v52 = vpop.f32.mrb[180].mxu0 }
 0x263   : > { %v25058_v24 = vadd.f32 %v1352_v52, %v29768_v30  ;;  %v20371_v18 = vpop.f32.mrb[181].mxu0  ;;  %v1473_v30 = vsel %vm1430_vm4, %v1470_v36, %v1472_v44  ;;  %v29778_v36 = vld [vmem:[#allocation17_spill] sm:$0xff] }
 0x264   : > { %v1355_v11 = vpop.f32.mrb[182].mxu0 }
 0x265   : > { %v25062_v22 = vadd.f32 %v1355_v11, %v29769_v62  ;;  %v20372_v13 = vpop.f32.mrb[183].mxu0 }
 0x267   : > { %20480 = vmatmul.mubr.msk.bf16.gmra.mrb[32].mxu0 %vm777_vm3, %v1469_v1  ;;  %v29776_v1 = vld [vmem:[#allocation21_spill] sm:$0xff] }
 0x268   : > { %20483 = vmatprep.mubr.msk.bf16.mxu0 %vm24093_vm1, %v29764_v14  ;;  %v1474_v62 = vrot.slane %v29776_v1, 1 }
 0x26a   : > { %v1360_v57 = vpop.f32.mrb[184].mxu0 }
 0x26b   : > { %v25069_v48 = vadd.f32 %v1360_v57, %v29771_v26  ;;  %v20375_v32 = vpop.f32.mrb[185].mxu0 }
 0x26c   : > { %v1363_v61 = vpop.f32.mrb[186].mxu0 }
 0x26d   : > { %v25073_v58 = vadd.f32 %v1363_v61, %v29772_v40  ;;  %v20376_v34 = vpop.f32.mrb[187].mxu0  ;;  %v1475_v61 = vsel %vm1430_vm4, %v1472_v44, %v1474_v62  ;;  %v29781_v44 = vld [vmem:[#allocation20_spill] sm:$0xff] }
 0x26e   : > { %v29779_v34 = vld [vmem:[#allocation24_spill] sm:$0xff] }
 0x26f   : > { %20484 = vmatmul.mubr.msk.bf16.gmra.mrb[36].mxu0 %vm777_vm3, %v1471_v38  ;;  %v1476_v10 = vrot.slane %v29779_v34, 1 }
 0x270   : > { %20487 = vmatprep.mubr.msk.bf16.mxu0 %vm24093_vm1, %v29764_v14 }
 0x272   : > { %v1368_v8 = vpop.f32.mrb[188].mxu0 }
 0x273   : > { %v25080_v17 = vadd.f32 %v1368_v8, %v29774_v51  ;;  %v20379_v15 = vpop.f32.mrb[189].mxu0  ;;  %v29780_v51 = vld [vmem:[#allocation19_spill] sm:$0xff] }
 0x274   : > { %v1371_v52 = vpop.f32.mrb[190].mxu0 }
 0x275   : > { %v25084_v18 = vadd.f32 %v1371_v52, %v29775_v41  ;;  %v20380_v11 = vpop.f32.mrb[191].mxu0  ;;  %v1477_v41 = vsel %vm1430_vm4, %v1474_v62, %v1476_v10  ;;  %v29784_v62 = vld [vmem:[#allocation23_spill] sm:$0xff] }
 0x277   : > { %20488 = vmatmul.mubr.msk.bf16.gmra.mrb[40].mxu0 %vm777_vm3, %v1473_v30 }
 0x278   : > { %20491 = vmatprep.mubr.msk.bf16.mxu0 %vm24093_vm1, %v29764_v14 }
 0x27a   : > { %v1376_v13 = vpop.f32.mrb[192].mxu0 }
 0x27b   : > { %v25091_v57 = vadd.f32 %v1376_v13, %v29777_v63  ;;  %v20383_v26 = vpop.f32.mrb[193].mxu0  ;;  %v29782_v13 = vld [vmem:[#allocation27_spill] sm:$0xff] }
 0x27c   : > { %v1379_v32 = vpop.f32.mrb[194].mxu0  ;;  %v1478_v63 = vrot.slane %v29782_v13, 1 }
 0x27d   : > { %v25095_v38 = vadd.f32 %v1379_v32, %v29778_v36  ;;  %v20384_v40 = vpop.f32.mrb[195].mxu0  ;;  %v29783_v32 = vld [vmem:[#allocation22_spill] sm:$0xff] }
 0x27e   : > { %v1479_v34 = vsel %vm1430_vm4, %v1476_v10, %v1478_v63 }
 0x27f   : > { %20492 = vmatmul.mubr.msk.bf16.gmra.mrb[44].mxu0 %vm777_vm3, %v1475_v61 }
 0x280   : > { %20495 = vmatprep.mubr.msk.bf16.mxu0 %vm24093_vm1, %v29764_v14 }
 0x282   : > { %v1384_v8 = vpop.f32.mrb[196].mxu0 }
 0x283   : > { %v25102_v15 = vadd.f32 %v1384_v8, %v29780_v51  ;;  %v20387_v52 = vpop.f32.mrb[197].mxu0 }
 0x284   : > { %v1387_v30 = vpop.f32.mrb[198].mxu0  ;;  %v29786_v52 = vld [vmem:[#allocation30_spill] sm:$0xff] }
 0x285   : > { %v25106_v11 = vadd.f32 %v1387_v30, %v29781_v44  ;;  %v20388_v1 = vpop.f32.mrb[199].mxu0  ;;  %v1480_v30 = vrot.slane %v29786_v52, 1  ;;  %v29787_v44 = vld [vmem:[#allocation25_spill] sm:$0xff]  ;;  %v29791_v52 = vld [vmem:[#allocation28_spill] sm:$0xff] }
 0x287   : > { %20496 = vmatmul.mubr.msk.bf16.gmra.mrb[48].mxu0 %vm777_vm3, %v1477_v41  ;;  %v1481_v10 = vsel %vm1430_vm4, %v1478_v63, %v1480_v30  ;;  %v29793_v63 = vld [vmem:[#allocation29_spill] sm:$0xff] }
 0x288   : > { %20499 = vmatprep.mubr.msk.bf16.mxu0 %vm24093_vm1, %v29764_v14 }
 0x28a   : > { %v1392_v26 = vpop.f32.mrb[200].mxu0 }
 0x28b   : > { %v25113_v61 = vadd.f32 %v1392_v26, %v29783_v32  ;;  %v20391_v36 = vpop.f32.mrb[201].mxu0  ;;  %v29789_v32 = vld [vmem:[#allocation26_spill] sm:$0xff] }
 0x28c   : > { %v1395_v40 = vpop.f32.mrb[202].mxu0 }
 0x28d   : > { %v25117_v8 = vadd.f32 %v1395_v40, %v29784_v62  ;;  %v20392_v51 = vpop.f32.mrb[203].mxu0 }
 0x28f   : > { %29785 = vst [vmem:[#allocation6_spill] sm:$0xff] %v25117_v8  ;;  %20500 = vmatmul.mubr.msk.bf16.gmra.mrb[52].mxu0 %vm777_vm3, %v1479_v34  ;;  %v29790_v34 = vld [vmem:[#allocation33_spill] sm:$0xff] }
 0x290   : > { %20503 = vmatprep.mubr.msk.bf16.mxu0 %vm24093_vm1, %v29764_v14  ;;  %v1482_v62 = vrot.slane %v29790_v34, 1  ;;  %v29794_v34 = vld [vmem:[#allocation31_spill] sm:$0xff] }
 0x292   : > { %v1400_v41 = vpop.f32.mrb[204].mxu0 }
 0x293   : > { %v25124_v1 = vadd.f32 %v1400_v41, %v29787_v44  ;;  %v20395_v13 = vpop.f32.mrb[205].mxu0 }
 0x294   : > { %v1403_v26 = vpop.f32.mrb[206].mxu0 }
 0x295   : > { %29788 = vst [vmem:[#allocation7_spill] sm:$0xff] %v25124_v1  ;;  %v25128_v36 = vadd.f32 %v1403_v26, %v29789_v32  ;;  %v20396_v40 = vpop.f32.mrb[207].mxu0  ;;  %v1483_v1 = vsel %vm1430_vm4, %v1480_v30, %v1482_v62 }
 0x297   : > { %20504 = vmatmul.mubr.msk.bf16.gmra.mrb[56].mxu0 %vm777_vm3, %v1481_v10  ;;  %v23871_v10 = vld [vmem:[%s24214_s25 + $0xd8] ss:$0 sps:$4 sm:$0x11]  }
 0x298   : > { %20507 = vmatprep.mubr.msk.bf16.mxu0 %vm24093_vm1, %v29764_v14  ;;  %v1484_v32 = vrot.slane %v23871_v10, 1 }
 0x29a   : > { %v1408_v51 = vpop.f32.mrb[208].mxu0  ;;  %v1485_v30 = vsel %vm1430_vm4, %v1482_v62, %v1484_v32  ;;  %v23273_v62 = vld [vmem:[%s24214_s25 + $0xc] sm:$0xff]  }
 0x29b   : > { %v25135_v41 = vadd.f32 %v1408_v51, %v29791_v52  ;;  %v20399_v44 = vpop.f32.mrb[209].mxu0 }
 0x29c   : > { %v1411_v13 = vpop.f32.mrb[210].mxu0 }
 0x29d   : > { %29792 = vst [vmem:[#allocation12_spill] sm:$0xff] %v25135_v41  ;;  %v25139_v8 = vadd.f32 %v1411_v13, %v29793_v63  ;;  %v20400_v26 = vpop.f32.mrb[211].mxu0  ;;  %v29795_v41 = vld [vmem:[#allocation32_spill] sm:$0xff] }
 0x29f   : > { %20508 = vmatmul.mubr.msk.bf16.gmra.mrb[60].mxu0 %vm777_vm3, %v1483_v1  ;;  %v23274_v1 = vld [vmem:[%s29591_s2 + $0x20] sm:$0x1f]  }
 0x2a0   : > { %20511 = vmatprep.mubr.msk.bf16.mxu0 %vm24093_vm1, %v29764_v14 }
 0x2a2   : > { %v1416_v40 = vpop.f32.mrb[212].mxu0 }
 0x2a3   : > { %v25146_v51 = vadd.f32 %v1416_v40, %v29794_v34  ;;  %v20403_v52 = vpop.f32.mrb[213].mxu0 }
 0x2a4   : > { %v1419_v44 = vpop.f32.mrb[214].mxu0  ;;  %v2965_v52 = vsel %vm859_vm0, %v23274_v1, 0 }
 0x2a5   : > { %v25150_v13 = vadd.f32 %v1419_v44, %v29795_v41  ;;  %v20404_v63 = vpop.f32.mrb[215].mxu0 }
 0x2a6   : > { %v23275_v63 = vld [vmem:[%s24214_s25 + $0x14] sm:$0xff]  }
 0x2a7   : > { %20512 = vmatmul.mubr.msk.bf16.gmra.mrb[64].mxu0 %vm777_vm3, %v1485_v30 }
 0x2a8   : > { %20517 = vmatprep.mubr.msk.bf16.mxu0 %vm24093_vm1, %v29764_v14 }
 0x2aa   : > { %v1609_v26 = vpop.f32.mrb[216].mxu0 }
 0x2ab   : > { %v25159_v10 = vadd.f32 %v1609_v26, %v24858_v42  ;;  %v20409_v40 = vpop.f32.mrb[217].mxu0 }
 0x2ac   : > { %v1612_v32 = vpop.f32.mrb[218].mxu0 }
 0x2ad   : > { %v25163_v41 = vadd.f32 %v1612_v32, %v24862_v29  ;;  %v20410_v34 = vpop.f32.mrb[219].mxu0 }
 0x2af   : > { %20518 = vmatmul.mubr.msk.bf16.vlgmr.msra.gmra.mrb[68].mxu0 %vm777_vm3, %v23273_v62 }
 0x2b0   : > { %20626 = vmatpush3.bf16.msra.mxu0 %v2965_v52  ;;  %20521 = vmatprep.mubr.msk.bf16.mxu0 %vm24093_vm1, %v29764_v14 }
 0x2b1   : > { %20735 = vmatprep.subr.bf16.mxu0 %v29764_v14 }
 0x2b2   : > { %v1617_v42 = vpop.f32.mrb[220].mxu0 }
 0x2b3   : > { %v25171_v44 = vadd.f32 %v1617_v42, %v24871_v45  ;;  %v20413_v30 = vpop.f32.mrb[221].mxu0  ;;  %v23276_v45 = vld [vmem:[%s24214_s25 + $0x1c] sm:$0xff]  }
 0x2b4   : > { %v1620_v29 = vpop.f32.mrb[222].mxu0 }
 0x2b5   : > { %v25175_v26 = vadd.f32 %v1620_v29, %v24875_v16  ;;  %v20414_v1 = vpop.f32.mrb[223].mxu0 }
 0x2b7   : > { %20522 = vmatmul.mubr.msk.bf16.gmra.mrb[72].mxu0 %vm777_vm3, %v23275_v63 }
 0x2b8   : > { %20525 = vmatprep.mubr.msk.bf16.mxu0 %vm24093_vm1, %v29764_v14 }
 0x2ba   : > { %v1625_v40 = vpop.f32.mrb[224].mxu0 }
 0x2bb   : > { %v25181_v62 = vadd.f32 %v1625_v40, %v24882_v60  ;;  %v20417_v32 = vpop.f32.mrb[225].mxu0  ;;  %v23277_v60 = vld [vmem:[%s24214_s25 + $0x24] sm:$0xff]  }
 0x2bc   : > { %v1628_v34 = vpop.f32.mrb[226].mxu0 }
 0x2bd   : > { %v25185_v52 = vadd.f32 %v1628_v34, %v24886_v25  ;;  %v20418_v16 = vpop.f32.mrb[227].mxu0 }
 0x2bf   : > { %20526 = vmatmul.mubr.msk.bf16.gmra.mrb[76].mxu0 %vm777_vm3, %v23276_v45 }
 0x2c0   : > { %20529 = vmatprep.mubr.msk.bf16.mxu0 %vm24093_vm1, %v29764_v14 }
 0x2c2   : > { %v1633_v42 = vpop.f32.mrb[228].mxu0 }
 0x2c3   : > { %v25191_v30 = vadd.f32 %v1633_v42, %v24893_v4  ;;  %v20421_v63 = vpop.f32.mrb[229].mxu0  ;;  %v23278_v4 = vld [vmem:[%s24214_s25 + $0x2c] sm:$0xff]  }
 0x2c4   : > { %v1636_v29 = vpop.f32.mrb[230].mxu0 }
 0x2c5   : > { %v25195_v1 = vadd.f32 %v1636_v29, %v24897_v12  ;;  %v20422_v25 = vpop.f32.mrb[231].mxu0 }
 0x2c7   : > { %20530 = vmatmul.mubr.msk.bf16.gmra.mrb[80].mxu0 %vm777_vm3, %v23277_v60 }
 0x2c8   : > { %20533 = vmatprep.mubr.msk.bf16.mxu0 %vm24093_vm1, %v29764_v14 }
 0x2ca   : > { %v1641_v40 = vpop.f32.mrb[232].mxu0 }
 0x2cb   : > { %v25201_v32 = vadd.f32 %v1641_v40, %v24904_v54  ;;  %v20425_v45 = vpop.f32.mrb[233].mxu0  ;;  %v23279_v54 = vld [vmem:[%s24214_s25 + $0x34] sm:$0xff]  }
 0x2cc   : > { %v1644_v34 = vpop.f32.mrb[234].mxu0 }
 0x2cd   : > { %v25205_v16 = vadd.f32 %v1644_v34, %v24908_v56  ;;  %v20426_v12 = vpop.f32.mrb[235].mxu0 }
 0x2cf   : > { %20534 = vmatmul.mubr.msk.bf16.gmra.mrb[84].mxu0 %vm777_vm3, %v23278_v4 }
 0x2d0   : > { %20537 = vmatprep.mubr.msk.bf16.mxu0 %vm24093_vm1, %v29764_v14 }
 0x2d2   : > { %v1649_v42 = vpop.f32.mrb[236].mxu0 }
 0x2d3   : > { %v25211_v63 = vadd.f32 %v1649_v42, %v24915_v28  ;;  %v20429_v60 = vpop.f32.mrb[237].mxu0  ;;  %v23280_v28 = vld [vmem:[%s24214_s25 + $0x3c] sm:$0xff]  }
 0x2d4   : > { %v1652_v29 = vpop.f32.mrb[238].mxu0 }
 0x2d5   : > { %v25215_v25 = vadd.f32 %v1652_v29, %v24919_v37  ;;  %v20430_v56 = vpop.f32.mrb[239].mxu0 }
 0x2d7   : > { %20538 = vmatmul.mubr.msk.bf16.gmra.mrb[88].mxu0 %vm777_vm3, %v23279_v54 }
 0x2d8   : > { %20541 = vmatprep.mubr.msk.bf16.mxu0 %vm24093_vm1, %v29764_v14 }
 0x2da   : > { %v1657_v40 = vpop.f32.mrb[240].mxu0 }
 0x2db   : > { %v25221_v45 = vadd.f32 %v1657_v40, %v24926_v19  ;;  %v20433_v4 = vpop.f32.mrb[241].mxu0  ;;  %v23281_v19 = vld [vmem:[%s24214_s25 + $0x44] sm:$0xff]  }
 0x2dc   : > { %v1660_v34 = vpop.f32.mrb[242].mxu0 }
 0x2dd   : > { %v25225_v12 = vadd.f32 %v1660_v34, %v24930_v55  ;;  %v20434_v37 = vpop.f32.mrb[243].mxu0 }
 0x2df   : > { %20542 = vmatmul.mubr.msk.bf16.gmra.mrb[92].mxu0 %vm777_vm3, %v23280_v28 }
 0x2e0   : > { %20545 = vmatprep.mubr.msk.bf16.mxu0 %vm24093_vm1, %v29764_v14 }
 0x2e2   : > { %v1665_v42 = vpop.f32.mrb[244].mxu0 }
 0x2e3   : > { %v25231_v60 = vadd.f32 %v1665_v42, %v24937_v53  ;;  %v20437_v54 = vpop.f32.mrb[245].mxu0  ;;  %v23282_v53 = vld [vmem:[%s24214_s25 + $0x4c] sm:$0xff]  }
 0x2e4   : > { %v1668_v29 = vpop.f32.mrb[246].mxu0 }
 0x2e5   : > { %v25235_v56 = vadd.f32 %v1668_v29, %v24941_v9  ;;  %v20438_v55 = vpop.f32.mrb[247].mxu0 }
 0x2e7   : > { %20546 = vmatmul.mubr.msk.bf16.gmra.mrb[96].mxu0 %vm777_vm3, %v23281_v19 }
 0x2e8   : > { %20549 = vmatprep.mubr.msk.bf16.mxu0 %vm24093_vm1, %v29764_v14 }
 0x2ea   : > { %v1673_v40 = vpop.f32.mrb[248].mxu0 }
 0x2eb   : > { %v25241_v4 = vadd.f32 %v1673_v40, %v24948_v5  ;;  %v20441_v28 = vpop.f32.mrb[249].mxu0  ;;  %v23283_v5 = vld [vmem:[%s24214_s25 + $0x54] sm:$0xff]  }
 0x2ec   : > { %v1676_v34 = vpop.f32.mrb[250].mxu0 }
 0x2ed   : > { %v25245_v37 = vadd.f32 %v1676_v34, %v24952_v20  ;;  %v20442_v9 = vpop.f32.mrb[251].mxu0 }
 0x2ef   : > { %20550 = vmatmul.mubr.msk.bf16.gmra.mrb[100].mxu0 %vm777_vm3, %v23282_v53 }
 0x2f0   : > { %20553 = vmatprep.mubr.msk.bf16.mxu0 %vm24093_vm1, %v29764_v14 }
 0x2f2   : > { %v1681_v42 = vpop.f32.mrb[252].mxu0 }
 0x2f3   : > { %v25251_v54 = vadd.f32 %v1681_v42, %v24959_v39  ;;  %v20445_v19 = vpop.f32.mrb[253].mxu0  ;;  %v23284_v39 = vld [vmem:[%s24214_s25 + $0x5c] sm:$0xff]  }
 0x2f4   : > { %v1684_v29 = vpop.f32.mrb[254].mxu0 }
 0x2f5   : > { %v25255_v55 = vadd.f32 %v1684_v29, %v24963_v46  ;;  %v20446_v20 = vpop.f32.mrb[255].mxu0 }
 0x2f7   : > { %20554 = vmatmul.mubr.msk.bf16.gmra.mrb[104].mxu0 %vm777_vm3, %v23283_v5 }
 0x2f8   : > { %20557 = vmatprep.mubr.msk.bf16.mxu0 %vm24093_vm1, %v29764_v14 }
 0x2fa   : > { %v1689_v40 = vpop.f32.mrb[0].mxu0 }
 0x2fb   : > { %v25261_v28 = vadd.f32 %v1689_v40, %v24970_v7  ;;  %v20449_v53 = vpop.f32.mrb[1].mxu0  ;;  %v23285_v7 = vld [vmem:[%s24214_s25 + $0x64] sm:$0xff]  }
 0x2fc   : > { %v1692_v34 = vpop.f32.mrb[2].mxu0 }
 0x2fd   : > { %v25265_v9 = vadd.f32 %v1692_v34, %v24974_v49  ;;  %v20450_v46 = vpop.f32.mrb[3].mxu0 }
 0x2ff   : > { %20558 = vmatmul.mubr.msk.bf16.gmra.mrb[108].mxu0 %vm777_vm3, %v23284_v39 }
 0x300   : > { %20561 = vmatprep.mubr.msk.bf16.mxu0 %vm24093_vm1, %v29764_v14 }
 0x302   : > { %v1697_v42 = vpop.f32.mrb[4].mxu0 }
 0x303   : > { %v25271_v19 = vadd.f32 %v1697_v42, %v24981_v33  ;;  %v20453_v5 = vpop.f32.mrb[5].mxu0  ;;  %v23286_v33 = vld [vmem:[%s24214_s25 + $0x6c] sm:$0xff]  }
 0x304   : > { %v1700_v29 = vpop.f32.mrb[6].mxu0 }
 0x305   : > { %v25275_v20 = vadd.f32 %v1700_v29, %v24985_v0  ;;  %v20454_v49 = vpop.f32.mrb[7].mxu0 }
 0x307   : > { %20562 = vmatmul.mubr.msk.bf16.gmra.mrb[112].mxu0 %vm777_vm3, %v23285_v7 }
 0x308   : > { %20565 = vmatprep.mubr.msk.bf16.mxu0 %vm24093_vm1, %v29764_v14 }
 0x30a   : > { %v1705_v40 = vpop.f32.mrb[8].mxu0 }
 0x30b   : > { %v25281_v53 = vadd.f32 %v1705_v40, %v24992_v2  ;;  %v20457_v39 = vpop.f32.mrb[9].mxu0  ;;  %v23287_v2 = vld [vmem:[%s24214_s25 + $0x74] sm:$0xff]  }
 0x30c   : > { %v1708_v34 = vpop.f32.mrb[10].mxu0 }
 0x30d   : > { %v25285_v46 = vadd.f32 %v1708_v34, %v24996_v3  ;;  %v20458_v0 = vpop.f32.mrb[11].mxu0 }
 0x30f   : > { %20566 = vmatmul.mubr.msk.bf16.gmra.mrb[116].mxu0 %vm777_vm3, %v23286_v33 }
 0x310   : > { %20569 = vmatprep.mubr.msk.bf16.mxu0 %vm24093_vm1, %v29764_v14 }
 0x312   : > { %v1713_v42 = vpop.f32.mrb[12].mxu0 }
 0x313   : > { %v25291_v5 = vadd.f32 %v1713_v42, %v25003_v59  ;;  %v20461_v7 = vpop.f32.mrb[13].mxu0  ;;  %v23288_v59 = vld [vmem:[%s24214_s25 + $0x7c] sm:$0xff]  }
 0x314   : > { %v1716_v29 = vpop.f32.mrb[14].mxu0 }
 0x315   : > { %v25295_v49 = vadd.f32 %v1716_v29, %v25007_v31  ;;  %v20462_v3 = vpop.f32.mrb[15].mxu0 }
 0x317   : > { %20570 = vmatmul.mubr.msk.bf16.gmra.mrb[120].mxu0 %vm777_vm3, %v23287_v2 }
 0x318   : > { %20573 = vmatprep.mubr.msk.bf16.mxu0 %vm24093_vm1, %v29764_v14 }
 0x31a   : > { %v1721_v40 = vpop.f32.mrb[16].mxu0 }
 0x31b   : > { %v25301_v39 = vadd.f32 %v1721_v40, %v25014_v47  ;;  %v20465_v33 = vpop.f32.mrb[17].mxu0  ;;  %v23289_v47 = vld [vmem:[%s24214_s25 + $0x84] sm:$0xff]  }
 0x31c   : > { %v1724_v34 = vpop.f32.mrb[18].mxu0 }
 0x31d   : > { %v25305_v0 = vadd.f32 %v1724_v34, %v25018_v43  ;;  %v20466_v31 = vpop.f32.mrb[19].mxu0 }
 0x31f   : > { %20574 = vmatmul.mubr.msk.bf16.gmra.mrb[124].mxu0 %vm777_vm3, %v23288_v59 }
 0x320   : > { %20577 = vmatprep.mubr.msk.bf16.mxu0 %vm24093_vm1, %v29764_v14 }
 0x322   : > { %v1729_v42 = vpop.f32.mrb[20].mxu0 }
 0x323   : > { %v25311_v7 = vadd.f32 %v1729_v42, %v25025_v23  ;;  %v20469_v2 = vpop.f32.mrb[21].mxu0  ;;  %v23290_v23 = vld [vmem:[%s24214_s25 + $0x8c] sm:$0xff]  }
 0x324   : > { %v1732_v29 = vpop.f32.mrb[22].mxu0 }
 0x325   : > { %v25315_v3 = vadd.f32 %v1732_v29, %v25029_v27  ;;  %v20470_v43 = vpop.f32.mrb[23].mxu0 }
 0x327   : > { %20578 = vmatmul.mubr.msk.bf16.gmra.mrb[128].mxu0 %vm777_vm3, %v23289_v47 }
 0x328   : > { %20581 = vmatprep.mubr.msk.bf16.mxu0 %vm24093_vm1, %v29764_v14 }
 0x32a   : > { %v1737_v40 = vpop.f32.mrb[24].mxu0 }
 0x32b   : > { %v25321_v33 = vadd.f32 %v1737_v40, %v25036_v6  ;;  %v20473_v59 = vpop.f32.mrb[25].mxu0  ;;  %v23291_v6 = vld [vmem:[%s24214_s25 + $0x94] sm:$0xff]  }
 0x32c   : > { %v1740_v34 = vpop.f32.mrb[26].mxu0 }
 0x32d   : > { %v25325_v31 = vadd.f32 %v1740_v34, %v25040_v21  ;;  %v20474_v27 = vpop.f32.mrb[27].mxu0 }
 0x32f   : > { %20582 = vmatmul.mubr.msk.bf16.gmra.mrb[132].mxu0 %vm777_vm3, %v23290_v23 }
 0x330   : > { %20585 = vmatprep.mubr.msk.bf16.mxu0 %vm24093_vm1, %v29764_v14 }
 0x332   : > { %v1745_v42 = vpop.f32.mrb[28].mxu0 }
 0x333   : > { %v25331_v2 = vadd.f32 %v1745_v42, %v25047_v35  ;;  %v20477_v47 = vpop.f32.mrb[29].mxu0  ;;  %v23292_v35 = vld [vmem:[%s24214_s25 + $0x9c] sm:$0xff]  }
 0x334   : > { %v1748_v29 = vpop.f32.mrb[30].mxu0 }
 0x335   : > { %v25335_v43 = vadd.f32 %v1748_v29, %v25051_v50  ;;  %v20478_v21 = vpop.f32.mrb[31].mxu0 }
 0x337   : > { %20586 = vmatmul.mubr.msk.bf16.gmra.mrb[136].mxu0 %vm777_vm3, %v23291_v6 }
 0x338   : > { %20589 = vmatprep.mubr.msk.bf16.mxu0 %vm24093_vm1, %v29764_v14 }
 0x33a   : > { %v1753_v40 = vpop.f32.mrb[32].mxu0 }
 0x33b   : > { %v25341_v59 = vadd.f32 %v1753_v40, %v25058_v24  ;;  %v20481_v23 = vpop.f32.mrb[33].mxu0  ;;  %v23293_v24 = vld [vmem:[%s24214_s25 + $0xa4] sm:$0xff]  }
 0x33c   : > { %v1756_v34 = vpop.f32.mrb[34].mxu0 }
 0x33d   : > { %v25345_v27 = vadd.f32 %v1756_v34, %v25062_v22  ;;  %v20482_v50 = vpop.f32.mrb[35].mxu0 }
 0x33f   : > { %20590 = vmatmul.mubr.msk.bf16.gmra.mrb[140].mxu0 %vm777_vm3, %v23292_v35 }
 0x340   : > { %20593 = vmatprep.mubr.msk.bf16.mxu0 %vm24093_vm1, %v29764_v14 }
 0x342   : > { %v1761_v42 = vpop.f32.mrb[36].mxu0 }
 0x343   : > { %v25351_v47 = vadd.f32 %v1761_v42, %v25069_v48  ;;  %v20485_v6 = vpop.f32.mrb[37].mxu0  ;;  %v23294_v48 = vld [vmem:[%s24214_s25 + $0xac] sm:$0xff]  }
 0x344   : > { %v1764_v29 = vpop.f32.mrb[38].mxu0 }
 0x345   : > { %v25355_v21 = vadd.f32 %v1764_v29, %v25073_v58  ;;  %v20486_v22 = vpop.f32.mrb[39].mxu0 }
 0x347   : > { %20594 = vmatmul.mubr.msk.bf16.gmra.mrb[144].mxu0 %vm777_vm3, %v23293_v24 }
 0x348   : > { %20597 = vmatprep.mubr.msk.bf16.mxu0 %vm24093_vm1, %v29764_v14 }
 0x34a   : > { %v1769_v40 = vpop.f32.mrb[40].mxu0 }
 0x34b   : > { %v25361_v23 = vadd.f32 %v1769_v40, %v25080_v17  ;;  %v20489_v35 = vpop.f32.mrb[41].mxu0  ;;  %v23295_v17 = vld [vmem:[%s24214_s25 + $0xb4] sm:$0xff]  }
 0x34c   : > { %v1772_v34 = vpop.f32.mrb[42].mxu0 }
 0x34d   : > { %v25365_v50 = vadd.f32 %v1772_v34, %v25084_v18  ;;  %v20490_v58 = vpop.f32.mrb[43].mxu0 }
 0x34f   : > { %20598 = vmatmul.mubr.msk.bf16.gmra.mrb[148].mxu0 %vm777_vm3, %v23294_v48 }
 0x350   : > { %20601 = vmatprep.mubr.msk.bf16.mxu0 %vm24093_vm1, %v29764_v14 }
 0x352   : > { %v1777_v42 = vpop.f32.mrb[44].mxu0 }
 0x353   : > { %v25371_v6 = vadd.f32 %v1777_v42, %v25091_v57  ;;  %v20493_v24 = vpop.f32.mrb[45].mxu0  ;;  %v23296_v57 = vld [vmem:[%s24214_s25 + $0xbc] sm:$0xff]  }
 0x354   : > { %v1780_v29 = vpop.f32.mrb[46].mxu0 }
 0x355   : > { %v25375_v22 = vadd.f32 %v1780_v29, %v25095_v38  ;;  %v20494_v18 = vpop.f32.mrb[47].mxu0 }
 0x356   : > { %v29797_v18 = vld [vmem:[#allocation6_spill] sm:$0xff] }
 0x357   : > { %20602 = vmatmul.mubr.msk.bf16.gmra.mrb[152].mxu0 %vm777_vm3, %v23295_v17 }
 0x358   : > { %20605 = vmatprep.mubr.msk.bf16.mxu0 %vm24093_vm1, %v29764_v14 }
 0x35a   : > { %v1785_v40 = vpop.f32.mrb[48].mxu0 }
 0x35b   : > { %v25381_v35 = vadd.f32 %v1785_v40, %v25102_v15  ;;  %v20497_v48 = vpop.f32.mrb[49].mxu0  ;;  %v23297_v15 = vld [vmem:[%s24214_s25 + $0xc4] sm:$0xff]  }
 0x35c   : > { %v1788_v34 = vpop.f32.mrb[50].mxu0 }
 0x35d   : > { %v25385_v58 = vadd.f32 %v1788_v34, %v25106_v11  ;;  %v20498_v38 = vpop.f32.mrb[51].mxu0 }
 0x35e   : > { %v23298_v38 = vld [vmem:[%s24214_s25 + $0xcc] sm:$0xff]  }
 0x35f   : > { %20606 = vmatmul.mubr.msk.bf16.gmra.mrb[156].mxu0 %vm777_vm3, %v23296_v57  ;;  %v29799_v57 = vld [vmem:[#allocation7_spill] sm:$0xff] }
 0x360   : > { %20609 = vmatprep.mubr.msk.bf16.mxu0 %vm24093_vm1, %v29764_v14 }
 0x362   : > { %v1793_v42 = vpop.f32.mrb[52].mxu0 }
 0x363   : > { %v25391_v24 = vadd.f32 %v1793_v42, %v25113_v61  ;;  %v20501_v17 = vpop.f32.mrb[53].mxu0 }
 0x364   : > { %v1796_v29 = vpop.f32.mrb[54].mxu0 }
 0x365   : > { %29796 = vst [vmem:[#allocation8_spill] sm:$0xff] %v25391_v24  ;;  %v25395_v40 = vadd.f32 %v1796_v29, %v29797_v18  ;;  %v20502_v11 = vpop.f32.mrb[55].mxu0  ;;  %v25412_v18 = vld [vmem:[%s24214_s25 + $0x10] sm:$0xf] }
 0x366   : > { %29802 = vst [vmem:[#allocation11_spill] sm:$0xff] %v25412_v18 }
 0x367   : > { %29798 = vst [vmem:[#allocation9_spill] sm:$0xff] %v25395_v40  ;;  %20610 = vmatmul.mubr.msk.bf16.gmra.mrb[160].mxu0 %vm777_vm3, %v23297_v15  ;;  %v2462_v15 = vld [vmem:[%s24214_s25 + $0xc] sm:$0xf] }
 0x368   : > { %20613 = vmatprep.mubr.msk.bf16.mxu0 %vm24093_vm1, %v29764_v14 }
 0x36a   : > { %v1801_v48 = vpop.f32.mrb[56].mxu0 }
 0x36b   : > { %v25401_v34 = vadd.f32 %v1801_v48, %v29799_v57  ;;  %v20505_v61 = vpop.f32.mrb[57].mxu0  ;;  %v29803_v48 = vld [vmem:[#allocation12_spill] sm:$0xff] }
 0x36c   : > { %v1804_v42 = vpop.f32.mrb[58].mxu0 }
 0x36d   : > { %29800 = vst [vmem:[#allocation15_spill] sm:$0xff] %v25401_v34  ;;  %v25405_v17 = vadd.f32 %v1804_v42, %v25128_v36  ;;  %v20506_v29 = vpop.f32.mrb[59].mxu0  ;;  %v23299_v34 = vld [vmem:[%s24214_s25 + $0xd4] sm:$0xff]   ;;  %v17810_v36 = vcombine.low %v2462_v15, %v25412_v18 }
 0x36e   : > { %v25426_v29 = vld [vmem:[%s24214_s25 + $0x14] sm:$0xff]  }
 0x36f   : > { %29801 = vst [vmem:[#allocation10_spill] sm:$0xff] %v25405_v17  ;;  %20614 = vmatmul.mubr.msk.bf16.gmra.mrb[164].mxu0 %vm777_vm3, %v23298_v38  ;;  %v2661_v17 = vshll.u32 %v17810_v36, 16  ;;  %v2659_v18 = vshrl.u32 %v17810_v36, 16  ;;  %v23303_v36 = vld [vmem:[%s29591_s2 + $0x28] sm:$0x1f]  }
 0x370   : > { %20617 = vmatprep.mubr.msk.bf16.mxu0 %vm24093_vm1, %v29764_v14 }
 0x372   : > { %v1809_v11 = vpop.f32.mrb[60].mxu0 }
 0x373   : > { %v25415_v57 = vadd.f32 %v1809_v11, %v29803_v48  ;;  %v20509_v61 = vpop.f32.mrb[61].mxu0 }
 0x374   : > { %v1812_v40 = vpop.f32.mrb[62].mxu0 }
 0x375   : > { %29804 = vst [vmem:[#allocation18_spill] sm:$0xff] %v25415_v57  ;;  %v25420_v42 = vadd.f32 %v1812_v40, %v25139_v8  ;;  %v20510_v38 = vpop.f32.mrb[63].mxu0  ;;  %v23300_v57 = vld [vmem:[%s24214_s25 + $0xdc] sm:$0xff]   ;;  %v2663_v8 = vrot.slane %v2661_v17, 1  ;;  %v2666_v40 = vshll.u32 %v25426_v29, 16 }
 0x377   : > { %29805 = vst [vmem:[#allocation13_spill] sm:$0xff] %v25420_v42  ;;  %20618 = vmatmul.mubr.msk.bf16.gmra.mrb[168].mxu0 %vm777_vm3, %v23299_v34  ;;  %v2664_v42 = vor.u32 %v2663_v8, %v2659_v18  ;;  %v2668_v24 = vrot.slane %v2666_v40, 1 }
 0x378   : > { %20621 = vmatprep.mubr.msk.bf16.mxu0 %vm24093_vm1, %v29764_v14 }
 0x37a   : > { %v1817_v11 = vpop.f32.mrb[64].mxu0 }
 0x37b   : > { %v25429_v48 = vadd.f32 %v1817_v11, %v25146_v51  ;;  %v20513_v61 = vpop.f32.mrb[65].mxu0  ;;  %v25440_v51 = vld [vmem:[%s24214_s25 + $0x1c] sm:$0xff]  }
 0x37c   : > { %v1820_v15 = vpop.f32.mrb[66].mxu0  ;;  %29806 = vst [vmem:[#allocation14_spill] sm:$0xff] %v25440_v51  ;;  %v2674_v18 = vshll.u32 %v25440_v51, 16 }
 0x37d   : > { %v25434_v34 = vadd.f32 %v1820_v15, %v25150_v13  ;;  %v20514_v38 = vpop.f32.mrb[67].mxu0  ;;  %v2670_v15 = vshrl.u32 %v25426_v29, 16 }
 0x37e   : > { %v3419_v38 = vsel %vm859_vm0, %v23303_v36, 0 }
 0x37f   : > { %20622 = vmatmul.mubr.msk.bf16.gmra.mrb[172].mxu0 %vm777_vm3, %v23300_v57  ;;  %v2669_v57 = vsel %vm551_vm2, %v2664_v42, %v2668_v24  ;;  %v25459_v42 = vld [vmem:[%s24214_s25 + $0x24] sm:$0xff]  }
 0x380   : > { %20627 = vmatprep.mubr.msk.bf16.mxu0 %vm24093_vm1, %v29764_v14 }
 0x382   : > { %v2193_v17 = vpop.f32.mrb[68].mxu0 }
 0x383   : > { %v25446_v11 = vadd.f32 %v2193_v17, %v25159_v10  ;;  %v20519_v13 = vpop.f32.mrb[69].mxu0  ;;  %v2672_v10 = vor.u32 %v2670_v15, %v2668_v24  ;;  %v2676_v17 = vrot.slane %v2674_v18, 1 }
 0x384   : > { %v2196_v61 = vpop.f32.mrb[70].mxu0 }
 0x385   : > { %v25452_v8 = vadd.f32 %v2196_v61, %v25163_v41  ;;  %v20520_v40 = vpop.f32.mrb[71].mxu0  ;;  %v2677_v36 = vsel %vm551_vm2, %v2672_v10, %v2676_v17 }
 0x387   : > { %20628 = vmatmul.mubr.msk.bf16.vlgmr.msra.gmra.mrb[176].mxu0 %vm777_vm3, %v2669_v57  ;;  %v2678_v57 = vshrl.u32 %v25440_v51, 16 }
 0x388   : > { %20736 = vmatpush3.bf16.msra.mxu0 %v3419_v38  ;;  %20631 = vmatprep.mubr.msk.bf16.mxu0 %vm24093_vm1, %v29764_v14  ;;  %v2682_v38 = vshll.u32 %v25459_v42, 16 }
 0x389   : > { %20845 = vmatprep.subr.bf16.mxu0 %v29764_v14  ;;  %v2680_v18 = vor.u32 %v2678_v57, %v2676_v17 }
 0x38a   : > { %v2201_v13 = vpop.f32.mrb[72].mxu0 }
 0x38b   : > { %v25463_v41 = vadd.f32 %v2201_v13, %v25171_v44  ;;  %v20523_v61 = vpop.f32.mrb[73].mxu0  ;;  %v2684_v44 = vrot.slane %v2682_v38, 1  ;;  %v25475_v13 = vld [vmem:[%s24214_s25 + $0x2c] sm:$0xff]  }
 0x38c   : > { %v2204_v40 = vpop.f32.mrb[74].mxu0 }
 0x38d   : > { %29807 = vst [vmem:[#allocation21_spill] sm:$0xff] %v25463_v41  ;;  %v25469_v24 = vadd.f32 %v2204_v40, %v25175_v26  ;;  %v20524_v15 = vpop.f32.mrb[75].mxu0  ;;  %v2685_v26 = vsel %vm551_vm2, %v2680_v18, %v2684_v44  ;;  %v2686_v40 = vshrl.u32 %v25459_v42, 16 }
 0x38f   : > { %20632 = vmatmul.mubr.msk.bf16.gmra.mrb[180].mxu0 %vm777_vm3, %v2677_v36  ;;  %v2690_v36 = vshll.u32 %v25475_v13, 16  ;;  %v2688_v57 = vor.u32 %v2686_v40, %v2684_v44 }
 0x390   : > { %20635 = vmatprep.mubr.msk.bf16.mxu0 %vm24093_vm1, %v29764_v14 }
 0x392   : > { %v2209_v61 = vpop.f32.mrb[76].mxu0 }
 0x393   : > { %v25478_v10 = vadd.f32 %v2209_v61, %v25181_v62  ;;  %v20527_v41 = vpop.f32.mrb[77].mxu0  ;;  %v2692_v62 = vrot.slane %v2690_v36, 1  ;;  %v25505_v36 = vld [vmem:[%s24214_s25 + $0x3c] sm:$0xff]  }
 0x394   : > { %v2212_v51 = vpop.f32.mrb[78].mxu0  ;;  %v25490_v41 = vld [vmem:[%s24214_s25 + $0x34] sm:$0xff]  }
 0x395   : > { %29808 = vst [vmem:[#allocation16_spill] sm:$0xff] %v25478_v10  ;;  %v25484_v15 = vadd.f32 %v2212_v51, %v25185_v52  ;;  %v20528_v17 = vpop.f32.mrb[79].mxu0  ;;  %v2693_v52 = vsel %vm551_vm2, %v2688_v57, %v2692_v62  ;;  %v2694_v51 = vshrl.u32 %v25475_v13, 16 }
 0x397   : > { %20636 = vmatmul.mubr.msk.bf16.gmra.mrb[184].mxu0 %vm777_vm3, %v2685_v26  ;;  %v2698_v26 = vshll.u32 %v25490_v41, 16  ;;  %v2696_v40 = vor.u32 %v2694_v51, %v2692_v62 }
 0x398   : > { %20639 = vmatprep.mubr.msk.bf16.mxu0 %vm24093_vm1, %v29764_v14 }
 0x39a   : > { %v2217_v38 = vpop.f32.mrb[80].mxu0 }
 0x39b   : > { %v25493_v18 = vadd.f32 %v2217_v38, %v25191_v30  ;;  %v20531_v61 = vpop.f32.mrb[81].mxu0  ;;  %v2700_v30 = vrot.slane %v2698_v26, 1  ;;  %v25520_v26 = vld [vmem:[%s24214_s25 + $0x44] sm:$0xff]  }
 0x39c   : > { %v2220_v10 = vpop.f32.mrb[82].mxu0 }
 0x39d   : > { %29809 = vst [vmem:[#allocation17_spill] sm:$0xff] %v25493_v18  ;;  %v25499_v17 = vadd.f32 %v2220_v10, %v25195_v1  ;;  %v20532_v44 = vpop.f32.mrb[83].mxu0  ;;  %v2701_v1 = vsel %vm551_vm2, %v2696_v40, %v2700_v30  ;;  %v2702_v10 = vshrl.u32 %v25490_v41, 16 }
 0x39f   : > { %20640 = vmatmul.mubr.msk.bf16.gmra.mrb[188].mxu0 %vm777_vm3, %v2693_v52  ;;  %v2706_v52 = vshll.u32 %v25505_v36, 16  ;;  %v2704_v51 = vor.u32 %v2702_v10, %v2700_v30 }
 0x3a0   : > { %20643 = vmatprep.mubr.msk.bf16.mxu0 %vm24093_vm1, %v29764_v14 }
 0x3a2   : > { %v2225_v38 = vpop.f32.mrb[84].mxu0 }
 0x3a3   : > { %v25508_v57 = vadd.f32 %v2225_v38, %v25201_v32  ;;  %v20535_v61 = vpop.f32.mrb[85].mxu0  ;;  %v2708_v32 = vrot.slane %v2706_v52, 1  ;;  %v25535_v52 = vld [vmem:[%s24214_s25 + $0x4c] sm:$0xff]  }
 0x3a4   : > { %v2228_v18 = vpop.f32.mrb[86].mxu0 }
 0x3a5   : > { %29810 = vst [vmem:[#allocation24_spill] sm:$0xff] %v25508_v57  ;;  %v25514_v44 = vadd.f32 %v2228_v18, %v25205_v16  ;;  %v20536_v62 = vpop.f32.mrb[87].mxu0  ;;  %v2709_v16 = vsel %vm551_vm2, %v2704_v51, %v2708_v32  ;;  %v2710_v18 = vshrl.u32 %v25505_v36, 16 }
 0x3a7   : > { %20644 = vmatmul.mubr.msk.bf16.gmra.mrb[192].mxu0 %vm777_vm3, %v2701_v1  ;;  %v2714_v1 = vshll.u32 %v25520_v26, 16  ;;  %v2712_v10 = vor.u32 %v2710_v18, %v2708_v32 }
 0x3a8   : > { %20647 = vmatprep.mubr.msk.bf16.mxu0 %vm24093_vm1, %v29764_v14 }
 0x3aa   : > { %v2233_v38 = vpop.f32.mrb[88].mxu0 }
 0x3ab   : > { %v25523_v40 = vadd.f32 %v2233_v38, %v25211_v63  ;;  %v20539_v61 = vpop.f32.mrb[89].mxu0  ;;  %v2716_v63 = vrot.slane %v2714_v1, 1  ;;  %v25550_v1 = vld [vmem:[%s24214_s25 + $0x54] sm:$0xff]  }
 0x3ac   : > { %v2236_v57 = vpop.f32.mrb[90].mxu0 }
 0x3ad   : > { %29811 = vst [vmem:[#allocation19_spill] sm:$0xff] %v25523_v40  ;;  %v25529_v62 = vadd.f32 %v2236_v57, %v25215_v25  ;;  %v20540_v30 = vpop.f32.mrb[91].mxu0  ;;  %v2717_v25 = vsel %vm551_vm2, %v2712_v10, %v2716_v63  ;;  %v2718_v57 = vshrl.u32 %v25520_v26, 16 }
 0x3af   : > { %20648 = vmatmul.mubr.msk.bf16.gmra.mrb[196].mxu0 %vm777_vm3, %v2709_v16  ;;  %v2722_v16 = vshll.u32 %v25535_v52, 16  ;;  %v2720_v18 = vor.u32 %v2718_v57, %v2716_v63 }
 0x3b0   : > { %20651 = vmatprep.mubr.msk.bf16.mxu0 %vm24093_vm1, %v29764_v14 }
 0x3b2   : > { %v2241_v38 = vpop.f32.mrb[92].mxu0 }
 0x3b3   : > { %v25538_v51 = vadd.f32 %v2241_v38, %v25221_v45  ;;  %v20543_v61 = vpop.f32.mrb[93].mxu0  ;;  %v2724_v45 = vrot.slane %v2722_v16, 1  ;;  %v25565_v16 = vld [vmem:[%s24214_s25 + $0x5c] sm:$0xff]  }
 0x3b4   : > { %v2244_v40 = vpop.f32.mrb[94].mxu0 }
 0x3b5   : > { %29812 = vst [vmem:[#allocation20_spill] sm:$0xff] %v25538_v51  ;;  %v25544_v30 = vadd.f32 %v2244_v40, %v25225_v12  ;;  %v20544_v32 = vpop.f32.mrb[95].mxu0  ;;  %v2725_v12 = vsel %vm551_vm2, %v2720_v18, %v2724_v45  ;;  %v2726_v40 = vshrl.u32 %v25535_v52, 16 }
 0x3b7   : > { %20652 = vmatmul.mubr.msk.bf16.gmra.mrb[200].mxu0 %vm777_vm3, %v2717_v25  ;;  %v2730_v25 = vshll.u32 %v25550_v1, 16  ;;  %v2728_v57 = vor.u32 %v2726_v40, %v2724_v45 }
 0x3b8   : > { %20655 = vmatprep.mubr.msk.bf16.mxu0 %vm24093_vm1, %v29764_v14 }
 0x3ba   : > { %v2249_v38 = vpop.f32.mrb[96].mxu0 }
 0x3bb   : > { %v25553_v10 = vadd.f32 %v2249_v38, %v25231_v60  ;;  %v20547_v61 = vpop.f32.mrb[97].mxu0  ;;  %v2732_v60 = vrot.slane %v2730_v25, 1  ;;  %v25580_v25 = vld [vmem:[%s24214_s25 + $0x64] sm:$0xff]  }
 0x3bc   : > { %v2252_v51 = vpop.f32.mrb[98].mxu0 }
 0x3bd   : > { %29813 = vst [vmem:[#allocation27_spill] sm:$0xff] %v25553_v10  ;;  %v25559_v32 = vadd.f32 %v2252_v51, %v25235_v56  ;;  %v20548_v63 = vpop.f32.mrb[99].mxu0  ;;  %v2733_v56 = vsel %vm551_vm2, %v2728_v57, %v2732_v60  ;;  %v2734_v51 = vshrl.u32 %v25550_v1, 16 }
 0x3bf   : > { %20656 = vmatmul.mubr.msk.bf16.gmra.mrb[204].mxu0 %vm777_vm3, %v2725_v12  ;;  %v2738_v12 = vshll.u32 %v25565_v16, 16  ;;  %v2736_v40 = vor.u32 %v2734_v51, %v2732_v60 }
 0x3c0   : > { %20659 = vmatprep.mubr.msk.bf16.mxu0 %vm24093_vm1, %v29764_v14 }
 0x3c2   : > { %v2257_v38 = vpop.f32.mrb[100].mxu0 }
 0x3c3   : > { %v25568_v18 = vadd.f32 %v2257_v38, %v25241_v4  ;;  %v20551_v61 = vpop.f32.mrb[101].mxu0  ;;  %v2740_v4 = vrot.slane %v2738_v12, 1  ;;  %v25595_v12 = vld [vmem:[%s24214_s25 + $0x6c] sm:$0xff]  }
 0x3c4   : > { %v2260_v10 = vpop.f32.mrb[102].mxu0 }
 0x3c5   : > { %29814 = vst [vmem:[#allocation22_spill] sm:$0xff] %v25568_v18  ;;  %v25574_v63 = vadd.f32 %v2260_v10, %v25245_v37  ;;  %v20552_v45 = vpop.f32.mrb[103].mxu0  ;;  %v2741_v37 = vsel %vm551_vm2, %v2736_v40, %v2740_v4  ;;  %v2742_v10 = vshrl.u32 %v25565_v16, 16 }
 0x3c7   : > { %20660 = vmatmul.mubr.msk.bf16.gmra.mrb[208].mxu0 %vm777_vm3, %v2733_v56  ;;  %v2746_v56 = vshll.u32 %v25580_v25, 16  ;;  %v2744_v51 = vor.u32 %v2742_v10, %v2740_v4 }
 0x3c8   : > { %20663 = vmatprep.mubr.msk.bf16.mxu0 %vm24093_vm1, %v29764_v14 }
 0x3ca   : > { %v2265_v38 = vpop.f32.mrb[104].mxu0 }
 0x3cb   : > { %v25583_v57 = vadd.f32 %v2265_v38, %v25251_v54  ;;  %v20555_v61 = vpop.f32.mrb[105].mxu0  ;;  %v2748_v54 = vrot.slane %v2746_v56, 1  ;;  %v25610_v56 = vld [vmem:[%s24214_s25 + $0x74] sm:$0xff]  }
 0x3cc   : > { %v2268_v18 = vpop.f32.mrb[106].mxu0 }
 0x3cd   : > { %29815 = vst [vmem:[#allocation23_spill] sm:$0xff] %v25583_v57  ;;  %v25589_v45 = vadd.f32 %v2268_v18, %v25255_v55  ;;  %v20556_v60 = vpop.f32.mrb[107].mxu0  ;;  %v2749_v55 = vsel %vm551_vm2, %v2744_v51, %v2748_v54  ;;  %v2750_v18 = vshrl.u32 %v25580_v25, 16 }
 0x3cf   : > { %20664 = vmatmul.mubr.msk.bf16.gmra.mrb[212].mxu0 %vm777_vm3, %v2741_v37  ;;  %v2754_v37 = vshll.u32 %v25595_v12, 16  ;;  %v2752_v10 = vor.u32 %v2750_v18, %v2748_v54 }
 0x3d0   : > { %20667 = vmatprep.mubr.msk.bf16.mxu0 %vm24093_vm1, %v29764_v14 }
 0x3d2   : > { %v2273_v38 = vpop.f32.mrb[108].mxu0 }
 0x3d3   : > { %v25598_v40 = vadd.f32 %v2273_v38, %v25261_v28  ;;  %v20559_v61 = vpop.f32.mrb[109].mxu0  ;;  %v2756_v28 = vrot.slane %v2754_v37, 1  ;;  %v25625_v37 = vld [vmem:[%s24214_s25 + $0x7c] sm:$0xff]  }
 0x3d4   : > { %v2276_v57 = vpop.f32.mrb[110].mxu0 }
 0x3d5   : > { %29816 = vst [vmem:[#allocation30_spill] sm:$0xff] %v25598_v40  ;;  %v25604_v60 = vadd.f32 %v2276_v57, %v25265_v9  ;;  %v20560_v4 = vpop.f32.mrb[111].mxu0  ;;  %v2757_v9 = vsel %vm551_vm2, %v2752_v10, %v2756_v28  ;;  %v2758_v57 = vshrl.u32 %v25595_v12, 16 }
 0x3d7   : > { %20668 = vmatmul.mubr.msk.bf16.gmra.mrb[216].mxu0 %vm777_vm3, %v2749_v55  ;;  %v2762_v55 = vshll.u32 %v25610_v56, 16  ;;  %v2760_v18 = vor.u32 %v2758_v57, %v2756_v28 }
 0x3d8   : > { %20671 = vmatprep.mubr.msk.bf16.mxu0 %vm24093_vm1, %v29764_v14 }
 0x3da   : > { %v2281_v38 = vpop.f32.mrb[112].mxu0 }
 0x3db   : > { %v25613_v51 = vadd.f32 %v2281_v38, %v25271_v19  ;;  %v20563_v61 = vpop.f32.mrb[113].mxu0  ;;  %v2764_v19 = vrot.slane %v2762_v55, 1  ;;  %v25640_v55 = vld [vmem:[%s24214_s25 + $0x84] sm:$0xff]  }
 0x3dc   : > { %v2284_v40 = vpop.f32.mrb[114].mxu0 }
 0x3dd   : > { %29817 = vst [vmem:[#allocation25_spill] sm:$0xff] %v25613_v51  ;;  %v25619_v4 = vadd.f32 %v2284_v40, %v25275_v20  ;;  %v20564_v54 = vpop.f32.mrb[115].mxu0  ;;  %v2765_v20 = vsel %vm551_vm2, %v2760_v18, %v2764_v19  ;;  %v2766_v40 = vshrl.u32 %v25610_v56, 16 }
 0x3df   : > { %20672 = vmatmul.mubr.msk.bf16.gmra.mrb[220].mxu0 %vm777_vm3, %v2757_v9  ;;  %v2770_v9 = vshll.u32 %v25625_v37, 16  ;;  %v2768_v57 = vor.u32 %v2766_v40, %v2764_v19 }
 0x3e0   : > { %20675 = vmatprep.mubr.msk.bf16.mxu0 %vm24093_vm1, %v29764_v14 }
 0x3e2   : > { %v2289_v38 = vpop.f32.mrb[116].mxu0 }
 0x3e3   : > { %v25628_v10 = vadd.f32 %v2289_v38, %v25281_v53  ;;  %v20567_v61 = vpop.f32.mrb[117].mxu0  ;;  %v2772_v53 = vrot.slane %v2770_v9, 1  ;;  %v25655_v9 = vld [vmem:[%s24214_s25 + $0x8c] sm:$0xff]  }
 0x3e4   : > { %v2292_v51 = vpop.f32.mrb[118].mxu0 }
 0x3e5   : > { %29818 = vst [vmem:[#allocation26_spill] sm:$0xff] %v25628_v10  ;;  %v25634_v54 = vadd.f32 %v2292_v51, %v25285_v46  ;;  %v20568_v28 = vpop.f32.mrb[119].mxu0  ;;  %v2773_v46 = vsel %vm551_vm2, %v2768_v57, %v2772_v53  ;;  %v2774_v51 = vshrl.u32 %v25625_v37, 16 }
 0x3e7   : > { %20676 = vmatmul.mubr.msk.bf16.gmra.mrb[224].mxu0 %vm777_vm3, %v2765_v20  ;;  %v2778_v20 = vshll.u32 %v25640_v55, 16  ;;  %v2776_v40 = vor.u32 %v2774_v51, %v2772_v53 }
 0x3e8   : > { %20679 = vmatprep.mubr.msk.bf16.mxu0 %vm24093_vm1, %v29764_v14 }
 0x3ea   : > { %v2297_v38 = vpop.f32.mrb[120].mxu0 }
 0x3eb   : > { %v25643_v18 = vadd.f32 %v2297_v38, %v25291_v5  ;;  %v20571_v61 = vpop.f32.mrb[121].mxu0  ;;  %v2780_v5 = vrot.slane %v2778_v20, 1  ;;  %v25670_v20 = vld [vmem:[%s24214_s25 + $0x94] sm:$0xff]  }
 0x3ec   : > { %v2300_v10 = vpop.f32.mrb[122].mxu0 }
 0x3ed   : > { %29819 = vst [vmem:[#allocation33_spill] sm:$0xff] %v25643_v18  ;;  %v25649_v28 = vadd.f32 %v2300_v10, %v25295_v49  ;;  %v20572_v19 = vpop.f32.mrb[123].mxu0  ;;  %v2781_v49 = vsel %vm551_vm2, %v2776_v40, %v2780_v5  ;;  %v2782_v10 = vshrl.u32 %v25640_v55, 16 }
 0x3ef   : > { %20680 = vmatmul.mubr.msk.bf16.gmra.mrb[228].mxu0 %vm777_vm3, %v2773_v46  ;;  %v2786_v46 = vshll.u32 %v25655_v9, 16  ;;  %v2784_v51 = vor.u32 %v2782_v10, %v2780_v5 }
 0x3f0   : > { %20683 = vmatprep.mubr.msk.bf16.mxu0 %vm24093_vm1, %v29764_v14 }
 0x3f2   : > { %v2305_v38 = vpop.f32.mrb[124].mxu0 }
 0x3f3   : > { %v25658_v57 = vadd.f32 %v2305_v38, %v25301_v39  ;;  %v20575_v61 = vpop.f32.mrb[125].mxu0  ;;  %v2788_v39 = vrot.slane %v2786_v46, 1  ;;  %v25685_v46 = vld [vmem:[%s24214_s25 + $0x9c] sm:$0xff]  }
 0x3f4   : > { %v2308_v18 = vpop.f32.mrb[126].mxu0 }
 0x3f5   : > { %29820 = vst [vmem:[#allocation28_spill] sm:$0xff] %v25658_v57  ;;  %v25664_v19 = vadd.f32 %v2308_v18, %v25305_v0  ;;  %v20576_v53 = vpop.f32.mrb[127].mxu0  ;;  %v2789_v0 = vsel %vm551_vm2, %v2784_v51, %v2788_v39  ;;  %v2790_v18 = vshrl.u32 %v25655_v9, 16 }
 0x3f7   : > { %20684 = vmatmul.mubr.msk.bf16.gmra.mrb[232].mxu0 %vm777_vm3, %v2781_v49  ;;  %v2794_v49 = vshll.u32 %v25670_v20, 16  ;;  %v2792_v10 = vor.u32 %v2790_v18, %v2788_v39 }
 0x3f8   : > { %20687 = vmatprep.mubr.msk.bf16.mxu0 %vm24093_vm1, %v29764_v14 }
 0x3fa   : > { %v2313_v38 = vpop.f32.mrb[128].mxu0 }
 0x3fb   : > { %v25673_v40 = vadd.f32 %v2313_v38, %v25311_v7  ;;  %v20579_v61 = vpop.f32.mrb[129].mxu0  ;;  %v2796_v7 = vrot.slane %v2794_v49, 1  ;;  %v25700_v49 = vld [vmem:[%s24214_s25 + $0xa4] sm:$0xff]  }
 0x3fc   : > { %v2316_v57 = vpop.f32.mrb[130].mxu0 }
 0x3fd   : > { %29821 = vst [vmem:[#allocation29_spill] sm:$0xff] %v25673_v40  ;;  %v25679_v53 = vadd.f32 %v2316_v57, %v25315_v3  ;;  %v20580_v5 = vpop.f32.mrb[131].mxu0  ;;  %v2797_v3 = vsel %vm551_vm2, %v2792_v10, %v2796_v7  ;;  %v2798_v57 = vshrl.u32 %v25670_v20, 16 }
 0x3ff   : > { %20688 = vmatmul.mubr.msk.bf16.gmra.mrb[236].mxu0 %vm777_vm3, %v2789_v0  ;;  %v2802_v0 = vshll.u32 %v25685_v46, 16  ;;  %v2800_v18 = vor.u32 %v2798_v57, %v2796_v7 }
 0x400   : > { %20691 = vmatprep.mubr.msk.bf16.mxu0 %vm24093_vm1, %v29764_v14 }
 0x402   : > { %v2321_v38 = vpop.f32.mrb[132].mxu0 }
 0x403   : > { %v25688_v51 = vadd.f32 %v2321_v38, %v25321_v33  ;;  %v20583_v61 = vpop.f32.mrb[133].mxu0  ;;  %v2804_v33 = vrot.slane %v2802_v0, 1  ;;  %v25715_v0 = vld [vmem:[%s24214_s25 + $0xac] sm:$0xff]  }
 0x404   : > { %v2324_v40 = vpop.f32.mrb[134].mxu0 }
 0x405   : > { %29822 = vst [vmem:[#allocation31_spill] sm:$0xff] %v25688_v51  ;;  %v25694_v5 = vadd.f32 %v2324_v40, %v25325_v31  ;;  %v20584_v39 = vpop.f32.mrb[135].mxu0  ;;  %v2805_v31 = vsel %vm551_vm2, %v2800_v18, %v2804_v33  ;;  %v2806_v40 = vshrl.u32 %v25685_v46, 16 }
 0x407   : > { %20692 = vmatmul.mubr.msk.bf16.gmra.mrb[240].mxu0 %vm777_vm3, %v2797_v3  ;;  %v2810_v3 = vshll.u32 %v25700_v49, 16  ;;  %v2808_v57 = vor.u32 %v2806_v40, %v2804_v33 }
 0x408   : > { %20695 = vmatprep.mubr.msk.bf16.mxu0 %vm24093_vm1, %v29764_v14 }
 0x40a   : > { %v2329_v38 = vpop.f32.mrb[136].mxu0 }
 0x40b   : > { %v25703_v10 = vadd.f32 %v2329_v38, %v25331_v2  ;;  %v20587_v61 = vpop.f32.mrb[137].mxu0  ;;  %v2812_v2 = vrot.slane %v2810_v3, 1  ;;  %v25730_v3 = vld [vmem:[%s24214_s25 + $0xb4] sm:$0xff]  }
 0x40c   : > { %v2332_v51 = vpop.f32.mrb[138].mxu0 }
 0x40d   : > { %29823 = vst [vmem:[#allocation32_spill] sm:$0xff] %v25703_v10  ;;  %v25709_v39 = vadd.f32 %v2332_v51, %v25335_v43  ;;  %v20588_v7 = vpop.f32.mrb[139].mxu0  ;;  %v2813_v43 = vsel %vm551_vm2, %v2808_v57, %v2812_v2  ;;  %v2814_v51 = vshrl.u32 %v25700_v49, 16 }
 0x40f   : > { %20696 = vmatmul.mubr.msk.bf16.gmra.mrb[244].mxu0 %vm777_vm3, %v2805_v31  ;;  %v2818_v31 = vshll.u32 %v25715_v0, 16  ;;  %v2816_v40 = vor.u32 %v2814_v51, %v2812_v2 }
 0x410   : > { %20699 = vmatprep.mubr.msk.bf16.mxu0 %vm24093_vm1, %v29764_v14 }
 0x412   : > { %v2337_v38 = vpop.f32.mrb[140].mxu0 }
 0x413   : > { %v25718_v18 = vadd.f32 %v2337_v38, %v25341_v59  ;;  %v20591_v61 = vpop.f32.mrb[141].mxu0  ;;  %v2820_v59 = vrot.slane %v2818_v31, 1  ;;  %v25745_v31 = vld [vmem:[%s24214_s25 + $0xbc] sm:$0xff]  }
 0x414   : > { %v2340_v10 = vpop.f32.mrb[142].mxu0 }
 0x415   : > { %29824 = vst [vmem:[#allocation6_spill] sm:$0xff] %v25718_v18  ;;  %v25724_v7 = vadd.f32 %v2340_v10, %v25345_v27  ;;  %v20592_v33 = vpop.f32.mrb[143].mxu0  ;;  %v2821_v27 = vsel %vm551_vm2, %v2816_v40, %v2820_v59  ;;  %v2822_v10 = vshrl.u32 %v25715_v0, 16 }
 0x417   : > { %20700 = vmatmul.mubr.msk.bf16.gmra.mrb[248].mxu0 %vm777_vm3, %v2813_v43  ;;  %v2826_v43 = vshll.u32 %v25730_v3, 16  ;;  %v2824_v51 = vor.u32 %v2822_v10, %v2820_v59 }
 0x418   : > { %20703 = vmatprep.mubr.msk.bf16.mxu0 %vm24093_vm1, %v29764_v14 }
 0x41a   : > { %v2345_v38 = vpop.f32.mrb[144].mxu0 }
 0x41b   : > { %v25733_v57 = vadd.f32 %v2345_v38, %v25351_v47  ;;  %v20595_v61 = vpop.f32.mrb[145].mxu0  ;;  %v2828_v47 = vrot.slane %v2826_v43, 1  ;;  %v25760_v43 = vld [vmem:[%s24214_s25 + $0xc4] sm:$0xff]  }
 0x41c   : > { %v2348_v18 = vpop.f32.mrb[146].mxu0  ;;  %29827 = vst [vmem:[#allocation34_spill] sm:$0xff] %v25760_v43 }
 0x41d   : > { %29825 = vst [vmem:[#allocation7_spill] sm:$0xff] %v25733_v57  ;;  %v25739_v33 = vadd.f32 %v2348_v18, %v25355_v21  ;;  %v20596_v2 = vpop.f32.mrb[147].mxu0  ;;  %v2829_v21 = vsel %vm551_vm2, %v2824_v51, %v2828_v47  ;;  %v2830_v18 = vshrl.u32 %v25730_v3, 16 }
 0x41f   : > { %20704 = vmatmul.mubr.msk.bf16.gmra.mrb[252].mxu0 %vm777_vm3, %v2821_v27  ;;  %v2834_v27 = vshll.u32 %v25745_v31, 16  ;;  %v2832_v10 = vor.u32 %v2830_v18, %v2828_v47 }
 0x420   : > { %20707 = vmatprep.mubr.msk.bf16.mxu0 %vm24093_vm1, %v29764_v14 }
 0x422   : > { %v2353_v38 = vpop.f32.mrb[148].mxu0 }
 0x423   : > { %v25748_v40 = vadd.f32 %v2353_v38, %v25361_v23  ;;  %v20599_v61 = vpop.f32.mrb[149].mxu0  ;;  %v2836_v23 = vrot.slane %v2834_v27, 1  ;;  %v25775_v27 = vld [vmem:[%s24214_s25 + $0xcc] sm:$0xff]  }
 0x424   : > { %v2356_v57 = vpop.f32.mrb[150].mxu0  ;;  %29829 = vst [vmem:[#allocation36_spill] sm:$0xff] %v25775_v27 }
 0x425   : > { %29826 = vst [vmem:[#allocation12_spill] sm:$0xff] %v25748_v40  ;;  %v25754_v2 = vadd.f32 %v2356_v57, %v25365_v50  ;;  %v20600_v59 = vpop.f32.mrb[151].mxu0  ;;  %v2837_v50 = vsel %vm551_vm2, %v2832_v10, %v2836_v23  ;;  %v2838_v57 = vshrl.u32 %v25745_v31, 16 }
 0x427   : > { %20708 = vmatmul.mubr.msk.bf16.gmra.mrb[0].mxu0 %vm777_vm3, %v2829_v21  ;;  %v2842_v21 = vshll.u32 %v25760_v43, 16  ;;  %v2840_v18 = vor.u32 %v2838_v57, %v2836_v23 }
 0x428   : > { %20711 = vmatprep.mubr.msk.bf16.mxu0 %vm24093_vm1, %v29764_v14 }
 0x42a   : > { %v2361_v38 = vpop.f32.mrb[152].mxu0 }
 0x42b   : > { %v25763_v51 = vadd.f32 %v2361_v38, %v25371_v6  ;;  %v20603_v61 = vpop.f32.mrb[153].mxu0  ;;  %v2844_v6 = vrot.slane %v2842_v21, 1  ;;  %v25790_v21 = vld [vmem:[%s24214_s25 + $0xd4] sm:$0xff]  }
 0x42c   : > { %v2364_v40 = vpop.f32.mrb[154].mxu0  ;;  %29832 = vst [vmem:[#allocation39_spill] sm:$0xff] %v25790_v21 }
 0x42d   : > { %29828 = vst [vmem:[#allocation35_spill] sm:$0xff] %v25763_v51  ;;  %v25769_v59 = vadd.f32 %v2364_v40, %v25375_v22  ;;  %v20604_v47 = vpop.f32.mrb[155].mxu0  ;;  %v2845_v22 = vsel %vm551_vm2, %v2840_v18, %v2844_v6  ;;  %v2846_v40 = vshrl.u32 %v25760_v43, 16  ;;  %v29833_v18 = vld [vmem:[#allocation8_spill] sm:$0xff] }
 0x42f   : > { %20712 = vmatmul.mubr.msk.bf16.gmra.mrb[4].mxu0 %vm777_vm3, %v2837_v50  ;;  %v2850_v50 = vshll.u32 %v25775_v27, 16  ;;  %v2848_v57 = vor.u32 %v2846_v40, %v2844_v6 }
 0x430   : > { %20715 = vmatprep.mubr.msk.bf16.mxu0 %vm24093_vm1, %v29764_v14 }
 0x432   : > { %v2369_v38 = vpop.f32.mrb[156].mxu0 }
 0x433   : > { %v25778_v10 = vadd.f32 %v2369_v38, %v25381_v35  ;;  %v20607_v61 = vpop.f32.mrb[157].mxu0  ;;  %v2852_v35 = vrot.slane %v2850_v50, 1 }
 0x434   : > { %v2372_v51 = vpop.f32.mrb[158].mxu0 }
 0x435   : > { %29830 = vst [vmem:[#allocation37_spill] sm:$0xff] %v25778_v10  ;;  %v25784_v47 = vadd.f32 %v2372_v51, %v25385_v58  ;;  %v20608_v23 = vpop.f32.mrb[159].mxu0  ;;  %v2853_v58 = vsel %vm551_vm2, %v2848_v57, %v2852_v35  ;;  %v2854_v51 = vshrl.u32 %v25775_v27, 16  ;;  %v29838_v57 = vld [vmem:[#allocation15_spill] sm:$0xff] }
 0x436   : > { %v29835_v23 = vld [vmem:[#allocation9_spill] sm:$0xff] }
 0x437   : > { %29831 = vst [vmem:[#allocation38_spill] sm:$0xff] %v25784_v47  ;;  %20716 = vmatmul.mubr.msk.bf16.gmra.mrb[8].mxu0 %vm777_vm3, %v2845_v22  ;;  %v2858_v22 = vshll.u32 %v25790_v21, 16  ;;  %v2856_v40 = vor.u32 %v2854_v51, %v2852_v35 }
 0x438   : > { %20719 = vmatprep.mubr.msk.bf16.mxu0 %vm24093_vm1, %v29764_v14 }
 0x439   : > { %v2860_v50 = vrot.slane %v2858_v22, 1 }
 0x43a   : > { %v2377_v38 = vpop.f32.mrb[160].mxu0 }
 0x43b   : > { %v25793_v61 = vadd.f32 %v2377_v38, %v29833_v18  ;;  %v20611_v10 = vpop.f32.mrb[161].mxu0 }
 0x43c   : > { %v2380_v43 = vpop.f32.mrb[162].mxu0  ;;  %v25805_v10 = vld [vmem:[%s24214_s25 + $0xdc] sm:$0xff]  }
 0x43d   : > { %29834 = vst [vmem:[#allocation8_spill] sm:$0xff] %v25793_v61  ;;  %v25799_v47 = vadd.f32 %v2380_v43, %v29835_v23  ;;  %v20612_v6 = vpop.f32.mrb[163].mxu0  ;;  %29837 = vst [vmem:[#allocation40_spill] sm:$0xff] %v25805_v10  ;;  %v2861_v43 = vsel %vm551_vm2, %v2856_v40, %v2860_v50  ;;  %v2862_v23 = vshrl.u32 %v25790_v21, 16  ;;  %v29843_v40 = vld [vmem:[#allocation18_spill] sm:$0xff] }
 0x43e   : > { %v29840_v6 = vld [vmem:[#allocation10_spill] sm:$0xff] }
 0x43f   : > { %29836 = vst [vmem:[#allocation9_spill] sm:$0xff] %v25799_v47  ;;  %20720 = vmatmul.mubr.msk.bf16.gmra.mrb[12].mxu0 %vm777_vm3, %v2853_v58  ;;  %v2866_v58 = vshll.u32 %v25805_v10, 16  ;;  %v2864_v51 = vor.u32 %v2862_v23, %v2860_v50 }
 0x440   : > { %20723 = vmatprep.mubr.msk.bf16.mxu0 %vm24093_vm1, %v29764_v14 }
 0x441   : > { %v2868_v22 = vrot.slane %v2866_v58, 1 }
 0x442   : > { %v2385_v38 = vpop.f32.mrb[164].mxu0 }
 0x443   : > { %v25808_v18 = vadd.f32 %v2385_v38, %v29838_v57  ;;  %v20615_v61 = vpop.f32.mrb[165].mxu0 }
 0x444   : > { %v2388_v27 = vpop.f32.mrb[166].mxu0  ;;  %v25820_v61 = vld [vmem:[%s24214_s25 + $0xe4] ss:$0 sps:$4 sm:$0x11]  }
 0x445   : > { %29839 = vst [vmem:[#allocation15_spill] sm:$0xff] %v25808_v18  ;;  %v25814_v47 = vadd.f32 %v2388_v27, %v29840_v6  ;;  %v20616_v35 = vpop.f32.mrb[167].mxu0  ;;  %29842 = vst [vmem:[#allocation41_spill] sm:$0xff] %v25820_v61  ;;  %v2869_v27 = vsel %vm551_vm2, %v2864_v51, %v2868_v22  ;;  %v2870_v6 = vshrl.u32 %v25805_v10, 16  ;;  %v29846_v10 = vld [vmem:[#allocation11_spill] sm:$0xff] }
 0x446   : > { %v29845_v35 = vld [vmem:[#allocation13_spill] sm:$0xff] }
 0x447   : > { %29841 = vst [vmem:[#allocation10_spill] sm:$0xff] %v25814_v47  ;;  %20724 = vmatmul.mubr.msk.bf16.gmra.mrb[16].mxu0 %vm777_vm3, %v2861_v43  ;;  %v2874_v43 = vshll.u32 %v25820_v61, 16  ;;  %v2872_v23 = vor.u32 %v2870_v6, %v2868_v22  ;;  %v3278_v6 = vrot.slane %v25426_v29, 1  ;;  %v29847_v29 = vld [vmem:[#allocation14_spill] sm:$0xff] }
 0x448   : > { %20727 = vmatprep.mubr.msk.bf16.mxu0 %vm24093_vm1, %v29764_v14 }
 0x449   : > { %v2876_v58 = vrot.slane %v2874_v43, 1 }
 0x44a   : > { %v2393_v38 = vpop.f32.mrb[168].mxu0 }
 0x44b   : > { %v25823_v57 = vadd.f32 %v2393_v38, %v29843_v40  ;;  %v20619_v18 = vpop.f32.mrb[169].mxu0  ;;  %v3270_v38 = vld [vmem:[%s24214_s25 + $0xc] sm:$0xe]  ;;  %v2877_v61 = vsel %vm551_vm2, %v2872_v23, %v2876_v58 }
 0x44c   : > { %v2396_v21 = vpop.f32.mrb[170].mxu0 }
 0x44d   : > { %29844 = vst [vmem:[#allocation18_spill] sm:$0xff] %v25823_v57  ;;  %v25829_v47 = vadd.f32 %v2396_v21, %v29845_v35  ;;  %v20620_v50 = vpop.f32.mrb[171].mxu0  ;;  %v17868_v21 = vcombine.low %v3270_v38, %v29846_v10  ;;  %v3280_v38 = vrot.slane %v29847_v29, 1 }
 0x44f   : > { %20728 = vmatmul.mubr.msk.bf16.gmra.mrb[20].mxu0 %vm777_vm3, %v2869_v27  ;;  %v3277_v22 = vrot.slane %v17868_v21, 1 }
 0x450   : > { %20731 = vmatprep.mubr.msk.bf16.mxu0 %vm24093_vm1, %v29764_v14 }
 0x452   : > { %v2401_v18 = vpop.f32.mrb[172].mxu0 }
 0x453   : > { %v25836_v40 = vadd.f32 %v2401_v18, %v25429_v48  ;;  %v20623_v51 = vpop.f32.mrb[173].mxu0  ;;  %v23331_v48 = vld [vmem:[%s29591_s2 + $0x30] sm:$0x1f]   ;;  %v29848_v18 = vld [vmem:[#allocation21_spill] sm:$0xff] }
 0x454   : > { %v2404_v57 = vpop.f32.mrb[174].mxu0  ;;  %v4003_v58 = vsel %vm859_vm0, %v23331_v48, 0 }
 0x455   : > { %v25841_v35 = vadd.f32 %v2404_v57, %v25434_v34  ;;  %v20624_v27 = vpop.f32.mrb[175].mxu0  ;;  %v3279_v57 = vsel %vm1430_vm4, %v3277_v22, %v3278_v6 }
 0x456   : > { %v3281_v27 = vsel %vm1430_vm4, %v3278_v6, %v3280_v38 }
 0x457   : > { %20732 = vmatmul.mubr.msk.bf16.gmra.mrb[24].mxu0 %vm777_vm3, %v2877_v61 }
 0x458   : > { %20737 = vmatprep.mubr.msk.bf16.mxu0 %vm24093_vm1, %v29764_v14 }
 0x45a   : > { %v3001_v43 = vpop.f32.mrb[176].mxu0 }
 0x45b   : > { %v25851_v50 = vadd.f32 %v3001_v43, %v25446_v11  ;;  %v20629_v10 = vpop.f32.mrb[177].mxu0  ;;  %v3282_v43 = vrot.slane %v25459_v42, 1 }
 0x45c   : > { %v3004_v34 = vpop.f32.mrb[178].mxu0 }
 0x45d   : > { %v25855_v61 = vadd.f32 %v3004_v34, %v25452_v8  ;;  %v20630_v23 = vpop.f32.mrb[179].mxu0  ;;  %v29849_v34 = vld [vmem:[#allocation16_spill] sm:$0xff]  ;;  %v3283_v29 = vsel %vm1430_vm4, %v3280_v38, %v3282_v43 }
 0x45f   : > { %20738 = vmatmul.mubr.msk.bf16.vlgmr.msra.gmra.mrb[28].mxu0 %vm777_vm3, %v3279_v57 }
 0x460   : > { %20846 = vmatpush3.bf16.msra.mxu0 %v4003_v58  ;;  %20741 = vmatprep.mubr.msk.bf16.mxu0 %vm24093_vm1, %v29764_v14 }
 0x461   : > { %20955 = vmatprep.subr.bf16.mxu0 %v29764_v14 }
 0x462   : > { %v3009_v11 = vpop.f32.mrb[180].mxu0 }
 0x463   : > { %v25864_v51 = vadd.f32 %v3009_v11, %v29848_v18  ;;  %v20633_v21 = vpop.f32.mrb[181].mxu0  ;;  %v3284_v11 = vrot.slane %v25475_v13, 1  ;;  %v29850_v18 = vld [vmem:[#allocation17_spill] sm:$0xff] }
 0x464   : > { %v3012_v8 = vpop.f32.mrb[182].mxu0 }
 0x465   : > { %v25868_v22 = vadd.f32 %v3012_v8, %v25469_v24  ;;  %v20634_v48 = vpop.f32.mrb[183].mxu0 }
 0x466   : > { %v3285_v48 = vsel %vm1430_vm4, %v3282_v43, %v3284_v11 }
 0x467   : > { %20742 = vmatmul.mubr.msk.bf16.gmra.mrb[32].mxu0 %vm777_vm3, %v3281_v27 }
 0x468   : > { %20745 = vmatprep.mubr.msk.bf16.mxu0 %vm24093_vm1, %v29764_v14 }
 0x46a   : > { %v3017_v10 = vpop.f32.mrb[184].mxu0 }
 0x46b   : > { %v25875_v57 = vadd.f32 %v3017_v10, %v29849_v34  ;;  %v20637_v23 = vpop.f32.mrb[185].mxu0  ;;  %v3286_v10 = vrot.slane %v25490_v41, 1  ;;  %v29851_v34 = vld [vmem:[#allocation24_spill] sm:$0xff] }
 0x46c   : > { %v3020_v58 = vpop.f32.mrb[186].mxu0 }
 0x46d   : > { %v25879_v6 = vadd.f32 %v3020_v58, %v25484_v15  ;;  %v20638_v24 = vpop.f32.mrb[187].mxu0 }
 0x46e   : > { %v3287_v24 = vsel %vm1430_vm4, %v3284_v11, %v3286_v10 }
 0x46f   : > { %20746 = vmatmul.mubr.msk.bf16.gmra.mrb[36].mxu0 %vm777_vm3, %v3283_v29 }
 0x470   : > { %20749 = vmatprep.mubr.msk.bf16.mxu0 %vm24093_vm1, %v29764_v14 }
 0x472   : > { %v3025_v42 = vpop.f32.mrb[188].mxu0 }
 0x473   : > { %v25886_v21 = vadd.f32 %v3025_v42, %v29850_v18  ;;  %v20641_v8 = vpop.f32.mrb[189].mxu0  ;;  %v3288_v42 = vrot.slane %v25505_v36, 1  ;;  %v29852_v18 = vld [vmem:[#allocation19_spill] sm:$0xff] }
 0x474   : > { %v3028_v27 = vpop.f32.mrb[190].mxu0 }
 0x475   : > { %v25890_v38 = vadd.f32 %v3028_v27, %v25499_v17  ;;  %v20642_v15 = vpop.f32.mrb[191].mxu0 }
 0x476   : > { %v3289_v15 = vsel %vm1430_vm4, %v3286_v10, %v3288_v42 }
 0x477   : > { %20750 = vmatmul.mubr.msk.bf16.gmra.mrb[40].mxu0 %vm777_vm3, %v3285_v48 }
 0x478   : > { %20753 = vmatprep.mubr.msk.bf16.mxu0 %vm24093_vm1, %v29764_v14 }
 0x47a   : > { %v3033_v13 = vpop.f32.mrb[192].mxu0 }
 0x47b   : > { %v25897_v23 = vadd.f32 %v3033_v13, %v29851_v34  ;;  %v20645_v58 = vpop.f32.mrb[193].mxu0  ;;  %v3290_v13 = vrot.slane %v25520_v26, 1  ;;  %v29853_v34 = vld [vmem:[#allocation20_spill] sm:$0xff] }
 0x47c   : > { %v3036_v29 = vpop.f32.mrb[194].mxu0 }
 0x47d   : > { %v25901_v43 = vadd.f32 %v3036_v29, %v25514_v44  ;;  %v20646_v17 = vpop.f32.mrb[195].mxu0 }
 0x47e   : > { %v3291_v17 = vsel %vm1430_vm4, %v3288_v42, %v3290_v13 }
 0x47f   : > { %20754 = vmatmul.mubr.msk.bf16.gmra.mrb[44].mxu0 %vm777_vm3, %v3287_v24 }
 0x480   : > { %20757 = vmatprep.mubr.msk.bf16.mxu0 %vm24093_vm1, %v29764_v14 }
 0x482   : > { %v3041_v41 = vpop.f32.mrb[196].mxu0 }
 0x483   : > { %v25908_v8 = vadd.f32 %v3041_v41, %v29852_v18  ;;  %v20649_v27 = vpop.f32.mrb[197].mxu0  ;;  %v3292_v41 = vrot.slane %v25535_v52, 1  ;;  %v29854_v18 = vld [vmem:[#allocation27_spill] sm:$0xff] }
 0x484   : > { %v3044_v48 = vpop.f32.mrb[198].mxu0 }
 0x485   : > { %v25912_v11 = vadd.f32 %v3044_v48, %v25529_v62  ;;  %v20650_v44 = vpop.f32.mrb[199].mxu0 }
 0x486   : > { %v3293_v44 = vsel %vm1430_vm4, %v3290_v13, %v3292_v41 }
 0x487   : > { %20758 = vmatmul.mubr.msk.bf16.gmra.mrb[48].mxu0 %vm777_vm3, %v3289_v15 }
 0x488   : > { %20761 = vmatprep.mubr.msk.bf16.mxu0 %vm24093_vm1, %v29764_v14 }
 0x48a   : > { %v3049_v36 = vpop.f32.mrb[200].mxu0 }
 0x48b   : > { %v25919_v58 = vadd.f32 %v3049_v36, %v29853_v34  ;;  %v20653_v29 = vpop.f32.mrb[201].mxu0  ;;  %v3294_v36 = vrot.slane %v25550_v1, 1  ;;  %v29855_v34 = vld [vmem:[#allocation22_spill] sm:$0xff] }
 0x48c   : > { %v3052_v24 = vpop.f32.mrb[202].mxu0 }
 0x48d   : > { %v25923_v10 = vadd.f32 %v3052_v24, %v25544_v30  ;;  %v20654_v62 = vpop.f32.mrb[203].mxu0 }
 0x48e   : > { %v3295_v62 = vsel %vm1430_vm4, %v3292_v41, %v3294_v36 }
 0x48f   : > { %20762 = vmatmul.mubr.msk.bf16.gmra.mrb[52].mxu0 %vm777_vm3, %v3291_v17 }
 0x490   : > { %20765 = vmatprep.mubr.msk.bf16.mxu0 %vm24093_vm1, %v29764_v14 }
 0x492   : > { %v3057_v26 = vpop.f32.mrb[204].mxu0 }
 0x493   : > { %v25930_v27 = vadd.f32 %v3057_v26, %v29854_v18  ;;  %v20657_v48 = vpop.f32.mrb[205].mxu0  ;;  %v3296_v26 = vrot.slane %v25565_v16, 1  ;;  %v29856_v18 = vld [vmem:[#allocation23_spill] sm:$0xff] }
 0x494   : > { %v3060_v15 = vpop.f32.mrb[206].mxu0 }
 0x495   : > { %v25934_v42 = vadd.f32 %v3060_v15, %v25559_v32  ;;  %v20658_v30 = vpop.f32.mrb[207].mxu0 }
 0x496   : > { %v3297_v30 = vsel %vm1430_vm4, %v3294_v36, %v3296_v26 }
 0x497   : > { %20766 = vmatmul.mubr.msk.bf16.gmra.mrb[56].mxu0 %vm777_vm3, %v3293_v44 }
 0x498   : > { %20769 = vmatprep.mubr.msk.bf16.mxu0 %vm24093_vm1, %v29764_v14 }
 0x49a   : > { %v3065_v52 = vpop.f32.mrb[208].mxu0 }
 0x49b   : > { %v25941_v29 = vadd.f32 %v3065_v52, %v29855_v34  ;;  %v20661_v24 = vpop.f32.mrb[209].mxu0  ;;  %v3298_v52 = vrot.slane %v25580_v25, 1  ;;  %v29857_v34 = vld [vmem:[#allocation30_spill] sm:$0xff] }
 0x49c   : > { %v3068_v17 = vpop.f32.mrb[210].mxu0 }
 0x49d   : > { %v25945_v13 = vadd.f32 %v3068_v17, %v25574_v63  ;;  %v20662_v32 = vpop.f32.mrb[211].mxu0 }
 0x49e   : > { %v3299_v32 = vsel %vm1430_vm4, %v3296_v26, %v3298_v52 }
 0x49f   : > { %20770 = vmatmul.mubr.msk.bf16.gmra.mrb[60].mxu0 %vm777_vm3, %v3295_v62 }
 0x4a0   : > { %20773 = vmatprep.mubr.msk.bf16.mxu0 %vm24093_vm1, %v29764_v14 }
 0x4a2   : > { %v3073_v1 = vpop.f32.mrb[212].mxu0 }
 0x4a3   : > { %v25952_v48 = vadd.f32 %v3073_v1, %v29856_v18  ;;  %v20665_v15 = vpop.f32.mrb[213].mxu0  ;;  %v3300_v1 = vrot.slane %v25595_v12, 1  ;;  %v29858_v18 = vld [vmem:[#allocation25_spill] sm:$0xff]  ;;  %v3302_v12 = vrot.slane %v25610_v56, 1  ;;  %v3304_v56 = vrot.slane %v25625_v37, 1 }
 0x4a4   : > { %v3076_v44 = vpop.f32.mrb[214].mxu0 }
 0x4a5   : > { %v25956_v41 = vadd.f32 %v3076_v44, %v25589_v45  ;;  %v20666_v63 = vpop.f32.mrb[215].mxu0 }
 0x4a6   : > { %v3301_v63 = vsel %vm1430_vm4, %v3298_v52, %v3300_v1 }
 0x4a7   : > { %20774 = vmatmul.mubr.msk.bf16.gmra.mrb[64].mxu0 %vm777_vm3, %v3297_v30 }
 0x4a8   : > { %20777 = vmatprep.mubr.msk.bf16.mxu0 %vm24093_vm1, %v29764_v14 }
 0x4aa   : > { %v3081_v16 = vpop.f32.mrb[216].mxu0 }
 0x4ab   : > { %v25963_v24 = vadd.f32 %v3081_v16, %v29857_v34  ;;  %v20669_v17 = vpop.f32.mrb[217].mxu0  ;;  %v23333_v16 = vld [vmem:[%s29591_s2 + $0x38] sm:$0x1f]  }
 0x4ac   : > { %v3084_v62 = vpop.f32.mrb[218].mxu0  ;;  %v25988_v34 = vsel %vm859_vm0, %v23333_v16, 0 }
 0x4ad   : > { %v25967_v36 = vadd.f32 %v3084_v62, %v25604_v60  ;;  %v20670_v45 = vpop.f32.mrb[219].mxu0  ;;  %22252 = vmatpush3.bf16.msra.mxu1 %v25988_v34 }
 0x4ae   : > { %v3303_v45 = vsel %vm1430_vm4, %v3300_v1, %v3302_v12 }
 0x4af   : > { %20778 = vmatmul.mubr.msk.bf16.gmra.mrb[68].mxu0 %vm777_vm3, %v3299_v32 }
 0x4b0   : > { %20781 = vmatprep.mubr.msk.bf16.mxu0 %vm24093_vm1, %v29764_v14 }
 0x4b2   : > { %v3089_v25 = vpop.f32.mrb[220].mxu0 }
 0x4b3   : > { %v25974_v15 = vadd.f32 %v3089_v25, %v29858_v18  ;;  %v20673_v44 = vpop.f32.mrb[221].mxu0 }
 0x4b4   : > { %v3092_v30 = vpop.f32.mrb[222].mxu0 }
 0x4b5   : > { %v25978_v26 = vadd.f32 %v3092_v30, %v25619_v4  ;;  %v20674_v60 = vpop.f32.mrb[223].mxu0  ;;  %v29859_v4 = vld [vmem:[#allocation26_spill] sm:$0xff]  ;;  %v29860_v30 = vld [vmem:[#allocation33_spill] sm:$0xff] }
 0x4b7   : > { %20782 = vmatmul.mubr.msk.bf16.gmra.mrb[72].mxu0 %vm777_vm3, %v3301_v63 }
 0x4b8   : > { %20785 = vmatprep.mubr.msk.bf16.mxu0 %vm24093_vm1, %v29764_v14 }
 0x4ba   : > { %v3097_v17 = vpop.f32.mrb[224].mxu0 }
 0x4bb   : > { %v25992_v52 = vadd.f32 %v3097_v17, %v29859_v4  ;;  %v20677_v62 = vpop.f32.mrb[225].mxu0  ;;  %v3305_v17 = vsel %vm1430_vm4, %v3302_v12, %v3304_v56  ;;  %v3306_v4 = vrot.slane %v25640_v55, 1 }
 0x4bc   : > { %v3100_v32 = vpop.f32.mrb[226].mxu0  ;;  %v29861_v62 = vld [vmem:[#allocation28_spill] sm:$0xff] }
 0x4bd   : > { %v25996_v25 = vadd.f32 %v3100_v32, %v25634_v54  ;;  %v20678_v18 = vpop.f32.mrb[227].mxu0 }
 0x4bf   : > { %20786 = vmatmul.mubr.msk.bf16.gmra.mrb[76].mxu0 %vm777_vm3, %v3303_v45 }
 0x4c0   : > { %20789 = vmatprep.mubr.msk.bf16.mxu0 %vm24093_vm1, %v29764_v14 }
 0x4c2   : > { %v3105_v44 = vpop.f32.mrb[228].mxu0 }
 0x4c3   : > { %v26003_v63 = vadd.f32 %v3105_v44, %v29860_v30  ;;  %v20681_v60 = vpop.f32.mrb[229].mxu0  ;;  %v3307_v44 = vsel %vm1430_vm4, %v3304_v56, %v3306_v4  ;;  %v3308_v30 = vrot.slane %v25655_v9, 1 }
 0x4c4   : > { %v3108_v16 = vpop.f32.mrb[230].mxu0  ;;  %v29862_v60 = vld [vmem:[#allocation29_spill] sm:$0xff] }
 0x4c5   : > { %v26007_v1 = vadd.f32 %v3108_v16, %v25649_v28  ;;  %v20682_v54 = vpop.f32.mrb[231].mxu0 }
 0x4c7   : > { %20790 = vmatmul.mubr.msk.bf16.gmra.mrb[80].mxu0 %vm777_vm3, %v3305_v17 }
 0x4c8   : > { %20793 = vmatprep.mubr.msk.bf16.mxu0 %vm24093_vm1, %v29764_v14 }
 0x4ca   : > { %v3113_v37 = vpop.f32.mrb[232].mxu0 }
 0x4cb   : > { %v26014_v32 = vadd.f32 %v3113_v37, %v29861_v62  ;;  %v20685_v45 = vpop.f32.mrb[233].mxu0  ;;  %v3309_v37 = vsel %vm1430_vm4, %v3306_v4, %v3308_v30  ;;  %v3310_v62 = vrot.slane %v25670_v20, 1 }
 0x4cc   : > { %v3116_v18 = vpop.f32.mrb[234].mxu0  ;;  %v29863_v45 = vld [vmem:[#allocation31_spill] sm:$0xff] }
 0x4cd   : > { %v26018_v12 = vadd.f32 %v3116_v18, %v25664_v19  ;;  %v20686_v28 = vpop.f32.mrb[235].mxu0 }
 0x4cf   : > { %20794 = vmatmul.mubr.msk.bf16.gmra.mrb[84].mxu0 %vm777_vm3, %v3307_v44 }
 0x4d0   : > { %20797 = vmatprep.mubr.msk.bf16.mxu0 %vm24093_vm1, %v29764_v14 }
 0x4d2   : > { %v3121_v55 = vpop.f32.mrb[236].mxu0 }
 0x4d3   : > { %v26025_v16 = vadd.f32 %v3121_v55, %v29862_v60  ;;  %v20689_v17 = vpop.f32.mrb[237].mxu0  ;;  %v3311_v55 = vsel %vm1430_vm4, %v3308_v30, %v3310_v62  ;;  %v3312_v60 = vrot.slane %v25685_v46, 1 }
 0x4d4   : > { %v3124_v54 = vpop.f32.mrb[238].mxu0  ;;  %v29864_v17 = vld [vmem:[#allocation32_spill] sm:$0xff] }
 0x4d5   : > { %v26029_v56 = vadd.f32 %v3124_v54, %v25679_v53  ;;  %v20690_v19 = vpop.f32.mrb[239].mxu0 }
 0x4d7   : > { %20798 = vmatmul.mubr.msk.bf16.gmra.mrb[88].mxu0 %vm777_vm3, %v3309_v37 }
 0x4d8   : > { %20801 = vmatprep.mubr.msk.bf16.mxu0 %vm24093_vm1, %v29764_v14 }
 0x4da   : > { %v3129_v9 = vpop.f32.mrb[240].mxu0 }
 0x4db   : > { %v26036_v18 = vadd.f32 %v3129_v9, %v29863_v45  ;;  %v20693_v44 = vpop.f32.mrb[241].mxu0  ;;  %v3313_v9 = vsel %vm1430_vm4, %v3310_v62, %v3312_v60  ;;  %v3314_v45 = vrot.slane %v25700_v49, 1 }
 0x4dc   : > { %v3132_v28 = vpop.f32.mrb[242].mxu0  ;;  %v29865_v44 = vld [vmem:[#allocation6_spill] sm:$0xff] }
 0x4dd   : > { %v26040_v4 = vadd.f32 %v3132_v28, %v25694_v5  ;;  %v20694_v53 = vpop.f32.mrb[243].mxu0 }
 0x4df   : > { %20802 = vmatmul.mubr.msk.bf16.gmra.mrb[92].mxu0 %vm777_vm3, %v3311_v55 }
 0x4e0   : > { %20805 = vmatprep.mubr.msk.bf16.mxu0 %vm24093_vm1, %v29764_v14 }
 0x4e2   : > { %v3137_v20 = vpop.f32.mrb[244].mxu0 }
 0x4e3   : > { %v26047_v54 = vadd.f32 %v3137_v20, %v29864_v17  ;;  %v20697_v37 = vpop.f32.mrb[245].mxu0  ;;  %v3315_v20 = vsel %vm1430_vm4, %v3312_v60, %v3314_v45  ;;  %v3316_v17 = vrot.slane %v25715_v0, 1 }
 0x4e4   : > { %v3140_v19 = vpop.f32.mrb[246].mxu0  ;;  %v29866_v37 = vld [vmem:[#allocation7_spill] sm:$0xff] }
 0x4e5   : > { %v26051_v30 = vadd.f32 %v3140_v19, %v25709_v39  ;;  %v20698_v5 = vpop.f32.mrb[247].mxu0 }
 0x4e7   : > { %20806 = vmatmul.mubr.msk.bf16.gmra.mrb[96].mxu0 %vm777_vm3, %v3313_v9 }
 0x4e8   : > { %20809 = vmatprep.mubr.msk.bf16.mxu0 %vm24093_vm1, %v29764_v14 }
 0x4ea   : > { %v3145_v46 = vpop.f32.mrb[248].mxu0 }
 0x4eb   : > { %v26058_v28 = vadd.f32 %v3145_v46, %v29865_v44  ;;  %v20701_v55 = vpop.f32.mrb[249].mxu0  ;;  %v3317_v46 = vsel %vm1430_vm4, %v3314_v45, %v3316_v17  ;;  %v3318_v44 = vrot.slane %v25730_v3, 1 }
 0x4ec   : > { %v3148_v53 = vpop.f32.mrb[250].mxu0  ;;  %v29867_v55 = vld [vmem:[#allocation12_spill] sm:$0xff] }
 0x4ed   : > { %v26062_v62 = vadd.f32 %v3148_v53, %v25724_v7  ;;  %v20702_v39 = vpop.f32.mrb[251].mxu0 }
 0x4ef   : > { %20810 = vmatmul.mubr.msk.bf16.gmra.mrb[100].mxu0 %vm777_vm3, %v3315_v20 }
 0x4f0   : > { %20813 = vmatprep.mubr.msk.bf16.mxu0 %vm24093_vm1, %v29764_v14 }
 0x4f2   : > { %v3153_v49 = vpop.f32.mrb[252].mxu0 }
 0x4f3   : > { %v26069_v19 = vadd.f32 %v3153_v49, %v29866_v37  ;;  %v20705_v9 = vpop.f32.mrb[253].mxu0  ;;  %v3319_v49 = vsel %vm1430_vm4, %v3316_v17, %v3318_v44  ;;  %v3320_v37 = vrot.slane %v25745_v31, 1 }
 0x4f4   : > { %v3156_v5 = vpop.f32.mrb[254].mxu0  ;;  %v29868_v9 = vld [vmem:[#allocation35_spill] sm:$0xff] }
 0x4f5   : > { %v26073_v60 = vadd.f32 %v3156_v5, %v25739_v33  ;;  %v20706_v7 = vpop.f32.mrb[255].mxu0 }
 0x4f7   : > { %20814 = vmatmul.mubr.msk.bf16.gmra.mrb[104].mxu0 %vm777_vm3, %v3317_v46 }
 0x4f8   : > { %20817 = vmatprep.mubr.msk.bf16.mxu0 %vm24093_vm1, %v29764_v14 }
 0x4fa   : > { %v3161_v0 = vpop.f32.mrb[0].mxu0 }
 0x4fb   : > { %v26080_v53 = vadd.f32 %v3161_v0, %v29867_v55  ;;  %v20709_v20 = vpop.f32.mrb[1].mxu0  ;;  %v3321_v0 = vsel %vm1430_vm4, %v3318_v44, %v3320_v37  ;;  %v29870_v55 = vld [vmem:[#allocation34_spill] sm:$0xff] }
 0x4fc   : > { %v3164_v39 = vpop.f32.mrb[2].mxu0  ;;  %v3322_v20 = vrot.slane %v29870_v55, 1  ;;  %v29873_v44 = vld [vmem:[#allocation38_spill] sm:$0xff]  ;;  %v29876_v55 = vld [vmem:[#allocation8_spill] sm:$0xff] }
 0x4fd   : > { %v26084_v45 = vadd.f32 %v3164_v39, %v25754_v2  ;;  %v20710_v33 = vpop.f32.mrb[3].mxu0  ;;  %v29871_v39 = vld [vmem:[#allocation37_spill] sm:$0xff] }
 0x4ff   : > { %20818 = vmatmul.mubr.msk.bf16.gmra.mrb[108].mxu0 %vm777_vm3, %v3319_v49 }
 0x500   : > { %20821 = vmatprep.mubr.msk.bf16.mxu0 %vm24093_vm1, %v29764_v14 }
 0x502   : > { %v3169_v3 = vpop.f32.mrb[4].mxu0 }
 0x503   : > { %v26091_v5 = vadd.f32 %v3169_v3, %v29868_v9  ;;  %v20713_v46 = vpop.f32.mrb[5].mxu0  ;;  %v3323_v9 = vsel %vm1430_vm4, %v3320_v37, %v3322_v20  ;;  %v29878_v37 = vld [vmem:[#allocation9_spill] sm:$0xff] }
 0x504   : > { %v3172_v7 = vpop.f32.mrb[6].mxu0 }
 0x505   : > { %v26095_v17 = vadd.f32 %v3172_v7, %v25769_v59  ;;  %v20714_v2 = vpop.f32.mrb[7].mxu0  ;;  %v29875_v7 = vld [vmem:[#allocation36_spill] sm:$0xff] }
 0x507   : > { %29869 = vst [vmem:[#allocation13_spill] sm:$0xff] %v26095_v17  ;;  %20822 = vmatmul.mubr.msk.bf16.gmra.mrb[112].mxu0 %vm777_vm3, %v3321_v0  ;;  %v3324_v0 = vrot.slane %v29875_v7, 1  ;;  %v29881_v7 = vld [vmem:[#allocation15_spill] sm:$0xff] }
 0x508   : > { %20825 = vmatprep.mubr.msk.bf16.mxu0 %vm24093_vm1, %v29764_v14 }
 0x50a   : > { %v3177_v31 = vpop.f32.mrb[8].mxu0 }
 0x50b   : > { %v26102_v49 = vadd.f32 %v3177_v31, %v29871_v39  ;;  %v20717_v33 = vpop.f32.mrb[9].mxu0 }
 0x50c   : > { %v3180_v3 = vpop.f32.mrb[10].mxu0  ;;  %v3325_v33 = vsel %vm1430_vm4, %v3322_v20, %v3324_v0  ;;  %v29882_v20 = vld [vmem:[#allocation10_spill] sm:$0xff] }
 0x50d   : > { %29872 = vst [vmem:[#allocation11_spill] sm:$0xff] %v26102_v49  ;;  %v26106_v46 = vadd.f32 %v3180_v3, %v29873_v44  ;;  %v20718_v59 = vpop.f32.mrb[11].mxu0 }
 0x50f   : > { %29874 = vst [vmem:[#allocation14_spill] sm:$0xff] %v26106_v46  ;;  %20826 = vmatmul.mubr.msk.bf16.gmra.mrb[116].mxu0 %vm777_vm3, %v3323_v9  ;;  %v29880_v9 = vld [vmem:[#allocation39_spill] sm:$0xff] }
 0x510   : > { %20829 = vmatprep.mubr.msk.bf16.mxu0 %vm24093_vm1, %v29764_v14  ;;  %v3326_v44 = vrot.slane %v29880_v9, 1  ;;  %v29884_v9 = vld [vmem:[#allocation18_spill] sm:$0xff] }
 0x512   : > { %v3185_v2 = vpop.f32.mrb[12].mxu0 }
 0x513   : > { %v26113_v17 = vadd.f32 %v3185_v2, %v29876_v55  ;;  %v20721_v31 = vpop.f32.mrb[13].mxu0 }
 0x514   : > { %v3188_v39 = vpop.f32.mrb[14].mxu0  ;;  %v3327_v31 = vsel %vm1430_vm4, %v3324_v0, %v3326_v44 }
 0x515   : > { %29877 = vst [vmem:[#allocation21_spill] sm:$0xff] %v26113_v17  ;;  %v26117_v49 = vadd.f32 %v3188_v39, %v29878_v37  ;;  %v20722_v3 = vpop.f32.mrb[15].mxu0 }
 0x517   : > { %29879 = vst [vmem:[#allocation16_spill] sm:$0xff] %v26117_v49  ;;  %20830 = vmatmul.mubr.msk.bf16.gmra.mrb[120].mxu0 %vm777_vm3, %v3325_v33  ;;  %v29883_v33 = vld [vmem:[#allocation40_spill] sm:$0xff] }
 0x518   : > { %20833 = vmatprep.mubr.msk.bf16.mxu0 %vm24093_vm1, %v29764_v14  ;;  %v3328_v37 = vrot.slane %v29883_v33, 1 }
 0x51a   : > { %v3193_v59 = vpop.f32.mrb[16].mxu0 }
 0x51b   : > { %v26124_v46 = vadd.f32 %v3193_v59, %v29881_v7  ;;  %v20725_v2 = vpop.f32.mrb[17].mxu0 }
 0x51c   : > { %v3196_v55 = vpop.f32.mrb[18].mxu0  ;;  %v3329_v2 = vsel %vm1430_vm4, %v3326_v44, %v3328_v37 }
 0x51d   : > { %v26128_v17 = vadd.f32 %v3196_v55, %v29882_v20  ;;  %v20726_v39 = vpop.f32.mrb[19].mxu0 }
 0x51f   : > { %20834 = vmatmul.mubr.msk.bf16.gmra.mrb[124].mxu0 %vm777_vm3, %v3327_v31  ;;  %v29885_v31 = vld [vmem:[#allocation41_spill] sm:$0xff] }
 0x520   : > { %20837 = vmatprep.mubr.msk.bf16.mxu0 %vm24093_vm1, %v29764_v14  ;;  %v3330_v20 = vrot.slane %v29885_v31, 1 }
 0x522   : > { %v3201_v3 = vpop.f32.mrb[20].mxu0  ;;  %v3331_v44 = vsel %vm1430_vm4, %v3328_v37, %v3330_v20 }
 0x523   : > { %v26135_v49 = vadd.f32 %v3201_v3, %v29884_v9  ;;  %v20729_v59 = vpop.f32.mrb[21].mxu0 }
 0x524   : > { %v3204_v7 = vpop.f32.mrb[22].mxu0 }
 0x525   : > { %v26139_v0 = vadd.f32 %v3204_v7, %v25829_v47  ;;  %v20730_v55 = vpop.f32.mrb[23].mxu0 }
 0x526   : > { %v23332_v55 = vld [vmem:[%s24214_s25 + $0x18] sm:$0xff]  }
 0x527   : > { %20838 = vmatmul.mubr.msk.bf16.gmra.mrb[128].mxu0 %vm777_vm3, %v3329_v2 }
 0x528   : > { %20841 = vmatprep.mubr.msk.bf16.mxu0 %vm24093_vm1, %v29764_v14 }
 0x52a   : > { %v3209_v39 = vpop.f32.mrb[24].mxu0 }
 0x52b   : > { %v26146_v33 = vadd.f32 %v3209_v39, %v25836_v40  ;;  %v20733_v3 = vpop.f32.mrb[25].mxu0 }
 0x52c   : > { %v3212_v9 = vpop.f32.mrb[26].mxu0  ;;  %v23334_v3 = vld [vmem:[%s24214_s25 + $0x20] sm:$0xff]  }
 0x52d   : > { %v26150_v47 = vadd.f32 %v3212_v9, %v25841_v35  ;;  %v20734_v59 = vpop.f32.mrb[27].mxu0 }
 0x52f   : > { %20842 = vmatmul.mubr.msk.bf16.gmra.mrb[132].mxu0 %vm777_vm3, %v3331_v44 }
 0x530   : > { %20847 = vmatprep.mubr.msk.bf16.mxu0 %vm24093_vm1, %v29764_v14 }
 0x532   : > { %v3455_v7 = vpop.f32.mrb[28].mxu0 }
 0x533   : > { %v26156_v2 = vadd.f32 %v3455_v7, %v25851_v50  ;;  %v20739_v40 = vpop.f32.mrb[29].mxu0  ;;  %v23335_v7 = vld [vmem:[%s24214_s25 + $0x28] sm:$0xff]  }
 0x534   : > { %v3458_v31 = vpop.f32.mrb[30].mxu0 }
 0x535   : > { %v26160_v39 = vadd.f32 %v3458_v31, %v25855_v61  ;;  %v20740_v37 = vpop.f32.mrb[31].mxu0 }
 0x537   : > { %20848 = vmatmul.mubr.msk.bf16.vlgmr.msra.gmra.mrb[136].mxu0 %vm777_vm3, %v23332_v55 }
 0x538   : > { %20956 = vmatpush3.bf16.msra.mxu0 %v25988_v34  ;;  %20851 = vmatprep.mubr.msk.bf16.mxu0 %vm24093_vm1, %v29764_v14 }
 0x539   : > { %21065 = vmatprep.subr.bf16.mxu0 %v29764_v14 }
 0x53a   : > { %v3463_v35 = vpop.f32.mrb[32].mxu0 }
 0x53b   : > { %v26168_v50 = vadd.f32 %v3463_v35, %v25864_v51  ;;  %v20743_v20 = vpop.f32.mrb[33].mxu0  ;;  %v23355_v35 = vld [vmem:[%s24214_s25 + $0xb8] sm:$0xff]  }
 0x53c   : > { %v3466_v61 = vpop.f32.mrb[34].mxu0 }
 0x53d   : > { %v26172_v9 = vadd.f32 %v3466_v61, %v25868_v22  ;;  %v20744_v44 = vpop.f32.mrb[35].mxu0  ;;  %v23354_v22 = vld [vmem:[%s24214_s25 + $0xb0] sm:$0xff]  }
 0x53e   : > { %v4656_v20 = vshll.u32 %v23354_v22, 16  ;;  %v23336_v61 = vld [vmem:[%s24214_s25 + $0x30] sm:$0xff]  }
 0x53f   : > { %20852 = vmatmul.mubr.msk.bf16.gmra.mrb[140].mxu0 %vm777_vm3, %v23334_v3 }
 0x540   : > { %20855 = vmatprep.mubr.msk.bf16.mxu0 %vm24093_vm1, %v29764_v14 }
 0x542   : > { %v3471_v34 = vpop.f32.mrb[36].mxu0 }
 0x543   : > { %v26178_v59 = vadd.f32 %v3471_v34, %v25875_v57  ;;  %v20747_v51 = vpop.f32.mrb[37].mxu0  ;;  %v26193_v34 = vrot.slane %v4656_v20, 1 }
 0x544   : > { %v3474_v40 = vpop.f32.mrb[38].mxu0  ;;  %v4664_v51 = vshll.u32 %v23355_v35, 16 }
 0x545   : > { %v26182_v55 = vadd.f32 %v3474_v40, %v25879_v6  ;;  %v20748_v31 = vpop.f32.mrb[39].mxu0  ;;  %v4660_v6 = vshrl.u32 %v23354_v22, 16  ;;  %v23357_v22 = vld [vmem:[%s24214_s25 + $0xc0] sm:$0xff]  }
 0x547   : > { %29886 = vst [vmem:[#allocation17_spill] sm:$0xff] %v26182_v55  ;;  %20856 = vmatmul.mubr.msk.bf16.gmra.mrb[144].mxu0 %vm777_vm3, %v23335_v7  ;;  %v4662_v31 = vor.u32 %v4660_v6, %v26193_v34  ;;  %v4666_v55 = vrot.slane %v4664_v51, 1  ;;  %v4672_v6 = vshll.u32 %v23357_v22, 16 }
 0x548   : > { %20859 = vmatprep.mubr.msk.bf16.mxu0 %vm24093_vm1, %v29764_v14 }
 0x54a   : > { %v3479_v37 = vpop.f32.mrb[40].mxu0 }
 0x54b   : > { %v26190_v3 = vadd.f32 %v3479_v37, %v25886_v21  ;;  %v20751_v57 = vpop.f32.mrb[41].mxu0  ;;  %v4667_v21 = vsel %vm551_vm2, %v4662_v31, %v4666_v55 }
 0x54c   : > { %v3482_v44 = vpop.f32.mrb[42].mxu0  ;;  %21034 = vmatmul.mubr.msk.bf16.vlgmr.msra.gmra.mrb[0].mxu1 %vm777_vm3, %v4667_v21  ;;  %v23337_v57 = vld [vmem:[%s24214_s25 + $0x38] sm:$0xff]   ;;  %v4674_v21 = vrot.slane %v4672_v6, 1 }
 0x54d   : > { %v26196_v7 = vadd.f32 %v3482_v44, %v25890_v38  ;;  %v20752_v40 = vpop.f32.mrb[43].mxu0  ;;  %21037 = vmatprep.mubr.msk.bf16.mxu1 %vm24093_vm1, %v29764_v14 }
 0x54f   : > { %20860 = vmatmul.mubr.msk.bf16.gmra.mrb[148].mxu0 %vm777_vm3, %v23336_v61  ;;  %v4668_v61 = vshrl.u32 %v23355_v35, 16  ;;  %v23359_v35 = vld [vmem:[%s24214_s25 + $0xc8] sm:$0xff]  }
 0x550   : > { %20863 = vmatprep.mubr.msk.bf16.mxu0 %vm24093_vm1, %v29764_v14 }
 0x551   : > { %v4670_v31 = vor.u32 %v4668_v61, %v4666_v55  ;;  %v4680_v61 = vshll.u32 %v23359_v35, 16 }
 0x552   : > { %v3487_v37 = vpop.f32.mrb[44].mxu0 }
 0x553   : > { %v26208_v38 = vadd.f32 %v3487_v37, %v25897_v23  ;;  %v20755_v20 = vpop.f32.mrb[45].mxu0  ;;  %v4675_v23 = vsel %vm551_vm2, %v4670_v31, %v4674_v21 }
 0x554   : > { %v3490_v44 = vpop.f32.mrb[46].mxu0  ;;  %21038 = vmatmul.mubr.msk.bf16.gmra.mrb[4].mxu1 %vm777_vm3, %v4675_v23  ;;  %v23338_v20 = vld [vmem:[%s24214_s25 + $0x40] sm:$0xff]   ;;  %v4682_v23 = vrot.slane %v4680_v61, 1 }
 0x555   : > { %v26212_v51 = vadd.f32 %v3490_v44, %v25901_v43  ;;  %v20756_v40 = vpop.f32.mrb[47].mxu0  ;;  %21041 = vmatprep.mubr.msk.bf16.mxu1 %vm24093_vm1, %v29764_v14 }
 0x557   : > { %20864 = vmatmul.mubr.msk.bf16.gmra.mrb[152].mxu0 %vm777_vm3, %v23337_v57  ;;  %v4676_v57 = vshrl.u32 %v23357_v22, 16  ;;  %v23361_v22 = vld [vmem:[%s24214_s25 + $0xd0] sm:$0xff]  }
 0x558   : > { %20867 = vmatprep.mubr.msk.bf16.mxu0 %vm24093_vm1, %v29764_v14 }
 0x559   : > { %v4678_v31 = vor.u32 %v4676_v57, %v4674_v21  ;;  %v4688_v57 = vshll.u32 %v23361_v22, 16 }
 0x55a   : > { %v3495_v37 = vpop.f32.mrb[48].mxu0 }
 0x55b   : > { %v26223_v43 = vadd.f32 %v3495_v37, %v25908_v8  ;;  %v20759_v55 = vpop.f32.mrb[49].mxu0  ;;  %v4683_v8 = vsel %vm551_vm2, %v4678_v31, %v4682_v23 }
 0x55c   : > { %v3498_v44 = vpop.f32.mrb[50].mxu0  ;;  %21042 = vmatmul.mubr.msk.bf16.gmra.mrb[8].mxu1 %vm777_vm3, %v4683_v8  ;;  %v23339_v55 = vld [vmem:[%s24214_s25 + $0x48] sm:$0xff]   ;;  %v4690_v8 = vrot.slane %v4688_v57, 1 }
 0x55d   : > { %v26227_v6 = vadd.f32 %v3498_v44, %v25912_v11  ;;  %v20760_v40 = vpop.f32.mrb[51].mxu0  ;;  %21045 = vmatprep.mubr.msk.bf16.mxu1 %vm24093_vm1, %v29764_v14 }
 0x55f   : > { %20868 = vmatmul.mubr.msk.bf16.gmra.mrb[156].mxu0 %vm777_vm3, %v23338_v20  ;;  %v4684_v20 = vshrl.u32 %v23359_v35, 16  ;;  %v23363_v35 = vld [vmem:[%s24214_s25 + $0xd8] sm:$0xff]  }
 0x560   : > { %20871 = vmatprep.mubr.msk.bf16.mxu0 %vm24093_vm1, %v29764_v14 }
 0x561   : > { %v4686_v31 = vor.u32 %v4684_v20, %v4682_v23  ;;  %v4696_v20 = vshll.u32 %v23363_v35, 16 }
 0x562   : > { %v3503_v37 = vpop.f32.mrb[52].mxu0 }
 0x563   : > { %v26238_v11 = vadd.f32 %v3503_v37, %v25919_v58  ;;  %v20763_v21 = vpop.f32.mrb[53].mxu0  ;;  %v4691_v58 = vsel %vm551_vm2, %v4686_v31, %v4690_v8 }
 0x564   : > { %v3506_v44 = vpop.f32.mrb[54].mxu0  ;;  %21046 = vmatmul.mubr.msk.bf16.gmra.mrb[12].mxu1 %vm777_vm3, %v4691_v58  ;;  %v23340_v21 = vld [vmem:[%s24214_s25 + $0x50] sm:$0xff]   ;;  %v4698_v58 = vrot.slane %v4696_v20, 1 }
 0x565   : > { %v26242_v61 = vadd.f32 %v3506_v44, %v25923_v10  ;;  %v20764_v40 = vpop.f32.mrb[55].mxu0  ;;  %21049 = vmatprep.mubr.msk.bf16.mxu1 %vm24093_vm1, %v29764_v14 }
 0x567   : > { %20872 = vmatmul.mubr.msk.bf16.gmra.mrb[160].mxu0 %vm777_vm3, %v23339_v55  ;;  %v4692_v55 = vshrl.u32 %v23361_v22, 16  ;;  %v23365_v22 = vld [vmem:[%s24214_s25 + $0xe0] sm:$0xff]  }
 0x568   : > { %20875 = vmatprep.mubr.msk.bf16.mxu0 %vm24093_vm1, %v29764_v14 }
 0x569   : > { %v4694_v31 = vor.u32 %v4692_v55, %v4690_v8  ;;  %v4704_v55 = vshll.u32 %v23365_v22, 16 }
 0x56a   : > { %v3511_v37 = vpop.f32.mrb[56].mxu0 }
 0x56b   : > { %v26253_v10 = vadd.f32 %v3511_v37, %v25930_v27  ;;  %v20767_v23 = vpop.f32.mrb[57].mxu0  ;;  %v4699_v27 = vsel %vm551_vm2, %v4694_v31, %v4698_v58 }
 0x56c   : > { %v3514_v44 = vpop.f32.mrb[58].mxu0  ;;  %21050 = vmatmul.mubr.msk.bf16.gmra.mrb[16].mxu1 %vm777_vm3, %v4699_v27  ;;  %v23341_v23 = vld [vmem:[%s24214_s25 + $0x58] sm:$0xff]   ;;  %v4706_v27 = vrot.slane %v4704_v55, 1 }
 0x56d   : > { %v26257_v57 = vadd.f32 %v3514_v44, %v25934_v42  ;;  %v20768_v40 = vpop.f32.mrb[59].mxu0  ;;  %21053 = vmatprep.mubr.msk.bf16.mxu1 %vm24093_vm1, %v29764_v14  ;;  %v4700_v44 = vshrl.u32 %v23363_v35, 16  ;;  %v23367_v35 = vld [vmem:[%s24214_s25 + $0xe8] sm:$0xff]  }
 0x56f   : > { %20876 = vmatmul.mubr.msk.bf16.gmra.mrb[164].mxu0 %vm777_vm3, %v23340_v21  ;;  %v4702_v31 = vor.u32 %v4700_v44, %v4698_v58  ;;  %v4712_v44 = vshll.u32 %v23367_v35, 16 }
 0x570   : > { %20879 = vmatprep.mubr.msk.bf16.mxu0 %vm24093_vm1, %v29764_v14 }
 0x572   : > { %v3519_v37 = vpop.f32.mrb[60].mxu0 }
 0x573   : > { %v26268_v42 = vadd.f32 %v3519_v37, %v25941_v29  ;;  %v20771_v8 = vpop.f32.mrb[61].mxu0  ;;  %v4707_v29 = vsel %vm551_vm2, %v4702_v31, %v4706_v27 }
 0x574   : > { %v3522_v21 = vpop.f32.mrb[62].mxu0  ;;  %21054 = vmatmul.mubr.msk.bf16.gmra.mrb[20].mxu1 %vm777_vm3, %v4707_v29  ;;  %v4714_v29 = vrot.slane %v4712_v44, 1 }
 0x575   : > { %v26272_v20 = vadd.f32 %v3522_v21, %v25945_v13  ;;  %v20772_v40 = vpop.f32.mrb[63].mxu0  ;;  %21057 = vmatprep.mubr.msk.bf16.mxu1 %vm24093_vm1, %v29764_v14  ;;  %v23342_v13 = vld [vmem:[%s24214_s25 + $0x60] sm:$0xff]   ;;  %v4708_v21 = vshrl.u32 %v23365_v22, 16  ;;  %v23369_v22 = vld [vmem:[%s24214_s25 + $0xf0] ss:$0 sps:$4 sm:$0x11]  }
 0x577   : > { %20880 = vmatmul.mubr.msk.bf16.gmra.mrb[168].mxu0 %vm777_vm3, %v23341_v23  ;;  %v4710_v31 = vor.u32 %v4708_v21, %v4706_v27  ;;  %v4720_v21 = vshll.u32 %v23369_v22, 16 }
 0x578   : > { %20883 = vmatprep.mubr.msk.bf16.mxu0 %vm24093_vm1, %v29764_v14 }
 0x57a   : > { %v3527_v37 = vpop.f32.mrb[64].mxu0 }
 0x57b   : > { %v20775_v8 = vpop.f32.mrb[65].mxu0  ;;  %v26284_v58 = vadd.f32 %v3527_v37, %v25952_v48 }
 0x57c   : > { %v3530_v23 = vpop.f32.mrb[66].mxu0  ;;  %v4715_v8 = vsel %vm551_vm2, %v4710_v31, %v4714_v29 }
 0x57d   : > { %v20776_v55 = vpop.f32.mrb[67].mxu0  ;;  %v26287_v40 = vadd.f32 %v3530_v23, %v25956_v41  ;;  %21058 = vmatmul.mubr.msk.bf16.gmra.mrb[24].mxu1 %vm777_vm3, %v4715_v8  ;;  %v23343_v41 = vld [vmem:[%s24214_s25 + $0x68] sm:$0xff]   ;;  %v4722_v8 = vrot.slane %v4720_v21, 1  ;;  %v23345_v21 = vld [vmem:[%s24214_s25 + $0x78] sm:$0xff]  }
 0x57e   : > { %21061 = vmatprep.mubr.msk.bf16.mxu1 %vm24093_vm1, %v29764_v14 }
 0x57f   : > { %20884 = vmatmul.mubr.msk.bf16.gmra.mrb[172].mxu0 %vm777_vm3, %v23342_v13  ;;  %v4716_v13 = vshrl.u32 %v23367_v35, 16  ;;  %v23344_v35 = vld [vmem:[%s24214_s25 + $0x70] sm:$0xff]  }
 0x580   : > { %20887 = vmatprep.mubr.msk.bf16.mxu0 %vm24093_vm1, %v29764_v14 }
 0x581   : > { %v4718_v31 = vor.u32 %v4716_v13, %v4714_v29 }
 0x582   : > { %v3535_v48 = vpop.f32.mrb[68].mxu0 }
 0x583   : > { %v20779_v37 = vpop.f32.mrb[69].mxu0  ;;  %v26299_v27 = vadd.f32 %v3535_v48, %v25963_v24 }
 0x584   : > { %v3538_v23 = vpop.f32.mrb[70].mxu0  ;;  %v4723_v37 = vsel %vm551_vm2, %v4718_v31, %v4722_v8 }
 0x585   : > { %v20780_v44 = vpop.f32.mrb[71].mxu0  ;;  %v26302_v55 = vadd.f32 %v3538_v23, %v25967_v36  ;;  %21062 = vmatmul.mubr.msk.bf16.gmra.mrb[28].mxu1 %vm777_vm3, %v4723_v37 }
 0x587   : > { %20888 = vmatmul.mubr.msk.bf16.gmra.mrb[176].mxu0 %vm777_vm3, %v23343_v41 }
 0x588   : > { %20891 = vmatprep.mubr.msk.bf16.mxu0 %vm24093_vm1, %v29764_v14 }
 0x58a   : > { %v3543_v24 = vpop.f32.mrb[72].mxu0 }
 0x58b   : > { %v20783_v48 = vpop.f32.mrb[73].mxu0  ;;  %v26311_v22 = vadd.f32 %v3543_v24, %v25974_v15  ;;  %v23346_v24 = vld [vmem:[%s24214_s25 + $0x80] sm:$0xff]  }
 0x58c   : > { %v3546_v36 = vpop.f32.mrb[74].mxu0 }
 0x58d   : > { %v20784_v29 = vpop.f32.mrb[75].mxu0  ;;  %v26314_v23 = vadd.f32 %v3546_v36, %v25978_v26 }
 0x58f   : > { %20892 = vmatmul.mubr.msk.bf16.gmra.mrb[180].mxu0 %vm777_vm3, %v23344_v35 }
 0x590   : > { %20895 = vmatprep.mubr.msk.bf16.mxu0 %vm24093_vm1, %v29764_v14 }
 0x592   : > { %v3551_v41 = vpop.f32.mrb[76].mxu0 }
 0x593   : > { %v20787_v13 = vpop.f32.mrb[77].mxu0  ;;  %v26321_v44 = vadd.f32 %v3551_v41, %v25992_v52  ;;  %v23347_v41 = vld [vmem:[%s24214_s25 + $0x88] sm:$0xff]  }
 0x594   : > { %v3554_v31 = vpop.f32.mrb[78].mxu0 }
 0x595   : > { %v20788_v15 = vpop.f32.mrb[79].mxu0  ;;  %v26324_v8 = vadd.f32 %v3554_v31, %v25996_v25 }
 0x597   : > { %20896 = vmatmul.mubr.msk.bf16.gmra.mrb[184].mxu0 %vm777_vm3, %v23345_v21 }
 0x598   : > { %20899 = vmatprep.mubr.msk.bf16.mxu0 %vm24093_vm1, %v29764_v14 }
 0x59a   : > { %v3559_v26 = vpop.f32.mrb[80].mxu0 }
 0x59b   : > { %v20791_v37 = vpop.f32.mrb[81].mxu0  ;;  %v26331_v48 = vadd.f32 %v3559_v26, %v26003_v63  ;;  %v23348_v26 = vld [vmem:[%s24214_s25 + $0x90] sm:$0xff]  }
 0x59c   : > { %v3562_v35 = vpop.f32.mrb[82].mxu0 }
 0x59d   : > { %v20792_v52 = vpop.f32.mrb[83].mxu0  ;;  %v26334_v36 = vadd.f32 %v3562_v35, %v26007_v1 }
 0x59f   : > { %20900 = vmatmul.mubr.msk.bf16.gmra.mrb[188].mxu0 %vm777_vm3, %v23346_v24 }
 0x5a0   : > { %20903 = vmatprep.mubr.msk.bf16.mxu0 %vm24093_vm1, %v29764_v14 }
 0x5a2   : > { %v3567_v25 = vpop.f32.mrb[84].mxu0 }
 0x5a3   : > { %v20795_v29 = vpop.f32.mrb[85].mxu0  ;;  %v26341_v13 = vadd.f32 %v3567_v25, %v26014_v32  ;;  %v23349_v25 = vld [vmem:[%s24214_s25 + $0x98] sm:$0xff]  }
 0x5a4   : > { %v3570_v21 = vpop.f32.mrb[86].mxu0 }
 0x5a5   : > { %v20796_v63 = vpop.f32.mrb[87].mxu0  ;;  %v26344_v31 = vadd.f32 %v3570_v21, %v26018_v12 }
 0x5a7   : > { %20904 = vmatmul.mubr.msk.bf16.gmra.mrb[192].mxu0 %vm777_vm3, %v23347_v41 }
 0x5a8   : > { %20907 = vmatprep.mubr.msk.bf16.mxu0 %vm24093_vm1, %v29764_v14 }
 0x5aa   : > { %v3575_v1 = vpop.f32.mrb[88].mxu0 }
 0x5ab   : > { %v20799_v15 = vpop.f32.mrb[89].mxu0  ;;  %v26351_v37 = vadd.f32 %v3575_v1, %v26025_v16  ;;  %v23350_v1 = vld [vmem:[%s24214_s25 + $0xa0] sm:$0xff]  }
 0x5ac   : > { %v3578_v24 = vpop.f32.mrb[90].mxu0 }
 0x5ad   : > { %v20800_v32 = vpop.f32.mrb[91].mxu0  ;;  %v26354_v35 = vadd.f32 %v3578_v24, %v26029_v56 }
 0x5af   : > { %20908 = vmatmul.mubr.msk.bf16.gmra.mrb[196].mxu0 %vm777_vm3, %v23348_v26 }
 0x5b0   : > { %20911 = vmatprep.mubr.msk.bf16.mxu0 %vm24093_vm1, %v29764_v14 }
 0x5b2   : > { %v3583_v12 = vpop.f32.mrb[92].mxu0 }
 0x5b3   : > { %v20803_v52 = vpop.f32.mrb[93].mxu0  ;;  %v26361_v29 = vadd.f32 %v3583_v12, %v26036_v18  ;;  %v23351_v12 = vld [vmem:[%s24214_s25 + $0xa8] sm:$0xff]  }
 0x5b4   : > { %v3586_v41 = vpop.f32.mrb[94].mxu0 }
 0x5b5   : > { %v20804_v16 = vpop.f32.mrb[95].mxu0  ;;  %v26364_v21 = vadd.f32 %v3586_v41, %v26040_v4 }
 0x5b7   : > { %20912 = vmatmul.mubr.msk.bf16.gmra.mrb[200].mxu0 %vm777_vm3, %v23349_v25 }
 0x5b8   : > { %20915 = vmatprep.mubr.msk.bf16.mxu0 %vm24093_vm1, %v29764_v14 }
 0x5ba   : > { %v3591_v56 = vpop.f32.mrb[96].mxu0 }
 0x5bb   : > { %v20807_v63 = vpop.f32.mrb[97].mxu0  ;;  %v26371_v15 = vadd.f32 %v3591_v56, %v26047_v54  ;;  %v23352_v56 = vld [vmem:[%s24214_s25 + $0xb0] sm:$0xff]  }
 0x5bc   : > { %v3594_v26 = vpop.f32.mrb[98].mxu0 }
 0x5bd   : > { %v20808_v18 = vpop.f32.mrb[99].mxu0  ;;  %v26374_v24 = vadd.f32 %v3594_v26, %v26051_v30 }
 0x5bf   : > { %20916 = vmatmul.mubr.msk.bf16.gmra.mrb[204].mxu0 %vm777_vm3, %v23350_v1 }
 0x5c0   : > { %20919 = vmatprep.mubr.msk.bf16.mxu0 %vm24093_vm1, %v29764_v14 }
 0x5c2   : > { %v3599_v4 = vpop.f32.mrb[100].mxu0 }
 0x5c3   : > { %v20811_v32 = vpop.f32.mrb[101].mxu0  ;;  %v26381_v52 = vadd.f32 %v3599_v4, %v26058_v28  ;;  %v23356_v4 = vld [vmem:[%s24214_s25 + $0xb8] sm:$0xff]  }
 0x5c4   : > { %v3602_v25 = vpop.f32.mrb[102].mxu0 }
 0x5c5   : > { %v20812_v54 = vpop.f32.mrb[103].mxu0  ;;  %v26384_v41 = vadd.f32 %v3602_v25, %v26062_v62 }
 0x5c7   : > { %20920 = vmatmul.mubr.msk.bf16.gmra.mrb[208].mxu0 %vm777_vm3, %v23351_v12 }
 0x5c8   : > { %20923 = vmatprep.mubr.msk.bf16.mxu0 %vm24093_vm1, %v29764_v14 }
 0x5ca   : > { %v3607_v30 = vpop.f32.mrb[104].mxu0 }
 0x5cb   : > { %v20815_v16 = vpop.f32.mrb[105].mxu0  ;;  %v26391_v63 = vadd.f32 %v3607_v30, %v26069_v19  ;;  %v23358_v30 = vld [vmem:[%s24214_s25 + $0xc0] sm:$0xff]  }
 0x5cc   : > { %v3610_v1 = vpop.f32.mrb[106].mxu0 }
 0x5cd   : > { %v20816_v28 = vpop.f32.mrb[107].mxu0  ;;  %v26394_v26 = vadd.f32 %v3610_v1, %v26073_v60  ;;  %v29887_v1 = vld [vmem:[#allocation13_spill] sm:$0xff] }
 0x5cf   : > { %20924 = vmatmul.mubr.msk.bf16.gmra.mrb[212].mxu0 %vm777_vm3, %v23352_v56 }
 0x5d0   : > { %20927 = vmatprep.mubr.msk.bf16.mxu0 %vm24093_vm1, %v29764_v14 }
 0x5d2   : > { %v3615_v62 = vpop.f32.mrb[108].mxu0 }
 0x5d3   : > { %v20819_v18 = vpop.f32.mrb[109].mxu0  ;;  %v26401_v32 = vadd.f32 %v3615_v62, %v26080_v53 }
 0x5d4   : > { %v3618_v12 = vpop.f32.mrb[110].mxu0  ;;  %v23360_v18 = vld [vmem:[%s24214_s25 + $0xc8] sm:$0xff]  }
 0x5d5   : > { %v20820_v19 = vpop.f32.mrb[111].mxu0  ;;  %v26404_v25 = vadd.f32 %v3618_v12, %v26084_v45 }
 0x5d7   : > { %20928 = vmatmul.mubr.msk.bf16.gmra.mrb[216].mxu0 %vm777_vm3, %v23356_v4  ;;  %v29888_v4 = vld [vmem:[#allocation11_spill] sm:$0xff] }
 0x5d8   : > { %20931 = vmatprep.mubr.msk.bf16.mxu0 %vm24093_vm1, %v29764_v14 }
 0x5da   : > { %v3623_v60 = vpop.f32.mrb[112].mxu0 }
 0x5db   : > { %v20823_v54 = vpop.f32.mrb[113].mxu0  ;;  %v26411_v16 = vadd.f32 %v3623_v60, %v26091_v5  ;;  %v29890_v60 = vld [vmem:[#allocation14_spill] sm:$0xff] }
 0x5dc   : > { %v3626_v56 = vpop.f32.mrb[114].mxu0 }
 0x5dd   : > { %v20824_v53 = vpop.f32.mrb[115].mxu0  ;;  %v26414_v28 = vadd.f32 %v3626_v56, %v29887_v1  ;;  %v29891_v1 = vld [vmem:[#allocation21_spill] sm:$0xff] }
 0x5de   : > { %v23362_v53 = vld [vmem:[%s24214_s25 + $0xd0] sm:$0xff]  }
 0x5df   : > { %20932 = vmatmul.mubr.msk.bf16.gmra.mrb[220].mxu0 %vm777_vm3, %v23358_v30 }
 0x5e0   : > { %20935 = vmatprep.mubr.msk.bf16.mxu0 %vm24093_vm1, %v29764_v14 }
 0x5e2   : > { %v3631_v45 = vpop.f32.mrb[116].mxu0 }
 0x5e3   : > { %v20827_v62 = vpop.f32.mrb[117].mxu0  ;;  %v26421_v12 = vadd.f32 %v3631_v45, %v29888_v4 }
 0x5e4   : > { %v3634_v19 = vpop.f32.mrb[118].mxu0 }
 0x5e5   : > { %29889 = vst [vmem:[#allocation24_spill] sm:$0xff] %v26421_v12  ;;  %v20828_v5 = vpop.f32.mrb[119].mxu0  ;;  %v26424_v54 = vadd.f32 %v3634_v19, %v29890_v60  ;;  %v29893_v12 = vld [vmem:[#allocation16_spill] sm:$0xff] }
 0x5e6   : > { %v23364_v60 = vld [vmem:[%s24214_s25 + $0xd8] sm:$0xff]  }
 0x5e7   : > { %20936 = vmatmul.mubr.msk.bf16.gmra.mrb[224].mxu0 %vm777_vm3, %v23360_v18 }
 0x5e8   : > { %20939 = vmatprep.mubr.msk.bf16.mxu0 %vm24093_vm1, %v29764_v14 }
 0x5ea   : > { %v3639_v30 = vpop.f32.mrb[120].mxu0 }
 0x5eb   : > { %v20831_v56 = vpop.f32.mrb[121].mxu0  ;;  %v26431_v62 = vadd.f32 %v3639_v30, %v29891_v1 }
 0x5ec   : > { %v3642_v45 = vpop.f32.mrb[122].mxu0 }
 0x5ed   : > { %29892 = vst [vmem:[#allocation19_spill] sm:$0xff] %v26431_v62  ;;  %v20832_v4 = vpop.f32.mrb[123].mxu0  ;;  %v26434_v5 = vadd.f32 %v3642_v45, %v29893_v12  ;;  %v4308_v12 = vld [vmem:[%s24214_s25 + $0x18] sm:$0xf]  ;;  %v26479_v62 = vld [vmem:[%s24214_s25 + $0x28] sm:$0xff]  }
 0x5ef   : > { %29894 = vst [vmem:[#allocation20_spill] sm:$0xff] %v26434_v5  ;;  %20940 = vmatmul.mubr.msk.bf16.gmra.mrb[228].mxu0 %vm777_vm3, %v23362_v53  ;;  %v26451_v53 = vld [vmem:[%s24214_s25 + $0x1c] sm:$0xf]  ;;  %v23366_v5 = vld [vmem:[%s24214_s25 + $0xe0] sm:$0xff]  }
 0x5f0   : > { %20943 = vmatprep.mubr.msk.bf16.mxu0 %vm24093_vm1, %v29764_v14 }
 0x5f2   : > { %v3647_v18 = vpop.f32.mrb[124].mxu0 }
 0x5f3   : > { %v20835_v19 = vpop.f32.mrb[125].mxu0  ;;  %v26441_v56 = vadd.f32 %v3647_v18, %v26124_v46 }
 0x5f4   : > { %v3650_v30 = vpop.f32.mrb[126].mxu0 }
 0x5f5   : > { %29895 = vst [vmem:[#allocation27_spill] sm:$0xff] %v26441_v56  ;;  %v20836_v1 = vpop.f32.mrb[127].mxu0  ;;  %v26444_v4 = vadd.f32 %v3650_v30, %v26128_v17 }
 0x5f6   : > { %v17956_v1 = vcombine.low %v4308_v12, %v26451_v53 }
 0x5f7   : > { %29896 = vst [vmem:[#allocation22_spill] sm:$0xff] %v26444_v4  ;;  %20944 = vmatmul.mubr.msk.bf16.gmra.mrb[232].mxu0 %vm777_vm3, %v23364_v60  ;;  %v26465_v60 = vld [vmem:[%s24214_s25 + $0x20] sm:$0xff]  }
 0x5f8   : > { %20947 = vmatprep.mubr.msk.bf16.mxu0 %vm24093_vm1, %v29764_v14 }
 0x5fa   : > { %v3655_v45 = vpop.f32.mrb[128].mxu0 }
 0x5fb   : > { %v20839_v19 = vpop.f32.mrb[129].mxu0  ;;  %v26455_v46 = vadd.f32 %v3655_v45, %v26135_v49  ;;  %v23368_v49 = vld [vmem:[%s24214_s25 + $0xe8] sm:$0xff]  }
 0x5fc   : > { %v3658_v18 = vpop.f32.mrb[130].mxu0  ;;  %v4507_v19 = vshll.u32 %v17956_v1, 16 }
 0x5fd   : > { %29897 = vst [vmem:[#allocation23_spill] sm:$0xff] %v26455_v46  ;;  %v20840_v17 = vpop.f32.mrb[131].mxu0  ;;  %v26459_v30 = vadd.f32 %v3658_v18, %v26139_v0  ;;  %v4512_v0 = vshll.u32 %v26465_v60, 16 }
 0x5fe   : > { %v4505_v17 = vshrl.u32 %v17956_v1, 16  ;;  %v4509_v46 = vrot.slane %v4507_v19, 1 }
 0x5ff   : > { %29898 = vst [vmem:[#allocation30_spill] sm:$0xff] %v26459_v30  ;;  %20948 = vmatmul.mubr.msk.bf16.gmra.mrb[236].mxu0 %vm777_vm3, %v23366_v5 }
 0x600   : > { %20951 = vmatprep.mubr.msk.bf16.mxu0 %vm24093_vm1, %v29764_v14  ;;  %v4510_v30 = vor.u32 %v4509_v46, %v4505_v17  ;;  %v4520_v46 = vshll.u32 %v26479_v62, 16 }
 0x602   : > { %v3663_v4 = vpop.f32.mrb[132].mxu0 }
 0x603   : > { %v20843_v56 = vpop.f32.mrb[133].mxu0  ;;  %v26469_v45 = vadd.f32 %v3663_v4, %v26146_v33  ;;  %v23372_v33 = vld [vmem:[%s29591_s2 + $0x40] sm:$0x1f]  }
 0x604   : > { %v3666_v12 = vpop.f32.mrb[134].mxu0  ;;  %v4514_v56 = vrot.slane %v4512_v0, 1  ;;  %v5265_v0 = vsel %vm859_vm0, %v23372_v33, 0 }
 0x605   : > { %29899 = vst [vmem:[#allocation25_spill] sm:$0xff] %v26469_v45  ;;  %v20844_v18 = vpop.f32.mrb[135].mxu0  ;;  %v26473_v5 = vadd.f32 %v3666_v12, %v26150_v47  ;;  %v4516_v12 = vshrl.u32 %v26465_v60, 16 }
 0x607   : > { %29900 = vst [vmem:[#allocation26_spill] sm:$0xff] %v26473_v5  ;;  %20952 = vmatmul.mubr.msk.bf16.gmra.mrb[240].mxu0 %vm777_vm3, %v23368_v49  ;;  %v4515_v49 = vsel %vm551_vm2, %v4510_v30, %v4514_v56  ;;  %v26498_v30 = vld [vmem:[%s24214_s25 + $0x30] sm:$0xff]  }
 0x608   : > { %20957 = vmatprep.mubr.msk.bf16.mxu0 %vm24093_vm1, %v29764_v14 }
 0x60a   : > { %v4039_v4 = vpop.f32.mrb[136].mxu0 }
 0x60b   : > { %v20849_v1 = vpop.f32.mrb[137].mxu0  ;;  %v26485_v19 = vadd.f32 %v4039_v4, %v26156_v2  ;;  %v4518_v2 = vor.u32 %v4516_v12, %v4514_v56  ;;  %v4522_v4 = vrot.slane %v4520_v46, 1 }
 0x60c   : > { %v4042_v47 = vpop.f32.mrb[138].mxu0 }
 0x60d   : > { %29901 = vst [vmem:[#allocation33_spill] sm:$0xff] %v26485_v19  ;;  %v20850_v17 = vpop.f32.mrb[139].mxu0  ;;  %v26492_v18 = vadd.f32 %v4042_v47, %v26160_v39  ;;  %v4523_v39 = vsel %vm551_vm2, %v4518_v2, %v4522_v4  ;;  %v4524_v47 = vshrl.u32 %v26479_v62, 16 }
 0x60f   : > { %29902 = vst [vmem:[#allocation28_spill] sm:$0xff] %v26492_v18  ;;  %20958 = vmatmul.mubr.msk.bf16.vlgmr.msra.gmra.mrb[244].mxu0 %vm777_vm3, %v4515_v49  ;;  %v4528_v49 = vshll.u32 %v26498_v30, 16  ;;  %v4526_v56 = vor.u32 %v4524_v47, %v4522_v4 }
 0x610   : > { %21066 = vmatpush3.bf16.msra.mxu0 %v5265_v0  ;;  %20961 = vmatprep.mubr.msk.bf16.mxu0 %vm24093_vm1, %v29764_v14 }
 0x612   : > { %v4047_v1 = vpop.f32.mrb[140].mxu0 }
 0x613   : > { %v20853_v19 = vpop.f32.mrb[141].mxu0  ;;  %v26501_v17 = vadd.f32 %v4047_v1, %v26168_v50  ;;  %v4530_v50 = vrot.slane %v4528_v49, 1 }
 0x614   : > { %v4050_v33 = vpop.f32.mrb[142].mxu0  ;;  %v26513_v19 = vld [vmem:[%s24214_s25 + $0x38] sm:$0xff]  }
 0x615   : > { %29903 = vst [vmem:[#allocation29_spill] sm:$0xff] %v26501_v17  ;;  %v20854_v0 = vpop.f32.mrb[143].mxu0  ;;  %v26507_v18 = vadd.f32 %v4050_v33, %v26172_v9  ;;  %v4532_v9 = vshrl.u32 %v26498_v30, 16  ;;  %v4536_v33 = vshll.u32 %v26513_v19, 16 }
 0x616   : > { %v4531_v0 = vsel %vm551_vm2, %v4526_v56, %v4530_v50 }
 0x617   : > { %29904 = vst [vmem:[#allocation31_spill] sm:$0xff] %v26507_v18  ;;  %20962 = vmatmul.mubr.msk.bf16.gmra.mrb[248].mxu0 %vm777_vm3, %v4523_v39  ;;  %v29906_v18 = vld [vmem:[#allocation17_spill] sm:$0xff]  ;;  %v4534_v4 = vor.u32 %v4532_v9, %v4530_v50  ;;  %v4538_v47 = vrot.slane %v4536_v33, 1 }
 0x618   : > { %20965 = vmatprep.mubr.msk.bf16.mxu0 %vm24093_vm1, %v29764_v14 }
 0x61a   : > { %v4055_v12 = vpop.f32.mrb[144].mxu0 }
 0x61b   : > { %v20857_v46 = vpop.f32.mrb[145].mxu0  ;;  %v26516_v2 = vadd.f32 %v4055_v12, %v26178_v59  ;;  %v26528_v59 = vld [vmem:[%s24214_s25 + $0x40] sm:$0xff]  }
 0x61c   : > { %v4058_v1 = vpop.f32.mrb[146].mxu0 }
 0x61d   : > { %29905 = vst [vmem:[#allocation32_spill] sm:$0xff] %v26516_v2  ;;  %v20858_v39 = vpop.f32.mrb[147].mxu0  ;;  %v26522_v17 = vadd.f32 %v4058_v1, %v29906_v18  ;;  %v4540_v18 = vshrl.u32 %v26513_v19, 16  ;;  %v4544_v1 = vshll.u32 %v26528_v59, 16 }
 0x61e   : > { %v4539_v39 = vsel %vm551_vm2, %v4534_v4, %v4538_v47 }
 0x61f   : > { %29907 = vst [vmem:[#allocation6_spill] sm:$0xff] %v26522_v17  ;;  %20966 = vmatmul.mubr.msk.bf16.gmra.mrb[252].mxu0 %vm777_vm3, %v4531_v0  ;;  %v26536_v0 = vpop.f32.mrb[0].mxu1  ;;  %v4542_v4 = vor.u32 %v4540_v18, %v4538_v47 }
 0x620   : > { %20969 = vmatprep.mubr.msk.bf16.mxu0 %vm24093_vm1, %v29764_v14  ;;  %v21035_v50 = vpop.f32.mrb[1].mxu1 }
 0x621   : > { %v26541_v33 = vpop.f32.mrb[2].mxu1  ;;  %v4548_v50 = vshrl.u32 %v26528_v59, 16 }
 0x622   : > { %v4063_v49 = vpop.f32.mrb[148].mxu0 }
 0x623   : > { %v20861_v12 = vpop.f32.mrb[149].mxu0  ;;  %v26531_v56 = vadd.f32 %v4063_v49, %v26190_v3  ;;  %v21036_v3 = vpop.f32.mrb[3].mxu1  ;;  %v4546_v49 = vrot.slane %v4544_v1, 1 }
 0x624   : > { %v4066_v46 = vpop.f32.mrb[150].mxu0  ;;  %v26547_v12 = vld [vmem:[%s24214_s25 + $0x48] sm:$0xff]  }
 0x625   : > { %29908 = vst [vmem:[#allocation7_spill] sm:$0xff] %v26531_v56  ;;  %v20862_v17 = vpop.f32.mrb[151].mxu0  ;;  %v26539_v9 = vadd.f32 %v4066_v46, %v26196_v7  ;;  %29910 = vst [vmem:[#allocation35_spill] sm:$0xff] %v26547_v12  ;;  %v4547_v46 = vsel %vm551_vm2, %v4542_v4, %v4546_v49  ;;  %v26566_v4 = vld [vmem:[%s24214_s25 + $0x50] sm:$0xff]  }
 0x626   : > { %29913 = vst [vmem:[#allocation38_spill] sm:$0xff] %v26566_v4 }
 0x627   : > { %29909 = vst [vmem:[#allocation12_spill] sm:$0xff] %v26539_v9  ;;  %20970 = vmatmul.mubr.msk.bf16.gmra.mrb[0].mxu0 %vm777_vm3, %v4539_v39  ;;  %v4552_v39 = vshll.u32 %v26547_v12, 16  ;;  %v26555_v3 = vpop.f32.mrb[4].mxu1 }
 0x628   : > { %20973 = vmatprep.mubr.msk.bf16.mxu0 %vm24093_vm1, %v29764_v14  ;;  %v21039_v47 = vpop.f32.mrb[5].mxu1 }
 0x629   : > { %v26560_v1 = vpop.f32.mrb[6].mxu1  ;;  %v4556_v47 = vshrl.u32 %v26547_v12, 16 }
 0x62a   : > { %v4071_v56 = vpop.f32.mrb[152].mxu0 }
 0x62b   : > { %v20865_v2 = vpop.f32.mrb[153].mxu0  ;;  %v26550_v17 = vadd.f32 %v4071_v56, %v26208_v38  ;;  %v21040_v38 = vpop.f32.mrb[7].mxu1  ;;  %v4554_v56 = vrot.slane %v4552_v39, 1 }
 0x62c   : > { %v4074_v7 = vpop.f32.mrb[154].mxu0  ;;  %v4550_v2 = vor.u32 %v4548_v50, %v4546_v49 }
 0x62d   : > { %29911 = vst [vmem:[#allocation34_spill] sm:$0xff] %v26550_v17  ;;  %v20866_v9 = vpop.f32.mrb[155].mxu0  ;;  %v26558_v18 = vadd.f32 %v4074_v7, %v26212_v51 }
 0x62e   : > { %v4555_v7 = vsel %vm551_vm2, %v4550_v2, %v4554_v56  ;;  %v26585_v2 = vld [vmem:[%s24214_s25 + $0x58] sm:$0xff]  }
 0x62f   : > { %29912 = vst [vmem:[#allocation37_spill] sm:$0xff] %v26558_v18  ;;  %20974 = vmatmul.mubr.msk.bf16.gmra.mrb[4].mxu0 %vm777_vm3, %v4547_v46  ;;  %v4560_v46 = vshll.u32 %v26566_v4, 16  ;;  %v26574_v38 = vpop.f32.mrb[8].mxu1  ;;  %29916 = vst [vmem:[#allocation9_spill] sm:$0xff] %v26585_v2 }
 0x630   : > { %20977 = vmatprep.mubr.msk.bf16.mxu0 %vm24093_vm1, %v29764_v14  ;;  %v21043_v49 = vpop.f32.mrb[9].mxu1 }
 0x631   : > { %v26579_v39 = vpop.f32.mrb[10].mxu1  ;;  %v4564_v49 = vshrl.u32 %v26566_v4, 16 }
 0x632   : > { %v4079_v17 = vpop.f32.mrb[156].mxu0 }
 0x633   : > { %v20869_v5 = vpop.f32.mrb[157].mxu0  ;;  %v26569_v9 = vadd.f32 %v4079_v17, %v26223_v43  ;;  %v21044_v43 = vpop.f32.mrb[11].mxu1  ;;  %v4562_v17 = vrot.slane %v4560_v46, 1 }
 0x634   : > { %v4082_v51 = vpop.f32.mrb[158].mxu0  ;;  %v4558_v5 = vor.u32 %v4556_v47, %v4554_v56 }
 0x635   : > { %29914 = vst [vmem:[#allocation36_spill] sm:$0xff] %v26569_v9  ;;  %v20870_v18 = vpop.f32.mrb[159].mxu0  ;;  %v26577_v50 = vadd.f32 %v4082_v51, %v26227_v6 }
 0x636   : > { %v4563_v51 = vsel %vm551_vm2, %v4558_v5, %v4562_v17  ;;  %v23380_v5 = vld [vmem:[%s24214_s25 + $0x60] sm:$0xff]  }
 0x637   : > { %29915 = vst [vmem:[#allocation8_spill] sm:$0xff] %v26577_v50  ;;  %20978 = vmatmul.mubr.msk.bf16.gmra.mrb[8].mxu0 %vm777_vm3, %v4555_v7  ;;  %v4568_v7 = vshll.u32 %v26585_v2, 16  ;;  %v26593_v43 = vpop.f32.mrb[12].mxu1 }
 0x638   : > { %20981 = vmatprep.mubr.msk.bf16.mxu0 %vm24093_vm1, %v29764_v14  ;;  %v21047_v56 = vpop.f32.mrb[13].mxu1 }
 0x639   : > { %v26598_v46 = vpop.f32.mrb[14].mxu1 }
 0x63a   : > { %v4087_v9 = vpop.f32.mrb[160].mxu0 }
 0x63b   : > { %v20873_v45 = vpop.f32.mrb[161].mxu0  ;;  %v26588_v18 = vadd.f32 %v4087_v9, %v26238_v11  ;;  %v21048_v11 = vpop.f32.mrb[15].mxu1  ;;  %v4570_v9 = vrot.slane %v4568_v7, 1  ;;  %v23381_v7 = vld [vmem:[%s24214_s25 + $0x68] sm:$0xff]  }
 0x63c   : > { %v4090_v6 = vpop.f32.mrb[162].mxu0  ;;  %v4566_v45 = vor.u32 %v4564_v49, %v4562_v17 }
 0x63d   : > { %29917 = vst [vmem:[#allocation39_spill] sm:$0xff] %v26588_v18  ;;  %v20874_v50 = vpop.f32.mrb[163].mxu0  ;;  %v26596_v47 = vadd.f32 %v4090_v6, %v26242_v61  ;;  %v4572_v6 = vshrl.u32 %v26585_v2, 16 }
 0x63e   : > { %v4571_v61 = vsel %vm551_vm2, %v4566_v45, %v4570_v9 }
 0x63f   : > { %29918 = vst [vmem:[#allocation15_spill] sm:$0xff] %v26596_v47  ;;  %20982 = vmatmul.mubr.msk.bf16.gmra.mrb[12].mxu0 %vm777_vm3, %v4563_v51  ;;  %v4576_v47 = vshll.u32 %v23380_v5, 16  ;;  %v26609_v51 = vpop.f32.mrb[16].mxu1 }
 0x640   : > { %20985 = vmatprep.mubr.msk.bf16.mxu0 %vm24093_vm1, %v29764_v14  ;;  %v21051_v12 = vpop.f32.mrb[17].mxu1 }
 0x641   : > { %v26614_v49 = vpop.f32.mrb[18].mxu1 }
 0x642   : > { %v4095_v18 = vpop.f32.mrb[164].mxu0  ;;  %29921 = vst [vmem:[#allocation18_spill] sm:$0xff] %v26614_v49 }
 0x643   : > { %v20877_v4 = vpop.f32.mrb[165].mxu0  ;;  %v26605_v50 = vadd.f32 %v4095_v18, %v26253_v10  ;;  %v4574_v10 = vor.u32 %v4572_v6, %v4570_v9  ;;  %v4578_v18 = vrot.slane %v4576_v47, 1  ;;  %v23382_v6 = vld [vmem:[%s24214_s25 + $0x70] sm:$0xff]  }
 0x644   : > { %v4098_v56 = vpop.f32.mrb[166].mxu0  ;;  %v21052_v4 = vpop.f32.mrb[19].mxu1 }
 0x645   : > { %29919 = vst [vmem:[#allocation10_spill] sm:$0xff] %v26605_v50  ;;  %v20878_v11 = vpop.f32.mrb[167].mxu0  ;;  %v26612_v17 = vadd.f32 %v4098_v56, %v26257_v57  ;;  %v4579_v57 = vsel %vm551_vm2, %v4574_v10, %v4578_v18  ;;  %v4580_v56 = vshrl.u32 %v23380_v5, 16 }
 0x647   : > { %29920 = vst [vmem:[#allocation40_spill] sm:$0xff] %v26612_v17  ;;  %20986 = vmatmul.mubr.msk.bf16.gmra.mrb[16].mxu0 %vm777_vm3, %v4571_v61  ;;  %v4584_v17 = vshll.u32 %v23381_v7, 16  ;;  %v26624_v2 = vpop.f32.mrb[20].mxu1 }
 0x648   : > { %20989 = vmatprep.mubr.msk.bf16.mxu0 %vm24093_vm1, %v29764_v14  ;;  %v21055_v4 = vpop.f32.mrb[21].mxu1 }
 0x649   : > { %v26629_v47 = vpop.f32.mrb[22].mxu1  ;;  %v4592_v4 = vshll.u32 %v23382_v6, 16 }
 0x64a   : > { %v4103_v45 = vpop.f32.mrb[168].mxu0  ;;  %v21056_v9 = vpop.f32.mrb[23].mxu1 }
 0x64b   : > { %v20881_v50 = vpop.f32.mrb[169].mxu0  ;;  %v26621_v11 = vadd.f32 %v4103_v45, %v26268_v42  ;;  %v4582_v42 = vor.u32 %v4580_v56, %v4578_v18 }
 0x64c   : > { %v4106_v12 = vpop.f32.mrb[170].mxu0  ;;  %v4586_v50 = vrot.slane %v4584_v17, 1 }
 0x64d   : > { %v20882_v61 = vpop.f32.mrb[171].mxu0  ;;  %v26627_v49 = vadd.f32 %v4106_v12, %v26272_v20  ;;  %v4588_v12 = vshrl.u32 %v23381_v7, 16 }
 0x64e   : > { %v4587_v20 = vsel %vm551_vm2, %v4582_v42, %v4586_v50  ;;  %v23383_v42 = vld [vmem:[%s24214_s25 + $0x78] sm:$0xff]  }
 0x64f   : > { %29922 = vst [vmem:[#allocation41_spill] sm:$0xff] %v26627_v49  ;;  %20990 = vmatmul.mubr.msk.bf16.gmra.mrb[20].mxu0 %vm777_vm3, %v4579_v57  ;;  %v4590_v56 = vor.u32 %v4588_v12, %v4586_v50 }
 0x650   : > { %20993 = vmatprep.mubr.msk.bf16.mxu0 %vm24093_vm1, %v29764_v14  ;;  %v26639_v49 = vpop.f32.mrb[24].mxu1 }
 0x651   : > { %v21059_v18 = vpop.f32.mrb[25].mxu1 }
 0x652   : > { %v4111_v5 = vpop.f32.mrb[172].mxu0  ;;  %v26644_v17 = vpop.f32.mrb[26].mxu1  ;;  %v4596_v18 = vshrl.u32 %v23382_v6, 16  ;;  %v23384_v6 = vld [vmem:[%s24214_s25 + $0x80] sm:$0xff]  }
 0x653   : > { %v26636_v10 = vadd.f32 %v4111_v5, %v26284_v58  ;;  %v20885_v45 = vpop.f32.mrb[173].mxu0  ;;  %v21060_v58 = vpop.f32.mrb[27].mxu1  ;;  %v4594_v5 = vrot.slane %v4592_v4, 1 }
 0x654   : > { %v4114_v61 = vpop.f32.mrb[174].mxu0 }
 0x655   : > { %29923 = vst [vmem:[#allocation13_spill] sm:$0xff] %v26636_v10  ;;  %v26642_v57 = vadd.f32 %v4114_v61, %v26287_v40  ;;  %v20886_v9 = vpop.f32.mrb[175].mxu0  ;;  %v4598_v4 = vor.u32 %v4596_v18, %v4594_v5 }
 0x656   : > { %v4595_v9 = vsel %vm551_vm2, %v4590_v56, %v4594_v5 }
 0x657   : > { %29924 = vst [vmem:[#allocation11_spill] sm:$0xff] %v26642_v57  ;;  %20994 = vmatmul.mubr.msk.bf16.gmra.mrb[24].mxu0 %vm777_vm3, %v4587_v20  ;;  %v4600_v57 = vshll.u32 %v23383_v42, 16 }
 0x658   : > { %20997 = vmatprep.mubr.msk.bf16.mxu0 %vm24093_vm1, %v29764_v14  ;;  %v26654_v10 = vpop.f32.mrb[28].mxu1 }
 0x659   : > { %v21063_v50 = vpop.f32.mrb[29].mxu1  ;;  %v4602_v56 = vrot.slane %v4600_v57, 1 }
 0x65a   : > { %v4119_v7 = vpop.f32.mrb[176].mxu0  ;;  %v26659_v12 = vpop.f32.mrb[30].mxu1  ;;  %v4604_v50 = vshrl.u32 %v23383_v42, 16 }
 0x65b   : > { %v26651_v45 = vadd.f32 %v4119_v7, %v26299_v27  ;;  %v20889_v40 = vpop.f32.mrb[177].mxu0  ;;  %v21064_v27 = vpop.f32.mrb[31].mxu1 }
 0x65c   : > { %v4122_v61 = vpop.f32.mrb[178].mxu0  ;;  %v4606_v57 = vor.u32 %v4604_v50, %v4602_v56 }
 0x65d   : > { %v26657_v20 = vadd.f32 %v4122_v61, %v26302_v55  ;;  %v20890_v58 = vpop.f32.mrb[179].mxu0 }
 0x65e   : > { %v4603_v58 = vsel %vm551_vm2, %v4598_v4, %v4602_v56  ;;  %v26694_v56 = vld [vmem:[%s24214_s25 + $0x90] sm:$0xff]  }
 0x65f   : > { %29925 = vst [vmem:[#allocation14_spill] sm:$0xff] %v26657_v20  ;;  %20998 = vmatmul.mubr.msk.bf16.gmra.mrb[28].mxu0 %vm777_vm3, %v4595_v9  ;;  %v4608_v20 = vshll.u32 %v23384_v6, 16 }
 0x660   : > { %21001 = vmatprep.mubr.msk.bf16.mxu0 %vm24093_vm1, %v29764_v14 }
 0x661   : > { %v4610_v5 = vrot.slane %v4608_v20, 1 }
 0x662   : > { %v4127_v7 = vpop.f32.mrb[180].mxu0 }
 0x663   : > { %v26666_v40 = vadd.f32 %v4127_v7, %v26311_v22  ;;  %v20893_v55 = vpop.f32.mrb[181].mxu0  ;;  %v26676_v22 = vld [vmem:[%s24214_s25 + $0x88] sm:$0xff]  }
 0x664   : > { %v4130_v61 = vpop.f32.mrb[182].mxu0  ;;  %v4612_v55 = vshrl.u32 %v23384_v6, 16 }
 0x665   : > { %v26670_v9 = vadd.f32 %v4130_v61, %v26314_v23  ;;  %v20894_v27 = vpop.f32.mrb[183].mxu0  ;;  %v4611_v23 = vsel %vm551_vm2, %v4606_v57, %v4610_v5  ;;  %v4616_v61 = vshll.u32 %v26676_v22, 16 }
 0x666   : > { %v26689_v20 = vor.u32 %v4612_v55, %v4610_v5 }
 0x667   : > { %21002 = vmatmul.mubr.msk.bf16.gmra.mrb[32].mxu0 %vm777_vm3, %v4603_v58 }
 0x668   : > { %21005 = vmatprep.mubr.msk.bf16.mxu0 %vm24093_vm1, %v29764_v14 }
 0x66a   : > { %v4135_v18 = vpop.f32.mrb[184].mxu0 }
 0x66b   : > { %v26679_v7 = vadd.f32 %v4135_v18, %v26321_v44  ;;  %v20897_v42 = vpop.f32.mrb[185].mxu0  ;;  %v26691_v44 = vrot.slane %v4616_v61, 1  ;;  %v24094_v18 = vmov 0  }
 0x66c   : > { %v4138_v4 = vpop.f32.mrb[186].mxu0  ;;  %23239 = vset.pattern.permute.xlu1 %v24094_v18  ;;  %6091 = vst [vmem:[#allocation2 + $0x4] sm:$0xf] %v24094_v18  ;;  %6092 = vst [vmem:[#allocation2 + $0x8] sm:$0xf] %v24094_v18  ;;  %23238 = vset.pattern.permute.xlu0 %v24094_v18 }
 0x66d   : > { %v26684_v58 = vadd.f32 %v4138_v4, %v26324_v8  ;;  %v20898_v27 = vpop.f32.mrb[187].mxu0  ;;  %6093 = vst [vmem:[#allocation2 + $0xc] sm:$0xf] %v24094_v18  ;;  %6094 = vst [vmem:[#allocation2 + $0x10] sm:$0xf] %v24094_v18  ;;  %v5687_v8 = vld [vmem:[%s29590_s1 + $0x10] sm:$0xff]  ;;  %v4619_v42 = vsel %vm551_vm2, %v26689_v20, %v26691_v44 }
 0x66e   : > { %6095 = vst [vmem:[#allocation2 + $0x14] sm:$0xf] %v24094_v18  ;;  %6096 = vst [vmem:[#allocation2 + $0x18] sm:$0xf] %v24094_v18  ;;  %v4620_v4 = vshrl.u32 %v26676_v22, 16  ;;  %5751 = vperm.xlu1 %23239, %v5687_v8   ;;  %v5688_v27 = vld [vmem:[%s29590_s1 + $0x18] sm:$0xff] }
 0x66f   : > { %21006 = vmatmul.mubr.msk.bf16.gmra.mrb[36].mxu0 %vm777_vm3, %v4611_v23  ;;  %6097 = vst [vmem:[#allocation2 + $0x1c] sm:$0xf] %v24094_v18  ;;  %6098 = vst [vmem:[#allocation2 + $0x20] sm:$0xf] %v24094_v18  ;;  %v4624_v23 = vshll.u32 %v26694_v56, 16  ;;  %v5686_v20 = vld [vmem:[%s29590_s1 + $0x8] sm:$0xff] }
 0x670   : > { %21009 = vmatprep.mubr.msk.bf16.mxu0 %vm24093_vm1, %v29764_v14  ;;  %6099 = vst [vmem:[#allocation2 + $0x24] sm:$0xf] %v24094_v18  ;;  %6100 = vst [vmem:[#allocation2 + $0x28] sm:$0xf] %v24094_v18  ;;  %v4622_v22 = vor.u32 %v4620_v4, %v26691_v44  ;;  %v4628_v4 = vshrl.u32 %v26694_v56, 16 }
 0x671   : > { %6101 = vst [vmem:[#allocation2 + $0x2c] sm:$0xf] %v24094_v18  ;;  %6102 = vst [vmem:[#allocation2 + $0x30] sm:$0xf] %v24094_v18 }
 0x672   : > { %v4143_v50 = vpop.f32.mrb[188].mxu0  ;;  %6103 = vst [vmem:[#allocation2 + $0x34] sm:$0xf] %v24094_v18  ;;  %6104 = vst [vmem:[#allocation2 + $0x38] sm:$0xf] %v24094_v18  ;;  %5756 = vperm.xlu1 %23239, %v5688_v27   ;;  %v5692_v27 = vld [vmem:[%s29590_s1 + $0x38] sm:$0xff] }
 0x673   : > { %v26697_v6 = vadd.f32 %v4143_v50, %v26331_v48  ;;  %v20901_v57 = vpop.f32.mrb[189].mxu0  ;;  %6105 = vst [vmem:[#allocation2 + $0x3c] sm:$0xf] %v24094_v18  ;;  %6106 = vst [vmem:[#allocation2 + $0x40] sm:$0xf] %v24094_v18  ;;  %v5685_v48 = vld [vmem:[%s29590_s1] sm:$0xff] }
 0x674   : > { %6107 = vst [vmem:[#allocation2 + $0x44] sm:$0xf] %v24094_v18  ;;  %6108 = vst [vmem:[#allocation2 + $0x48] sm:$0xf] %v24094_v18  ;;  %v4146_v5 = vpop.f32.mrb[190].mxu0  ;;  %5741 = vperm.xlu0 %23238, %v5685_v48   ;;  %v4626_v50 = vrot.slane %v4624_v23, 1 }
 0x675   : > { %6109 = vst [vmem:[#allocation2 + $0x4c] sm:$0xf] %v24094_v18  ;;  %6110 = vst [vmem:[#allocation2 + $0x50] sm:$0xf] %v24094_v18  ;;  %v26711_v55 = vadd.f32 %v4146_v5, %v26334_v36  ;;  %v20902_v61 = vpop.f32.mrb[191].mxu0  ;;  %v23387_v57 = vld [vmem:[%s24214_s25 + $0x98] sm:$0xff]  }
 0x676   : > { %6111 = vst [vmem:[#allocation2 + $0x54] sm:$0xf] %v24094_v18  ;;  %6112 = vst [vmem:[#allocation2 + $0x58] sm:$0xf] %v24094_v18  ;;  %v5690_v48 = vld [vmem:[%s29590_s1 + $0x28] sm:$0xff]  ;;  %v5689_v5 = vld [vmem:[%s29590_s1 + $0x20] sm:$0xff]  ;;  %v4627_v44 = vsel %vm551_vm2, %v4622_v22, %v4626_v50  ;;  %v4630_v56 = vor.u32 %v4628_v4, %v4626_v50 }
 0x677   : > { %6113 = vst [vmem:[#allocation2 + $0x5c] sm:$0xf] %v24094_v18  ;;  %6114 = vst [vmem:[#allocation2 + $0x60] sm:$0xf] %v24094_v18  ;;  %21010 = vmatmul.mubr.msk.bf16.gmra.mrb[40].mxu0 %vm777_vm3, %v4619_v42  ;;  %v4632_v23 = vshll.u32 %v23387_v57, 16  ;;  %5766 = vperm.xlu1 %23239, %v5690_v48   ;;  %v4636_v4 = vshrl.u32 %v23387_v57, 16 }
 0x678   : > { %6115 = vst [vmem:[#allocation2 + $0x64] sm:$0xf] %v24094_v18  ;;  %6116 = vst [vmem:[#allocation2 + $0x68] sm:$0xf] %v24094_v18  ;;  %21013 = vmatprep.mubr.msk.bf16.mxu0 %vm24093_vm1, %v29764_v14  ;;  %5746 = vperm.xlu0 %23238, %v5686_v20   ;;  %v5691_v20 = vld [vmem:[%s29590_s1 + $0x30] sm:$0xff] }
 0x679   : > { %6117 = vst [vmem:[#allocation2 + $0x6c] sm:$0xf] %v24094_v18  ;;  %6118 = vst [vmem:[#allocation2 + $0x70] sm:$0xf] %v24094_v18  ;;  %v4634_v22 = vrot.slane %v4632_v23, 1 }
 0x67a   : > { %6119 = vst [vmem:[#allocation2 + $0x74] sm:$0xf] %v24094_v18  ;;  %6120 = vst [vmem:[#allocation2 + $0x78] sm:$0xf] %v24094_v18  ;;  %v4151_v36 = vpop.f32.mrb[192].mxu0 }
 0x67b   : > { %6121 = vst [vmem:[#allocation2 + $0x7c] sm:$0xf] %v24094_v18  ;;  %6122 = vst [vmem:[#allocation2 + $0x80] sm:$0xf] %v24094_v18  ;;  %v20905_v8 = vpop.f32.mrb[193].mxu0  ;;  %5776 = vperm.xlu1 %23239, %v5692_v27   ;;  %v4635_v50 = vsel %vm551_vm2, %v4630_v56, %v4634_v22  ;;  %v5696_v27 = vld [vmem:[%s29590_s1 + $0x58] sm:$0xff]  ;;  %v4638_v57 = vor.u32 %v4636_v4, %v4634_v22 }
 0x67c   : > { %6123 = vst [vmem:[#allocation2 + $0x84] sm:$0xf] %v24094_v18  ;;  %6124 = vst [vmem:[#allocation2 + $0x88] sm:$0xf] %v24094_v18  ;;  %v4154_v42 = vpop.f32.mrb[194].mxu0  ;;  %5761 = vperm.xlu0 %23238, %v5689_v5   ;;  %v5694_v5 = vld [vmem:[%s29590_s1 + $0x48] sm:$0xff] }
 0x67d   : > { %6125 = vst [vmem:[#allocation2 + $0x8c] sm:$0xf] %v24094_v18  ;;  %6126 = vst [vmem:[#allocation2 + $0x90] sm:$0xf] %v24094_v18  ;;  %v20906_v61 = vpop.f32.mrb[195].mxu0 }
 0x67e   : > { %6127 = vst [vmem:[#allocation2 + $0x94] sm:$0xf] %v24094_v18  ;;  %6128 = vst [vmem:[#allocation2 + $0x98] sm:$0xf] %v24094_v18 }
 0x67f   : > { %6129 = vst [vmem:[#allocation2 + $0x9c] sm:$0xf] %v24094_v18  ;;  %6130 = vst [vmem:[#allocation2 + $0xa0] sm:$0xf] %v24094_v18  ;;  %21014 = vmatmul.mubr.msk.bf16.gmra.mrb[44].mxu0 %vm777_vm3, %v4627_v44  ;;  %5786 = vperm.xlu1 %23239, %v5694_v5  }
 0x680   : > { %6131 = vst [vmem:[#allocation2 + $0xa4] sm:$0xf] %v24094_v18  ;;  %6132 = vst [vmem:[#allocation2 + $0xa8] sm:$0xf] %v24094_v18  ;;  %21017 = vmatprep.mubr.msk.bf16.mxu0 %vm24093_vm1, %v29764_v14  ;;  %5771 = vperm.xlu0 %23238, %v5691_v20   ;;  %v5695_v20 = vld [vmem:[%s29590_s1 + $0x50] sm:$0xff] }
 0x681   : > { %6133 = vst [vmem:[#allocation2 + $0xac] sm:$0xf] %v24094_v18  ;;  %6134 = vst [vmem:[#allocation2 + $0xb0] sm:$0xf] %v24094_v18 }
 0x682   : > { %6135 = vst [vmem:[#allocation2 + $0xb4] sm:$0xf] %v24094_v18  ;;  %6136 = vst [vmem:[#allocation2 + $0xb8] sm:$0xf] %v24094_v18 }
 0x683   : > { %6137 = vst [vmem:[#allocation2 + $0xbc] sm:$0xf] %v24094_v18  ;;  %6138 = vst [vmem:[#allocation2 + $0xc0] sm:$0xf] %v24094_v18  ;;  %5796 = vperm.xlu1 %23239, %v5696_v27   ;;  %v5700_v27 = vld [vmem:[%s29590_s1 + $0x78] sm:$0xff] }
 0x684   : > { %6139 = vst [vmem:[#allocation2 + $0xc4] sm:$0xf] %v24094_v18  ;;  %6140 = vst [vmem:[#allocation2 + $0xc8] sm:$0xf] %v24094_v18 }
 0x685   : > { %6141 = vst [vmem:[#allocation2 + $0xcc] sm:$0xf] %v24094_v18  ;;  %6142 = vst [vmem:[#allocation2 + $0xd0] sm:$0xf] %v24094_v18 }
 0x686   : > { %6143 = vst [vmem:[#allocation2 + $0xd4] sm:$0xf] %v24094_v18  ;;  %6144 = vst [vmem:[#allocation2 + $0xd8] sm:$0xf] %v24094_v18 }
 0x687   : > { %6145 = vst [vmem:[#allocation2 + $0xdc] sm:$0xf] %v24094_v18  ;;  %6146 = vst [vmem:[#allocation2 + $0xe0] sm:$0xf] %v24094_v18  ;;  %v26725_v18 = vadd.f32 %v4151_v36, %v26341_v13  ;;  %v26736_v13 = vadd.f32 %v4154_v42, %v26344_v31  ;;  %v23388_v36 = vld [vmem:[%s24214_s25 + $0xa0] sm:$0xff]   ;;  %v4159_v31 = vpop.f32.mrb[196].mxu0  ;;  %21018 = vmatmul.mubr.msk.bf16.gmra.mrb[48].mxu0 %vm777_vm3, %v4635_v50 }
 0x688   : > { %v26749_v8 = vadd.f32 %v4159_v31, %v26351_v37  ;;  %v20909_v48 = vpop.f32.mrb[197].mxu0  ;;  %v5693_v42 = vld [vmem:[%s29590_s1 + $0x40] sm:$0xff]  ;;  %v4640_v23 = vshll.u32 %v23388_v36, 16  ;;  %v23353_v31 = vld [vmem:[%s24214_s25 + $0xa8] sm:$0xff]   ;;  %21021 = vmatprep.mubr.msk.bf16.mxu0 %vm24093_vm1, %v29764_v14  ;;  %v4644_v4 = vshrl.u32 %v23388_v36, 16 }
 0x689   : > { %v4162_v44 = vpop.f32.mrb[198].mxu0  ;;  %5781 = vperm.xlu0 %23238, %v5693_v42   ;;  %v5698_v42 = vld [vmem:[%s29590_s1 + $0x68] sm:$0xff]  ;;  %v4648_v50 = vshll.u32 %v23353_v31, 16 }
 0x68a   : > { %v26759_v61 = vadd.f32 %v4162_v44, %v26354_v35  ;;  %v20910_v37 = vpop.f32.mrb[199].mxu0  ;;  %v4642_v56 = vrot.slane %v4640_v23, 1  ;;  %v5697_v44 = vld [vmem:[%s29590_s1 + $0x60] sm:$0xff]  ;;  %5806 = vperm.xlu1 %23239, %v5698_v42   ;;  %v5702_v42 = vld [vmem:[%s29590_s1 + $0x88] sm:$0xff] }
 0x68b   : > { %v4167_v35 = vpop.f32.mrb[200].mxu0 }
 0x68c   : > { %v26772_v48 = vadd.f32 %v4167_v35, %v26361_v29  ;;  %v20913_v5 = vpop.f32.mrb[201].mxu0  ;;  %v4643_v22 = vsel %vm551_vm2, %v4638_v57, %v4642_v56  ;;  %v4650_v35 = vrot.slane %v4648_v50, 1  ;;  %v4646_v36 = vor.u32 %v4644_v4, %v4642_v56  ;;  %v5704_v4 = vld [vmem:[%s29590_s1 + $0x98] sm:$0xff] }
 0x68d   : > { %5791 = vperm.xlu0 %23238, %v5695_v20   ;;  %v4170_v37 = vpop.f32.mrb[202].mxu0  ;;  %v5699_v20 = vld [vmem:[%s29590_s1 + $0x70] sm:$0xff]  ;;  %v4652_v50 = vshrl.u32 %v23353_v31, 16 }
 0x68e   : > { %v26782_v23 = vadd.f32 %v4170_v37, %v26364_v21  ;;  %v20914_v29 = vpop.f32.mrb[203].mxu0  ;;  %5816 = vperm.xlu1 %23239, %v5700_v27   ;;  %v4651_v56 = vsel %vm551_vm2, %v4646_v36, %v4650_v35  ;;  %v5116_v27 = vld [vmem:[%s24214_s25 + $0x18] sm:$0xe] }
 0x68f   : > { %21022 = vmatmul.mubr.msk.bf16.gmra.mrb[52].mxu0 %vm777_vm3, %v4643_v22  ;;  %v5703_v29 = vld [vmem:[%s29590_s1 + $0x90] sm:$0xff]  ;;  %v4654_v31 = vor.u32 %v4652_v50, %v4650_v35 }
 0x690   : > { %21025 = vmatprep.mubr.msk.bf16.mxu0 %vm24093_vm1, %v29764_v14 }
 0x691   : > { %5801 = vperm.xlu0 %23238, %v5697_v44   ;;  %v5701_v44 = vld [vmem:[%s29590_s1 + $0x80] sm:$0xff]  ;;  %v4659_v35 = vsel %vm551_vm2, %v4654_v31, %v26193_v34 }
 0x692   : > { %v4175_v21 = vpop.f32.mrb[204].mxu0  ;;  %5826 = vperm.xlu1 %23239, %v5702_v42   ;;  %v5709_v31 = vld [vmem:[%s29590_s1 + $0xc0] sm:$0xff] }
 0x693   : > { %v26794_v57 = vadd.f32 %v4175_v21, %v26371_v15  ;;  %v20917_v5 = vpop.f32.mrb[205].mxu0  ;;  %v5706_v21 = vld [vmem:[%s29590_s1 + $0xa8] sm:$0xff] }
 0x694   : > { %v4178_v37 = vpop.f32.mrb[206].mxu0  ;;  %v5705_v5 = vld [vmem:[%s29590_s1 + $0xa0] sm:$0xff] }
 0x695   : > { %5811 = vperm.xlu0 %23238, %v5699_v20   ;;  %v26804_v22 = vadd.f32 %v4178_v37, %v26374_v24  ;;  %v20918_v15 = vpop.f32.mrb[207].mxu0  ;;  %v5708_v37 = vld [vmem:[%s29590_s1 + $0xb8] sm:$0xff] }
 0x696   : > { %5836 = vperm.xlu1 %23239, %v5704_v4  }
 0x697   : > { %21026 = vmatmul.mubr.msk.bf16.gmra.mrb[56].mxu0 %vm777_vm3, %v4651_v56  ;;  %v5707_v56 = vld [vmem:[%s29590_s1 + $0xb0] sm:$0xff] }
 0x698   : > { %21029 = vmatprep.mubr.msk.bf16.mxu0 %vm24093_vm1, %v29764_v14 }
 0x699   : > { %5821 = vperm.xlu0 %23238, %v5701_v44   ;;  %v18014_v44 = vcombine.low %v5116_v27, %v26451_v53  ;;  %v5124_v53 = vrot.slane %v26465_v60, 1 }
 0x69a   : > { %v4183_v24 = vpop.f32.mrb[208].mxu0  ;;  %5846 = vperm.xlu1 %23239, %v5706_v21  }
 0x69b   : > { %v26817_v20 = vadd.f32 %v4183_v24, %v26381_v52  ;;  %v20921_v36 = vpop.f32.mrb[209].mxu0  ;;  %v5123_v34 = vrot.slane %v18014_v44, 1  ;;  %v5714_v44 = vld [vmem:[%s29590_s1 + $0xe8] sm:$0xff] }
 0x69c   : > { %v4186_v42 = vpop.f32.mrb[210].mxu0 }
 0x69d   : > { %5831 = vperm.xlu0 %23238, %v5703_v29   ;;  %v26829_v50 = vadd.f32 %v4186_v42, %v26384_v41  ;;  %v20922_v52 = vpop.f32.mrb[211].mxu0  ;;  %v5710_v29 = vld [vmem:[%s29590_s1 + $0xc8] sm:$0xff]  ;;  %v5125_v24 = vsel %vm1430_vm4, %v5123_v34, %v5124_v53 }
 0x69e   : > { %5856 = vperm.xlu1 %23239, %v5708_v37   ;;  %v5713_v52 = vld [vmem:[%s29590_s1 + $0xe0] sm:$0xff] }
 0x69f   : > { %21030 = vmatmul.mubr.msk.bf16.gmra.mrb[60].mxu0 %vm777_vm3, %v4659_v35  ;;  %v5711_v35 = vld [vmem:[%s29590_s1 + $0xd0] sm:$0xff] }
 0x6a0   : > { %21067 = vmatprep.mubr.msk.bf16.mxu0 %vm24093_vm1, %v29764_v14 }
 0x6a1   : > { %5841 = vperm.xlu0 %23238, %v5705_v5   ;;  %v5712_v5 = vld [vmem:[%s29590_s1 + $0xd8] sm:$0xff] }
 0x6a2   : > { %v4191_v41 = vpop.f32.mrb[212].mxu0  ;;  %5866 = vperm.xlu1 %23239, %v5710_v29   ;;  %v5718_v29 = vld [vmem:[%s29590_s1 + $0x108] sm:$0xff] }
 0x6a3   : > { %v4292_v15 = vadd.f32 %v4191_v41, %v26391_v63  ;;  %v20925_v4 = vpop.f32.mrb[213].mxu0 }
 0x6a4   : > { %v4194_v27 = vpop.f32.mrb[214].mxu0 }
 0x6a5   : > { %5851 = vperm.xlu0 %23238, %v5707_v56   ;;  %v4293_v60 = vadd.f32 %v4194_v27, %v26394_v26  ;;  %v26851_v36 = vadd.f32 %v26536_v0, %v4292_v15  ;;  %v20926_v21 = vpop.f32.mrb[215].mxu0  ;;  %v5126_v26 = vrot.slane %v26479_v62, 1  ;;  %v5716_v15 = vld [vmem:[%s29590_s1 + $0xf8] sm:$0xff] }
 0x6a6   : > { %5876 = vperm.xlu1 %23239, %v5712_v5   ;;  %v5720_v5 = vld [vmem:[%s29590_s1 + $0x118] sm:$0xff] }
 0x6a7   : > { %29926 = vst [vmem:[#allocation21_spill] sm:$0xff] %v26851_v36  ;;  %v26854_v63 = vadd.f32 %v26541_v33, %v4293_v60  ;;  %21068 = vmatmul.mubr.msk.bf16.vlgmr.msra.gmra.mrb[64].mxu0 %vm777_vm3, %v5125_v24  ;;  %v5127_v56 = vsel %vm1430_vm4, %v5124_v53, %v5126_v26  ;;  %v5715_v53 = vld [vmem:[%s29590_s1 + $0xf0] sm:$0xff] }
 0x6a8   : > { %21071 = vmatprep.mubr.msk.bf16.mxu0 %vm24093_vm1, %v29764_v14 }
 0x6a9   : > { %5861 = vperm.xlu0 %23238, %v5709_v31   ;;  %29927 = vst [vmem:[#allocation16_spill] sm:$0xff] %v26854_v63  ;;  %v5717_v31 = vld [vmem:[%s29590_s1 + $0x100] sm:$0xff] }
 0x6aa   : > { %v4199_v0 = vpop.f32.mrb[216].mxu0  ;;  %5886 = vperm.xlu1 %23239, %v5714_v44   ;;  %v29993_v63 = vld [vmem:[#allocation40_spill] sm:$0xff] }
 0x6ab   : > { %v4294_v33 = vadd.f32 %v4199_v0, %v26401_v32  ;;  %v20929_v42 = vpop.f32.mrb[217].mxu0  ;;  %v26918_v0 = vld [vmem:[%s24214_s25 + $0xb0] sm:$0xff]  }
 0x6ac   : > { %v4202_v37 = vpop.f32.mrb[218].mxu0  ;;  %v29932_v42 = vld [vmem:[#allocation24_spill] sm:$0xff] }
 0x6ad   : > { %5871 = vperm.xlu0 %23238, %v5711_v35   ;;  %v4295_v62 = vadd.f32 %v4202_v37, %v26404_v25  ;;  %v26876_v34 = vadd.f32 %v26555_v3, %v4294_v33  ;;  %v20930_v41 = vpop.f32.mrb[219].mxu0  ;;  %v5128_v25 = vrot.slane %v26498_v30, 1  ;;  %v5719_v35 = vld [vmem:[%s29590_s1 + $0x110] sm:$0xff]  ;;  %v29618_v33 = vrot.slane %v26918_v0, 1  ;;  %v5722_v37 = vld [vmem:[%s29590_s1 + $0x128] sm:$0xff] }
 0x6ae   : > { %5896 = vperm.xlu1 %23239, %v5716_v15   ;;  %v6392_v41 = vld [vmem:[%s24214_s25 + $0x18] sm:$0xf]  ;;  %v6393_v15 = vld [vmem:[%s24214_s25 + $0x1c] sm:$0xf] }
 0x6af   : > { %29928 = vst [vmem:[#allocation17_spill] sm:$0xff] %v26876_v34  ;;  %v26879_v32 = vadd.f32 %v26560_v1, %v4295_v62  ;;  %21072 = vmatmul.mubr.msk.bf16.gmra.mrb[68].mxu0 %vm777_vm3, %v5127_v56  ;;  %v5129_v24 = vsel %vm1430_vm4, %v5126_v26, %v5128_v25 }
 0x6b0   : > { %21075 = vmatprep.mubr.msk.bf16.mxu0 %vm24093_vm1, %v29764_v14 }
 0x6b1   : > { %5881 = vperm.xlu0 %23238, %v5713_v52   ;;  %29929 = vst [vmem:[#allocation42_spill] sm:$0xff] %v26879_v32  ;;  %v29988_v32 = vld [vmem:[#allocation15_spill] sm:$0xff] }
 0x6b2   : > { %v4207_v3 = vpop.f32.mrb[220].mxu0  ;;  %5906 = vperm.xlu1 %23239, %v5718_v29   ;;  %v18099_v29 = vcombine.low %v6392_v41, %v6393_v15  ;;  %v5725_v41 = vld [vmem:[%s29590_s1 + $0x140] sm:$0xff] }
 0x6b3   : > { %v4296_v1 = vadd.f32 %v4207_v3, %v26411_v16  ;;  %v20933_v4 = vpop.f32.mrb[221].mxu0 }
 0x6b4   : > { %v4210_v27 = vpop.f32.mrb[222].mxu0 }
 0x6b5   : > { %5891 = vperm.xlu0 %23238, %v5715_v53   ;;  %v4297_v30 = vadd.f32 %v4210_v27, %v26414_v28  ;;  %v26901_v60 = vadd.f32 %v26574_v38, %v4296_v1  ;;  %v20934_v16 = vpop.f32.mrb[223].mxu0  ;;  %v5130_v28 = vrot.slane %v26513_v19, 1  ;;  %v23872_v38 = vld [vmem:[%s24214_s25 + $0xb8] sm:$0xff]   ;;  %v5721_v19 = vld [vmem:[%s29590_s1 + $0x120] sm:$0xff]  ;;  %v6576_v27 = vshll.u32 %v18099_v29, 16 }
 0x6b6   : > { %5916 = vperm.xlu1 %23239, %v5720_v5   ;;  %v26956_v16 = vld [vmem:[%s24214_s25 + $0xc0] sm:$0xff]  }
 0x6b7   : > { %29930 = vst [vmem:[#allocation43_spill] sm:$0xff] %v26901_v60  ;;  %v26904_v21 = vadd.f32 %v26579_v39, %v4297_v30  ;;  %21076 = vmatmul.mubr.msk.bf16.gmra.mrb[72].mxu0 %vm777_vm3, %v5129_v24  ;;  %v5162_v39 = vrot.slane %v23872_v38, 1  ;;  %v5131_v62 = vsel %vm1430_vm4, %v5128_v25, %v5130_v28  ;;  %v5132_v24 = vrot.slane %v26528_v59, 1 }
 0x6b8   : > { %21079 = vmatprep.mubr.msk.bf16.mxu0 %vm24093_vm1, %v29764_v14  ;;  %v5164_v5 = vrot.slane %v26956_v16, 1  ;;  %v6574_v38 = vshrl.u32 %v18099_v29, 16  ;;  %v5732_v16 = vld [vmem:[%s29590_s1 + $0x178] sm:$0xff] }
 0x6b9   : > { %5901 = vperm.xlu0 %23238, %v5717_v31   ;;  %29931 = vst [vmem:[#allocation44_spill] sm:$0xff] %v26904_v21  ;;  %v26938_v4 = vsel %vm1430_vm4, %v29618_v33, %v5162_v39  ;;  %v23392_v31 = vld [vmem:[%s24214_s25 + $0x20] sm:$0xff]   ;;  %v5133_v29 = vsel %vm1430_vm4, %v5130_v28, %v5132_v24 }
 0x6ba   : > { %v4215_v26 = vpop.f32.mrb[224].mxu0  ;;  %5926 = vperm.xlu1 %23239, %v5722_v37   ;;  %v6581_v30 = vshll.u32 %v23392_v31, 16  ;;  %v26982_v28 = vsel %vm1430_vm4, %v5162_v39, %v5164_v5  ;;  %v5728_v39 = vld [vmem:[%s29590_s1 + $0x158] sm:$0xff] }
 0x6bb   : > { %v4298_v44 = vadd.f32 %v4215_v26, %v29932_v42  ;;  %v20937_v52 = vpop.f32.mrb[225].mxu0  ;;  %v6578_v26 = vrot.slane %v6576_v27, 1  ;;  %v29984_v21 = vld [vmem:[#allocation8_spill] sm:$0xff] }
 0x6bc   : > { %v4218_v56 = vpop.f32.mrb[226].mxu0  ;;  %v6585_v52 = vshrl.u32 %v23392_v31, 16 }
 0x6bd   : > { %5911 = vperm.xlu0 %23238, %v5719_v35   ;;  %v4299_v53 = vadd.f32 %v4218_v56, %v26424_v54  ;;  %v26933_v3 = vadd.f32 %v26593_v43, %v4298_v44  ;;  %v20938_v1 = vpop.f32.mrb[227].mxu0  ;;  %v5724_v54 = vld [vmem:[%s29590_s1 + $0x138] sm:$0xff]  ;;  %v5723_v43 = vld [vmem:[%s29590_s1 + $0x130] sm:$0xff]  ;;  %v23390_v35 = vld [vmem:[%s29596_s7] sm:$0x1f]   ;;  %v6583_v44 = vrot.slane %v6581_v30, 1 }
 0x6be   : > { %5936 = vperm.xlu1 %23239, %v5724_v54   ;;  %23165 = vmatprep.subr.msk.bf16.mxu1 %vm859_vm0, %v23390_v35  ;;  %v6847_v15 = vsel %vm859_vm0, %v23390_v35, 0 }
 0x6bf   : > { %29933 = vst [vmem:[#allocation24_spill] sm:$0xff] %v26933_v3  ;;  %v26942_v25 = vadd.f32 %v26598_v46, %v4299_v53  ;;  %21080 = vmatmul.mubr.msk.bf16.gmra.mrb[76].mxu0 %vm777_vm3, %v5131_v62  ;;  %v23393_v46 = vld [vmem:[%s24214_s25 + $0x28] sm:$0xff]   ;;  %v6579_v53 = vor.u32 %v6578_v26, %v6574_v38  ;;  %21176 = vmatpush3.bf16.msra.mxu1 %v6847_v15 }
 0x6c0   : > { %21083 = vmatprep.mubr.msk.bf16.mxu0 %vm24093_vm1, %v29764_v14  ;;  %v6589_v37 = vshll.u32 %v23393_v46, 16  ;;  %v5726_v62 = vld [vmem:[%s29590_s1 + $0x148] sm:$0xff]  ;;  %v6587_v31 = vor.u32 %v6585_v52, %v6583_v44  ;;  %v6593_v15 = vshrl.u32 %v23393_v46, 16 }
 0x6c1   : > { %5921 = vperm.xlu0 %23238, %v5721_v19   ;;  %29934 = vst [vmem:[#allocation45_spill] sm:$0xff] %v26942_v25  ;;  %v29935_v19 = vld [vmem:[#allocation19_spill] sm:$0xff]  ;;  %v26977_v35 = vsel %vm551_vm2, %v6579_v53, %v6583_v44  ;;  %v29940_v26 = vld [vmem:[#allocation18_spill] sm:$0xff]  ;;  %v29980_v25 = vld [vmem:[#allocation37_spill] sm:$0xff] }
 0x6c2   : > { %v4223_v42 = vpop.f32.mrb[228].mxu0  ;;  %5946 = vperm.xlu1 %23239, %v5726_v62   ;;  %v6591_v54 = vrot.slane %v6589_v37, 1  ;;  %21177 = vmatprep.mubr.msk.bf16.mxu1 %vm777_vm3, %v26977_v35  ;;  %v5727_v44 = vld [vmem:[%s29590_s1 + $0x150] sm:$0xff]  ;;  %v23875_v62 = vld [vmem:[%s24214_s25 + $0xc8] sm:$0xff]  }
 0x6c3   : > { %v4300_v59 = vadd.f32 %v4223_v42, %v29935_v19  ;;  %v20941_v56 = vpop.f32.mrb[229].mxu0  ;;  %v29942_v37 = vld [vmem:[#allocation35_spill] sm:$0xff] }
 0x6c4   : > { %v4226_v1 = vpop.f32.mrb[230].mxu0  ;;  %v26987_v38 = vsel %vm551_vm2, %v6587_v31, %v6591_v54  ;;  %v5134_v19 = vrot.slane %v29942_v37, 1  ;;  %v23395_v56 = vld [vmem:[%s24214_s25 + $0x38] sm:$0xff]   ;;  %v6595_v37 = vor.u32 %v6593_v15, %v6591_v54 }
 0x6c5   : > { %5931 = vperm.xlu0 %23238, %v5723_v43   ;;  %v29936_v43 = vld [vmem:[#allocation20_spill] sm:$0xff]  ;;  %v26974_v30 = vadd.f32 %v26609_v51, %v4300_v59  ;;  %v20942_v42 = vpop.f32.mrb[231].mxu0  ;;  %29939 = vst [vmem:[#allocation46_spill] sm:$0xff] %v26987_v38  ;;  %v23394_v51 = vld [vmem:[%s24214_s25 + $0x30] sm:$0xff]   ;;  %21178 = vmatmul.mubr.msk.bf16.vlgmr.msra.gmra.mrb[32].mxu1 %vm777_vm3, %v26987_v38  ;;  %v6605_v31 = vshll.u32 %v23395_v56, 16 }
 0x6c6   : > { %v4301_v27 = vadd.f32 %v4226_v1, %v29936_v43  ;;  %29938 = vst [vmem:[#allocation20_spill] sm:$0xff] %v26977_v35  ;;  %5956 = vperm.xlu1 %23239, %v5728_v39   ;;  %v6597_v59 = vshll.u32 %v23394_v51, 16  ;;  %v29943_v43 = vld [vmem:[#allocation27_spill] sm:$0xff]  ;;  %v5729_v39 = vld [vmem:[%s29590_s1 + $0x160] sm:$0xff]  ;;  %v5135_v46 = vsel %vm1430_vm4, %v5132_v24, %v5134_v19 }
 0x6c7   : > { %29937 = vst [vmem:[#allocation19_spill] sm:$0xff] %v26974_v30  ;;  %21084 = vmatmul.mubr.msk.bf16.gmra.mrb[80].mxu0 %vm777_vm3, %v5133_v29  ;;  %v6601_v29 = vshrl.u32 %v23394_v51, 16  ;;  %v6607_v51 = vrot.slane %v6605_v31, 1  ;;  %v23876_v31 = vld [vmem:[%s24214_s25 + $0xd0] sm:$0xff]  }
 0x6c8   : > { %v26991_v52 = vadd.f32 %v29940_v26, %v4301_v27  ;;  %21087 = vmatprep.mubr.msk.bf16.mxu0 %vm24093_vm1, %v29764_v14  ;;  %v6599_v1 = vrot.slane %v6597_v59, 1  ;;  %v5730_v26 = vld [vmem:[%s29590_s1 + $0x168] sm:$0xff] }
 0x6c9   : > { %5941 = vperm.xlu0 %23238, %v5725_v41   ;;  %v5166_v41 = vrot.slane %v23875_v62, 1  ;;  %v29944_v59 = vld [vmem:[#allocation22_spill] sm:$0xff] }
 0x6ca   : > { %29941 = vst [vmem:[#allocation18_spill] sm:$0xff] %v26991_v52  ;;  %v4231_v53 = vpop.f32.mrb[232].mxu0  ;;  %5966 = vperm.xlu1 %23239, %v5730_v26   ;;  %v6609_v26 = vshrl.u32 %v23395_v56, 16  ;;  %v29972_v52 = vld [vmem:[#allocation6_spill] sm:$0xff] }
 0x6cb   : > { %v4302_v27 = vadd.f32 %v4231_v53, %v29943_v43  ;;  %v20945_v42 = vpop.f32.mrb[233].mxu0  ;;  %v27025_v54 = vsel %vm1430_vm4, %v5164_v5, %v5166_v41  ;;  %v5731_v5 = vld [vmem:[%s29590_s1 + $0x170] sm:$0xff] }
 0x6cc   : > { %v4234_v62 = vpop.f32.mrb[234].mxu0  ;;  %v27020_v42 = vsel %vm551_vm2, %v6595_v37, %v6599_v1 }
 0x6cd   : > { %5951 = vperm.xlu0 %23238, %v5727_v44   ;;  %v6603_v44 = vor.u32 %v6601_v29, %v6599_v1  ;;  %v4303_v33 = vadd.f32 %v4234_v62, %v29944_v59  ;;  %v27017_v53 = vadd.f32 %v26624_v2, %v4302_v27  ;;  %v20946_v43 = vpop.f32.mrb[235].mxu0  ;;  %29946 = vst [vmem:[#allocation27_spill] sm:$0xff] %v27020_v42  ;;  %v23396_v2 = vld [vmem:[%s24214_s25 + $0x40] sm:$0xff]   ;;  %v29949_v1 = vld [vmem:[#allocation38_spill] sm:$0xff]  ;;  %v5168_v27 = vrot.slane %v23876_v31, 1 }
 0x6ce   : > { %21181 = vmatprep.mubr.msk.bf16.mxu1 %vm777_vm3, %v27020_v42  ;;  %v5136_v29 = vrot.slane %v29949_v1, 1  ;;  %5976 = vperm.xlu1 %23239, %v5732_v16   ;;  %v6617_v62 = vshrl.u32 %v23396_v2, 16  ;;  %v5733_v16 = vld [vmem:[%s29590_s1 + $0x180] sm:$0xff]  ;;  %v6611_v1 = vor.u32 %v6609_v26, %v6607_v51  ;;  %v5735_v26 = vld [vmem:[%s29590_s1 + $0x190] sm:$0xff] }
 0x6cf   : > { %29945 = vst [vmem:[#allocation35_spill] sm:$0xff] %v27017_v53  ;;  %v27030_v24 = vsel %vm551_vm2, %v6603_v44, %v6607_v51  ;;  %v27034_v15 = vadd.f32 %v26629_v47, %v4303_v33  ;;  %21088 = vmatmul.mubr.msk.bf16.gmra.mrb[84].mxu0 %vm777_vm3, %v5135_v46  ;;  %v6613_v47 = vshll.u32 %v23396_v2, 16  ;;  %v23397_v33 = vld [vmem:[%s24214_s25 + $0x48] sm:$0xff]   ;;  %v29950_v44 = vld [vmem:[#allocation23_spill] sm:$0xff]  ;;  %v27066_v51 = vsel %vm1430_vm4, %v5166_v41, %v5168_v27 }
 0x6d0   : > { %29947 = vst [vmem:[#allocation22_spill] sm:$0xff] %v27030_v24  ;;  %21182 = vmatmul.mubr.msk.bf16.gmra.mrb[36].mxu1 %vm777_vm3, %v27030_v24  ;;  %21091 = vmatprep.mubr.msk.bf16.mxu0 %vm24093_vm1, %v29764_v14  ;;  %v6621_v46 = vshll.u32 %v23397_v33, 16  ;;  %v5734_v24 = vld [vmem:[%s29590_s1 + $0x188] sm:$0xff]  ;;  %v5137_v56 = vsel %vm1430_vm4, %v5134_v19, %v5136_v29  ;;  %v5736_v41 = vld [vmem:[%s29590_s1 + $0x198] sm:$0xff] }
 0x6d1   : > { %5961 = vperm.xlu0 %23238, %v5729_v39   ;;  %29948 = vst [vmem:[#allocation47_spill] sm:$0xff] %v27034_v15  ;;  %v6615_v37 = vrot.slane %v6613_v47, 1  ;;  %v29951_v47 = vld [vmem:[#allocation30_spill] sm:$0xff] }
 0x6d2   : > { %v4239_v39 = vpop.f32.mrb[236].mxu0  ;;  %5986 = vperm.xlu1 %23239, %v5734_v24   ;;  %v6623_v2 = vrot.slane %v6621_v46, 1  ;;  %v23398_v24 = vld [vmem:[%s24214_s25 + $0x50] sm:$0xff]   ;;  %v23877_v46 = vld [vmem:[%s24214_s25 + $0xd8] sm:$0xff]  }
 0x6d3   : > { %v4304_v59 = vadd.f32 %v4239_v39, %v29950_v44  ;;  %v20949_v43 = vpop.f32.mrb[237].mxu0 }
 0x6d4   : > { %v4242_v31 = vpop.f32.mrb[238].mxu0  ;;  %v27063_v43 = vsel %vm551_vm2, %v6611_v1, %v6615_v37 }
 0x6d5   : > { %5971 = vperm.xlu0 %23238, %v5731_v5   ;;  %v6619_v5 = vor.u32 %v6617_v62, %v6615_v37  ;;  %v4305_v42 = vadd.f32 %v4242_v31, %v29951_v47  ;;  %v27060_v39 = vadd.f32 %v26639_v49, %v4304_v59  ;;  %v20950_v44 = vpop.f32.mrb[239].mxu0  ;;  %29953 = vst [vmem:[#allocation23_spill] sm:$0xff] %v27063_v43  ;;  %v29956_v37 = vld [vmem:[#allocation9_spill] sm:$0xff]  ;;  %v5170_v59 = vrot.slane %v23877_v46, 1 }
 0x6d6   : > { %21185 = vmatprep.mubr.msk.bf16.mxu1 %vm777_vm3, %v27063_v43  ;;  %v5138_v62 = vrot.slane %v29956_v37, 1  ;;  %5996 = vperm.xlu1 %23239, %v5736_v41   ;;  %v29957_v47 = vld [vmem:[#allocation25_spill] sm:$0xff] }
 0x6d7   : > { %29952 = vst [vmem:[#allocation38_spill] sm:$0xff] %v27060_v39  ;;  %v27071_v19 = vsel %vm551_vm2, %v6619_v5, %v6623_v2  ;;  %v27075_v49 = vadd.f32 %v26644_v17, %v4305_v42  ;;  %21092 = vmatmul.mubr.msk.bf16.gmra.mrb[88].mxu0 %vm777_vm3, %v5137_v56  ;;  %v6629_v17 = vshll.u32 %v23398_v24, 16  ;;  %v23399_v42 = vld [vmem:[%s24214_s25 + $0x58] sm:$0xff]   ;;  %v6633_v56 = vshrl.u32 %v23398_v24, 16  ;;  %v5738_v43 = vld [vmem:[%s29590_s1 + $0x1a8] sm:$0xff]  ;;  %v5737_v41 = vld [vmem:[%s29590_s1 + $0x1a0] sm:$0xff] }
 0x6d8   : > { %29954 = vst [vmem:[#allocation30_spill] sm:$0xff] %v27071_v19  ;;  %21186 = vmatmul.mubr.msk.bf16.gmra.mrb[40].mxu1 %vm777_vm3, %v27071_v19  ;;  %21095 = vmatprep.mubr.msk.bf16.mxu0 %vm24093_vm1, %v29764_v14  ;;  %v6637_v5 = vshll.u32 %v23399_v42, 16 }
 0x6d9   : > { %5981 = vperm.xlu0 %23238, %v5733_v16   ;;  %29955 = vst [vmem:[#allocation48_spill] sm:$0xff] %v27075_v49  ;;  %v6625_v16 = vshrl.u32 %v23397_v33, 16  ;;  %v6631_v31 = vrot.slane %v6629_v17, 1  ;;  %v5139_v33 = vsel %vm1430_vm4, %v5136_v29, %v5138_v62  ;;  %v29958_v17 = vld [vmem:[#allocation26_spill] sm:$0xff] }
 0x6da   : > { %v4247_v1 = vpop.f32.mrb[240].mxu0  ;;  %6006 = vperm.xlu1 %23239, %v5738_v43   ;;  %v23400_v43 = vld [vmem:[%s24214_s25 + $0x60] sm:$0xff]  }
 0x6db   : > { %v4306_v44 = vadd.f32 %v4247_v1, %v29957_v47  ;;  %v20953_v19 = vpop.f32.mrb[241].mxu0  ;;  %v6627_v37 = vor.u32 %v6625_v16, %v6623_v2  ;;  %v6635_v24 = vor.u32 %v6633_v56, %v6631_v31  ;;  %v27107_v2 = vsel %vm1430_vm4, %v5168_v27, %v5170_v59  ;;  %v23401_v56 = vld [vmem:[%s24214_s25 + $0x68] sm:$0xff]  }
 0x6dc   : > { %v4250_v46 = vpop.f32.mrb[242].mxu0 }
 0x6dd   : > { %5991 = vperm.xlu0 %23238, %v5735_v26   ;;  %v6639_v26 = vrot.slane %v6637_v5, 1  ;;  %v4307_v1 = vadd.f32 %v4250_v46, %v29958_v17  ;;  %v27101_v19 = vadd.f32 %v26654_v10, %v4306_v44  ;;  %v20954_v47 = vpop.f32.mrb[243].mxu0  ;;  %v27104_v38 = vsel %vm551_vm2, %v6627_v37, %v6631_v31  ;;  %v23878_v10 = vld [vmem:[%s24214_s25 + $0x60] sm:$0xff]  }
 0x6de   : > { %29960 = vst [vmem:[#allocation25_spill] sm:$0xff] %v27104_v38  ;;  %21189 = vmatprep.mubr.msk.bf16.mxu1 %vm777_vm3, %v27104_v38  ;;  %v5140_v27 = vrot.slane %v23878_v10, 1  ;;  %v6645_v31 = vshll.u32 %v23400_v43, 16  ;;  %v23879_v5 = vld [vmem:[%s24214_s25 + $0xe0] sm:$0xff]  }
 0x6df   : > { %29959 = vst [vmem:[#allocation9_spill] sm:$0xff] %v27101_v19  ;;  %v27112_v29 = vsel %vm551_vm2, %v6635_v24, %v6639_v26  ;;  %v27116_v16 = vadd.f32 %v26659_v12, %v4307_v1  ;;  %21096 = vmatmul.mubr.msk.bf16.gmra.mrb[92].mxu0 %vm777_vm3, %v5139_v33  ;;  %v5172_v44 = vrot.slane %v23879_v5, 1  ;;  %v6649_v12 = vshrl.u32 %v23400_v43, 16  ;;  %v29963_v17 = vld [vmem:[#allocation33_spill] sm:$0xff]  ;;  %v29964_v5 = vld [vmem:[#allocation28_spill] sm:$0xff] }
 0x6e0   : > { %29961 = vst [vmem:[#allocation26_spill] sm:$0xff] %v27112_v29  ;;  %21190 = vmatmul.mubr.msk.bf16.gmra.mrb[44].mxu1 %vm777_vm3, %v27112_v29  ;;  %21099 = vmatprep.mubr.msk.bf16.mxu0 %vm24093_vm1, %v29764_v14  ;;  %v6647_v46 = vrot.slane %v6645_v31, 1  ;;  %v6653_v24 = vshll.u32 %v23401_v56, 16  ;;  %v5141_v38 = vsel %vm1430_vm4, %v5138_v62, %v5140_v27  ;;  %v23402_v62 = vld [vmem:[%s24214_s25 + $0x70] sm:$0xff]  }
 0x6e1   : > { %6001 = vperm.xlu0 %23238, %v5737_v41   ;;  %29962 = vst [vmem:[#allocation49_spill] sm:$0xff] %v27116_v16  ;;  %v6641_v41 = vshrl.u32 %v23399_v42, 16 }
 0x6e2   : > { %v4847_v37 = vpop.f32.mrb[244].mxu0  ;;  %v6651_v10 = vor.u32 %v6649_v12, %v6647_v46  ;;  %v6655_v35 = vrot.slane %v6653_v24, 1  ;;  %v23881_v12 = vld [vmem:[%s24214_s25 + $0xe8] sm:$0xff]  }
 0x6e3   : > { %v27127_v33 = vadd.f32 %v4847_v37, %v29963_v17  ;;  %v20959_v1 = vpop.f32.mrb[245].mxu0  ;;  %v6643_v47 = vor.u32 %v6641_v41, %v6639_v26  ;;  %v27137_v37 = vsel %vm1430_vm4, %v5170_v59, %v5172_v44  ;;  %v23403_v59 = vld [vmem:[%s24214_s25 + $0x78] sm:$0xff]   ;;  %v5174_v24 = vrot.slane %v23881_v12, 1 }
 0x6e4   : > { %v4850_v29 = vpop.f32.mrb[246].mxu0  ;;  %v27142_v26 = vsel %vm551_vm2, %v6651_v10, %v6655_v35  ;;  %v6657_v17 = vshrl.u32 %v23401_v56, 16  ;;  %v6665_v10 = vshrl.u32 %v23402_v62, 16  ;;  %v29968_v12 = vld [vmem:[#allocation31_spill] sm:$0xff] }
 0x6e5   : > { %v27131_v42 = vadd.f32 %v4850_v29, %v29964_v5  ;;  %v20960_v31 = vpop.f32.mrb[247].mxu0  ;;  %v27134_v43 = vsel %vm551_vm2, %v6643_v47, %v6647_v46  ;;  %29966 = vst [vmem:[#allocation28_spill] sm:$0xff] %v27142_v26  ;;  %v23880_v29 = vld [vmem:[%s24214_s25 + $0x68] sm:$0xff]   ;;  %v6661_v46 = vshll.u32 %v23402_v62, 16  ;;  %v6669_v5 = vshll.u32 %v23403_v59, 16 }
 0x6e6   : > { %29965 = vst [vmem:[#allocation33_spill] sm:$0xff] %v27134_v43  ;;  %21193 = vmatprep.mubr.msk.bf16.mxu1 %vm777_vm3, %v27134_v43  ;;  %v5142_v41 = vrot.slane %v23880_v29, 1  ;;  %v29967_v31 = vld [vmem:[#allocation29_spill] sm:$0xff] }
 0x6e7   : > { %21100 = vmatmul.mubr.msk.bf16.gmra.mrb[96].mxu0 %vm777_vm3, %v5141_v38  ;;  %v6663_v47 = vrot.slane %v6661_v46, 1  ;;  %v6671_v49 = vrot.slane %v6669_v5, 1 }
 0x6e8   : > { %21194 = vmatmul.mubr.msk.bf16.gmra.mrb[48].mxu1 %vm777_vm3, %v27142_v26  ;;  %21103 = vmatprep.mubr.msk.bf16.mxu0 %vm24093_vm1, %v29764_v14  ;;  %v6659_v26 = vor.u32 %v6657_v17, %v6655_v35  ;;  %v5143_v19 = vsel %vm1430_vm4, %v5140_v27, %v5142_v41  ;;  %v23404_v27 = vld [vmem:[%s24214_s25 + $0x80] sm:$0xff]   ;;  %v23883_v17 = vld [vmem:[%s24214_s25 + $0xf0] ss:$0 sps:$4 sm:$0x11]  }
 0x6e9   : > { %v6667_v29 = vor.u32 %v6665_v10, %v6663_v47  ;;  %v6673_v10 = vshrl.u32 %v23403_v59, 16 }
 0x6ea   : > { %v4855_v1 = vpop.f32.mrb[248].mxu0  ;;  %v27161_v62 = vsel %vm551_vm2, %v6659_v26, %v6663_v47  ;;  %v6677_v26 = vshll.u32 %v23404_v27, 16  ;;  %v5176_v47 = vrot.slane %v23883_v17, 1 }
 0x6eb   : > { %v27154_v38 = vadd.f32 %v4855_v1, %v29967_v31  ;;  %v20963_v43 = vpop.f32.mrb[249].mxu0  ;;  %29969 = vst [vmem:[#allocation29_spill] sm:$0xff] %v27161_v62  ;;  %v27164_v1 = vsel %vm1430_vm4, %v5172_v44, %v5174_v24  ;;  %21197 = vmatprep.mubr.msk.bf16.mxu1 %vm777_vm3, %v27161_v62  ;;  %v27169_v35 = vsel %vm551_vm2, %v6667_v29, %v6671_v49  ;;  %v23405_v44 = vld [vmem:[%s24214_s25 + $0x88] sm:$0xff]   ;;  %v6681_v29 = vshrl.u32 %v23404_v27, 16 }
 0x6ec   : > { %v4858_v16 = vpop.f32.mrb[250].mxu0  ;;  %29970 = vst [vmem:[#allocation31_spill] sm:$0xff] %v27169_v35  ;;  %v6679_v31 = vrot.slane %v6677_v26, 1  ;;  %v27191_v27 = vsel %vm1430_vm4, %v5174_v24, %v5176_v47  ;;  %v23407_v24 = vld [vmem:[%s24214_s25 + $0x98] sm:$0xff]  }
 0x6ed   : > { %v27158_v56 = vadd.f32 %v4858_v16, %v29968_v12  ;;  %v20964_v46 = vpop.f32.mrb[251].mxu0  ;;  %v23882_v16 = vld [vmem:[%s24214_s25 + $0x70] sm:$0xff]   ;;  %v6685_v12 = vshll.u32 %v23405_v44, 16 }
 0x6ee   : > { %v5144_v43 = vrot.slane %v23882_v16, 1  ;;  %v29971_v46 = vld [vmem:[#allocation32_spill] sm:$0xff]  ;;  %v6683_v16 = vor.u32 %v6681_v29, %v6679_v31  ;;  %v29975_v29 = vld [vmem:[#allocation7_spill] sm:$0xff] }
 0x6ef   : > { %21104 = vmatmul.mubr.msk.bf16.gmra.mrb[100].mxu0 %vm777_vm3, %v5143_v19  ;;  %v6687_v53 = vrot.slane %v6685_v12, 1 }
 0x6f0   : > { %21198 = vmatmul.mubr.msk.bf16.gmra.mrb[52].mxu1 %vm777_vm3, %v27169_v35  ;;  %21107 = vmatprep.mubr.msk.bf16.mxu0 %vm24093_vm1, %v29764_v14  ;;  %v6675_v35 = vor.u32 %v6673_v10, %v6671_v49  ;;  %v5145_v15 = vsel %vm1430_vm4, %v5142_v41, %v5144_v43  ;;  %v23406_v41 = vld [vmem:[%s24214_s25 + $0x90] sm:$0xff]  }
 0x6f1   : > { %v27196_v49 = vsel %vm551_vm2, %v6683_v16, %v6687_v53 }
 0x6f2   : > { %v4863_v5 = vpop.f32.mrb[252].mxu0  ;;  %v27188_v26 = vsel %vm551_vm2, %v6675_v35, %v6679_v31  ;;  %29974 = vst [vmem:[#allocation6_spill] sm:$0xff] %v27196_v49  ;;  %v6689_v35 = vshrl.u32 %v23405_v44, 16  ;;  %v6701_v31 = vshll.u32 %v23407_v24, 16 }
 0x6f3   : > { %v27181_v19 = vadd.f32 %v4863_v5, %v29971_v46  ;;  %v20967_v62 = vpop.f32.mrb[253].mxu0  ;;  %29973 = vst [vmem:[#allocation32_spill] sm:$0xff] %v27188_v26  ;;  %21201 = vmatprep.mubr.msk.bf16.mxu1 %vm777_vm3, %v27188_v26  ;;  %v6697_v5 = vshrl.u32 %v23406_v41, 16  ;;  %v29976_v26 = vld [vmem:[#allocation12_spill] sm:$0xff] }
 0x6f4   : > { %v4866_v39 = vpop.f32.mrb[254].mxu0  ;;  %v6693_v62 = vshll.u32 %v23406_v41, 16  ;;  %v6691_v46 = vor.u32 %v6689_v35, %v6687_v53  ;;  %v23408_v53 = vld [vmem:[%s24214_s25 + $0xa0] sm:$0xff]  }
 0x6f5   : > { %v27185_v17 = vadd.f32 %v4866_v39, %v29972_v52  ;;  %v20968_v59 = vpop.f32.mrb[255].mxu0  ;;  %v23884_v52 = vld [vmem:[%s24214_s25 + $0x78] sm:$0xff]   ;;  %v6709_v35 = vshll.u32 %v23408_v53, 16 }
 0x6f6   : > { %v5146_v39 = vrot.slane %v23884_v52, 1  ;;  %v6695_v10 = vrot.slane %v6693_v62, 1  ;;  %v6703_v52 = vrot.slane %v6701_v31, 1 }
 0x6f7   : > { %21108 = vmatmul.mubr.msk.bf16.gmra.mrb[104].mxu0 %vm777_vm3, %v5145_v15  ;;  %v6711_v31 = vrot.slane %v6709_v35, 1 }
 0x6f8   : > { %21202 = vmatmul.mubr.msk.bf16.gmra.mrb[56].mxu1 %vm777_vm3, %v27196_v49  ;;  %21111 = vmatprep.mubr.msk.bf16.mxu0 %vm24093_vm1, %v29764_v14  ;;  %v5147_v59 = vsel %vm1430_vm4, %v5144_v43, %v5146_v39  ;;  %v6699_v49 = vor.u32 %v6697_v5, %v6695_v10  ;;  %v27214_v62 = vsel %vm551_vm2, %v6691_v46, %v6695_v10  ;;  %v23885_v43 = vld [vmem:[%s24214_s25 + $0x80] sm:$0xff]   ;;  %v6705_v10 = vshrl.u32 %v23407_v24, 16 }
 0x6f9   : > { %29977 = vst [vmem:[#allocation7_spill] sm:$0xff] %v27214_v62  ;;  %21205 = vmatprep.mubr.msk.bf16.mxu1 %vm777_vm3, %v27214_v62 }
 0x6fa   : > { %v4871_v47 = vpop.f32.mrb[0].mxu0  ;;  %v27219_v41 = vsel %vm551_vm2, %v6699_v49, %v6703_v52 }
 0x6fb   : > { %v27207_v12 = vadd.f32 %v4871_v47, %v29975_v29  ;;  %v20971_v15 = vpop.f32.mrb[1].mxu0  ;;  %29978 = vst [vmem:[#allocation12_spill] sm:$0xff] %v27219_v41  ;;  %v23409_v47 = vld [vmem:[%s24214_s25 + $0xa8] sm:$0xff]   ;;  %v6713_v29 = vshrl.u32 %v23408_v53, 16 }
 0x6fc   : > { %v4874_v16 = vpop.f32.mrb[2].mxu0  ;;  %v6717_v49 = vshll.u32 %v23409_v47, 16  ;;  %v29979_v15 = vld [vmem:[#allocation34_spill] sm:$0xff] }
 0x6fd   : > { %v27211_v30 = vadd.f32 %v4874_v16, %v29976_v26  ;;  %v20972_v44 = vpop.f32.mrb[3].mxu0  ;;  %v5148_v26 = vrot.slane %v23885_v43, 1  ;;  %v6715_v62 = vor.u32 %v6713_v29, %v6711_v31 }
 0x6fe   : > { %v6719_v43 = vrot.slane %v6717_v49, 1  ;;  %v23411_v49 = vld [vmem:[%s29592_s3 + $0x8] sm:$0xff]  }
 0x6ff   : > { %21112 = vmatmul.mubr.msk.bf16.gmra.mrb[108].mxu0 %vm777_vm3, %v5147_v59  ;;  %v6707_v59 = vor.u32 %v6705_v10, %v6703_v52  ;;  %v23412_v52 = vld [vmem:[%s24214_s25 + $0xb0] sm:$0xff]  }
 0x700   : > { %21206 = vmatmul.mubr.msk.bf16.gmra.mrb[60].mxu1 %vm777_vm3, %v27219_v41  ;;  %21115 = vmatprep.mubr.msk.bf16.mxu0 %vm24093_vm1, %v29764_v14  ;;  %v5149_v41 = vsel %vm1430_vm4, %v5146_v39, %v5148_v26  ;;  %v27242_v53 = vsel %vm551_vm2, %v6715_v62, %v6719_v43  ;;  %v23410_v39 = vld [vmem:[%s29592_s3] sm:$0xff]   ;;  %v6721_v62 = vshrl.u32 %v23409_v47, 16 }
 0x701   : > { %v27237_v35 = vsel %vm551_vm2, %v6707_v59, %v6711_v31  ;;  %29982 = vst [vmem:[#allocation37_spill] sm:$0xff] %v27242_v53  ;;  %21225 = vmatprep.subr.bf16.mxu1 %v23410_v39  ;;  %v23413_v31 = vld [vmem:[%s24214_s25 + $0xb8] sm:$0xff]  }
 0x702   : > { %v4879_v5 = vpop.f32.mrb[4].mxu0  ;;  %29981 = vst [vmem:[#allocation34_spill] sm:$0xff] %v27237_v35  ;;  %21209 = vmatprep.mubr.msk.bf16.mxu1 %vm777_vm3, %v27237_v35  ;;  %21226 = vmatpush3.bf16.msra.mxu1 %v23410_v39  ;;  %v29983_v59 = vld [vmem:[#allocation36_spill] sm:$0xff] }
 0x703   : > { %v27230_v46 = vadd.f32 %v4879_v5, %v29979_v15  ;;  %v20975_v16 = vpop.f32.mrb[5].mxu0  ;;  %v6725_v5 = vshll.u32 %v23412_v52, 16  ;;  %21227 = vmatprep.subr.bf16.mxu1 %v23411_v49 }
 0x704   : > { %v4882_v44 = vpop.f32.mrb[6].mxu0  ;;  %v6733_v16 = vshll.u32 %v23413_v31, 16 }
 0x705   : > { %v27234_v3 = vadd.f32 %v4882_v44, %v29980_v25  ;;  %v20976_v24 = vpop.f32.mrb[7].mxu0  ;;  %v23886_v25 = vld [vmem:[%s24214_s25 + $0x88] sm:$0xff]   ;;  %v6727_v15 = vrot.slane %v6725_v5, 1 }
 0x706   : > { %v5150_v10 = vrot.slane %v23886_v25, 1  ;;  %v6735_v39 = vrot.slane %v6733_v16, 1  ;;  %21228 = vmatpush3.bf16.msra.mxu1 %v23411_v49  ;;  %v23417_v49 = vld [vmem:[%s24214_s25 + $0xc8] sm:$0xff]   ;;  %v23415_v16 = vld [vmem:[%s29592_s3 + $0x18] sm:$0xff]  }
 0x707   : > { %21116 = vmatmul.mubr.msk.bf16.gmra.mrb[112].mxu0 %vm777_vm3, %v5149_v41  ;;  %v6729_v41 = vshrl.u32 %v23412_v52, 16 }
 0x708   : > { %21210 = vmatmul.mubr.msk.bf16.gmra.mrb[64].mxu1 %vm777_vm3, %v27242_v53  ;;  %21119 = vmatprep.mubr.msk.bf16.mxu0 %vm24093_vm1, %v29764_v14  ;;  %v6723_v53 = vor.u32 %v6721_v62, %v6719_v43  ;;  %v5151_v35 = vsel %vm1430_vm4, %v5148_v26, %v5150_v10  ;;  %v23414_v26 = vld [vmem:[%s29592_s3 + $0x10] sm:$0xff]   ;;  %v23416_v62 = vld [vmem:[%s24214_s25 + $0xc0] sm:$0xff]  }
 0x709   : > { %v6731_v47 = vor.u32 %v6729_v41, %v6727_v15  ;;  %21229 = vmatprep.subr.bf16.mxu1 %v23414_v26 }
 0x70a   : > { %v4887_v29 = vpop.f32.mrb[8].mxu0  ;;  %v27266_v52 = vsel %vm551_vm2, %v6723_v53, %v6727_v15  ;;  %21230 = vmatpush3.bf16.msra.mxu1 %v23414_v26  ;;  %v6737_v15 = vshrl.u32 %v23413_v31, 16 }
 0x70b   : > { %v27259_v44 = vadd.f32 %v4887_v29, %v29983_v59  ;;  %v20979_v24 = vpop.f32.mrb[9].mxu0  ;;  %29985 = vst [vmem:[#allocation36_spill] sm:$0xff] %v27266_v52  ;;  %21213 = vmatprep.mubr.msk.bf16.mxu1 %vm777_vm3, %v27266_v52  ;;  %v27271_v43 = vsel %vm551_vm2, %v6731_v47, %v6735_v39  ;;  %v6741_v29 = vshll.u32 %v23416_v62, 16  ;;  %21231 = vmatprep.subr.bf16.mxu1 %v23415_v16 }
 0x70c   : > { %v4890_v25 = vpop.f32.mrb[10].mxu0  ;;  %29986 = vst [vmem:[#allocation8_spill] sm:$0xff] %v27271_v43  ;;  %v6749_v24 = vshll.u32 %v23417_v49, 16 }
 0x70d   : > { %v27263_v60 = vadd.f32 %v4890_v25, %v29984_v21  ;;  %v20980_v5 = vpop.f32.mrb[11].mxu0  ;;  %v23887_v21 = vld [vmem:[%s24214_s25 + $0x90] sm:$0xff]   ;;  %v6743_v59 = vrot.slane %v6741_v29, 1 }
 0x70e   : > { %v5152_v53 = vrot.slane %v23887_v21, 1  ;;  %v29987_v25 = vld [vmem:[#allocation39_spill] sm:$0xff]  ;;  %v6751_v26 = vrot.slane %v6749_v24, 1  ;;  %21232 = vmatpush3.bf16.msra.mxu1 %v23415_v16  ;;  %v23419_v24 = vld [vmem:[%s29592_s3 + $0x28] sm:$0xff]  }
 0x70f   : > { %21120 = vmatmul.mubr.msk.bf16.gmra.mrb[116].mxu0 %vm777_vm3, %v5151_v35  ;;  %v6745_v35 = vshrl.u32 %v23416_v62, 16  ;;  %v23421_v16 = vld [vmem:[%s24214_s25 + $0xd8] ss:$0 sps:$4 sm:$0x11]  }
 0x710   : > { %21214 = vmatmul.mubr.msk.bf16.gmra.mrb[68].mxu1 %vm777_vm3, %v27271_v43  ;;  %21123 = vmatprep.mubr.msk.bf16.mxu0 %vm24093_vm1, %v29764_v14  ;;  %v6739_v43 = vor.u32 %v6737_v15, %v6735_v39  ;;  %v5153_v52 = vsel %vm1430_vm4, %v5150_v10, %v5152_v53  ;;  %v23418_v10 = vld [vmem:[%s29592_s3 + $0x20] sm:$0xff]   ;;  %v23420_v15 = vld [vmem:[%s24214_s25 + $0xd0] sm:$0xff]  }
 0x711   : > { %v6747_v31 = vor.u32 %v6745_v35, %v6743_v59  ;;  %21233 = vmatprep.subr.bf16.mxu1 %v23418_v10 }
 0x712   : > { %v4895_v41 = vpop.f32.mrb[12].mxu0  ;;  %v27295_v62 = vsel %vm551_vm2, %v6739_v43, %v6743_v59  ;;  %21234 = vmatpush3.bf16.msra.mxu1 %v23418_v10  ;;  %v6753_v59 = vshrl.u32 %v23417_v49, 16 }
 0x713   : > { %v27288_v47 = vadd.f32 %v4895_v41, %v29987_v25  ;;  %v20983_v5 = vpop.f32.mrb[13].mxu0  ;;  %29990 = vst [vmem:[#allocation15_spill] sm:$0xff] %v27295_v62  ;;  %21217 = vmatprep.mubr.msk.bf16.mxu1 %vm777_vm3, %v27295_v62  ;;  %v27300_v39 = vsel %vm551_vm2, %v6747_v31, %v6751_v26  ;;  %v6757_v41 = vshll.u32 %v23420_v15, 16  ;;  %21235 = vmatprep.subr.bf16.mxu1 %v23419_v24 }
 0x714   : > { %v4898_v21 = vpop.f32.mrb[14].mxu0  ;;  %29991 = vst [vmem:[#allocation50_spill] sm:$0xff] %v27300_v39  ;;  %v6765_v5 = vshll.u32 %v23421_v16, 16 }
 0x715   : > { %v27292_v34 = vadd.f32 %v4898_v21, %v29988_v32  ;;  %v20984_v29 = vpop.f32.mrb[15].mxu0  ;;  %v23888_v32 = vld [vmem:[%s24214_s25 + $0x98] sm:$0xff]   ;;  %v6759_v25 = vrot.slane %v6757_v41, 1  ;;  %v29992_v21 = vld [vmem:[#allocation10_spill] sm:$0xff] }
 0x716   : > { %v5154_v43 = vrot.slane %v23888_v32, 1  ;;  %v6767_v49 = vrot.slane %v6765_v5, 1  ;;  %21236 = vmatpush3.bf16.msra.mxu1 %v23419_v24  ;;  %v23425_v41 = vld [vmem:[%s29592_s3 + $0x38] sm:$0xff]   ;;  %v29996_v24 = vld [vmem:[#allocation41_spill] sm:$0xff] }
 0x717   : > { %29989 = vst [vmem:[#allocation39_spill] sm:$0xff] %v27292_v34  ;;  %21124 = vmatmul.mubr.msk.bf16.gmra.mrb[120].mxu0 %vm777_vm3, %v5153_v52  ;;  %v6761_v52 = vshrl.u32 %v23420_v15, 16  ;;  %v23890_v5 = vld [vmem:[%s24214_s25 + $0xa8] sm:$0xff]  }
 0x718   : > { %21218 = vmatmul.mubr.msk.bf16.gmra.mrb[72].mxu1 %vm777_vm3, %v27300_v39  ;;  %21127 = vmatprep.mubr.msk.bf16.mxu0 %vm24093_vm1, %v29764_v14  ;;  %v6755_v39 = vor.u32 %v6753_v59, %v6751_v26  ;;  %v5155_v62 = vsel %vm1430_vm4, %v5152_v53, %v5154_v43  ;;  %v23422_v53 = vld [vmem:[%s29592_s3 + $0x30] sm:$0xff]  }
 0x719   : > { %v6763_v10 = vor.u32 %v6761_v52, %v6759_v25  ;;  %21237 = vmatprep.subr.bf16.mxu1 %v23422_v53 }
 0x71a   : > { %v4903_v35 = vpop.f32.mrb[16].mxu0  ;;  %v27324_v15 = vsel %vm551_vm2, %v6755_v39, %v6759_v25  ;;  %21238 = vmatpush3.bf16.msra.mxu1 %v23422_v53  ;;  %v29998_v53 = vld [vmem:[#allocation11_spill] sm:$0xff] }
 0x71b   : > { %v27317_v31 = vadd.f32 %v4903_v35, %v29992_v21  ;;  %v20987_v29 = vpop.f32.mrb[17].mxu0  ;;  %29994 = vst [vmem:[#allocation10_spill] sm:$0xff] %v27324_v15  ;;  %21221 = vmatprep.mubr.msk.bf16.mxu1 %vm777_vm3, %v27324_v15  ;;  %v27329_v26 = vsel %vm551_vm2, %v6763_v10, %v6767_v49  ;;  %21239 = vmatprep.subr.bf16.mxu1 %v23425_v41  ;;  %v5158_v21 = vrot.slane %v23890_v5, 1 }
 0x71c   : > { %v4906_v32 = vpop.f32.mrb[18].mxu0  ;;  %29995 = vst [vmem:[#allocation40_spill] sm:$0xff] %v27329_v26 }
 0x71d   : > { %v27321_v36 = vadd.f32 %v4906_v32, %v29993_v63  ;;  %v20988_v34 = vpop.f32.mrb[19].mxu0  ;;  %v23889_v63 = vld [vmem:[%s24214_s25 + $0xa0] sm:$0xff]  }
 0x71e   : > { %v5156_v34 = vrot.slane %v23889_v63, 1  ;;  %21240 = vmatpush3.bf16.msra.mxu1 %v23425_v41 }
 0x71f   : > { %21128 = vmatmul.mubr.msk.bf16.gmra.mrb[124].mxu0 %vm777_vm3, %v5155_v62 }
 0x720   : > { %21222 = vmatmul.mubr.msk.bf16.gmra.mrb[76].mxu1 %vm777_vm3, %v27329_v26  ;;  %21131 = vmatprep.mubr.msk.bf16.mxu0 %vm24093_vm1, %v29764_v14  ;;  %v5157_v35 = vsel %vm1430_vm4, %v5154_v43, %v5156_v34  ;;  %v5159_v43 = vsel %vm1430_vm4, %v5156_v34, %v5158_v21  ;;  %v30000_v34 = vld [vmem:[#allocation14_spill] sm:$0xff] }
 0x722   : > { %v4911_v39 = vpop.f32.mrb[20].mxu0 }
 0x723   : > { %v27344_v16 = vadd.f32 %v4911_v39, %v26621_v11  ;;  %v20991_v62 = vpop.f32.mrb[21].mxu0  ;;  %v29997_v11 = vld [vmem:[#allocation13_spill] sm:$0xff] }
 0x724   : > { %v4914_v59 = vpop.f32.mrb[22].mxu0 }
 0x725   : > { %v27348_v25 = vadd.f32 %v4914_v59, %v29996_v24  ;;  %v20992_v52 = vpop.f32.mrb[23].mxu0  ;;  %v29999_v24 = vrot.slane %v26918_v0, 1 }
 0x727   : > { %21132 = vmatmul.mubr.msk.bf16.gmra.mrb[128].mxu0 %vm777_vm3, %v5157_v35  ;;  %v5161_v52 = vsel %vm1430_vm4, %v5158_v21, %v29999_v24 }
 0x728   : > { %21135 = vmatprep.mubr.msk.bf16.mxu0 %vm24093_vm1, %v29764_v14 }
 0x72a   : > { %v4919_v29 = vpop.f32.mrb[24].mxu0 }
 0x72b   : > { %v27355_v32 = vadd.f32 %v4919_v29, %v29997_v11  ;;  %v20995_v10 = vpop.f32.mrb[25].mxu0 }
 0x72c   : > { %v4922_v49 = vpop.f32.mrb[26].mxu0 }
 0x72d   : > { %v27359_v63 = vadd.f32 %v4922_v49, %v29998_v53  ;;  %v20996_v39 = vpop.f32.mrb[27].mxu0 }
 0x72f   : > { %21136 = vmatmul.mubr.msk.bf16.gmra.mrb[132].mxu0 %vm777_vm3, %v5159_v43 }
 0x730   : > { %21139 = vmatprep.mubr.msk.bf16.mxu0 %vm24093_vm1, %v29764_v14 }
 0x732   : > { %v4927_v41 = vpop.f32.mrb[28].mxu0 }
 0x733   : > { %v27365_v62 = vadd.f32 %v4927_v41, %v26651_v45  ;;  %v20999_v59 = vpop.f32.mrb[29].mxu0 }
 0x734   : > { %v4930_v35 = vpop.f32.mrb[30].mxu0 }
 0x735   : > { %v27371_v5 = vadd.f32 %v4930_v35, %v30000_v34  ;;  %v21000_v29 = vpop.f32.mrb[31].mxu0 }
 0x737   : > { %21140 = vmatmul.mubr.msk.bf16.gmra.mrb[136].mxu0 %vm777_vm3, %v5161_v52 }
 0x738   : > { %21143 = vmatprep.mubr.msk.bf16.mxu0 %vm24093_vm1, %v29764_v14 }
 0x73a   : > { %v4935_v11 = vpop.f32.mrb[32].mxu0 }
 0x73b   : > { %v27377_v10 = vadd.f32 %v4935_v11, %v26666_v40  ;;  %v21003_v45 = vpop.f32.mrb[33].mxu0 }
 0x73c   : > { %v4938_v49 = vpop.f32.mrb[34].mxu0 }
 0x73d   : > { %v27380_v43 = vadd.f32 %v4938_v49, %v26670_v9  ;;  %v21004_v0 = vpop.f32.mrb[35].mxu0 }
 0x73f   : > { %21144 = vmatmul.mubr.msk.bf16.gmra.mrb[140].mxu0 %vm777_vm3, %v26938_v4 }
 0x740   : > { %21147 = vmatprep.mubr.msk.bf16.mxu0 %vm24093_vm1, %v29764_v14 }
 0x742   : > { %v4943_v21 = vpop.f32.mrb[36].mxu0 }
 0x743   : > { %v27387_v53 = vadd.f32 %v4943_v21, %v26679_v7  ;;  %v21007_v39 = vpop.f32.mrb[37].mxu0 }
 0x744   : > { %v4946_v41 = vpop.f32.mrb[38].mxu0 }
 0x745   : > { %v27390_v40 = vadd.f32 %v4946_v41, %v26684_v58  ;;  %v21008_v59 = vpop.f32.mrb[39].mxu0 }
 0x747   : > { %21148 = vmatmul.mubr.msk.bf16.gmra.mrb[144].mxu0 %vm777_vm3, %v26982_v28 }
 0x748   : > { %21151 = vmatprep.mubr.msk.bf16.mxu0 %vm24093_vm1, %v29764_v14 }
 0x74a   : > { %v4951_v9 = vpop.f32.mrb[40].mxu0 }
 0x74b   : > { %v27397_v4 = vadd.f32 %v4951_v9, %v26697_v6  ;;  %v21011_v35 = vpop.f32.mrb[41].mxu0 }
 0x74c   : > { %v4954_v24 = vpop.f32.mrb[42].mxu0 }
 0x74d   : > { %v27400_v7 = vadd.f32 %v4954_v24, %v26711_v55  ;;  %v21012_v52 = vpop.f32.mrb[43].mxu0 }
 0x74f   : > { %21152 = vmatmul.mubr.msk.bf16.gmra.mrb[148].mxu0 %vm777_vm3, %v27025_v54 }
 0x750   : > { %21155 = vmatprep.mubr.msk.bf16.mxu0 %vm24093_vm1, %v29764_v14 }
 0x752   : > { %v4959_v58 = vpop.f32.mrb[44].mxu0 }
 0x753   : > { %v27407_v28 = vadd.f32 %v4959_v58, %v26725_v18  ;;  %v21015_v34 = vpop.f32.mrb[45].mxu0 }
 0x754   : > { %v4962_v29 = vpop.f32.mrb[46].mxu0 }
 0x755   : > { %v27410_v6 = vadd.f32 %v4962_v29, %v26736_v13  ;;  %v21016_v11 = vpop.f32.mrb[47].mxu0 }
 0x757   : > { %21156 = vmatmul.mubr.msk.bf16.gmra.mrb[152].mxu0 %vm777_vm3, %v27066_v51 }
 0x758   : > { %21159 = vmatprep.mubr.msk.bf16.mxu0 %vm24093_vm1, %v29764_v14 }
 0x75a   : > { %v4967_v55 = vpop.f32.mrb[48].mxu0 }
 0x75b   : > { %v27417_v54 = vadd.f32 %v4967_v55, %v26749_v8  ;;  %v21019_v45 = vpop.f32.mrb[49].mxu0 }
 0x75c   : > { %v4970_v49 = vpop.f32.mrb[50].mxu0 }
 0x75d   : > { %v27420_v18 = vadd.f32 %v4970_v49, %v26759_v61  ;;  %v21020_v0 = vpop.f32.mrb[51].mxu0 }
 0x75f   : > { %21160 = vmatmul.mubr.msk.bf16.gmra.mrb[156].mxu0 %vm777_vm3, %v27107_v2 }
 0x760   : > { %21163 = vmatprep.mubr.msk.bf16.mxu0 %vm24093_vm1, %v29764_v14 }
 0x762   : > { %v4975_v13 = vpop.f32.mrb[52].mxu0 }
 0x763   : > { %v27427_v51 = vadd.f32 %v4975_v13, %v26772_v48  ;;  %v21023_v21 = vpop.f32.mrb[53].mxu0 }
 0x764   : > { %v4978_v39 = vpop.f32.mrb[54].mxu0 }
 0x765   : > { %v27430_v8 = vadd.f32 %v4978_v39, %v26782_v23  ;;  %v21024_v41 = vpop.f32.mrb[55].mxu0 }
 0x767   : > { %21164 = vmatmul.mubr.msk.bf16.gmra.mrb[160].mxu0 %vm777_vm3, %v27137_v37 }
 0x768   : > { %21167 = vmatprep.mubr.msk.bf16.mxu0 %vm24093_vm1, %v29764_v14 }
 0x76a   : > { %v4983_v61 = vpop.f32.mrb[56].mxu0 }
 0x76b   : > { %v27437_v2 = vadd.f32 %v4983_v61, %v26794_v57  ;;  %v21027_v59 = vpop.f32.mrb[57].mxu0  ;;  %v5752_v61 = vpop.permute.xlu1 %5751 }
 0x76c   : > { %v4986_v9 = vpop.f32.mrb[58].mxu0 }
 0x76d   : > { %v27440_v48 = vadd.f32 %v4986_v9, %v26804_v22  ;;  %v21028_v35 = vpop.f32.mrb[59].mxu0 }
 0x76f   : > { %21168 = vmatmul.mubr.msk.bf16.gmra.mrb[164].mxu0 %vm777_vm3, %v27164_v1  ;;  %v27457_v1 = vld [vmem:[%s29594_s5] ss:$0 sm:$0xff] }
 0x770   : > { %21171 = vmatprep.mubr.msk.bf16.mxu0 %vm24093_vm1, %v29764_v14 }
 0x772   : > { %v4991_v23 = vpop.f32.mrb[60].mxu0 }
 0x773   : > { %v27447_v37 = vadd.f32 %v4991_v23, %v26817_v20  ;;  %v21031_v24 = vpop.f32.mrb[61].mxu0  ;;  %v5742_v20 = vpop.permute.xlu0 %5741 }
 0x774   : > { %v4994_v52 = vpop.f32.mrb[62].mxu0 }
 0x775   : > { %v27450_v57 = vadd.f32 %v4994_v52, %v26829_v50  ;;  %v21032_v58 = vpop.f32.mrb[63].mxu0 }
 0x777   : > { %21172 = vmatmul.mubr.msk.bf16.gmra.mrb[168].mxu0 %vm777_vm3, %v27191_v27  ;;  %v27466_v27 = vld [vmem:[%s29593_s4] sm:$0x1f]  }
 0x778   : > { %23166 = vmatprep.subr.msk.bf16.mxu1 %vm859_vm0, %v27466_v27 }
 0x77a   : > { %v5301_v22 = vpop.f32.mrb[64].mxu0 }
 0x77b   : > { %v5516_v14 = vadd.f32 %v5301_v22, %v27127_v33  ;;  %v21069_v34 = vpop.f32.mrb[65].mxu0  ;;  %v5747_v33 = vpop.permute.xlu0 %5746 }
 0x77c   : > { %v5304_v29 = vpop.f32.mrb[66].mxu0 }
 0x77d   : > { %v5577_v11 = vadd.f32 %v27457_v1, %v5516_v14  ;;  %v5517_v50 = vadd.f32 %v5304_v29, %v27131_v42  ;;  %v21070_v55 = vpop.f32.mrb[67].mxu0  ;;  %v5757_v14 = vpop.permute.xlu1 %5756 }
 0x77f   : > { %v5631_v45 = vmax.f32 %v5577_v11, 0.0  ;;  %v5578_v49 = vadd.f32 %v27457_v1, %v5517_v50 }
 0x781   : > { %v5632_v0 = vmax.f32 %v5578_v49, 0.0  ;;  %v6009_v21 = vmul.f32 %v5742_v20, %v5631_v45 }
 0x782   : > { %v5309_v13 = vpop.f32.mrb[68].mxu0 }
 0x783   : > { %v6010_v39 = vmul.f32 %v5747_v33, %v5632_v0  ;;  %v5518_v41 = vadd.f32 %v5309_v13, %v27154_v38  ;;  %v21073_v42 = vpop.f32.mrb[69].mxu0  ;;  %v7074_v0 = vld [vmem:[#allocation2 + $0x4] sm:$0x8] }
 0x784   : > { %v5312_v59 = vpop.f32.mrb[70].mxu0  ;;  %v5767_v42 = vpop.permute.xlu1 %5766 }
 0x785   : > { %v19093_v9 = vpack.c.bf16 %v6010_v39, %v6009_v21  ;;  %v5579_v35 = vadd.f32 %v27457_v1, %v5518_v41  ;;  %v5519_v23 = vadd.f32 %v5312_v59, %v27158_v56  ;;  %v21074_v24 = vpop.f32.mrb[71].mxu0  ;;  %v5762_v59 = vpop.permute.xlu0 %5761 }
 0x787   : > { %19345 = vst [vmem:[#allocation2 + $0x8] sm:$0xff] %v19093_v9   ;;  %v5633_v52 = vmax.f32 %v5579_v35, 0.0  ;;  %v5580_v58 = vadd.f32 %v27457_v1, %v5519_v23 }
 0x789   : > { %v5634_v22 = vmax.f32 %v5580_v58, 0.0  ;;  %v6011_v20 = vmul.f32 %v5752_v61, %v5633_v52 }
 0x78a   : > { %v5317_v34 = vpop.f32.mrb[72].mxu0 }
 0x78b   : > { %v6012_v29 = vmul.f32 %v5757_v14, %v5634_v22  ;;  %v5520_v38 = vadd.f32 %v5317_v34, %v27181_v19  ;;  %v21077_v11 = vpop.f32.mrb[73].mxu0 }
 0x78c   : > { %v5320_v50 = vpop.f32.mrb[74].mxu0 }
 0x78d   : > { %v19098_v55 = vpack.c.bf16 %v6012_v29, %v6011_v20  ;;  %v5581_v45 = vadd.f32 %v27457_v1, %v5520_v38  ;;  %v5521_v49 = vadd.f32 %v5320_v50, %v27185_v17  ;;  %v21078_v56 = vpop.f32.mrb[75].mxu0 }
 0x78e   : > { %v27477_v33 = vld [vmem:[#allocation2 + $0x8] sm:$0xf]  ;;  %v27479_v13 = vld [vmem:[#allocation2 + $0xc] sm:$0xf] }
 0x78f   : > { %19346 = vst [vmem:[#allocation2 + $0x10] sm:$0xff] %v19098_v55   ;;  %v5635_v21 = vmax.f32 %v5581_v45, 0.0  ;;  %v5582_v39 = vadd.f32 %v27457_v1, %v5521_v49  ;;  %v18149_v41 = vcombine.low %v7074_v0, %v27477_v33  ;;  %v5772_v0 = vpop.permute.xlu0 %5771 }
 0x791   : > { %v5636_v61 = vmax.f32 %v5582_v39, 0.0  ;;  %v6013_v17 = vmul.f32 %v5762_v59, %v5635_v21  ;;  %v7264_v58 = vshrl.u32 %v18149_v41, 16  ;;  %v7267_v22 = vshll.u32 %v18149_v41, 16  ;;  %v5777_v41 = vpop.permute.xlu1 %5776 }
 0x792   : > { %v5325_v9 = vpop.f32.mrb[76].mxu0 }
 0x793   : > { %v6014_v35 = vmul.f32 %v5767_v42, %v5636_v61  ;;  %v5522_v23 = vadd.f32 %v5325_v9, %v27207_v12  ;;  %v21081_v24 = vpop.f32.mrb[77].mxu0  ;;  %v7266_v49 = vrot.slane %v7264_v58, 3  ;;  %v7269_v56 = vrot.slane %v7267_v22, 4 }
 0x794   : > { %v5328_v52 = vpop.f32.mrb[78].mxu0 }
 0x795   : > { %v19103_v14 = vpack.c.bf16 %v6014_v35, %v6013_v17  ;;  %v5583_v34 = vadd.f32 %v27457_v1, %v5522_v23  ;;  %v5523_v20 = vadd.f32 %v5328_v52, %v27211_v30  ;;  %v21082_v29 = vpop.f32.mrb[79].mxu0  ;;  %v7270_v52 = vor.u32 %v7269_v56, %v7266_v49 }
 0x796   : > { %v27488_v38 = vld [vmem:[#allocation2 + $0x10] sm:$0xf]  ;;  %v27490_v11 = vld [vmem:[#allocation2 + $0x14] sm:$0xf] }
 0x797   : > { %19347 = vst [vmem:[#allocation2 + $0x18] sm:$0xff] %v19103_v14   ;;  %v5637_v50 = vmax.f32 %v5583_v34, 0.0  ;;  %v5584_v55 = vadd.f32 %v27457_v1, %v5523_v20  ;;  %v18150_v12 = vcombine.low %v27479_v13, %v27488_v38  ;;  %v27500_v29 = vld [vmem:[#allocation2 + $0x14] sm:$0xf] }
 0x798   : > { %30001 = vst [vmem:[#allocation41_spill] sm:$0xff] %v27500_v29 }
 0x799   : > { %v5638_v21 = vmax.f32 %v5584_v55, 0.0  ;;  %v7272_v30 = vshrl.u32 %v18150_v12, 16  ;;  %v7275_v39 = vshll.u32 %v18150_v12, 16  ;;  %v6015_v42 = vmul.f32 %v5772_v0, %v5637_v50 }
 0x79a   : > { %v5333_v61 = vpop.f32.mrb[80].mxu0 }
 0x79b   : > { %v6016_v59 = vmul.f32 %v5777_v41, %v5638_v21  ;;  %v5524_v9 = vadd.f32 %v5333_v61, %v27230_v46  ;;  %v21085_v17 = vpop.f32.mrb[81].mxu0  ;;  %v7274_v35 = vrot.slane %v7272_v30, 3  ;;  %v7277_v23 = vrot.slane %v7275_v39, 4  ;;  %v5782_v30 = vpop.permute.xlu0 %5781 }
 0x79c   : > { %v5336_v24 = vpop.f32.mrb[82].mxu0  ;;  %v5787_v61 = vpop.permute.xlu1 %5786 }
 0x79d   : > { %v19108_v14 = vpack.c.bf16 %v6016_v59, %v6015_v42  ;;  %v5585_v58 = vadd.f32 %v27457_v1, %v5524_v9  ;;  %v5525_v22 = vadd.f32 %v5336_v24, %v27234_v3  ;;  %v21086_v34 = vpop.f32.mrb[83].mxu0  ;;  %v7278_v20 = vor.u32 %v7277_v23, %v7274_v35  ;;  %v30005_v3 = vld [vmem:[#allocation39_spill] sm:$0xff] }
 0x79e   : > { %v27502_v50 = vld [vmem:[#allocation2 + $0x18] sm:$0xf]  ;;  %v27504_v55 = vld [vmem:[#allocation2 + $0x1c] sm:$0xf] }
 0x79f   : > { %19348 = vst [vmem:[#allocation2 + $0x20] sm:$0xff] %v19108_v14   ;;  %v5639_v46 = vmax.f32 %v5585_v58, 0.0  ;;  %v5586_v12 = vadd.f32 %v27457_v1, %v5525_v22  ;;  %v7279_v0 = vsel %vm7262_vm5, %v7270_v52, %v7278_v20  ;;  %v18151_v49 = vcombine.low %v27490_v11, %v27502_v50  ;;  %v27510_v56 = vld [vmem:[#allocation2 + $0x18] sm:$0xf]  ;;  %v27521_v21 = vld [vmem:[#allocation2 + $0x1c] sm:$0xf] }
 0x7a0   : > { %30002 = vst [vmem:[#allocation13_spill] sm:$0xff] %v27510_v56  ;;  %21241 = vmatprep.mubr.bf16.mxu1 %v7279_v0  ;;  %v8080_v58 = vsel %vm859_vm0, %v27466_v27, 0  ;;  %30003 = vst [vmem:[#allocation11_spill] sm:$0xff] %v27521_v21 }
 0x7a1   : > { %v5640_v39 = vmax.f32 %v5586_v12, 0.0  ;;  %v7281_v41 = vshrl.u32 %v18151_v49, 16  ;;  %v7284_v42 = vshll.u32 %v18151_v49, 16  ;;  %v6017_v59 = vmul.f32 %v5782_v30, %v5639_v46 }
 0x7a2   : > { %v5341_v9 = vpop.f32.mrb[84].mxu0 }
 0x7a3   : > { %v6018_v17 = vmul.f32 %v5787_v61, %v5640_v39  ;;  %v5526_v35 = vadd.f32 %v5341_v9, %v27259_v44  ;;  %v21089_v23 = vpop.f32.mrb[85].mxu0  ;;  %v7283_v24 = vrot.slane %v7281_v41, 3  ;;  %v7286_v52 = vrot.slane %v7284_v42, 4 }
 0x7a4   : > { %v5344_v14 = vpop.f32.mrb[86].mxu0  ;;  %v5797_v23 = vpop.permute.xlu1 %5796 }
 0x7a5   : > { %v19113_v22 = vpack.c.bf16 %v6018_v17, %v6017_v59  ;;  %v5587_v34 = vadd.f32 %v27457_v1, %v5526_v35  ;;  %v5527_v12 = vadd.f32 %v5344_v14, %v27263_v60  ;;  %v21090_v0 = vpop.f32.mrb[87].mxu0  ;;  %v7287_v49 = vor.u32 %v7286_v52, %v7283_v24  ;;  %v5792_v59 = vpop.permute.xlu0 %5791 }
 0x7a6   : > { %v27523_v46 = vld [vmem:[#allocation2 + $0x20] sm:$0xf]  ;;  %v27525_v30 = vld [vmem:[#allocation2 + $0x24] sm:$0xf] }
 0x7a7   : > { %19349 = vst [vmem:[#allocation2 + $0x28] sm:$0xff] %v19113_v22   ;;  %v5641_v44 = vmax.f32 %v5587_v34, 0.0  ;;  %v5588_v39 = vadd.f32 %v27457_v1, %v5527_v12  ;;  %v7288_v41 = vsel %vm7262_vm5, %v7278_v20, %v7287_v49  ;;  %v18152_v27 = vcombine.low %v27504_v55, %v27523_v46  ;;  %v27531_v42 = vld [vmem:[#allocation2 + $0x20] sm:$0xf]  ;;  %v27540_v19 = vld [vmem:[#allocation2 + $0x24] sm:$0xf] }
 0x7a8   : > { %30004 = vst [vmem:[#allocation14_spill] sm:$0xff] %v27531_v42  ;;  %21242 = vmatmul.mubr.bf16.vlgmr.msra.gmra.mrb[32].mxu1 %v7288_v41  ;;  %30006 = vst [vmem:[#allocation39_spill] sm:$0xff] %v27540_v19 }
 0x7a9   : > { %v5642_v9 = vmax.f32 %v5588_v39, 0.0  ;;  %v7290_v17 = vshrl.u32 %v18152_v27, 16  ;;  %v7293_v35 = vshll.u32 %v18152_v27, 16  ;;  %21290 = vmatpush3.bf16.msra.mxu1 %v8080_v58  ;;  %v6019_v24 = vmul.f32 %v5792_v59, %v5641_v44 }
 0x7aa   : > { %v5349_v20 = vpop.f32.mrb[88].mxu0 }
 0x7ab   : > { %v6020_v52 = vmul.f32 %v5797_v23, %v5642_v9  ;;  %v5528_v14 = vadd.f32 %v5349_v20, %v27288_v47  ;;  %v21093_v22 = vpop.f32.mrb[89].mxu0  ;;  %v7292_v34 = vrot.slane %v7290_v17, 3  ;;  %v7295_v12 = vrot.slane %v7293_v35, 4  ;;  %v5802_v35 = vpop.permute.xlu0 %5801 }
 0x7ac   : > { %v5352_v0 = vpop.f32.mrb[90].mxu0  ;;  %v5807_v20 = vpop.permute.xlu1 %5806 }
 0x7ad   : > { %v19118_v41 = vpack.c.bf16 %v6020_v52, %v6019_v24  ;;  %v5589_v60 = vadd.f32 %v27457_v1, %v5528_v14  ;;  %v5529_v61 = vadd.f32 %v5352_v0, %v30005_v3  ;;  %v21094_v45 = vpop.f32.mrb[91].mxu0  ;;  %v7296_v39 = vor.u32 %v7295_v12, %v7292_v34 }
 0x7ae   : > { %v27542_v58 = vld [vmem:[#allocation2 + $0x28] sm:$0xf]  ;;  %v27544_v44 = vld [vmem:[#allocation2 + $0x2c] sm:$0xf] }
 0x7af   : > { %19350 = vst [vmem:[#allocation2 + $0x30] sm:$0xff] %v19118_v41   ;;  %v5643_v27 = vmax.f32 %v5589_v60, 0.0  ;;  %v5590_v47 = vadd.f32 %v27457_v1, %v5529_v61  ;;  %v7297_v59 = vsel %vm7262_vm5, %v7287_v49, %v7296_v39  ;;  %v18153_v9 = vcombine.low %v27525_v30, %v27542_v58  ;;  %v27550_v17 = vld [vmem:[#allocation2 + $0x28] sm:$0xf] }
 0x7b0   : > { %30007 = vst [vmem:[#allocation51_spill] sm:$0xff] %v27550_v17  ;;  %21245 = vmatprep.mubr.bf16.mxu1 %v7297_v59 }
 0x7b1   : > { %v5644_v23 = vmax.f32 %v5590_v47, 0.0  ;;  %v7299_v24 = vshrl.u32 %v18153_v9, 16  ;;  %v7302_v60 = vshll.u32 %v18153_v9, 16  ;;  %v6021_v61 = vmul.f32 %v5802_v35, %v5643_v27  ;;  %v27559_v47 = vld [vmem:[#allocation2 + $0x2c] sm:$0xf] }
 0x7b2   : > { %v5357_v52 = vpop.f32.mrb[92].mxu0  ;;  %30008 = vst [vmem:[#allocation52_spill] sm:$0xff] %v27559_v47 }
 0x7b3   : > { %v6022_v49 = vmul.f32 %v5807_v20, %v5644_v23  ;;  %v5530_v14 = vadd.f32 %v5357_v52, %v27317_v31  ;;  %v21097_v22 = vpop.f32.mrb[93].mxu0  ;;  %v7301_v34 = vrot.slane %v7299_v24, 3  ;;  %v7304_v12 = vrot.slane %v7302_v60, 4  ;;  %v5812_v20 = vpop.permute.xlu0 %5811 }
 0x7b4   : > { %v5360_v0 = vpop.f32.mrb[94].mxu0 }
 0x7b5   : > { %v19123_v41 = vpack.c.bf16 %v6022_v49, %v6021_v61  ;;  %v5591_v59 = vadd.f32 %v27457_v1, %v5530_v14  ;;  %v5531_v45 = vadd.f32 %v5360_v0, %v27321_v36  ;;  %v21098_v3 = vpop.f32.mrb[95].mxu0  ;;  %v7305_v26 = vor.u32 %v7304_v12, %v7301_v34  ;;  %v5817_v14 = vpop.permute.xlu1 %5816 }
 0x7b6   : > { %v27561_v9 = vld [vmem:[#allocation2 + $0x30] sm:$0xf]  ;;  %v27563_v27 = vld [vmem:[#allocation2 + $0x34] sm:$0xf] }
 0x7b7   : > { %19351 = vst [vmem:[#allocation2 + $0x38] sm:$0xff] %v19123_v41   ;;  %v5645_v35 = vmax.f32 %v5591_v59, 0.0  ;;  %v5592_v31 = vadd.f32 %v27457_v1, %v5531_v45  ;;  %v7306_v23 = vsel %vm7262_vm5, %v7296_v39, %v7305_v26  ;;  %v18154_v24 = vcombine.low %v27544_v44, %v27561_v9  ;;  %v27569_v60 = vld [vmem:[#allocation2 + $0x30] sm:$0xf] }
 0x7b8   : > { %30009 = vst [vmem:[#allocation53_spill] sm:$0xff] %v27569_v60  ;;  %21246 = vmatmul.mubr.bf16.gmra.mrb[36].mxu1 %v7306_v23 }
 0x7b9   : > { %v5646_v61 = vmax.f32 %v5592_v31, 0.0  ;;  %v7308_v52 = vshrl.u32 %v18154_v24, 16  ;;  %v7311_v49 = vshll.u32 %v18154_v24, 16  ;;  %v6023_v45 = vmul.f32 %v5812_v20, %v5645_v35  ;;  %v27578_v31 = vld [vmem:[#allocation2 + $0x34] sm:$0xf] }
 0x7ba   : > { %v5365_v22 = vpop.f32.mrb[96].mxu0  ;;  %30010 = vst [vmem:[#allocation54_spill] sm:$0xff] %v27578_v31 }
 0x7bb   : > { %v6024_v39 = vmul.f32 %v5817_v14, %v5646_v61  ;;  %v5532_v34 = vadd.f32 %v5365_v22, %v27344_v16  ;;  %v21101_v12 = vpop.f32.mrb[97].mxu0  ;;  %v7310_v0 = vrot.slane %v7308_v52, 3  ;;  %v7313_v41 = vrot.slane %v7311_v49, 4  ;;  %v5822_v14 = vpop.permute.xlu0 %5821 }
 0x7bc   : > { %v5368_v59 = vpop.f32.mrb[98].mxu0 }
 0x7bd   : > { %v19128_v23 = vpack.c.bf16 %v6024_v39, %v6023_v45  ;;  %v5593_v36 = vadd.f32 %v27457_v1, %v5532_v34  ;;  %v5533_v15 = vadd.f32 %v5368_v59, %v27348_v25  ;;  %v21102_v3 = vpop.f32.mrb[99].mxu0  ;;  %v7314_v60 = vor.u32 %v7313_v41, %v7310_v0  ;;  %v5827_v39 = vpop.permute.xlu1 %5826 }
 0x7be   : > { %v27580_v24 = vld [vmem:[#allocation2 + $0x38] sm:$0xf]  ;;  %v27582_v35 = vld [vmem:[#allocation2 + $0x3c] sm:$0xf] }
 0x7bf   : > { %19352 = vst [vmem:[#allocation2 + $0x40] sm:$0xff] %v19128_v23   ;;  %v5647_v20 = vmax.f32 %v5593_v36, 0.0  ;;  %v5594_v16 = vadd.f32 %v27457_v1, %v5533_v15  ;;  %v7315_v61 = vsel %vm7262_vm5, %v7305_v26, %v7314_v60  ;;  %v18155_v52 = vcombine.low %v27563_v27, %v27580_v24  ;;  %v27588_v49 = vld [vmem:[#allocation2 + $0x38] sm:$0xf] }
 0x7c0   : > { %30011 = vst [vmem:[#allocation55_spill] sm:$0xff] %v27588_v49  ;;  %21249 = vmatprep.mubr.bf16.mxu1 %v7315_v61 }
 0x7c1   : > { %v5648_v45 = vmax.f32 %v5594_v16, 0.0  ;;  %v7317_v22 = vshrl.u32 %v18155_v52, 16  ;;  %v7320_v36 = vshll.u32 %v18155_v52, 16  ;;  %v6025_v15 = vmul.f32 %v5822_v14, %v5647_v20  ;;  %v27597_v16 = vld [vmem:[#allocation2 + $0x3c] sm:$0xf] }
 0x7c2   : > { %v5373_v34 = vpop.f32.mrb[100].mxu0  ;;  %30012 = vst [vmem:[#allocation56_spill] sm:$0xff] %v27597_v16 }
 0x7c3   : > { %v6026_v26 = vmul.f32 %v5827_v39, %v5648_v45  ;;  %v5534_v12 = vadd.f32 %v5373_v34, %v27355_v32  ;;  %v21105_v0 = vpop.f32.mrb[101].mxu0  ;;  %v7319_v41 = vrot.slane %v7317_v22, 3  ;;  %v7322_v59 = vrot.slane %v7320_v36, 4  ;;  %v5832_v39 = vpop.permute.xlu0 %5831 }
 0x7c4   : > { %v5376_v23 = vpop.f32.mrb[102].mxu0 }
 0x7c5   : > { %v19133_v61 = vpack.c.bf16 %v6026_v26, %v6025_v15  ;;  %v5595_v25 = vadd.f32 %v27457_v1, %v5534_v12  ;;  %v5535_v47 = vadd.f32 %v5376_v23, %v27359_v63  ;;  %v21106_v3 = vpop.f32.mrb[103].mxu0  ;;  %v7323_v49 = vor.u32 %v7322_v59, %v7319_v41  ;;  %v5837_v26 = vpop.permute.xlu1 %5836 }
 0x7c6   : > { %v27599_v52 = vld [vmem:[#allocation2 + $0x40] sm:$0xf]  ;;  %v27601_v20 = vld [vmem:[#allocation2 + $0x44] sm:$0xf] }
 0x7c7   : > { %19353 = vst [vmem:[#allocation2 + $0x48] sm:$0xff] %v19133_v61   ;;  %v5649_v14 = vmax.f32 %v5595_v25, 0.0  ;;  %v5596_v32 = vadd.f32 %v27457_v1, %v5535_v47  ;;  %v7324_v45 = vsel %vm7262_vm5, %v7314_v60, %v7323_v49  ;;  %v18156_v22 = vcombine.low %v27582_v35, %v27599_v52  ;;  %v27607_v36 = vld [vmem:[#allocation2 + $0x40] sm:$0xf] }
 0x7c8   : > { %30013 = vst [vmem:[#allocation57_spill] sm:$0xff] %v27607_v36  ;;  %21250 = vmatmul.mubr.bf16.gmra.mrb[40].mxu1 %v7324_v45 }
 0x7c9   : > { %v5650_v15 = vmax.f32 %v5596_v32, 0.0  ;;  %v7326_v34 = vshrl.u32 %v18156_v22, 16  ;;  %v7329_v25 = vshll.u32 %v18156_v22, 16  ;;  %v6027_v47 = vmul.f32 %v5832_v39, %v5649_v14  ;;  %v27616_v32 = vld [vmem:[#allocation2 + $0x44] sm:$0xf] }
 0x7ca   : > { %v5381_v12 = vpop.f32.mrb[104].mxu0  ;;  %30014 = vst [vmem:[#allocation58_spill] sm:$0xff] %v27616_v32 }
 0x7cb   : > { %v6028_v60 = vmul.f32 %v5837_v26, %v5650_v15  ;;  %v5536_v0 = vadd.f32 %v5381_v12, %v27365_v62  ;;  %v21109_v41 = vpop.f32.mrb[105].mxu0  ;;  %v7328_v59 = vrot.slane %v7326_v34, 3  ;;  %v7331_v23 = vrot.slane %v7329_v25, 4  ;;  %v5842_v26 = vpop.permute.xlu0 %5841 }
 0x7cc   : > { %v5384_v61 = vpop.f32.mrb[106].mxu0 }
 0x7cd   : > { %v19138_v45 = vpack.c.bf16 %v6028_v60, %v6027_v47  ;;  %v5597_v63 = vadd.f32 %v27457_v1, %v5536_v0  ;;  %v5537_v31 = vadd.f32 %v5384_v61, %v27371_v5  ;;  %v21110_v3 = vpop.f32.mrb[107].mxu0  ;;  %v7332_v36 = vor.u32 %v7331_v23, %v7328_v59  ;;  %v5847_v60 = vpop.permute.xlu1 %5846 }
 0x7ce   : > { %v27618_v22 = vld [vmem:[#allocation2 + $0x48] sm:$0xf]  ;;  %v27620_v14 = vld [vmem:[#allocation2 + $0x4c] sm:$0xf] }
 0x7cf   : > { %19354 = vst [vmem:[#allocation2 + $0x50] sm:$0xff] %v19138_v45   ;;  %v5651_v39 = vmax.f32 %v5597_v63, 0.0  ;;  %v5598_v62 = vadd.f32 %v27457_v1, %v5537_v31  ;;  %v7333_v15 = vsel %vm7262_vm5, %v7323_v49, %v7332_v36  ;;  %v18157_v34 = vcombine.low %v27601_v20, %v27618_v22  ;;  %v27626_v25 = vld [vmem:[#allocation2 + $0x48] sm:$0xf] }
 0x7d0   : > { %30015 = vst [vmem:[#allocation59_spill] sm:$0xff] %v27626_v25  ;;  %21253 = vmatprep.mubr.bf16.mxu1 %v7333_v15 }
 0x7d1   : > { %v5652_v47 = vmax.f32 %v5598_v62, 0.0  ;;  %v7335_v12 = vshrl.u32 %v18157_v34, 16  ;;  %v7338_v63 = vshll.u32 %v18157_v34, 16  ;;  %v6029_v31 = vmul.f32 %v5842_v26, %v5651_v39 }
 0x7d2   : > { %v5389_v0 = vpop.f32.mrb[108].mxu0 }
 0x7d3   : > { %v6030_v49 = vmul.f32 %v5847_v60, %v5652_v47  ;;  %v5538_v41 = vadd.f32 %v5389_v0, %v27377_v10  ;;  %v21113_v59 = vpop.f32.mrb[109].mxu0  ;;  %v7337_v23 = vrot.slane %v7335_v12, 3  ;;  %v7340_v61 = vrot.slane %v7338_v63, 4  ;;  %v23451_v12 = vld [vmem:[%s29592_s3 + $0x40] sm:$0xff]   ;;  %v5852_v63 = vpop.permute.xlu0 %5851 }
 0x7d4   : > { %v5392_v45 = vpop.f32.mrb[110].mxu0  ;;  %21339 = vmatprep.subr.bf16.mxu1 %v23451_v12 }
 0x7d5   : > { %v19143_v15 = vpack.c.bf16 %v6030_v49, %v6029_v31  ;;  %v5599_v5 = vadd.f32 %v27457_v1, %v5538_v41  ;;  %v5539_v16 = vadd.f32 %v5392_v45, %v27380_v43  ;;  %v21114_v3 = vpop.f32.mrb[111].mxu0  ;;  %v7341_v25 = vor.u32 %v7340_v61, %v7337_v23 }
 0x7d6   : > { %v27635_v62 = vld [vmem:[#allocation2 + $0x50] sm:$0xf]  ;;  %v27637_v34 = vld [vmem:[#allocation2 + $0x54] sm:$0xf]  ;;  %v27648_v3 = vld [vmem:[#allocation2 + $0x4c] sm:$0xf] }
 0x7d7   : > { %19355 = vst [vmem:[#allocation2 + $0x58] sm:$0xff] %v19143_v15   ;;  %v5653_v39 = vmax.f32 %v5599_v5, 0.0  ;;  %v5600_v26 = vadd.f32 %v27457_v1, %v5539_v16  ;;  %v7342_v10 = vsel %vm7262_vm5, %v7332_v36, %v7341_v25  ;;  %v18158_v47 = vcombine.low %v27620_v14, %v27635_v62  ;;  %30016 = vst [vmem:[#allocation60_spill] sm:$0xff] %v27648_v3  ;;  %v27650_v16 = vld [vmem:[#allocation2 + $0x50] sm:$0xf]  ;;  %v5857_v36 = vpop.permute.xlu1 %5856 }
 0x7d8   : > { %21254 = vmatmul.mubr.bf16.gmra.mrb[44].mxu1 %v7342_v10  ;;  %30017 = vst [vmem:[#allocation61_spill] sm:$0xff] %v27650_v16  ;;  %v27657_v17 = vld [vmem:[#allocation2 + $0x54] sm:$0xf]  ;;  %v27848_v19 = vld [vmem:[#allocation2 + $0x50] sm:$0xf] }
 0x7d9   : > { %v5654_v60 = vmax.f32 %v5600_v26, 0.0  ;;  %v7344_v5 = vshrl.u32 %v18158_v47, 16  ;;  %v7347_v31 = vshll.u32 %v18158_v47, 16  ;;  %v6031_v0 = vmul.f32 %v5852_v63, %v5653_v39  ;;  %30018 = vst [vmem:[#allocation62_spill] sm:$0xff] %v27657_v17 }
 0x7da   : > { %v5397_v49 = vpop.f32.mrb[112].mxu0 }
 0x7db   : > { %v6032_v59 = vmul.f32 %v5857_v36, %v5654_v60  ;;  %v5540_v23 = vadd.f32 %v5397_v49, %v27387_v53  ;;  %v21117_v61 = vpop.f32.mrb[113].mxu0  ;;  %v7346_v45 = vrot.slane %v7344_v5, 3  ;;  %v7349_v15 = vrot.slane %v7347_v31, 4  ;;  %v5862_v49 = vpop.permute.xlu0 %5861 }
 0x7dc   : > { %v5400_v10 = vpop.f32.mrb[114].mxu0  ;;  %v5867_v61 = vpop.permute.xlu1 %5866 }
 0x7dd   : > { %v19148_v43 = vpack.c.bf16 %v6032_v59, %v6031_v0  ;;  %v5601_v26 = vadd.f32 %v27457_v1, %v5540_v23  ;;  %v5541_v47 = vadd.f32 %v5400_v10, %v27390_v40  ;;  %v21118_v12 = vpop.f32.mrb[115].mxu0  ;;  %v7350_v32 = vor.u32 %v7349_v15, %v7346_v45 }
 0x7de   : > { %v27659_v39 = vld [vmem:[#allocation2 + $0x58] sm:$0xf]  ;;  %v27661_v63 = vld [vmem:[#allocation2 + $0x5c] sm:$0xf] }
 0x7df   : > { %19356 = vst [vmem:[#allocation2 + $0x60] sm:$0xff] %v19148_v43   ;;  %v5655_v60 = vmax.f32 %v5601_v26, 0.0  ;;  %v5602_v53 = vadd.f32 %v27457_v1, %v5541_v47  ;;  %v7351_v5 = vsel %vm7262_vm5, %v7341_v25, %v7350_v32  ;;  %v18159_v31 = vcombine.low %v27637_v34, %v27659_v39  ;;  %v27667_v36 = vld [vmem:[#allocation2 + $0x58] sm:$0xf] }
 0x7e0   : > { %30019 = vst [vmem:[#allocation63_spill] sm:$0xff] %v27667_v36  ;;  %21257 = vmatprep.mubr.bf16.mxu1 %v7351_v5  ;;  %v27873_v21 = vld [vmem:[#allocation2 + $0x58] sm:$0xf] }
 0x7e1   : > { %v5656_v59 = vmax.f32 %v5602_v53, 0.0  ;;  %v7353_v43 = vshrl.u32 %v18159_v31, 16  ;;  %v7356_v23 = vshll.u32 %v18159_v31, 16  ;;  %v6033_v45 = vmul.f32 %v5862_v49, %v5655_v60  ;;  %v27676_v53 = vld [vmem:[#allocation2 + $0x5c] sm:$0xf] }
 0x7e2   : > { %v5405_v15 = vpop.f32.mrb[116].mxu0  ;;  %30020 = vst [vmem:[#allocation64_spill] sm:$0xff] %v27676_v53 }
 0x7e3   : > { %v6034_v25 = vmul.f32 %v5867_v61, %v5656_v59  ;;  %v5542_v10 = vadd.f32 %v5405_v15, %v27397_v4  ;;  %v21121_v26 = vpop.f32.mrb[117].mxu0  ;;  %v7355_v47 = vrot.slane %v7353_v43, 3  ;;  %v7358_v12 = vrot.slane %v7356_v23, 4  ;;  %v5872_v61 = vpop.permute.xlu0 %5871 }
 0x7e4   : > { %v5408_v5 = vpop.f32.mrb[118].mxu0  ;;  %v5877_v15 = vpop.permute.xlu1 %5876 }
 0x7e5   : > { %v19153_v41 = vpack.c.bf16 %v6034_v25, %v6033_v45  ;;  %v5603_v40 = vadd.f32 %v27457_v1, %v5542_v10  ;;  %v5543_v16 = vadd.f32 %v5408_v5, %v27400_v7  ;;  %v21122_v0 = vpop.f32.mrb[119].mxu0  ;;  %v7359_v36 = vor.u32 %v7358_v12, %v7355_v47  ;;  %v27694_v10 = vld [vmem:[#allocation2 + $0x24] sm:$0xf] }
 0x7e6   : > { %v27678_v31 = vld [vmem:[#allocation2 + $0x60] sm:$0xf]  ;;  %v27680_v60 = vld [vmem:[#allocation2 + $0x64] sm:$0xf]  ;;  %30023 = vst [vmem:[#allocation67_spill] sm:$0xff] %v27694_v10 }
 0x7e7   : > { %19357 = vst [vmem:[#allocation2 + $0x68] sm:$0xff] %v19153_v41   ;;  %v5657_v49 = vmax.f32 %v5603_v40, 0.0  ;;  %v5604_v4 = vadd.f32 %v27457_v1, %v5543_v16  ;;  %v7360_v59 = vsel %vm7262_vm5, %v7350_v32, %v7359_v36  ;;  %v18160_v43 = vcombine.low %v27661_v63, %v27678_v31  ;;  %v27686_v23 = vld [vmem:[#allocation2 + $0x60] sm:$0xf]  ;;  %v27716_v10 = vld [vmem:[#allocation2 + $0x2c] sm:$0xf] }
 0x7e8   : > { %30021 = vst [vmem:[#allocation65_spill] sm:$0xff] %v27686_v23  ;;  %21258 = vmatmul.mubr.bf16.gmra.mrb[48].mxu1 %v7360_v59  ;;  %v27692_v32 = vld [vmem:[#allocation2 + $0x20] sm:$0xf]  ;;  %30026 = vst [vmem:[#allocation70_spill] sm:$0xff] %v27716_v10 }
 0x7e9   : > { %v5658_v45 = vmax.f32 %v5604_v4, 0.0  ;;  %v7362_v41 = vshrl.u32 %v18160_v43, 16  ;;  %v7365_v40 = vshll.u32 %v18160_v43, 16  ;;  %v6035_v16 = vmul.f32 %v5872_v61, %v5657_v49  ;;  %30022 = vst [vmem:[#allocation66_spill] sm:$0xff] %v27692_v32  ;;  %v27898_v29 = vld [vmem:[#allocation2 + $0x60] sm:$0xf] }
 0x7ea   : > { %v5413_v25 = vpop.f32.mrb[120].mxu0 }
 0x7eb   : > { %v6036_v26 = vmul.f32 %v5877_v15, %v5658_v45  ;;  %v5544_v47 = vadd.f32 %v5413_v25, %v27407_v28  ;;  %v21125_v12 = vpop.f32.mrb[121].mxu0  ;;  %v7364_v5 = vrot.slane %v7362_v41, 3  ;;  %v7367_v59 = vrot.slane %v7365_v40, 4 }
 0x7ec   : > { %v5416_v7 = vpop.f32.mrb[122].mxu0  ;;  %v5887_v12 = vpop.permute.xlu1 %5886 }
 0x7ed   : > { %v19158_v17 = vpack.c.bf16 %v6036_v26, %v6035_v16  ;;  %v5605_v0 = vadd.f32 %v27457_v1, %v5544_v47  ;;  %v5545_v4 = vadd.f32 %v5416_v7, %v27410_v6  ;;  %v21126_v43 = vpop.f32.mrb[123].mxu0  ;;  %v7368_v23 = vor.u32 %v7367_v59, %v7364_v5  ;;  %v5882_v7 = vpop.permute.xlu0 %5881  ;;  %v27711_v47 = vld [vmem:[#allocation2 + $0x28] sm:$0xf] }
 0x7ee   : > { %v27699_v49 = vld [vmem:[#allocation2 + $0x68] sm:$0xf]  ;;  %v27701_v61 = vld [vmem:[#allocation2 + $0x6c] sm:$0xf]  ;;  %30024 = vst [vmem:[#allocation68_spill] sm:$0xff] %v27711_v47 }
 0x7ef   : > { %19358 = vst [vmem:[#allocation2 + $0x70] sm:$0xff] %v19158_v17   ;;  %v5659_v28 = vmax.f32 %v5605_v0, 0.0  ;;  %v5606_v41 = vadd.f32 %v27457_v1, %v5545_v4  ;;  %v7369_v40 = vsel %vm7262_vm5, %v7359_v36, %v7368_v23  ;;  %v18161_v15 = vcombine.low %v27680_v60, %v27699_v49  ;;  %v27713_v5 = vld [vmem:[#allocation2 + $0x68] sm:$0xf]  ;;  %v27743_v47 = vld [vmem:[#allocation2 + $0x30] sm:$0xf] }
 0x7f0   : > { %21261 = vmatprep.mubr.bf16.mxu1 %v7369_v40  ;;  %30025 = vst [vmem:[#allocation69_spill] sm:$0xff] %v27713_v5  ;;  %30030 = vst [vmem:[#allocation74_spill] sm:$0xff] %v27743_v47  ;;  %v27773_v5 = vld [vmem:[#allocation2 + $0x38] sm:$0xf] }
 0x7f1   : > { %v5660_v16 = vmax.f32 %v5606_v41, 0.0  ;;  %v7371_v25 = vshrl.u32 %v18161_v15, 16  ;;  %v7374_v26 = vshll.u32 %v18161_v15, 16  ;;  %v6037_v17 = vmul.f32 %v5882_v7, %v5659_v28  ;;  %v27720_v28 = vld [vmem:[#allocation2 + $0x64] sm:$0xf]  ;;  %30034 = vst [vmem:[#allocation78_spill] sm:$0xff] %v27773_v5 }
 0x7f2   : > { %v5421_v0 = vpop.f32.mrb[124].mxu0  ;;  %30027 = vst [vmem:[#allocation71_spill] sm:$0xff] %v27720_v28  ;;  %v27722_v7 = vld [vmem:[#allocation2 + $0x6c] sm:$0xf]  ;;  %v27798_v5 = vld [vmem:[#allocation2 + $0x40] sm:$0xf] }
 0x7f3   : > { %v6038_v59 = vmul.f32 %v5887_v12, %v5660_v16  ;;  %v5546_v36 = vadd.f32 %v5421_v0, %v27417_v54  ;;  %v21129_v4 = vpop.f32.mrb[125].mxu0  ;;  %v7373_v43 = vrot.slane %v7371_v25, 3  ;;  %v7376_v40 = vrot.slane %v7374_v26, 4  ;;  %30028 = vst [vmem:[#allocation72_spill] sm:$0xff] %v27722_v7  ;;  %30038 = vst [vmem:[#allocation82_spill] sm:$0xff] %v27798_v5 }
 0x7f4   : > { %v5424_v45 = vpop.f32.mrb[126].mxu0 }
 0x7f5   : > { %v19163_v6 = vpack.c.bf16 %v6038_v59, %v6037_v17  ;;  %v5607_v41 = vadd.f32 %v27457_v1, %v5546_v36  ;;  %v5547_v15 = vadd.f32 %v5424_v45, %v27420_v18  ;;  %v21130_v32 = vpop.f32.mrb[127].mxu0  ;;  %v7377_v53 = vor.u32 %v7376_v40, %v7373_v43  ;;  %v5892_v36 = vpop.permute.xlu0 %5891  ;;  %v27748_v59 = vld [vmem:[%s29594_s5] ss:$0 sm:$0xff] }
 0x7f6   : > { %v27724_v16 = vld [vmem:[#allocation2 + $0x70] sm:$0xf]  ;;  %v27726_v54 = vld [vmem:[#allocation2 + $0x74] sm:$0xf]  ;;  %v5897_v40 = vpop.permute.xlu1 %5896 }
 0x7f7   : > { %19359 = vst [vmem:[#allocation2 + $0x78] sm:$0xff] %v19163_v6   ;;  %v5661_v12 = vmax.f32 %v5607_v41, 0.0  ;;  %v5608_v18 = vadd.f32 %v27457_v1, %v5547_v15  ;;  %v7378_v32 = vsel %vm7262_vm5, %v7368_v23, %v7377_v53  ;;  %v18162_v45 = vcombine.low %v27701_v61, %v27724_v16  ;;  %v27736_v17 = vld [vmem:[#allocation2 + $0x70] sm:$0xf] }
 0x7f8   : > { %30029 = vst [vmem:[#allocation73_spill] sm:$0xff] %v27736_v17  ;;  %21262 = vmatmul.mubr.bf16.gmra.mrb[52].mxu1 %v7378_v32 }
 0x7f9   : > { %v5662_v4 = vmax.f32 %v5608_v18, 0.0  ;;  %v7380_v6 = vshrl.u32 %v18162_v45, 16  ;;  %v7383_v43 = vshll.u32 %v18162_v45, 16  ;;  %v6039_v1 = vmul.f32 %v5892_v36, %v5661_v12 }
 0x7fa   : > { %v5429_v41 = vpop.f32.mrb[128].mxu0 }
 0x7fb   : > { %v6040_v23 = vmul.f32 %v5897_v40, %v5662_v4  ;;  %v5548_v15 = vadd.f32 %v5429_v41, %v27427_v51  ;;  %v21133_v26 = vpop.f32.mrb[129].mxu0  ;;  %v7382_v25 = vrot.slane %v7380_v6, 3  ;;  %v7385_v10 = vrot.slane %v7383_v43, 4  ;;  %v27752_v4 = vld [vmem:[#allocation2 + $0x74] sm:$0xf] }
 0x7fc   : > { %v5432_v32 = vpop.f32.mrb[130].mxu0  ;;  %30031 = vst [vmem:[#allocation75_spill] sm:$0xff] %v27752_v4  ;;  %v27754_v51 = vld [vmem:[#allocation2 + $0x34] sm:$0xf] }
 0x7fd   : > { %v19168_v0 = vpack.c.bf16 %v6040_v23, %v6039_v1  ;;  %v5609_v18 = vadd.f32 %v27748_v59, %v5548_v15  ;;  %v5549_v12 = vadd.f32 %v5432_v32, %v27430_v8  ;;  %v21134_v45 = vpop.f32.mrb[131].mxu0  ;;  %v7386_v36 = vor.u32 %v7385_v10, %v7382_v25  ;;  %30032 = vst [vmem:[#allocation76_spill] sm:$0xff] %v27754_v51  ;;  %v5902_v15 = vpop.permute.xlu0 %5901 }
 0x7fe   : > { %v27756_v26 = vld [vmem:[#allocation2 + $0x78] sm:$0xf]  ;;  %v27758_v6 = vld [vmem:[#allocation2 + $0x7c] sm:$0xf]  ;;  %v5907_v45 = vpop.permute.xlu1 %5906 }
 0x7ff   : > { %19360 = vst [vmem:[#allocation2 + $0x80] sm:$0xff] %v19168_v0   ;;  %v5663_v40 = vmax.f32 %v5609_v18, 0.0  ;;  %v5610_v1 = vadd.f32 %v27748_v59, %v5549_v12  ;;  %v7387_v41 = vsel %vm7262_vm5, %v7377_v53, %v7386_v36  ;;  %v18163_v8 = vcombine.low %v27726_v54, %v27756_v26  ;;  %v27766_v10 = vld [vmem:[#allocation2 + $0x78] sm:$0xf] }
 0x800   : > { %30033 = vst [vmem:[#allocation77_spill] sm:$0xff] %v27766_v10  ;;  %21265 = vmatprep.mubr.bf16.mxu1 %v7387_v41 }
 0x801   : > { %v5664_v32 = vmax.f32 %v5610_v1, 0.0  ;;  %v7389_v0 = vshrl.u32 %v18163_v8, 16  ;;  %v7392_v18 = vshll.u32 %v18163_v8, 16  ;;  %v6041_v12 = vmul.f32 %v5902_v15, %v5663_v40  ;;  %v27777_v8 = vld [vmem:[#allocation2 + $0x7c] sm:$0xf] }
 0x802   : > { %v5437_v43 = vpop.f32.mrb[132].mxu0  ;;  %30035 = vst [vmem:[#allocation79_spill] sm:$0xff] %v27777_v8  ;;  %v27779_v40 = vld [vmem:[#allocation2 + $0x3c] sm:$0xf]  ;;  %v27823_v8 = vld [vmem:[#allocation2 + $0x48] sm:$0xf] }
 0x803   : > { %v6042_v53 = vmul.f32 %v5907_v45, %v5664_v32  ;;  %v5550_v51 = vadd.f32 %v5437_v43, %v27437_v2  ;;  %v21137_v47 = vpop.f32.mrb[133].mxu0  ;;  %v7391_v17 = vrot.slane %v7389_v0, 3  ;;  %v7394_v7 = vrot.slane %v7392_v18, 4  ;;  %30036 = vst [vmem:[#allocation80_spill] sm:$0xff] %v27779_v40  ;;  %v5912_v18 = vpop.permute.xlu0 %5911 }
 0x804   : > { %v5440_v41 = vpop.f32.mrb[134].mxu0 }
 0x805   : > { %v19173_v25 = vpack.c.bf16 %v6042_v53, %v6041_v12  ;;  %v5611_v28 = vadd.f32 %v27748_v59, %v5550_v51  ;;  %v5551_v23 = vadd.f32 %v5440_v41, %v27440_v48  ;;  %v21138_v1 = vpop.f32.mrb[135].mxu0  ;;  %v7395_v10 = vor.u32 %v7394_v7, %v7391_v17  ;;  %v5917_v12 = vpop.permute.xlu1 %5916 }
 0x806   : > { %v27781_v15 = vld [vmem:[#allocation2 + $0x80] sm:$0xf]  ;;  %v27783_v2 = vld [vmem:[#allocation2 + $0x84] sm:$0xf] }
 0x807   : > { %19361 = vst [vmem:[#allocation2 + $0x88] sm:$0xff] %v19173_v25   ;;  %v5665_v43 = vmax.f32 %v5611_v28, 0.0  ;;  %v5612_v32 = vadd.f32 %v27748_v59, %v5551_v23  ;;  %v7396_v51 = vsel %vm7262_vm5, %v7386_v36, %v7395_v10  ;;  %v18164_v48 = vcombine.low %v27758_v6, %v27781_v15  ;;  %v27791_v7 = vld [vmem:[#allocation2 + $0x80] sm:$0xf] }
 0x808   : > { %30037 = vst [vmem:[#allocation81_spill] sm:$0xff] %v27791_v7  ;;  %21266 = vmatmul.mubr.bf16.gmra.mrb[56].mxu1 %v7396_v51 }
 0x809   : > { %v5666_v45 = vmax.f32 %v5612_v32, 0.0  ;;  %v7398_v25 = vshrl.u32 %v18164_v48, 16  ;;  %v7401_v28 = vshll.u32 %v18164_v48, 16  ;;  %v6043_v23 = vmul.f32 %v5912_v18, %v5665_v43  ;;  %v27802_v48 = vld [vmem:[#allocation2 + $0x84] sm:$0xf] }
 0x80a   : > { %v5445_v53 = vpop.f32.mrb[136].mxu0  ;;  %30039 = vst [vmem:[#allocation83_spill] sm:$0xff] %v27802_v48  ;;  %v27804_v43 = vld [vmem:[#allocation2 + $0x44] sm:$0xf] }
 0x80b   : > { %v6044_v36 = vmul.f32 %v5917_v12, %v5666_v45  ;;  %v5552_v41 = vadd.f32 %v5445_v53, %v27447_v37  ;;  %v21141_v1 = vpop.f32.mrb[137].mxu0  ;;  %v7400_v47 = vrot.slane %v7398_v25, 3  ;;  %v7403_v40 = vrot.slane %v7401_v28, 4  ;;  %30040 = vst [vmem:[#allocation84_spill] sm:$0xff] %v27804_v43  ;;  %v5922_v53 = vpop.permute.xlu0 %5921 }
 0x80c   : > { %v5448_v51 = vpop.f32.mrb[138].mxu0 }
 0x80d   : > { %v19178_v17 = vpack.c.bf16 %v6044_v36, %v6043_v23  ;;  %v5613_v4 = vadd.f32 %v27748_v59, %v5552_v41  ;;  %v5553_v0 = vadd.f32 %v5448_v51, %v27450_v57  ;;  %v21142_v32 = vpop.f32.mrb[139].mxu0  ;;  %v7404_v7 = vor.u32 %v7403_v40, %v7400_v47  ;;  %v5927_v41 = vpop.permute.xlu1 %5926  ;;  %v30042_v51 = vld [vmem:[#allocation21_spill] sm:$0xff]  ;;  %v30044_v23 = vld [vmem:[#allocation16_spill] sm:$0xff] }
 0x80e   : > { %v27806_v18 = vld [vmem:[#allocation2 + $0x88] sm:$0xf]  ;;  %v27808_v37 = vld [vmem:[#allocation2 + $0x8c] sm:$0xf]  ;;  %30043 = vst [vmem:[#allocation21_spill] sm:$0xff] %v27823_v8 }
 0x80f   : > { %19362 = vst [vmem:[#allocation2 + $0x90] sm:$0xff] %v19178_v17   ;;  %v5667_v25 = vmax.f32 %v5613_v4, 0.0  ;;  %v5614_v28 = vadd.f32 %v27748_v59, %v5553_v0  ;;  %v7405_v12 = vsel %vm7262_vm5, %v7395_v10, %v7404_v7  ;;  %v18165_v57 = vcombine.low %v27783_v2, %v27806_v18  ;;  %v27816_v40 = vld [vmem:[#allocation2 + $0x88] sm:$0xf] }
 0x810   : > { %30041 = vst [vmem:[#allocation85_spill] sm:$0xff] %v27816_v40  ;;  %21269 = vmatprep.mubr.bf16.mxu1 %v7405_v12 }
 0x811   : > { %v5668_v36 = vmax.f32 %v5614_v28, 0.0  ;;  %v7407_v17 = vshrl.u32 %v18165_v57, 16  ;;  %v7410_v4 = vshll.u32 %v18165_v57, 16  ;;  %v6045_v0 = vmul.f32 %v5922_v53, %v5667_v25  ;;  %v27827_v57 = vld [vmem:[#allocation2 + $0x8c] sm:$0xf] }
 0x812   : > { %v5453_v1 = vpop.f32.mrb[140].mxu0  ;;  %30045 = vst [vmem:[#allocation16_spill] sm:$0xff] %v27827_v57  ;;  %v27829_v25 = vld [vmem:[#allocation2 + $0x4c] sm:$0xf] }
 0x813   : > { %v6046_v10 = vmul.f32 %v5927_v41, %v5668_v36  ;;  %v5554_v32 = vadd.f32 %v5453_v1, %v30042_v51  ;;  %v21145_v45 = vpop.f32.mrb[141].mxu0  ;;  %v7409_v43 = vrot.slane %v7407_v17, 3  ;;  %v7412_v5 = vrot.slane %v7410_v4, 4  ;;  %30046 = vst [vmem:[#allocation86_spill] sm:$0xff] %v27829_v25  ;;  %v5932_v1 = vpop.permute.xlu0 %5931 }
 0x814   : > { %v5456_v12 = vpop.f32.mrb[142].mxu0  ;;  %v5937_v51 = vpop.permute.xlu1 %5936 }
 0x815   : > { %v19183_v47 = vpack.c.bf16 %v6046_v10, %v6045_v0  ;;  %v5615_v3 = vadd.f32 %v27748_v59, %v5554_v32  ;;  %v5555_v40 = vadd.f32 %v5456_v12, %v30044_v23  ;;  %v21146_v28 = vpop.f32.mrb[143].mxu0  ;;  %v7413_v48 = vor.u32 %v7412_v5, %v7409_v43  ;;  %v30048_v12 = vld [vmem:[#allocation17_spill] sm:$0xff]  ;;  %v30050_v0 = vld [vmem:[#allocation42_spill] sm:$0xff] }
 0x816   : > { %v27831_v53 = vld [vmem:[#allocation2 + $0x90] sm:$0xf]  ;;  %v27833_v36 = vld [vmem:[#allocation2 + $0x94] sm:$0xf]  ;;  %30049 = vst [vmem:[#allocation17_spill] sm:$0xff] %v27848_v19 }
 0x817   : > { %19363 = vst [vmem:[#allocation2 + $0x98] sm:$0xff] %v19183_v47   ;;  %v5669_v17 = vmax.f32 %v5615_v3, 0.0  ;;  %v5616_v4 = vadd.f32 %v27748_v59, %v5555_v40  ;;  %v7414_v41 = vsel %vm7262_vm5, %v7404_v7, %v7413_v48  ;;  %v18166_v5 = vcombine.low %v27808_v37, %v27831_v53  ;;  %v27841_v43 = vld [vmem:[#allocation2 + $0x90] sm:$0xf] }
 0x818   : > { %30047 = vst [vmem:[#allocation87_spill] sm:$0xff] %v27841_v43  ;;  %21270 = vmatmul.mubr.bf16.gmra.mrb[60].mxu1 %v7414_v41 }
 0x819   : > { %v5670_v10 = vmax.f32 %v5616_v4, 0.0  ;;  %v7416_v47 = vshrl.u32 %v18166_v5, 16  ;;  %v7419_v3 = vshll.u32 %v18166_v5, 16  ;;  %v6047_v40 = vmul.f32 %v5932_v1, %v5669_v17  ;;  %v27852_v5 = vld [vmem:[#allocation2 + $0x94] sm:$0xf] }
 0x81a   : > { %v5461_v32 = vpop.f32.mrb[144].mxu0  ;;  %30051 = vst [vmem:[#allocation42_spill] sm:$0xff] %v27852_v5  ;;  %v27854_v17 = vld [vmem:[#allocation2 + $0x54] sm:$0xf] }
 0x81b   : > { %v6048_v7 = vmul.f32 %v5937_v51, %v5670_v10  ;;  %v5556_v28 = vadd.f32 %v5461_v32, %v30048_v12  ;;  %v21149_v45 = vpop.f32.mrb[145].mxu0  ;;  %v7418_v25 = vrot.slane %v7416_v47, 3  ;;  %v7421_v8 = vrot.slane %v7419_v3, 4  ;;  %30052 = vst [vmem:[#allocation88_spill] sm:$0xff] %v27854_v17  ;;  %v5942_v32 = vpop.permute.xlu0 %5941 }
 0x81c   : > { %v5464_v41 = vpop.f32.mrb[146].mxu0  ;;  %v5947_v12 = vpop.permute.xlu1 %5946 }
 0x81d   : > { %v19188_v23 = vpack.c.bf16 %v6048_v7, %v6047_v40  ;;  %v5617_v42 = vadd.f32 %v27748_v59, %v5556_v28  ;;  %v5557_v43 = vadd.f32 %v5464_v41, %v30050_v0  ;;  %v21150_v4 = vpop.f32.mrb[147].mxu0  ;;  %v7422_v57 = vor.u32 %v7421_v8, %v7418_v25  ;;  %v30056_v41 = vld [vmem:[#allocation43_spill] sm:$0xff]  ;;  %v30058_v40 = vld [vmem:[#allocation44_spill] sm:$0xff] }
 0x81e   : > { %v27856_v1 = vld [vmem:[#allocation2 + $0x98] sm:$0xf]  ;;  %v27858_v10 = vld [vmem:[#allocation2 + $0x9c] sm:$0xf]  ;;  %30057 = vst [vmem:[#allocation43_spill] sm:$0xff] %v27873_v21 }
 0x81f   : > { %30053 = vst [vmem:[#allocation89_spill] sm:$0xff] %v27856_v1  ;;  %30054 = vst [vmem:[#allocation90_spill] sm:$0xff] %v27858_v10  ;;  %v5671_v47 = vmax.f32 %v5617_v42, 0.0  ;;  %v5618_v3 = vadd.f32 %v27748_v59, %v5557_v43  ;;  %v7423_v51 = vsel %vm7262_vm5, %v7413_v48, %v7422_v57  ;;  %v18167_v8 = vcombine.low %v27833_v36, %v27856_v1  ;;  %v27866_v25 = vld [vmem:[#allocation2 + $0x98] sm:$0xf]  ;;  %v23450_v1 = vld [vmem:[%s24214_s25 + $0xc] sm:$0xff]  }
 0x820   : > { %19364 = vst [vmem:[#allocation2 + $0xa0] sm:$0xff] %v19188_v23   ;;  %30055 = vst [vmem:[#allocation91_spill] sm:$0xff] %v27866_v25  ;;  %21273 = vmatprep.mubr.bf16.mxu1 %v7423_v51 }
 0x821   : > { %v5672_v7 = vmax.f32 %v5618_v3, 0.0  ;;  %v7425_v23 = vshrl.u32 %v18167_v8, 16  ;;  %v7428_v42 = vshll.u32 %v18167_v8, 16  ;;  %v6049_v43 = vmul.f32 %v5942_v32, %v5671_v47  ;;  %v27877_v8 = vld [vmem:[#allocation2 + $0x9c] sm:$0xf] }
 0x822   : > { %v5469_v28 = vpop.f32.mrb[148].mxu0  ;;  %30059 = vst [vmem:[#allocation44_spill] sm:$0xff] %v27877_v8  ;;  %v27879_v47 = vld [vmem:[#allocation2 + $0x5c] sm:$0xf] }
 0x823   : > { %v6050_v48 = vmul.f32 %v5947_v12, %v5672_v7  ;;  %v5558_v4 = vadd.f32 %v5469_v28, %v30056_v41  ;;  %v21153_v45 = vpop.f32.mrb[149].mxu0  ;;  %v7427_v17 = vrot.slane %v7425_v23, 3  ;;  %v7430_v19 = vrot.slane %v7428_v42, 4  ;;  %30060 = vst [vmem:[#allocation92_spill] sm:$0xff] %v27879_v47  ;;  %v5952_v28 = vpop.permute.xlu0 %5951 }
 0x824   : > { %v5472_v51 = vpop.f32.mrb[150].mxu0  ;;  %v5957_v41 = vpop.permute.xlu1 %5956 }
 0x825   : > { %v19193_v0 = vpack.c.bf16 %v6050_v48, %v6049_v43  ;;  %v5619_v56 = vadd.f32 %v27748_v59, %v5558_v4  ;;  %v5559_v25 = vadd.f32 %v5472_v51, %v30058_v40  ;;  %v21154_v3 = vpop.f32.mrb[151].mxu0  ;;  %v7431_v5 = vor.u32 %v7430_v19, %v7427_v17  ;;  %v30064_v51 = vld [vmem:[#allocation24_spill] sm:$0xff]  ;;  %v30066_v43 = vld [vmem:[#allocation45_spill] sm:$0xff] }
 0x826   : > { %30065 = vst [vmem:[#allocation24_spill] sm:$0xff] %v27898_v29 }
 0x827   : > { %v27881_v32 = vld [vmem:[#allocation2 + $0xa0] sm:$0xf]  ;;  %v27883_v7 = vld [vmem:[#allocation2 + $0xa4] sm:$0xf]  ;;  %19365 = vst [vmem:[#allocation2 + $0xa8] sm:$0xff] %v19193_v0   ;;  %v5673_v23 = vmax.f32 %v5619_v56, 0.0  ;;  %v5620_v42 = vadd.f32 %v27748_v59, %v5559_v25  ;;  %v7432_v12 = vsel %vm7262_vm5, %v7422_v57, %v7431_v5 }
 0x828   : > { %30061 = vst [vmem:[#allocation93_spill] sm:$0xff] %v27881_v32  ;;  %30062 = vst [vmem:[#allocation94_spill] sm:$0xff] %v27883_v7  ;;  %v18168_v19 = vcombine.low %v27858_v10, %v27881_v32  ;;  %v27891_v17 = vld [vmem:[#allocation2 + $0xa0] sm:$0xf]  ;;  %21274 = vmatmul.mubr.bf16.gmra.mrb[64].mxu1 %v7432_v12 }
 0x829   : > { %30063 = vst [vmem:[#allocation95_spill] sm:$0xff] %v27891_v17  ;;  %v5674_v48 = vmax.f32 %v5620_v42, 0.0  ;;  %v6051_v25 = vmul.f32 %v5952_v28, %v5673_v23  ;;  %v27904_v23 = vld [vmem:[#allocation2 + $0x64] sm:$0xf] }
 0x82a   : > { %v7434_v0 = vshrl.u32 %v18168_v19, 16  ;;  %v7437_v56 = vshll.u32 %v18168_v19, 16  ;;  %v5477_v4 = vpop.f32.mrb[152].mxu0  ;;  %v27902_v19 = vld [vmem:[#allocation2 + $0xa4] sm:$0xf]  ;;  %30068 = vst [vmem:[#allocation96_spill] sm:$0xff] %v27904_v23 }
 0x82b   : > { %v6052_v57 = vmul.f32 %v5957_v41, %v5674_v48  ;;  %v5560_v3 = vadd.f32 %v5477_v4, %v30064_v51  ;;  %v21157_v45 = vpop.f32.mrb[153].mxu0  ;;  %30067 = vst [vmem:[#allocation45_spill] sm:$0xff] %v27902_v19  ;;  %v5962_v4 = vpop.permute.xlu0 %5961 }
 0x82c   : > { %v7436_v47 = vrot.slane %v7434_v0, 3  ;;  %v7439_v21 = vrot.slane %v7437_v56, 4  ;;  %v5480_v12 = vpop.f32.mrb[154].mxu0  ;;  %v5967_v51 = vpop.permute.xlu1 %5966 }
 0x82d   : > { %v19198_v40 = vpack.c.bf16 %v6052_v57, %v6051_v25  ;;  %v5621_v32 = vadd.f32 %v27748_v59, %v5560_v3  ;;  %v5561_v17 = vadd.f32 %v5480_v12, %v30066_v43  ;;  %v21158_v42 = vpop.f32.mrb[155].mxu0  ;;  %v30072_v12 = vld [vmem:[#allocation19_spill] sm:$0xff]  ;;  %v30074_v25 = vld [vmem:[#allocation18_spill] sm:$0xff] }
 0x82e   : > { %v7440_v8 = vor.u32 %v7439_v21, %v7436_v47  ;;  %v27906_v28 = vld [vmem:[#allocation2 + $0xa8] sm:$0xf]  ;;  %v27908_v48 = vld [vmem:[#allocation2 + $0xac] sm:$0xf] }
 0x82f   : > { %30069 = vst [vmem:[#allocation97_spill] sm:$0xff] %v27906_v28  ;;  %30070 = vst [vmem:[#allocation98_spill] sm:$0xff] %v27908_v48  ;;  %v5675_v0 = vmax.f32 %v5621_v32, 0.0  ;;  %v5622_v56 = vadd.f32 %v27748_v59, %v5561_v17  ;;  %v18169_v21 = vcombine.low %v27883_v7, %v27906_v28  ;;  %v27916_v47 = vld [vmem:[#allocation2 + $0xa8] sm:$0xf] }
 0x830   : > { %19366 = vst [vmem:[#allocation2 + $0xb0] sm:$0xff] %v19198_v40   ;;  %v7441_v41 = vsel %vm7262_vm5, %v7431_v5, %v7440_v8  ;;  %30071 = vst [vmem:[#allocation99_spill] sm:$0xff] %v27916_v47  ;;  %v27923_v7 = vld [vmem:[#allocation2 + $0x68] sm:$0xf] }
 0x831   : > { %21277 = vmatprep.mubr.bf16.mxu1 %v7441_v41  ;;  %v5676_v57 = vmax.f32 %v5622_v56, 0.0  ;;  %v7443_v40 = vshrl.u32 %v18169_v21, 16  ;;  %v7446_v32 = vshll.u32 %v18169_v21, 16  ;;  %v6053_v17 = vmul.f32 %v5962_v4, %v5675_v0  ;;  %30073 = vst [vmem:[#allocation19_spill] sm:$0xff] %v27923_v7  ;;  %v27927_v21 = vld [vmem:[#allocation2 + $0xac] sm:$0xf] }
 0x832   : > { %v5485_v3 = vpop.f32.mrb[156].mxu0  ;;  %30075 = vst [vmem:[#allocation18_spill] sm:$0xff] %v27927_v21  ;;  %v27929_v0 = vld [vmem:[#allocation2 + $0x6c] sm:$0xf] }
 0x833   : > { %v6054_v5 = vmul.f32 %v5967_v51, %v5676_v57  ;;  %v5562_v42 = vadd.f32 %v5485_v3, %v30072_v12  ;;  %v21161_v45 = vpop.f32.mrb[157].mxu0  ;;  %v7445_v23 = vrot.slane %v7443_v40, 3  ;;  %v7448_v29 = vrot.slane %v7446_v32, 4  ;;  %30076 = vst [vmem:[#allocation100_spill] sm:$0xff] %v27929_v0  ;;  %v5972_v3 = vpop.permute.xlu0 %5971 }
 0x834   : > { %v5488_v41 = vpop.f32.mrb[158].mxu0  ;;  %v5977_v12 = vpop.permute.xlu1 %5976 }
 0x835   : > { %v19203_v43 = vpack.c.bf16 %v6054_v5, %v6053_v17  ;;  %v5623_v28 = vadd.f32 %v27748_v59, %v5562_v42  ;;  %v5563_v47 = vadd.f32 %v5488_v41, %v30074_v25  ;;  %v21162_v56 = vpop.f32.mrb[159].mxu0  ;;  %v7449_v19 = vor.u32 %v7448_v29, %v7445_v23  ;;  %v30080_v41 = vld [vmem:[#allocation35_spill] sm:$0xff] }
 0x837   : > { %v27931_v4 = vld [vmem:[#allocation2 + $0xb0] sm:$0xf]  ;;  %v27933_v57 = vld [vmem:[#allocation2 + $0xb4] sm:$0xf]  ;;  %19367 = vst [vmem:[#allocation2 + $0xb8] sm:$0xff] %v19203_v43   ;;  %v5677_v40 = vmax.f32 %v5623_v28, 0.0  ;;  %v5624_v32 = vadd.f32 %v27748_v59, %v5563_v47  ;;  %v7450_v51 = vsel %vm7262_vm5, %v7440_v8, %v7449_v19 }
 0x838   : > { %30077 = vst [vmem:[#allocation101_spill] sm:$0xff] %v27931_v4  ;;  %30078 = vst [vmem:[#allocation102_spill] sm:$0xff] %v27933_v57  ;;  %v18170_v29 = vcombine.low %v27908_v48, %v27931_v4  ;;  %v27941_v23 = vld [vmem:[#allocation2 + $0xb0] sm:$0xf]  ;;  %21278 = vmatmul.mubr.bf16.gmra.mrb[68].mxu1 %v7450_v51  ;;  %v30081_v4 = vld [vmem:[#allocation47_spill] sm:$0xff] }
 0x839   : > { %30079 = vst [vmem:[#allocation103_spill] sm:$0xff] %v27941_v23  ;;  %v5678_v5 = vmax.f32 %v5624_v32, 0.0  ;;  %v6055_v47 = vmul.f32 %v5972_v3, %v5677_v40  ;;  %v27950_v32 = vld [vmem:[#allocation2 + $0xb4] sm:$0xf] }
 0x83a   : > { %v7452_v43 = vshrl.u32 %v18170_v29, 16  ;;  %v7455_v28 = vshll.u32 %v18170_v29, 16  ;;  %v5493_v42 = vpop.f32.mrb[160].mxu0  ;;  %30082 = vst [vmem:[#allocation35_spill] sm:$0xff] %v27950_v32 }
 0x83b   : > { %v6056_v8 = vmul.f32 %v5977_v12, %v5678_v5  ;;  %v5564_v56 = vadd.f32 %v5493_v42, %v30080_v41  ;;  %v21165_v45 = vpop.f32.mrb[161].mxu0  ;;  %v5987_v12 = vpop.permute.xlu1 %5986  ;;  %v30086_v42 = vld [vmem:[#allocation38_spill] sm:$0xff] }
 0x83c   : > { %v7454_v0 = vrot.slane %v7452_v43, 3  ;;  %v7457_v7 = vrot.slane %v7455_v28, 4  ;;  %v5496_v51 = vpop.f32.mrb[162].mxu0 }
 0x83d   : > { %v19208_v48 = vpack.c.bf16 %v6056_v8, %v6055_v47  ;;  %v5625_v25 = vadd.f32 %v27748_v59, %v5564_v56  ;;  %v5565_v10 = vadd.f32 %v5496_v51, %v30081_v4  ;;  %v21166_v23 = vpop.f32.mrb[163].mxu0  ;;  %v5982_v4 = vpop.permute.xlu0 %5981 }
 0x83e   : > { %v7458_v17 = vor.u32 %v7457_v7, %v7454_v0  ;;  %v27952_v29 = vld [vmem:[#allocation2 + $0xb8] sm:$0xf]  ;;  %v27954_v40 = vld [vmem:[#allocation2 + $0xbc] sm:$0xf] }
 0x83f   : > { %30083 = vst [vmem:[#allocation47_spill] sm:$0xff] %v27952_v29  ;;  %30084 = vst [vmem:[#allocation104_spill] sm:$0xff] %v27954_v40  ;;  %v5679_v3 = vmax.f32 %v5625_v25, 0.0  ;;  %v5626_v45 = vadd.f32 %v27748_v59, %v5565_v10  ;;  %v18171_v43 = vcombine.low %v27933_v57, %v27952_v29  ;;  %v27960_v28 = vld [vmem:[#allocation2 + $0xb8] sm:$0xf]  ;;  %v30087_v29 = vld [vmem:[#allocation48_spill] sm:$0xff] }
 0x840   : > { %19368 = vst [vmem:[#allocation2 + $0xc0] sm:$0xff] %v19208_v48   ;;  %v7459_v5 = vsel %vm7262_vm5, %v7449_v19, %v7458_v17  ;;  %30085 = vst [vmem:[#allocation105_spill] sm:$0xff] %v27960_v28 }
 0x841   : > { %21281 = vmatprep.mubr.bf16.mxu1 %v7459_v5  ;;  %v5680_v23 = vmax.f32 %v5626_v45, 0.0  ;;  %v7461_v48 = vshrl.u32 %v18171_v43, 16  ;;  %v7464_v25 = vshll.u32 %v18171_v43, 16  ;;  %v6057_v10 = vmul.f32 %v5982_v4, %v5679_v3 }
 0x842   : > { %v5501_v47 = vpop.f32.mrb[164].mxu0 }
 0x843   : > { %v6058_v19 = vmul.f32 %v5987_v12, %v5680_v23  ;;  %v5566_v8 = vadd.f32 %v5501_v47, %v30086_v42  ;;  %v21169_v41 = vpop.f32.mrb[165].mxu0  ;;  %v7463_v56 = vrot.slane %v7461_v48, 3  ;;  %v7466_v51 = vrot.slane %v7464_v25, 4 }
 0x844   : > { %v5504_v5 = vpop.f32.mrb[166].mxu0 }
 0x845   : > { %v19213_v21 = vpack.c.bf16 %v6058_v19, %v6057_v10  ;;  %v5627_v7 = vadd.f32 %v27748_v59, %v5566_v8  ;;  %v5567_v57 = vadd.f32 %v5504_v5, %v30087_v29  ;;  %v7467_v0 = vor.u32 %v7466_v51, %v7463_v56  ;;  %v21170_v28 = vpop.f32.mrb[167].mxu0  ;;  %v30090_v8 = vld [vmem:[#allocation9_spill] sm:$0xff] }
 0x846   : > { %v5992_v28 = vpop.permute.xlu0 %5991 }
 0x847   : > { %v27969_v45 = vld [vmem:[#allocation2 + $0xc0] sm:$0xf]  ;;  %v27971_v43 = vld [vmem:[#allocation2 + $0xc4] sm:$0xf]  ;;  %19369 = vst [vmem:[#allocation2 + $0xc8] sm:$0xff] %v19213_v21   ;;  %v5681_v3 = vmax.f32 %v5627_v7, 0.0  ;;  %v5628_v4 = vadd.f32 %v27748_v59, %v5567_v57  ;;  %v7468_v23 = vsel %vm7262_vm5, %v7458_v17, %v7467_v0  ;;  %v5997_v21 = vpop.permute.xlu1 %5996 }
 0x848   : > { %30088 = vst [vmem:[#allocation38_spill] sm:$0xff] %v27969_v45  ;;  %30089 = vst [vmem:[#allocation48_spill] sm:$0xff] %v27971_v43  ;;  %v18172_v48 = vcombine.low %v27954_v40, %v27969_v45  ;;  %21282 = vmatmul.mubr.bf16.gmra.mrb[72].mxu1 %v7468_v23  ;;  %v18173_v25 = vcombine.low %v27971_v43, %v27971_v43  ;;  %v30091_v43 = vld [vmem:[#allocation49_spill] sm:$0xff] }
 0x849   : > { %v5682_v12 = vmax.f32 %v5628_v4, 0.0  ;;  %v6059_v7 = vmul.f32 %v5992_v28, %v5681_v3 }
 0x84a   : > { %v7470_v10 = vshrl.u32 %v18172_v48, 16  ;;  %v7473_v47 = vshll.u32 %v18172_v48, 16  ;;  %v5509_v19 = vpop.f32.mrb[168].mxu0  ;;  %v7479_v57 = vshrl.u32 %v18173_v25, 16  ;;  %v7482_v17 = vshll.u32 %v18173_v25, 16 }
 0x84b   : > { %v6060_v42 = vmul.f32 %v5997_v21, %v5682_v12  ;;  %v5568_v41 = vadd.f32 %v5509_v19, %v30090_v8  ;;  %v21173_v56 = vpop.f32.mrb[169].mxu0  ;;  %v6007_v19 = vpop.permute.xlu1 %6006  ;;  %v23453_v8 = vld [vmem:[%s24214_s25 + $0x1c] sm:$0xff]  }
 0x84c   : > { %v7472_v51 = vrot.slane %v7470_v10, 3  ;;  %v7475_v5 = vrot.slane %v7473_v47, 4  ;;  %v5512_v23 = vpop.f32.mrb[170].mxu0  ;;  %v7481_v32 = vrot.slane %v7479_v57, 3  ;;  %v7484_v40 = vrot.slane %v7482_v17, 4  ;;  %v23455_v56 = vld [vmem:[%s29592_s3 + $0x48] sm:$0xff]  }
 0x84d   : > { %v19218_v29 = vpack.c.bf16 %v6060_v42, %v6059_v7  ;;  %v5629_v4 = vadd.f32 %v27748_v59, %v5568_v41  ;;  %v5569_v48 = vadd.f32 %v5512_v23, %v30091_v43  ;;  %v21174_v3 = vpop.f32.mrb[171].mxu0  ;;  %v27988_v47 = vld [vmem:[#allocation2 + $0xc0] sm:$0xf]  ;;  %v23452_v42 = vld [vmem:[%s24214_s25 + $0x14] sm:$0xff]  }
 0x84e   : > { %v7476_v45 = vor.u32 %v7475_v5, %v7472_v51  ;;  %v7485_v28 = vor.u32 %v7484_v40, %v7481_v32  ;;  %v27990_v43 = vld [vmem:[#allocation2 + $0xc8] sm:$0xf]  ;;  %v6002_v32 = vpop.permute.xlu0 %6001  ;;  %v27993_v40 = vld [vmem:[#allocation2 + $0xbc] sm:$0xf]  ;;  %v28003_v41 = vld [vmem:[#allocation2 + $0xcc] sm:$0xf] }
 0x84f   : > { %19370 = vst [vmem:[#allocation2 + $0xd0] sm:$0xff] %v19218_v29   ;;  %v5683_v25 = vmax.f32 %v5629_v4, 0.0  ;;  %v5630_v12 = vadd.f32 %v27748_v59, %v5569_v48  ;;  %30092 = vst [vmem:[#allocation9_spill] sm:$0xff] %v28003_v41  ;;  %v23892_v5 = vld [vmem:[%s29592_s3 + $0x40] sm:$0xff]   ;;  %v23459_v23 = vld [vmem:[%s29592_s3 + $0x50] sm:$0xff]  }
 0x850   : > { %v7477_v21 = vsel %vm7262_vm5, %v7467_v0, %v7476_v45  ;;  %v7486_v10 = vsel %vm7262_vm5, %v7476_v45, %v7485_v28  ;;  %v27995_v0 = vld [vmem:[#allocation2 + $0xc4] sm:$0xf]  ;;  %v23456_v48 = vld [vmem:[%s24214_s25 + $0x2c] sm:$0xff]   ;;  %v23463_v3 = vld [vmem:[%s29592_s3 + $0x58] sm:$0xff]  }
 0x851   : > { %21285 = vmatprep.mubr.bf16.mxu1 %v7477_v21  ;;  %v5684_v7 = vmax.f32 %v5630_v12, 0.0  ;;  %v6061_v59 = vmul.f32 %v6002_v32, %v5683_v25  ;;  %v23454_v4 = vld [vmem:[%s24214_s25 + $0x24] sm:$0xff]   ;;  %v23457_v25 = vld [vmem:[%s24214_s25 + $0x34] sm:$0xff]   ;;  %v23458_v12 = vld [vmem:[%s24214_s25 + $0x3c] sm:$0xff]  }
 0x852   : > { %21286 = vmatmul.mubr.bf16.gmra.mrb[76].mxu1 %v7486_v10  ;;  %v23467_v28 = vld [vmem:[%s29592_s3 + $0x60] sm:$0xff]   ;;  %v23471_v21 = vld [vmem:[%s29592_s3 + $0x68] sm:$0xff]   ;;  %v23475_v10 = vld [vmem:[%s29592_s3 + $0x70] sm:$0xff]  }
 0x853   : > { %21291 = vmatprep.mubr.msk.bf16.mxu1 %vm777_vm3, %v23450_v1  ;;  %v6062_v29 = vmul.f32 %v6007_v19, %v5684_v7  ;;  %v23460_v7 = vld [vmem:[%s24214_s25 + $0x44] sm:$0xff]   ;;  %v23461_v19 = vld [vmem:[%s24214_s25 + $0x4c] sm:$0xff]   ;;  %v23479_v32 = vld [vmem:[%s29592_s3 + $0x78] sm:$0xff]  }
 0x854   : > { %v28111_v51 = vld [vmem:[#allocation2 + $0xb8] sm:$0xf]  ;;  %v28115_v45 = vld [vmem:[#allocation2 + $0xbc] sm:$0xf]  ;;  %v23477_v41 = vld [vmem:[%s24214_s25 + $0xac] sm:$0xff]  }
 0x855   : > { %v19223_v17 = vpack.c.bf16 %v6062_v29, %v6061_v59  ;;  %v28050_v59 = vld [vmem:[%s29593_s4 + $0x8] sm:$0x1f]   ;;  %v23462_v29 = vld [vmem:[%s24214_s25 + $0x54] sm:$0xff]   ;;  %v23509_v57 = vld [vmem:[%s29592_s3 + $0x80] sm:$0xff]  }
 0x856   : > { %v28005_v1 = vld [vmem:[#allocation2 + $0xd0] sm:$0xf] }
 0x857   : > { %30093 = vst [vmem:[#allocation49_spill] sm:$0xff] %v28005_v1  ;;  %19371 = vst [vmem:[#allocation2 + $0xd8] sm:$0xff] %v19223_v17   ;;  %v23464_v17 = vld [vmem:[%s24214_s25 + $0x5c] sm:$0xff]  }
 0x85a   : > { %21292 = vmatmul.mubr.msk.bf16.vlgmr.msra.gmra.mrb[32].mxu1 %vm777_vm3, %v23452_v42  ;;  %v23465_v42 = vld [vmem:[%s24214_s25 + $0x64] sm:$0xff]  }
 0x85b   : > { %21340 = vmatpush3.bf16.msra.mxu1 %v23892_v5  ;;  %21295 = vmatprep.mubr.msk.bf16.mxu1 %vm777_vm3, %v23453_v8  ;;  %v23466_v8 = vld [vmem:[%s24214_s25 + $0x6c] sm:$0xff]   ;;  %v23469_v5 = vld [vmem:[%s24214_s25 + $0x7c] sm:$0xff]  }
 0x85c   : > { %21341 = vmatprep.subr.bf16.mxu1 %v23455_v56 }
 0x85e   : > { %v28150_v1 = vld [vmem:[#allocation2 + $0xd8] sm:$0xf] }
 0x85f   : > { %21342 = vmatpush3.bf16.msra.mxu1 %v23455_v56  ;;  %v23468_v56 = vld [vmem:[%s24214_s25 + $0x74] sm:$0xff]   ;;  %30107 = vst [vmem:[#allocation119_spill] sm:$0xff] %v28150_v1 }
 0x860   : > { %21343 = vmatprep.subr.bf16.mxu1 %v23459_v23 }
 0x862   : > { %21296 = vmatmul.mubr.msk.bf16.gmra.mrb[36].mxu1 %vm777_vm3, %v23454_v4  ;;  %v23472_v4 = vld [vmem:[%s24214_s25 + $0x8c] sm:$0xff]  }
 0x863   : > { %21299 = vmatprep.mubr.msk.bf16.mxu1 %vm777_vm3, %v23456_v48  ;;  %21344 = vmatpush3.bf16.msra.mxu1 %v23459_v23  ;;  %v23470_v23 = vld [vmem:[%s24214_s25 + $0x84] sm:$0xff]   ;;  %v23473_v48 = vld [vmem:[%s24214_s25 + $0x94] sm:$0xff]  }
 0x864   : > { %21345 = vmatprep.subr.bf16.mxu1 %v23463_v3 }
 0x867   : > { %21346 = vmatpush3.bf16.msra.mxu1 %v23463_v3  ;;  %v23474_v3 = vld [vmem:[%s24214_s25 + $0x9c] sm:$0xff]  }
 0x868   : > { %21347 = vmatprep.subr.bf16.mxu1 %v23467_v28 }
 0x86a   : > { %21300 = vmatmul.mubr.msk.bf16.gmra.mrb[40].mxu1 %vm777_vm3, %v23457_v25  ;;  %v28074_v25 = vld [vmem:[#allocation2 + $0x7c] sm:$0xf] }
 0x86b   : > { %21303 = vmatprep.mubr.msk.bf16.mxu1 %vm777_vm3, %v23458_v12  ;;  %21348 = vmatpush3.bf16.msra.mxu1 %v23467_v28  ;;  %v28072_v28 = vld [vmem:[#allocation2 + $0x78] sm:$0xf]  ;;  %30095 = vst [vmem:[#allocation107_spill] sm:$0xff] %v28074_v25  ;;  %v28076_v12 = vld [vmem:[#allocation2 + $0x80] sm:$0xf] }
 0x86c   : > { %21349 = vmatprep.subr.bf16.mxu1 %v23471_v21  ;;  %30094 = vst [vmem:[#allocation106_spill] sm:$0xff] %v28072_v28  ;;  %30096 = vst [vmem:[#allocation108_spill] sm:$0xff] %v28076_v12  ;;  %v28117_v25 = vld [vmem:[#allocation2 + $0xc0] sm:$0xf]  ;;  %v28119_v28 = vld [vmem:[#allocation2 + $0xc4] sm:$0xf] }
 0x86d   : > { %v28134_v12 = vld [vmem:[#allocation2 + $0xd4] sm:$0xf] }
 0x86e   : > { %30106 = vst [vmem:[#allocation118_spill] sm:$0xff] %v28134_v12  ;;  %v23545_v12 = vld [vmem:[#allocation2 + $0x28] sm:$0xff]  }
 0x86f   : > { %21350 = vmatpush3.bf16.msra.mxu1 %v23471_v21  ;;  %v28078_v21 = vld [vmem:[#allocation2 + $0x84] sm:$0xf] }
 0x870   : > { %21351 = vmatprep.subr.bf16.mxu1 %v23475_v10  ;;  %30097 = vst [vmem:[#allocation109_spill] sm:$0xff] %v28078_v21  ;;  %v30110_v21 = vcombine.low %v27488_v38, %v27490_v11  ;;  %v30115_v38 = vcombine.low %v27580_v24, %v27582_v35  ;;  %v30116_v11 = vcombine.low %v27599_v52, %v27601_v20  ;;  %v30127_v52 = vld [vmem:[#allocation89_spill] sm:$0xff]  ;;  %v30128_v20 = vld [vmem:[#allocation90_spill] sm:$0xff] }
 0x871   : > { %v30125_v24 = vcombine.low %v27806_v18, %v27808_v37  ;;  %v30126_v35 = vcombine.low %v27831_v53, %v27833_v36  ;;  %v30137_v18 = vld [vmem:[#allocation102_spill] sm:$0xff]  ;;  %v28243_v53 = vld [vmem:[%s24214_s25 + $0x1c] sm:$0xff]   ;;  %v30139_v36 = vld [vmem:[#allocation47_spill] sm:$0xff] }
 0x872   : > { %21304 = vmatmul.mubr.msk.bf16.gmra.mrb[44].mxu1 %vm777_vm3, %v23460_v7  ;;  %v28083_v7 = vld [vmem:[#allocation2 + $0x8c] sm:$0xf] }
 0x873   : > { %21307 = vmatprep.mubr.msk.bf16.mxu1 %vm777_vm3, %v23461_v19  ;;  %21352 = vmatpush3.bf16.msra.mxu1 %v23475_v10  ;;  %v28080_v10 = vld [vmem:[#allocation2 + $0x88] sm:$0xf]  ;;  %30099 = vst [vmem:[#allocation111_spill] sm:$0xff] %v28083_v7  ;;  %v28085_v19 = vld [vmem:[#allocation2 + $0x90] sm:$0xf] }
 0x874   : > { %21353 = vmatprep.subr.bf16.mxu1 %v23479_v32  ;;  %30098 = vst [vmem:[#allocation110_spill] sm:$0xff] %v28080_v10  ;;  %v28130_v7 = vld [vmem:[#allocation2 + $0xcc] sm:$0xf]  ;;  %v28132_v10 = vld [vmem:[#allocation2 + $0xd0] sm:$0xf] }
 0x875   : > { %30105 = vst [vmem:[#allocation117_spill] sm:$0xff] %v28132_v10  ;;  %v23550_v10 = vld [vmem:[#allocation2 + $0x50] sm:$0xff]  }
 0x877   : > { %21354 = vmatpush3.bf16.msra.mxu1 %v23479_v32  ;;  %v28087_v32 = vld [vmem:[#allocation2 + $0x94] sm:$0xf] }
 0x878   : > { %23167 = vmatprep.subr.msk.bf16.mxu1 %vm859_vm0, %v28050_v59  ;;  %30100 = vst [vmem:[#allocation112_spill] sm:$0xff] %v28087_v32  ;;  %v23478_v32 = vld [vmem:[%s24214_s25 + $0xb4] sm:$0xff]  }
 0x87a   : > { %21308 = vmatmul.mubr.msk.bf16.gmra.mrb[48].mxu1 %vm777_vm3, %v23462_v29  ;;  %v28107_v29 = vld [vmem:[#allocation2 + $0xb0] sm:$0xf] }
 0x87b   : > { %21311 = vmatprep.mubr.msk.bf16.mxu1 %vm777_vm3, %v23464_v17  ;;  %v28092_v17 = vld [vmem:[#allocation2 + $0x98] sm:$0xf] }
 0x882   : > { %21312 = vmatmul.mubr.msk.bf16.gmra.mrb[52].mxu1 %vm777_vm3, %v23465_v42  ;;  %v28094_v42 = vld [vmem:[#allocation2 + $0x9c] sm:$0xf] }
 0x883   : > { %21315 = vmatprep.mubr.msk.bf16.mxu1 %vm777_vm3, %v23466_v8  ;;  %30101 = vst [vmem:[#allocation113_spill] sm:$0xff] %v28094_v42  ;;  %v28096_v8 = vld [vmem:[#allocation2 + $0xa0] sm:$0xf] }
 0x884   : > { %v23544_v42 = vld [vmem:[#allocation2 + $0x20] sm:$0xff]  }
 0x885   : > { %v9678_v1 = vshll.u32 %v23544_v42, 16 }
 0x88a   : > { %21316 = vmatmul.mubr.msk.bf16.gmra.mrb[56].mxu1 %vm777_vm3, %v23468_v56  ;;  %v23476_v56 = vld [vmem:[%s24214_s25 + $0xa4] sm:$0xff]  }
 0x88b   : > { %21319 = vmatprep.mubr.msk.bf16.mxu1 %vm777_vm3, %v23469_v5  ;;  %v28099_v5 = vld [vmem:[#allocation2 + $0xa4] sm:$0xf] }
 0x88c   : > { %30102 = vst [vmem:[#allocation114_spill] sm:$0xff] %v28099_v5  ;;  %v9190_v5 = vsel %vm859_vm0, %v28050_v59, 0  ;;  %v30114_v59 = vcombine.low %v27561_v9, %v27563_v27  ;;  %v30123_v9 = vcombine.low %v27756_v26, %v27758_v6  ;;  %v30124_v27 = vcombine.low %v27781_v15, %v27783_v2  ;;  %v30136_v2 = vld [vmem:[#allocation101_spill] sm:$0xff] }
 0x88d   : > { %v30138_v37 = vcombine.low %v30136_v2, %v30137_v18 }
 0x892   : > { %21320 = vmatmul.mubr.msk.bf16.gmra.mrb[60].mxu1 %vm777_vm3, %v23470_v23  ;;  %v28101_v23 = vld [vmem:[#allocation2 + $0xa8] sm:$0xf] }
 0x893   : > { %21323 = vmatprep.mubr.msk.bf16.mxu1 %vm777_vm3, %v23472_v4  ;;  %v28103_v4 = vld [vmem:[#allocation2 + $0xac] sm:$0xf] }
 0x894   : > { %30103 = vst [vmem:[#allocation115_spill] sm:$0xff] %v28103_v4  ;;  %v28152_v4 = vld [vmem:[#allocation2 + $0xdc] sm:$0xf] }
 0x895   : > { %30108 = vst [vmem:[#allocation120_spill] sm:$0xff] %v28152_v4 }
 0x89a   : > { %21324 = vmatmul.mubr.msk.bf16.gmra.mrb[64].mxu1 %vm777_vm3, %v23473_v48  ;;  %v28124_v48 = vld [vmem:[#allocation2 + $0xc8] sm:$0xf] }
 0x89b   : > { %21327 = vmatprep.mubr.msk.bf16.mxu1 %vm777_vm3, %v23474_v3  ;;  %v28109_v3 = vld [vmem:[#allocation2 + $0xb4] sm:$0xf] }
 0x89c   : > { %30104 = vst [vmem:[#allocation116_spill] sm:$0xff] %v28109_v3  ;;  %v23480_v3 = vld [vmem:[%s24214_s25 + $0xbc] sm:$0xff]  }
 0x8a2   : > { %21328 = vmatmul.mubr.msk.bf16.gmra.mrb[68].mxu1 %vm777_vm3, %v23476_v56  ;;  %v30109_v56 = vcombine.low %v27477_v33, %v27479_v13  ;;  %v30112_v33 = vcombine.low %v27523_v46, %v27525_v30  ;;  %v30113_v13 = vcombine.low %v27542_v58, %v27544_v44  ;;  %v30119_v46 = vcombine.low %v27659_v39, %v27661_v63  ;;  %v30130_v39 = vld [vmem:[#allocation93_spill] sm:$0xff]  ;;  %v30131_v63 = vld [vmem:[#allocation94_spill] sm:$0xff] }
 0x8a3   : > { %21331 = vmatprep.mubr.msk.bf16.mxu1 %vm777_vm3, %v23477_v41  ;;  %v23481_v41 = vld [vmem:[%s24214_s25 + $0xc4] sm:$0xff]   ;;  %v30120_v30 = vcombine.low %v27678_v31, %v27680_v60  ;;  %v30121_v58 = vcombine.low %v27699_v49, %v27701_v61  ;;  %v30122_v44 = vcombine.low %v27724_v16, %v27726_v54  ;;  %v30132_v31 = vcombine.low %v30130_v39, %v30131_v63  ;;  %v30134_v49 = vld [vmem:[#allocation98_spill] sm:$0xff]  ;;  %v28236_v16 = vld [vmem:[%s24214_s25 + $0x14] sm:$0xff]  }
 0x8a4   : > { %v30133_v60 = vld [vmem:[#allocation97_spill] sm:$0xff]  ;;  %v8924_v15 = vshll.u32 %v28236_v16, 16  ;;  %v28277_v63 = vld [vmem:[%s24214_s25 + $0x3c] sm:$0xff]  }
 0x8a5   : > { %v30135_v61 = vcombine.low %v30133_v60, %v30134_v49  ;;  %v8968_v2 = vshrl.u32 %v28277_v63, 16 }
 0x8aa   : > { %21332 = vmatmul.mubr.msk.bf16.gmra.mrb[72].mxu1 %vm777_vm3, %v23478_v32  ;;  %v30111_v32 = vcombine.low %v27502_v50, %v27504_v55  ;;  %v30117_v50 = vcombine.low %v27618_v22, %v27620_v14  ;;  %v30118_v55 = vcombine.low %v27635_v62, %v27637_v34  ;;  %v30129_v22 = vcombine.low %v30127_v52, %v30128_v20  ;;  %v8741_v14 = vld [vmem:[%s24214_s25 + $0xc] sm:$0xf]  ;;  %v28226_v62 = vld [vmem:[%s24214_s25 + $0x10] sm:$0xf] }
 0x8ab   : > { %21335 = vmatprep.mubr.msk.bf16.mxu1 %vm777_vm3, %v23480_v3  ;;  %v18281_v34 = vcombine.low %v8741_v14, %v28226_v62 }
 0x8ad   : > { %v8919_v54 = vshll.u32 %v18281_v34, 16  ;;  %v8917_v26 = vshrl.u32 %v18281_v34, 16 }
 0x8af   : > { %v8921_v6 = vrot.slane %v8919_v54, 1  ;;  %v23517_v54 = vld [vmem:[%s29592_s3 + $0x90] sm:$0xff]  }
 0x8b1   : > { %v8922_v3 = vor.u32 %v8921_v6, %v8917_v26  ;;  %v8964_v26 = vshll.u32 %v28277_v63, 16 }
 0x8b2   : > { %21336 = vmatmul.mubr.msk.bf16.gmra.mrb[76].mxu1 %vm777_vm3, %v23481_v41  ;;  %v8926_v41 = vrot.slane %v8924_v15, 1 }
 0x8b3   : > { %21355 = vmatprep.mubr.bf16.mxu1 %v30109_v56  ;;  %v28249_v56 = vld [vmem:[%s24214_s25 + $0x24] sm:$0xff]  }
 0x8b4   : > { %v8944_v52 = vshrl.u32 %v28249_v56, 16 }
 0x8ba   : > { %21356 = vmatmul.mubr.bf16.vlgmr.msra.gmra.mrb[32].mxu1 %v30110_v21  ;;  %v30140_v21 = vld [vmem:[#allocation104_spill] sm:$0xff] }
 0x8bb   : > { %21404 = vmatpush3.bf16.msra.mxu1 %v9190_v5  ;;  %21359 = vmatprep.mubr.bf16.mxu1 %v30111_v32  ;;  %v30141_v5 = vcombine.low %v30139_v36, %v30140_v21  ;;  %v8932_v32 = vshll.u32 %v28243_v53, 16  ;;  %v8966_v36 = vrot.slane %v8964_v26, 1  ;;  %v28297_v21 = vld [vmem:[%s24214_s25 + $0x4c] sm:$0xff]  }
 0x8bc   : > { %21453 = vmatprep.subr.bf16.mxu1 %v23509_v57  ;;  %v28337_v26 = vld [vmem:[%s24214_s25 + $0x6c] sm:$0xff]  }
 0x8c2   : > { %21360 = vmatmul.mubr.bf16.gmra.mrb[36].mxu1 %v30112_v33  ;;  %v8928_v33 = vshrl.u32 %v28236_v16, 16 }
 0x8c3   : > { %21363 = vmatprep.mubr.bf16.mxu1 %v30113_v13  ;;  %v8927_v13 = vsel %vm551_vm2, %v8922_v3, %v8926_v41  ;;  %v8970_v3 = vor.u32 %v8968_v2, %v8966_v36  ;;  %v28341_v2 = vld [vmem:[%s24214_s25 + $0x74] sm:$0xff]  }
 0x8ca   : > { %21364 = vmatmul.mubr.bf16.gmra.mrb[40].mxu1 %v30114_v59  ;;  %v8936_v59 = vshrl.u32 %v28243_v53, 16 }
 0x8cb   : > { %21367 = vmatprep.mubr.bf16.mxu1 %v30115_v38  ;;  %v8940_v38 = vshll.u32 %v28249_v56, 16 }
 0x8d2   : > { %21368 = vmatmul.mubr.bf16.gmra.mrb[44].mxu1 %v30116_v11  ;;  %v30142_v11 = vld [vmem:[#allocation38_spill] sm:$0xff] }
 0x8d3   : > { %21371 = vmatprep.mubr.bf16.mxu1 %v30117_v50  ;;  %v30143_v50 = vld [vmem:[#allocation48_spill] sm:$0xff] }
 0x8da   : > { %21372 = vmatmul.mubr.bf16.gmra.mrb[48].mxu1 %v30118_v55  ;;  %v30144_v55 = vcombine.low %v30142_v11, %v30143_v50  ;;  %v8984_v50 = vshrl.u32 %v28297_v21, 16 }
 0x8db   : > { %21375 = vmatprep.mubr.bf16.mxu1 %v30119_v46  ;;  %v8934_v46 = vrot.slane %v8932_v32, 1  ;;  %v28301_v32 = vld [vmem:[%s24214_s25 + $0x54] sm:$0xff]  }
 0x8e2   : > { %21376 = vmatmul.mubr.bf16.gmra.mrb[52].mxu1 %v30120_v30  ;;  %v28260_v30 = vld [vmem:[%s24214_s25 + $0x2c] sm:$0xff]  }
 0x8e3   : > { %21379 = vmatprep.mubr.bf16.mxu1 %v30121_v58  ;;  %v8930_v58 = vor.u32 %v8928_v33, %v8926_v41  ;;  %v8952_v14 = vshrl.u32 %v28260_v30, 16  ;;  %v23525_v33 = vld [vmem:[%s29592_s3 + $0xa0] sm:$0xff]  }
 0x8ea   : > { %21380 = vmatmul.mubr.bf16.gmra.mrb[56].mxu1 %v30122_v44  ;;  %v8938_v44 = vor.u32 %v8936_v59, %v8934_v46 }
 0x8eb   : > { %21383 = vmatprep.mubr.bf16.mxu1 %v30123_v9  ;;  %v8942_v9 = vrot.slane %v8940_v38, 1 }
 0x8ed   : > { %v8943_v20 = vsel %vm551_vm2, %v8938_v44, %v8942_v9  ;;  %v28317_v44 = vld [vmem:[%s24214_s25 + $0x5c] sm:$0xff]  }
 0x8f2   : > { %21384 = vmatmul.mubr.bf16.gmra.mrb[60].mxu1 %v30124_v27  ;;  %v28264_v27 = vld [vmem:[%s24214_s25 + $0x34] sm:$0xff]  }
 0x8f3   : > { %21387 = vmatprep.mubr.bf16.mxu1 %v30125_v24  ;;  %v8948_v24 = vshll.u32 %v28260_v30, 16  ;;  %v8956_v34 = vshll.u32 %v28264_v27, 16 }
 0x8f5   : > { %v8950_v39 = vrot.slane %v8948_v24, 1  ;;  %v8958_v49 = vrot.slane %v8956_v34, 1  ;;  %v8992_v34 = vshrl.u32 %v28301_v32, 16 }
 0x8f7   : > { %v8954_v60 = vor.u32 %v8952_v14, %v8950_v39 }
 0x8f9   : > { %v8959_v15 = vsel %vm551_vm2, %v8954_v60, %v8958_v49 }
 0x8fa   : > { %21388 = vmatmul.mubr.bf16.gmra.mrb[64].mxu1 %v30126_v35  ;;  %v8935_v35 = vsel %vm551_vm2, %v8930_v58, %v8934_v46  ;;  %v23529_v46 = vld [vmem:[%s29592_s3 + $0xa8] sm:$0xff]  }
 0x8fb   : > { %21391 = vmatprep.mubr.bf16.mxu1 %v30129_v22  ;;  %v23513_v22 = vld [vmem:[%s29592_s3 + $0x88] sm:$0xff]  }
 0x902   : > { %21392 = vmatmul.mubr.bf16.gmra.mrb[68].mxu1 %v30132_v31  ;;  %v8946_v31 = vor.u32 %v8944_v52, %v8942_v9  ;;  %v28321_v52 = vld [vmem:[%s24214_s25 + $0x64] sm:$0xff]  }
 0x903   : > { %21395 = vmatprep.mubr.bf16.mxu1 %v30135_v61  ;;  %v28281_v61 = vld [vmem:[%s24214_s25 + $0x44] sm:$0xff]   ;;  %v9004_v60 = vshll.u32 %v28321_v52, 16 }
 0x904   : > { %v8951_v6 = vsel %vm551_vm2, %v8946_v31, %v8950_v39  ;;  %v8972_v18 = vshll.u32 %v28281_v61, 16  ;;  %v8976_v38 = vshrl.u32 %v28281_v61, 16  ;;  %v9000_v31 = vshrl.u32 %v28317_v44, 16 }
 0x906   : > { %v8974_v41 = vrot.slane %v8972_v18, 1  ;;  %v28346_v18 = vld [vmem:[%s29593_s4 + $0x10] sm:$0x1f]  }
 0x908   : > { %v8975_v11 = vsel %vm551_vm2, %v8970_v3, %v8974_v41  ;;  %v8978_v9 = vor.u32 %v8976_v38, %v8974_v41  ;;  %v9016_v41 = vshrl.u32 %v28337_v26, 16 }
 0x90a   : > { %21396 = vmatmul.mubr.bf16.gmra.mrb[72].mxu1 %v30138_v37  ;;  %v23521_v37 = vld [vmem:[%s29592_s3 + $0x98] sm:$0xff]  }
 0x90b   : > { %21399 = vmatprep.mubr.bf16.mxu1 %v30141_v5 }
 0x912   : > { %21400 = vmatmul.mubr.bf16.gmra.mrb[76].mxu1 %v30144_v55  ;;  %v8988_v55 = vshll.u32 %v28301_v32, 16 }
 0x913   : > { %21405 = vmatprep.mubr.msk.bf16.mxu1 %vm777_vm3, %v8927_v13  ;;  %v8980_v13 = vshll.u32 %v28297_v21, 16 }
 0x915   : > { %v8982_v58 = vrot.slane %v8980_v13, 1 }
 0x917   : > { %v8986_v24 = vor.u32 %v8984_v50, %v8982_v58  ;;  %v8983_v14 = vsel %vm551_vm2, %v8978_v9, %v8982_v58  ;;  %v9024_v9 = vshrl.u32 %v28341_v2, 16 }
 0x91a   : > { %21406 = vmatmul.mubr.msk.bf16.vlgmr.msra.gmra.mrb[32].mxu1 %vm777_vm3, %v8935_v35  ;;  %v8990_v35 = vrot.slane %v8988_v55, 1  ;;  %v28362_v55 = vld [vmem:[%s24214_s25 + $0x84] sm:$0xff]  }
 0x91b   : > { %21454 = vmatpush3.bf16.msra.mxu1 %v23509_v57  ;;  %21409 = vmatprep.mubr.msk.bf16.mxu1 %vm777_vm3, %v8943_v20  ;;  %v8960_v57 = vshrl.u32 %v28264_v27, 16  ;;  %v23533_v20 = vld [vmem:[%s29592_s3 + $0xb0] sm:$0xff]  }
 0x91c   : > { %21455 = vmatprep.subr.bf16.mxu1 %v23513_v22  ;;  %v8991_v39 = vsel %vm551_vm2, %v8986_v24, %v8990_v35 }
 0x91d   : > { %v8962_v5 = vor.u32 %v8960_v57, %v8958_v49  ;;  %v23537_v49 = vld [vmem:[%s29592_s3 + $0xb8] sm:$0xff]  }
 0x91f   : > { %21456 = vmatpush3.bf16.msra.mxu1 %v23513_v22  ;;  %v8967_v59 = vsel %vm551_vm2, %v8962_v5, %v8966_v36  ;;  %v8996_v22 = vshll.u32 %v28317_v44, 16  ;;  %v9008_v5 = vshrl.u32 %v28321_v52, 16 }
 0x920   : > { %21457 = vmatprep.subr.bf16.mxu1 %v23517_v54 }
 0x922   : > { %21410 = vmatmul.mubr.msk.bf16.gmra.mrb[36].mxu1 %vm777_vm3, %v8951_v6  ;;  %v8994_v6 = vor.u32 %v8992_v34, %v8990_v35 }
 0x923   : > { %21413 = vmatprep.mubr.msk.bf16.mxu1 %vm777_vm3, %v8959_v15  ;;  %21458 = vmatpush3.bf16.msra.mxu1 %v23517_v54  ;;  %v8998_v54 = vrot.slane %v8996_v22, 1  ;;  %v9006_v15 = vrot.slane %v9004_v60, 1  ;;  %v28376_v60 = vld [vmem:[%s24214_s25 + $0x94] sm:$0xff]  }
 0x924   : > { %21459 = vmatprep.subr.bf16.mxu1 %v23521_v37 }
 0x925   : > { %v9002_v57 = vor.u32 %v9000_v31, %v8998_v54  ;;  %v8999_v36 = vsel %vm551_vm2, %v8994_v6, %v8998_v54  ;;  %v9010_v38 = vor.u32 %v9008_v5, %v9006_v15  ;;  %v9040_v6 = vshrl.u32 %v28362_v55, 16  ;;  %v28386_v5 = vld [vmem:[%s24214_s25 + $0x9c] sm:$0xff]  }
 0x927   : > { %21460 = vmatpush3.bf16.msra.mxu1 %v23521_v37  ;;  %v9012_v37 = vshll.u32 %v28337_v26, 16  ;;  %v9007_v3 = vsel %vm551_vm2, %v9002_v57, %v9006_v15 }
 0x928   : > { %21461 = vmatprep.subr.bf16.mxu1 %v23525_v33 }
 0x929   : > { %v9014_v13 = vrot.slane %v9012_v37, 1  ;;  %v9052_v37 = vshll.u32 %v28376_v60, 16 }
 0x92a   : > { %21414 = vmatmul.mubr.msk.bf16.gmra.mrb[40].mxu1 %vm777_vm3, %v8967_v59  ;;  %v28358_v59 = vld [vmem:[%s24214_s25 + $0x7c] sm:$0xff]  }
 0x92b   : > { %21417 = vmatprep.mubr.msk.bf16.mxu1 %vm777_vm3, %v8975_v11  ;;  %21462 = vmatpush3.bf16.msra.mxu1 %v23525_v33  ;;  %v9020_v33 = vshll.u32 %v28341_v2, 16  ;;  %v9018_v11 = vor.u32 %v9016_v41, %v9014_v13  ;;  %v9015_v58 = vsel %vm551_vm2, %v9010_v38, %v9014_v13  ;;  %v9032_v35 = vshrl.u32 %v28358_v59, 16  ;;  %v28390_v13 = vld [vmem:[%s24214_s25 + $0xa4] sm:$0xff]  }
 0x92c   : > { %21463 = vmatprep.subr.bf16.mxu1 %v23529_v46  ;;  %v9060_v38 = vshll.u32 %v28386_v5, 16 }
 0x92d   : > { %v9022_v50 = vrot.slane %v9020_v33, 1  ;;  %v9054_v33 = vrot.slane %v9052_v37, 1 }
 0x92f   : > { %21464 = vmatpush3.bf16.msra.mxu1 %v23529_v46  ;;  %v9028_v46 = vshll.u32 %v28358_v59, 16  ;;  %v9023_v24 = vsel %vm551_vm2, %v9018_v11, %v9022_v50  ;;  %v9026_v34 = vor.u32 %v9024_v9, %v9022_v50  ;;  %v9056_v50 = vshrl.u32 %v28376_v60, 16 }
 0x930   : > { %21465 = vmatprep.subr.bf16.mxu1 %v23533_v20  ;;  %v9068_v9 = vshll.u32 %v28390_v13, 16 }
 0x931   : > { %v9030_v22 = vrot.slane %v9028_v46, 1 }
 0x932   : > { %21418 = vmatmul.mubr.msk.bf16.gmra.mrb[44].mxu1 %vm777_vm3, %v8983_v14  ;;  %v28372_v14 = vld [vmem:[%s24214_s25 + $0x8c] sm:$0xff]  }
 0x933   : > { %21421 = vmatprep.mubr.msk.bf16.mxu1 %vm777_vm3, %v8991_v39  ;;  %21466 = vmatpush3.bf16.msra.mxu1 %v23533_v20  ;;  %v9036_v20 = vshll.u32 %v28362_v55, 16  ;;  %v9034_v39 = vor.u32 %v9032_v35, %v9030_v22  ;;  %v9031_v54 = vsel %vm551_vm2, %v9026_v34, %v9030_v22  ;;  %v9048_v15 = vshrl.u32 %v28372_v14, 16  ;;  %v28400_v35 = vld [vmem:[%s24214_s25 + $0xac] sm:$0xff]  }
 0x934   : > { %21467 = vmatprep.subr.bf16.mxu1 %v23537_v49  ;;  %v9070_v34 = vrot.slane %v9068_v9, 1 }
 0x935   : > { %v9038_v31 = vrot.slane %v9036_v20, 1  ;;  %v9058_v20 = vor.u32 %v9056_v50, %v9054_v33 }
 0x937   : > { %21468 = vmatpush3.bf16.msra.mxu1 %v23537_v49  ;;  %v9044_v49 = vshll.u32 %v28372_v14, 16  ;;  %v9039_v57 = vsel %vm551_vm2, %v9034_v39, %v9038_v31  ;;  %v28404_v39 = vld [vmem:[%s24214_s25 + $0xb4] sm:$0xff]  }
 0x938   : > { %23168 = vmatprep.subr.msk.bf16.mxu1 %vm859_vm0, %v28346_v18 }
 0x93a   : > { %21422 = vmatmul.mubr.msk.bf16.gmra.mrb[48].mxu1 %vm777_vm3, %v8999_v36  ;;  %v9046_v36 = vrot.slane %v9044_v49, 1 }
 0x93b   : > { %21425 = vmatprep.mubr.msk.bf16.mxu1 %vm777_vm3, %v9007_v3  ;;  %v9042_v3 = vor.u32 %v9040_v6, %v9038_v31  ;;  %v9076_v31 = vshll.u32 %v28400_v35, 16 }
 0x93c   : > { %v9050_v41 = vor.u32 %v9048_v15, %v9046_v36  ;;  %v9084_v15 = vshll.u32 %v28404_v39, 16 }
 0x93d   : > { %v9047_v11 = vsel %vm551_vm2, %v9042_v3, %v9046_v36  ;;  %v9078_v37 = vrot.slane %v9076_v31, 1  ;;  %v28414_v36 = vld [vmem:[%s24214_s25 + $0xbc] sm:$0xff]  }
 0x93e   : > { %v9055_v46 = vsel %vm551_vm2, %v9050_v41, %v9054_v33  ;;  %v9086_v33 = vrot.slane %v9084_v15, 1  ;;  %v9096_v9 = vshrl.u32 %v28414_v36, 16 }
 0x942   : > { %21426 = vmatmul.mubr.msk.bf16.gmra.mrb[52].mxu1 %vm777_vm3, %v9015_v58  ;;  %v9064_v58 = vshrl.u32 %v28386_v5, 16 }
 0x943   : > { %21429 = vmatprep.mubr.msk.bf16.mxu1 %vm777_vm3, %v9023_v24  ;;  %v9062_v24 = vrot.slane %v9060_v38, 1  ;;  %v28418_v38 = vld [vmem:[%s24214_s25 + $0xc4] sm:$0xff]  }
 0x944   : > { %v9104_v15 = vshrl.u32 %v28418_v38, 16 }
 0x945   : > { %v9066_v22 = vor.u32 %v9064_v58, %v9062_v24  ;;  %v9063_v49 = vsel %vm551_vm2, %v9058_v20, %v9062_v24  ;;  %v9100_v24 = vshll.u32 %v28418_v38, 16 }
 0x947   : > { %v9071_v6 = vsel %vm551_vm2, %v9066_v22, %v9070_v34 }
 0x94a   : > { %21430 = vmatmul.mubr.msk.bf16.gmra.mrb[56].mxu1 %vm777_vm3, %v9031_v54  ;;  %v9072_v54 = vshrl.u32 %v28390_v13, 16 }
 0x94b   : > { %21433 = vmatprep.mubr.msk.bf16.mxu1 %vm777_vm3, %v9039_v57  ;;  %v9080_v57 = vshrl.u32 %v28400_v35, 16 }
 0x94c   : > { %v9074_v3 = vor.u32 %v9072_v54, %v9070_v34  ;;  %v28429_v34 = vld [vmem:[%s24214_s25 + $0xcc] ss:$0 sps:$4 sm:$0x11]  }
 0x94d   : > { %v9082_v41 = vor.u32 %v9080_v57, %v9078_v37  ;;  %v23540_v54 = vld [vmem:[#allocation2 + $0x8] sm:$0xff]  }
 0x94e   : > { %v9079_v50 = vsel %vm551_vm2, %v9074_v3, %v9078_v37  ;;  %v9108_v37 = vshll.u32 %v28429_v34, 16 }
 0x94f   : > { %v9087_v58 = vsel %vm551_vm2, %v9082_v41, %v9086_v33  ;;  %v9657_v41 = vshll.u32 %v23540_v54, 16 }
 0x952   : > { %21434 = vmatmul.mubr.msk.bf16.gmra.mrb[60].mxu1 %vm777_vm3, %v9047_v11  ;;  %v9092_v11 = vshll.u32 %v28414_v36, 16 }
 0x953   : > { %21437 = vmatprep.mubr.msk.bf16.mxu1 %vm777_vm3, %v9055_v46  ;;  %v9088_v46 = vshrl.u32 %v28404_v39, 16 }
 0x954   : > { %v9094_v20 = vrot.slane %v9092_v11, 1 }
 0x955   : > { %v9090_v22 = vor.u32 %v9088_v46, %v9086_v33  ;;  %v9659_v46 = vrot.slane %v9657_v41, 1 }
 0x956   : > { %v9098_v31 = vor.u32 %v9096_v9, %v9094_v20  ;;  %v9655_v9 = vshrl.u32 %v23540_v54, 16  ;;  %v10329_v54 = vsel %vm859_vm0, %v28346_v18, 0  ;;  %v9682_v18 = vshrl.u32 %v23544_v42, 16 }
 0x957   : > { %v9095_v57 = vsel %vm551_vm2, %v9090_v22, %v9094_v20 }
 0x958   : > { %v9660_v22 = vor.u32 %v9659_v46, %v9655_v9  ;;  %v9690_v9 = vshrl.u32 %v23545_v12, 16 }
 0x95a   : > { %21438 = vmatmul.mubr.msk.bf16.gmra.mrb[64].mxu1 %vm777_vm3, %v9063_v49  ;;  %v9102_v49 = vrot.slane %v9100_v24, 1 }
 0x95b   : > { %21441 = vmatprep.mubr.msk.bf16.mxu1 %vm777_vm3, %v9071_v6  ;;  %v23541_v6 = vld [vmem:[#allocation2 + $0x10] sm:$0xff]  }
 0x95c   : > { %v9103_v3 = vsel %vm551_vm2, %v9098_v31, %v9102_v49  ;;  %v9662_v11 = vshll.u32 %v23541_v6, 16  ;;  %v9106_v33 = vor.u32 %v9104_v15, %v9102_v49  ;;  %v9680_v15 = vrot.slane %v9678_v1, 1 }
 0x95e   : > { %v9664_v24 = vrot.slane %v9662_v11, 1 }
 0x960   : > { %v9665_v31 = vsel %vm551_vm2, %v9660_v22, %v9664_v24  ;;  %v9684_v22 = vor.u32 %v9682_v18, %v9680_v15 }
 0x962   : > { %21442 = vmatmul.mubr.msk.bf16.gmra.mrb[68].mxu1 %vm777_vm3, %v9079_v50  ;;  %v9110_v50 = vrot.slane %v9108_v37, 1  ;;  %v23546_v37 = vld [vmem:[#allocation2 + $0x30] sm:$0xff]  }
 0x963   : > { %21445 = vmatprep.mubr.msk.bf16.mxu1 %vm777_vm3, %v9087_v58  ;;  %v23543_v58 = vld [vmem:[#allocation2 + $0x18] sm:$0xff]  }
 0x964   : > { %v9111_v20 = vsel %vm551_vm2, %v9106_v33, %v9110_v50  ;;  %v9670_v4 = vshll.u32 %v23543_v58, 16  ;;  %v9674_v49 = vshrl.u32 %v23543_v58, 16  ;;  %v9686_v33 = vshll.u32 %v23545_v12, 16  ;;  %v28445_v50 = vld [vmem:[%s29592_s3 + $0xc0] sm:$0xff]   ;;  %v23547_v58 = vld [vmem:[#allocation2 + $0x38] sm:$0xff]  }
 0x966   : > { %v9688_v1 = vrot.slane %v9686_v33, 1  ;;  %v9698_v33 = vshrl.u32 %v23546_v37, 16 }
 0x96a   : > { %21446 = vmatmul.mubr.msk.bf16.gmra.mrb[72].mxu1 %vm777_vm3, %v9095_v57  ;;  %v9672_v57 = vrot.slane %v9670_v4, 1 }
 0x96b   : > { %21449 = vmatprep.mubr.msk.bf16.mxu1 %vm777_vm3, %v9103_v3  ;;  %v9666_v3 = vshrl.u32 %v23541_v6, 16  ;;  %v9694_v6 = vshll.u32 %v23546_v37, 16 }
 0x96c   : > { %v9676_v11 = vor.u32 %v9674_v49, %v9672_v57  ;;  %v9689_v49 = vsel %vm551_vm2, %v9684_v22, %v9688_v1  ;;  %v23551_v22 = vld [vmem:[#allocation2 + $0x58] sm:$0xff]  }
 0x96d   : > { %v9668_v41 = vor.u32 %v9666_v3, %v9664_v24  ;;  %v9696_v24 = vrot.slane %v9694_v6, 1  ;;  %v9702_v3 = vshll.u32 %v23547_v58, 16 }
 0x96e   : > { %v9681_v4 = vsel %vm551_vm2, %v9676_v11, %v9680_v15  ;;  %v23549_v11 = vld [vmem:[#allocation2 + $0x48] sm:$0xff]  }
 0x96f   : > { %v9673_v46 = vsel %vm551_vm2, %v9668_v41, %v9672_v57  ;;  %v9700_v42 = vor.u32 %v9698_v33, %v9696_v24  ;;  %v9718_v6 = vshll.u32 %v23549_v11, 16 }
 0x972   : > { %21450 = vmatmul.mubr.msk.bf16.gmra.mrb[76].mxu1 %vm777_vm3, %v9111_v20  ;;  %v23548_v20 = vld [vmem:[#allocation2 + $0x40] sm:$0xff]  }
 0x973   : > { %21469 = vmatprep.mubr.bf16.mxu1 %v9665_v31  ;;  %v9692_v31 = vor.u32 %v9690_v9, %v9688_v1  ;;  %v9710_v41 = vshll.u32 %v23548_v20, 16  ;;  %v9726_v1 = vshll.u32 %v23550_v10, 16  ;;  %v9720_v9 = vrot.slane %v9718_v6, 1 }
 0x975   : > { %v9697_v57 = vsel %vm551_vm2, %v9692_v31, %v9696_v24  ;;  %v9714_v31 = vshrl.u32 %v23548_v20, 16 }
 0x97a   : > { %21470 = vmatmul.mubr.bf16.vlgmr.msra.gmra.mrb[32].mxu1 %v9673_v46  ;;  %v9706_v46 = vshrl.u32 %v23547_v58, 16 }
 0x97b   : > { %21518 = vmatpush3.bf16.msra.mxu1 %v10329_v54  ;;  %21473 = vmatprep.mubr.bf16.mxu1 %v9681_v4  ;;  %v9704_v54 = vrot.slane %v9702_v3, 1  ;;  %v9712_v4 = vrot.slane %v9710_v41, 1  ;;  %v9728_v3 = vrot.slane %v9726_v1, 1  ;;  %v9734_v41 = vshll.u32 %v23551_v22, 16 }
 0x97c   : > { %21567 = vmatprep.subr.bf16.mxu1 %v28445_v50 }
 0x97d   : > { %v9708_v12 = vor.u32 %v9706_v46, %v9704_v54  ;;  %v9705_v15 = vsel %vm551_vm2, %v9700_v42, %v9704_v54  ;;  %v9716_v37 = vor.u32 %v9714_v31, %v9712_v4  ;;  %v9736_v46 = vrot.slane %v9734_v41, 1  ;;  %v23553_v42 = vld [vmem:[#allocation2 + $0x68] sm:$0xff]  }
 0x97e   : > { %v9750_v1 = vshll.u32 %v23553_v42, 16 }
 0x97f   : > { %v9713_v18 = vsel %vm551_vm2, %v9708_v12, %v9712_v4  ;;  %v9721_v24 = vsel %vm551_vm2, %v9716_v37, %v9720_v9  ;;  %v9730_v12 = vshrl.u32 %v23550_v10, 16  ;;  %v23555_v37 = vld [vmem:[#allocation2 + $0x78] sm:$0xff]  }
 0x981   : > { %v9732_v20 = vor.u32 %v9730_v12, %v9728_v3 }
 0x982   : > { %21474 = vmatmul.mubr.bf16.gmra.mrb[36].mxu1 %v9689_v49  ;;  %v9722_v49 = vshrl.u32 %v23549_v11, 16 }
 0x983   : > { %21477 = vmatprep.mubr.bf16.mxu1 %v9697_v57  ;;  %v23552_v57 = vld [vmem:[#allocation2 + $0x60] sm:$0xff]   ;;  %v9737_v4 = vsel %vm551_vm2, %v9732_v20, %v9736_v46  ;;  %v23557_v20 = vld [vmem:[#allocation2 + $0x88] sm:$0xff]  }
 0x984   : > { %v9724_v58 = vor.u32 %v9722_v49, %v9720_v9  ;;  %v9742_v54 = vshll.u32 %v23552_v57, 16  ;;  %v9752_v49 = vrot.slane %v9750_v1, 1 }
 0x986   : > { %v9729_v33 = vsel %vm551_vm2, %v9724_v58, %v9728_v3  ;;  %v9744_v6 = vrot.slane %v9742_v54, 1  ;;  %v9746_v58 = vshrl.u32 %v23552_v57, 16  ;;  %v9766_v54 = vshll.u32 %v23555_v37, 16 }
 0x988   : > { %v9748_v10 = vor.u32 %v9746_v58, %v9744_v6 }
 0x98a   : > { %21478 = vmatmul.mubr.bf16.gmra.mrb[40].mxu1 %v9705_v15  ;;  %v9738_v15 = vshrl.u32 %v23551_v22, 16  ;;  %v9753_v3 = vsel %vm551_vm2, %v9748_v10, %v9752_v49  ;;  %v23559_v10 = vld [vmem:[#allocation2 + $0x98] sm:$0xff]  }
 0x98b   : > { %21481 = vmatprep.mubr.bf16.mxu1 %v9713_v18  ;;  %v23554_v18 = vld [vmem:[#allocation2 + $0x70] sm:$0xff]  }
 0x98c   : > { %v9740_v11 = vor.u32 %v9738_v15, %v9736_v46  ;;  %v9758_v9 = vshll.u32 %v23554_v18, 16  ;;  %v9768_v15 = vrot.slane %v9766_v54, 1 }
 0x98e   : > { %v9745_v31 = vsel %vm551_vm2, %v9740_v11, %v9744_v6  ;;  %v9760_v41 = vrot.slane %v9758_v9, 1  ;;  %v9762_v11 = vshrl.u32 %v23554_v18, 16  ;;  %v9782_v9 = vshll.u32 %v23557_v20, 16 }
 0x990   : > { %v9764_v57 = vor.u32 %v9762_v11, %v9760_v41 }
 0x992   : > { %21482 = vmatmul.mubr.bf16.gmra.mrb[44].mxu1 %v9721_v24  ;;  %v9754_v24 = vshrl.u32 %v23553_v42, 16  ;;  %v9769_v6 = vsel %vm551_vm2, %v9764_v57, %v9768_v15  ;;  %v23561_v57 = vld [vmem:[#allocation2 + $0xa8] sm:$0xff]  }
 0x993   : > { %21485 = vmatprep.mubr.bf16.mxu1 %v9729_v33  ;;  %v23556_v33 = vld [vmem:[#allocation2 + $0x80] sm:$0xff]  }
 0x994   : > { %v9756_v22 = vor.u32 %v9754_v24, %v9752_v49  ;;  %v9774_v46 = vshll.u32 %v23556_v33, 16  ;;  %v9784_v24 = vrot.slane %v9782_v9, 1 }
 0x996   : > { %v9761_v12 = vsel %vm551_vm2, %v9756_v22, %v9760_v41  ;;  %v9776_v1 = vrot.slane %v9774_v46, 1  ;;  %v9778_v22 = vshrl.u32 %v23556_v33, 16  ;;  %v9798_v46 = vshll.u32 %v23559_v10, 16 }
 0x998   : > { %v9780_v18 = vor.u32 %v9778_v22, %v9776_v1 }
 0x99a   : > { %21486 = vmatmul.mubr.bf16.gmra.mrb[48].mxu1 %v9737_v4  ;;  %v9770_v4 = vshrl.u32 %v23555_v37, 16  ;;  %v9785_v41 = vsel %vm551_vm2, %v9780_v18, %v9784_v24  ;;  %v23563_v18 = vld [vmem:[#allocation2 + $0xb8] sm:$0xff]  }
 0x99b   : > { %21489 = vmatprep.mubr.bf16.mxu1 %v9745_v31  ;;  %v23558_v31 = vld [vmem:[#allocation2 + $0x90] sm:$0xff]  }
 0x99c   : > { %v9772_v42 = vor.u32 %v9770_v4, %v9768_v15  ;;  %v9790_v49 = vshll.u32 %v23558_v31, 16  ;;  %v9800_v4 = vrot.slane %v9798_v46, 1  ;;  %v9818_v46 = vshrl.u32 %v23561_v57, 16 }
 0x99e   : > { %v9777_v58 = vsel %vm551_vm2, %v9772_v42, %v9776_v1  ;;  %v9792_v54 = vrot.slane %v9790_v49, 1  ;;  %v9794_v42 = vshrl.u32 %v23558_v31, 16  ;;  %v9814_v49 = vshll.u32 %v23561_v57, 16  ;;  %v23564_v31 = vld [vmem:[#allocation2 + $0xc0] sm:$0xff]  }
 0x9a0   : > { %v9796_v33 = vor.u32 %v9794_v42, %v9792_v54  ;;  %v9838_v42 = vshll.u32 %v23564_v31, 16 }
 0x9a2   : > { %21490 = vmatmul.mubr.bf16.gmra.mrb[52].mxu1 %v9753_v3  ;;  %v9786_v3 = vshrl.u32 %v23557_v20, 16  ;;  %v9801_v1 = vsel %vm551_vm2, %v9796_v33, %v9800_v4 }
 0x9a3   : > { %21493 = vmatprep.mubr.bf16.mxu1 %v9761_v12  ;;  %v23560_v12 = vld [vmem:[#allocation2 + $0xa0] sm:$0xff]  }
 0x9a4   : > { %v9788_v37 = vor.u32 %v9786_v3, %v9784_v24  ;;  %v9806_v15 = vshll.u32 %v23560_v12, 16  ;;  %v9816_v3 = vrot.slane %v9814_v49, 1  ;;  %v10195_v49 = vld [vmem:[%s24214_s25 + $0xc] sm:$0xe] }
 0x9a6   : > { %v9793_v11 = vsel %vm551_vm2, %v9788_v37, %v9792_v54  ;;  %v9808_v9 = vrot.slane %v9806_v15, 1  ;;  %v9810_v37 = vshrl.u32 %v23560_v12, 16  ;;  %v9830_v15 = vshll.u32 %v23563_v18, 16 }
 0x9aa   : > { %21494 = vmatmul.mubr.bf16.gmra.mrb[56].mxu1 %v9769_v6  ;;  %v9802_v6 = vshrl.u32 %v23559_v10, 16  ;;  %v9812_v10 = vor.u32 %v9810_v37, %v9808_v9 }
 0x9ab   : > { %21497 = vmatprep.mubr.bf16.mxu1 %v9777_v58  ;;  %v23562_v58 = vld [vmem:[#allocation2 + $0xb0] sm:$0xff]  }
 0x9ac   : > { %v9804_v20 = vor.u32 %v9802_v6, %v9800_v4  ;;  %v9822_v24 = vshll.u32 %v23562_v58, 16  ;;  %v9817_v54 = vsel %vm551_vm2, %v9812_v10, %v9816_v3  ;;  %v9832_v6 = vrot.slane %v9830_v15, 1 }
 0x9ad   : > { %v9826_v33 = vshrl.u32 %v23562_v58, 16  ;;  %v10203_v10 = vrot.slane %v28236_v16, 1  ;;  %v23568_v16 = vld [vmem:[%s29592_s3 + $0xc8] sm:$0xff]  }
 0x9ae   : > { %v9809_v22 = vsel %vm551_vm2, %v9804_v20, %v9808_v9  ;;  %v23565_v20 = vld [vmem:[#allocation2 + $0xc8] ss:$0 sps:$4 sm:$0x11]  }
 0x9af   : > { %v9846_v37 = vshll.u32 %v23565_v20, 16  ;;  %v23571_v20 = vld [vmem:[%s29592_s3 + $0xe0] sm:$0xff]  }
 0x9b1   : > { %v9848_v58 = vrot.slane %v9846_v37, 1  ;;  %v28527_v37 = vld [vmem:[%s29593_s4 + $0x18] sm:$0x1f]  }
 0x9b2   : > { %21498 = vmatmul.mubr.bf16.gmra.mrb[60].mxu1 %v9785_v41  ;;  %v9824_v41 = vrot.slane %v9822_v24, 1  ;;  %v18382_v24 = vcombine.low %v10195_v49, %v28226_v62  ;;  %v10205_v62 = vrot.slane %v28243_v53, 1  ;;  %v10211_v53 = vrot.slane %v28264_v27, 1 }
 0x9b3   : > { %21501 = vmatprep.mubr.bf16.mxu1 %v9793_v11  ;;  %v9820_v11 = vor.u32 %v9818_v46, %v9816_v3  ;;  %v10215_v27 = vrot.slane %v28281_v61, 1  ;;  %v10219_v61 = vrot.slane %v28301_v32, 1  ;;  %v10223_v32 = vrot.slane %v28321_v52, 1 }
 0x9b4   : > { %v9828_v12 = vor.u32 %v9826_v33, %v9824_v41  ;;  %v10202_v46 = vrot.slane %v18382_v24, 1  ;;  %v10227_v52 = vrot.slane %v28341_v2, 1  ;;  %v10235_v2 = vrot.slane %v28376_v60, 1 }
 0x9b5   : > { %v9825_v4 = vsel %vm551_vm2, %v9820_v11, %v9824_v41  ;;  %v9842_v11 = vshrl.u32 %v23564_v31, 16  ;;  %v10209_v31 = vrot.slane %v28260_v30, 1  ;;  %v10213_v30 = vrot.slane %v28277_v63, 1 }
 0x9b6   : > { %v9833_v9 = vsel %vm551_vm2, %v9828_v12, %v9832_v6  ;;  %v10217_v63 = vrot.slane %v28297_v21, 1  ;;  %v23573_v12 = vld [vmem:[%s29592_s3 + $0xf0] sm:$0xff]   ;;  %v10221_v21 = vrot.slane %v28317_v44, 1  ;;  %v10225_v44 = vrot.slane %v28337_v26, 1 }
 0x9b7   : > { %v10212_v33 = vsel %vm1430_vm4, %v10209_v31, %v10211_v53  ;;  %v10214_v49 = vsel %vm1430_vm4, %v10211_v53, %v10213_v30  ;;  %v10233_v26 = vrot.slane %v28372_v14, 1  ;;  %v10241_v14 = vrot.slane %v28400_v35, 1  ;;  %v10604_v53 = vld [vmem:[#allocation2 + $0x10] sm:$0x8] }
 0x9b8   : > { %v10220_v24 = vsel %vm1430_vm4, %v10217_v63, %v10219_v61  ;;  %v10243_v60 = vrot.slane %v28404_v39, 1 }
 0x9ba   : > { %21502 = vmatmul.mubr.bf16.gmra.mrb[64].mxu1 %v9801_v1  ;;  %v9834_v1 = vshrl.u32 %v23563_v18, 16  ;;  %v10204_v18 = vsel %vm1430_vm4, %v10202_v46, %v10203_v10  ;;  %v10224_v46 = vsel %vm1430_vm4, %v10221_v21, %v10223_v32 }
 0x9bb   : > { %21505 = vmatprep.mubr.bf16.mxu1 %v9809_v22  ;;  %v9840_v22 = vrot.slane %v9838_v42, 1 }
 0x9bc   : > { %v9836_v57 = vor.u32 %v9834_v1, %v9832_v6  ;;  %v10216_v1 = vsel %vm1430_vm4, %v10213_v30, %v10215_v27 }
 0x9bd   : > { %v9844_v15 = vor.u32 %v9842_v11, %v9840_v22  ;;  %v10228_v11 = vsel %vm1430_vm4, %v10225_v44, %v10227_v52 }
 0x9be   : > { %v9841_v3 = vsel %vm551_vm2, %v9836_v57, %v9840_v22  ;;  %v23572_v22 = vld [vmem:[%s29592_s3 + $0xe8] sm:$0xff]   ;;  %v10218_v57 = vsel %vm1430_vm4, %v10215_v27, %v10217_v63  ;;  %v23897_v63 = vld [vmem:[#allocation2 + $0x24] sm:$0xf] }
 0x9bf   : > { %v9849_v41 = vsel %vm551_vm2, %v9844_v15, %v9848_v58  ;;  %v10229_v58 = vrot.slane %v28358_v59, 1  ;;  %v10231_v15 = vrot.slane %v28362_v55, 1  ;;  %v10237_v59 = vrot.slane %v28386_v5, 1  ;;  %v23893_v5 = vld [vmem:[#allocation2 + $0x18] sm:$0xf] }
 0x9c0   : > { %v10239_v55 = vrot.slane %v28390_v13, 1  ;;  %v23894_v13 = vld [vmem:[#allocation2 + $0x1c] sm:$0xf] }
 0x9c2   : > { %21506 = vmatmul.mubr.bf16.gmra.mrb[68].mxu1 %v9817_v54  ;;  %v10207_v54 = vrot.slane %v28249_v56, 1  ;;  %v23569_v56 = vld [vmem:[%s29592_s3 + $0xd0] sm:$0xff]  }
 0x9c3   : > { %21509 = vmatprep.mubr.bf16.mxu1 %v9825_v4  ;;  %v10206_v4 = vsel %vm1430_vm4, %v10203_v10, %v10205_v62  ;;  %v10226_v10 = vsel %vm1430_vm4, %v10223_v32, %v10225_v44 }
 0x9c4   : > { %v10208_v42 = vsel %vm1430_vm4, %v10205_v62, %v10207_v54  ;;  %v10210_v6 = vsel %vm1430_vm4, %v10207_v54, %v10209_v31  ;;  %v10234_v62 = vsel %vm1430_vm4, %v10231_v15, %v10233_v26  ;;  %v10236_v54 = vsel %vm1430_vm4, %v10233_v26, %v10235_v2  ;;  %v23901_v26 = vld [vmem:[#allocation2 + $0x34] sm:$0xf] }
 0x9c5   : > { %v10244_v31 = vsel %vm1430_vm4, %v10241_v14, %v10243_v60 }
 0x9ca   : > { %21510 = vmatmul.mubr.bf16.gmra.mrb[72].mxu1 %v9833_v9  ;;  %v23574_v9 = vld [vmem:[%s29592_s3 + $0xf8] sm:$0xff]  }
 0x9cb   : > { %21513 = vmatprep.mubr.bf16.mxu1 %v9841_v3  ;;  %v10222_v3 = vsel %vm1430_vm4, %v10219_v61, %v10221_v21 }
 0x9d2   : > { %21514 = vmatmul.mubr.bf16.gmra.mrb[76].mxu1 %v9849_v41  ;;  %v10232_v41 = vsel %vm1430_vm4, %v10229_v58, %v10231_v15 }
 0x9d3   : > { %21519 = vmatprep.mubr.msk.bf16.mxu1 %vm777_vm3, %v10204_v18  ;;  %v10230_v18 = vsel %vm1430_vm4, %v10227_v52, %v10229_v58 }
 0x9da   : > { %21520 = vmatmul.mubr.msk.bf16.vlgmr.msra.gmra.mrb[32].mxu1 %vm777_vm3, %v10206_v4  ;;  %v10238_v4 = vsel %vm1430_vm4, %v10235_v2, %v10237_v59 }
 0x9db   : > { %21568 = vmatpush3.bf16.msra.mxu1 %v28445_v50  ;;  %21523 = vmatprep.mubr.msk.bf16.mxu1 %vm777_vm3, %v10208_v42  ;;  %v23570_v50 = vld [vmem:[%s29592_s3 + $0xd8] sm:$0xff]   ;;  %v10240_v42 = vsel %vm1430_vm4, %v10237_v59, %v10239_v55 }
 0x9dc   : > { %21569 = vmatprep.subr.bf16.mxu1 %v23568_v16  ;;  %v23902_v59 = vld [vmem:[#allocation2 + $0x38] sm:$0xf] }
 0x9df   : > { %21570 = vmatpush3.bf16.msra.mxu1 %v23568_v16  ;;  %v10242_v16 = vsel %vm1430_vm4, %v10239_v55, %v10241_v14  ;;  %v23903_v55 = vld [vmem:[#allocation2 + $0x3c] sm:$0xf] }
 0x9e0   : > { %21571 = vmatprep.subr.bf16.mxu1 %v23569_v56 }
 0x9e2   : > { %21524 = vmatmul.mubr.msk.bf16.gmra.mrb[36].mxu1 %vm777_vm3, %v10210_v6  ;;  %v10245_v6 = vrot.slane %v28414_v36, 1  ;;  %v23898_v36 = vld [vmem:[#allocation2 + $0x28] sm:$0xf] }
 0x9e3   : > { %21527 = vmatprep.mubr.msk.bf16.mxu1 %vm777_vm3, %v10212_v33  ;;  %21572 = vmatpush3.bf16.msra.mxu1 %v23569_v56  ;;  %v18425_v56 = vcombine.low %v23893_v5, %v23894_v13  ;;  %v10247_v33 = vrot.slane %v28418_v38, 1  ;;  %v11611_v5 = vsel %vm859_vm0, %v28527_v37, 0  ;;  %v28580_v13 = vld [vmem:[%s29592_s3 + $0x100] sm:$0xff]  }
 0x9e4   : > { %21573 = vmatprep.subr.bf16.mxu1 %v23570_v50  ;;  %v10246_v27 = vsel %vm1430_vm4, %v10243_v60, %v10245_v6 }
 0x9e5   : > { %v10802_v30 = vshrl.u32 %v18425_v56, 16  ;;  %v10805_v39 = vshll.u32 %v18425_v56, 16 }
 0x9e7   : > { %21574 = vmatpush3.bf16.msra.mxu1 %v23570_v50  ;;  %v23895_v50 = vld [vmem:[#allocation2 + $0x14] sm:$0xf] }
 0x9e8   : > { %21575 = vmatprep.subr.bf16.mxu1 %v23571_v20  ;;  %v18424_v35 = vcombine.low %v10604_v53, %v23895_v50  ;;  %v23904_v50 = vld [vmem:[#allocation2 + $0x40] sm:$0xf] }
 0x9ea   : > { %21528 = vmatmul.mubr.msk.bf16.gmra.mrb[40].mxu1 %vm777_vm3, %v10214_v49  ;;  %v10794_v49 = vshrl.u32 %v18424_v35, 16 }
 0x9eb   : > { %21531 = vmatprep.mubr.msk.bf16.mxu1 %vm777_vm3, %v10216_v1  ;;  %21576 = vmatpush3.bf16.msra.mxu1 %v23571_v20  ;;  %v10248_v20 = vsel %vm1430_vm4, %v10245_v6, %v10247_v33  ;;  %v10797_v1 = vshll.u32 %v18424_v35, 16  ;;  %v23905_v35 = vld [vmem:[#allocation2 + $0x44] sm:$0xf] }
 0x9ec   : > { %21577 = vmatprep.subr.bf16.mxu1 %v23572_v22  ;;  %v10796_v21 = vrot.slane %v10794_v49, 3  ;;  %v23906_v49 = vld [vmem:[#allocation2 + $0x48] sm:$0xf] }
 0x9ed   : > { %v10799_v32 = vrot.slane %v10797_v1, 4  ;;  %v23907_v1 = vld [vmem:[#allocation2 + $0x4c] sm:$0xf] }
 0x9ef   : > { %21578 = vmatpush3.bf16.msra.mxu1 %v23572_v22  ;;  %v23896_v22 = vld [vmem:[#allocation2 + $0x20] sm:$0xf]  ;;  %v10800_v58 = vor.u32 %v10799_v32, %v10796_v21  ;;  %v23908_v21 = vld [vmem:[#allocation2 + $0x50] sm:$0xf]  ;;  %v23909_v32 = vld [vmem:[#allocation2 + $0x54] sm:$0xf] }
 0x9f0   : > { %21579 = vmatprep.subr.bf16.mxu1 %v23573_v12  ;;  %v18426_v61 = vcombine.low %v23896_v22, %v23897_v63 }
 0x9f2   : > { %21532 = vmatmul.mubr.msk.bf16.gmra.mrb[44].mxu1 %vm777_vm3, %v10218_v57  ;;  %v10807_v57 = vrot.slane %v10805_v39, 4 }
 0x9f3   : > { %21535 = vmatprep.mubr.msk.bf16.mxu1 %vm777_vm3, %v10220_v24  ;;  %21580 = vmatpush3.bf16.msra.mxu1 %v23573_v12  ;;  %v10804_v12 = vrot.slane %v10802_v30, 3  ;;  %v23899_v24 = vld [vmem:[#allocation2 + $0x2c] sm:$0xf]  ;;  %v18430_v30 = vcombine.low %v23904_v50, %v23905_v35 }
 0x9f4   : > { %21581 = vmatprep.subr.bf16.mxu1 %v23574_v9  ;;  %v18427_v38 = vcombine.low %v23898_v36, %v23899_v24 }
 0x9f5   : > { %v10808_v44 = vor.u32 %v10807_v57, %v10804_v12  ;;  %v10847_v63 = vshrl.u32 %v18430_v30, 16 }
 0x9f6   : > { %v10820_v52 = vshrl.u32 %v18427_v38, 16 }
 0x9f7   : > { %21582 = vmatpush3.bf16.msra.mxu1 %v23574_v9  ;;  %v10249_v9 = vrot.slane %v28429_v34, 1 }
 0x9f8   : > { %23169 = vmatprep.subr.msk.bf16.mxu1 %vm859_vm0, %v28527_v37  ;;  %v10822_v34 = vrot.slane %v10820_v52, 3  ;;  %v18431_v37 = vcombine.low %v23906_v49, %v23907_v1  ;;  %v23916_v49 = vld [vmem:[#allocation2 + $0x70] sm:$0xf]  ;;  %v23917_v1 = vld [vmem:[#allocation2 + $0x74] sm:$0xf] }
 0x9fa   : > { %21536 = vmatmul.mubr.msk.bf16.gmra.mrb[48].mxu1 %vm777_vm3, %v10222_v3  ;;  %v10811_v3 = vshrl.u32 %v18426_v61, 16  ;;  %v10856_v57 = vshrl.u32 %v18431_v37, 16  ;;  %v10859_v36 = vshll.u32 %v18431_v37, 16  ;;  %v18436_v37 = vcombine.low %v23916_v49, %v23917_v1 }
 0x9fb   : > { %21539 = vmatprep.mubr.msk.bf16.mxu1 %vm777_vm3, %v10224_v46  ;;  %v10814_v46 = vshll.u32 %v18426_v61, 16  ;;  %v10850_v61 = vshll.u32 %v18430_v30, 16 }
 0x9fc   : > { %v10813_v15 = vrot.slane %v10811_v3, 3  ;;  %v18432_v3 = vcombine.low %v23908_v21, %v23909_v32  ;;  %v10861_v52 = vrot.slane %v10859_v36, 4 }
 0xa02   : > { %21540 = vmatmul.mubr.msk.bf16.gmra.mrb[52].mxu1 %vm777_vm3, %v10226_v10  ;;  %v10823_v10 = vshll.u32 %v18427_v38, 16  ;;  %v10849_v38 = vrot.slane %v10847_v63, 3 }
 0xa03   : > { %21543 = vmatprep.mubr.msk.bf16.mxu1 %vm777_vm3, %v10228_v11  ;;  %v10250_v11 = vsel %vm1430_vm4, %v10247_v33, %v10249_v9  ;;  %v10852_v9 = vrot.slane %v10850_v61, 4 }
 0xa0a   : > { %21544 = vmatmul.mubr.msk.bf16.gmra.mrb[56].mxu1 %vm777_vm3, %v10230_v18  ;;  %v10816_v18 = vrot.slane %v10814_v46, 4 }
 0xa0b   : > { %21547 = vmatprep.mubr.msk.bf16.mxu1 %vm777_vm3, %v10232_v41  ;;  %v23900_v41 = vld [vmem:[#allocation2 + $0x30] sm:$0xf] }
 0xa0c   : > { %v18428_v2 = vcombine.low %v23900_v41, %v23901_v26  ;;  %v10868_v41 = vshll.u32 %v18432_v3, 16 }
 0xa0e   : > { %v10829_v14 = vshrl.u32 %v18428_v2, 16  ;;  %v10832_v60 = vshll.u32 %v18428_v2, 16 }
 0xa10   : > { %v10831_v6 = vrot.slane %v10829_v14, 3  ;;  %v10834_v33 = vrot.slane %v10832_v60, 4 }
 0xa12   : > { %21548 = vmatmul.mubr.msk.bf16.gmra.mrb[60].mxu1 %vm777_vm3, %v10234_v62  ;;  %v10809_v62 = vsel %vm7262_vm5, %v10800_v58, %v10808_v44  ;;  %v10835_v22 = vor.u32 %v10834_v33, %v10831_v6 }
 0xa13   : > { %21551 = vmatprep.mubr.msk.bf16.mxu1 %vm777_vm3, %v10236_v54  ;;  %v10825_v54 = vrot.slane %v10823_v10, 4  ;;  %v23910_v10 = vld [vmem:[#allocation2 + $0x58] sm:$0xf] }
 0xa1a   : > { %21552 = vmatmul.mubr.msk.bf16.gmra.mrb[64].mxu1 %vm777_vm3, %v10238_v4  ;;  %v18429_v4 = vcombine.low %v23902_v59, %v23903_v55  ;;  %v10870_v59 = vrot.slane %v10868_v41, 4  ;;  %v23912_v55 = vld [vmem:[#allocation2 + $0x60] sm:$0xf] }
 0xa1b   : > { %21555 = vmatprep.mubr.msk.bf16.mxu1 %vm777_vm3, %v10240_v42  ;;  %v10817_v42 = vor.u32 %v10816_v18, %v10813_v15  ;;  %v10853_v15 = vor.u32 %v10852_v9, %v10849_v38  ;;  %v10865_v18 = vshrl.u32 %v18432_v3, 16  ;;  %v10901_v38 = vshrl.u32 %v18436_v37, 16 }
 0xa1c   : > { %v10841_v53 = vshll.u32 %v18429_v4, 16  ;;  %v10904_v9 = vshll.u32 %v18436_v37, 16 }
 0xa1d   : > { %v10818_v56 = vsel %vm7262_vm5, %v10808_v44, %v10817_v42  ;;  %v10858_v44 = vrot.slane %v10856_v57, 3  ;;  %v23919_v57 = vld [vmem:[#allocation2 + $0x7c] sm:$0xf] }
 0xa1f   : > { %v10862_v26 = vor.u32 %v10861_v52, %v10858_v44  ;;  %v10903_v44 = vrot.slane %v10901_v38, 3  ;;  %v10906_v52 = vrot.slane %v10904_v9, 4 }
 0xa21   : > { %v10863_v14 = vsel %vm7262_vm5, %v10853_v15, %v10862_v26 }
 0xa22   : > { %21556 = vmatmul.mubr.msk.bf16.gmra.mrb[68].mxu1 %vm777_vm3, %v10242_v16  ;;  %v10826_v16 = vor.u32 %v10825_v54, %v10822_v34  ;;  %v10867_v54 = vrot.slane %v10865_v18, 3 }
 0xa23   : > { %21559 = vmatprep.mubr.msk.bf16.mxu1 %vm777_vm3, %v10244_v31  ;;  %v10838_v31 = vshrl.u32 %v18429_v4, 16  ;;  %v23913_v4 = vld [vmem:[#allocation2 + $0x64] sm:$0xf] }
 0xa24   : > { %v10827_v39 = vsel %vm7262_vm5, %v10817_v42, %v10826_v16  ;;  %v10836_v24 = vsel %vm7262_vm5, %v10826_v16, %v10835_v22  ;;  %v18434_v42 = vcombine.low %v23912_v55, %v23913_v4 }
 0xa26   : > { %v10883_v6 = vshrl.u32 %v18434_v42, 16  ;;  %v10886_v33 = vshll.u32 %v18434_v42, 16 }
 0xa2a   : > { %21560 = vmatmul.mubr.msk.bf16.gmra.mrb[72].mxu1 %vm777_vm3, %v10246_v27  ;;  %v10840_v27 = vrot.slane %v10838_v31, 3  ;;  %v23914_v31 = vld [vmem:[#allocation2 + $0x68] sm:$0xf] }
 0xa2b   : > { %21563 = vmatprep.mubr.msk.bf16.mxu1 %vm777_vm3, %v10248_v20  ;;  %v10843_v20 = vrot.slane %v10841_v53, 4  ;;  %v23915_v53 = vld [vmem:[#allocation2 + $0x6c] sm:$0xf] }
 0xa2d   : > { %v10844_v12 = vor.u32 %v10843_v20, %v10840_v27  ;;  %v10885_v27 = vrot.slane %v10883_v6, 3  ;;  %v10888_v20 = vrot.slane %v10886_v33, 4 }
 0xa2f   : > { %v10845_v46 = vsel %vm7262_vm5, %v10835_v22, %v10844_v12  ;;  %v10854_v34 = vsel %vm7262_vm5, %v10844_v12, %v10853_v15  ;;  %v23918_v12 = vld [vmem:[#allocation2 + $0x78] sm:$0xf] }
 0xa30   : > { %v18437_v36 = vcombine.low %v23918_v12, %v23919_v57  ;;  %v23928_v12 = vld [vmem:[#allocation2 + $0xa0] sm:$0xf]  ;;  %v23929_v57 = vld [vmem:[#allocation2 + $0xa4] sm:$0xf] }
 0xa32   : > { %21564 = vmatmul.mubr.msk.bf16.gmra.mrb[76].mxu1 %vm777_vm3, %v10250_v11  ;;  %v23911_v11 = vld [vmem:[#allocation2 + $0x5c] sm:$0xf]  ;;  %v10910_v32 = vshrl.u32 %v18437_v36, 16  ;;  %v10913_v3 = vshll.u32 %v18437_v36, 16  ;;  %v18442_v36 = vcombine.low %v23928_v12, %v23929_v57 }
 0xa33   : > { %21583 = vmatprep.mubr.bf16.mxu1 %v10809_v62  ;;  %v18433_v58 = vcombine.low %v23910_v10, %v23911_v11  ;;  %v23920_v10 = vld [vmem:[#allocation2 + $0x80] sm:$0xf]  ;;  %v23921_v11 = vld [vmem:[#allocation2 + $0x84] sm:$0xf] }
 0xa34   : > { %v10912_v18 = vrot.slane %v10910_v32, 3  ;;  %v10915_v41 = vrot.slane %v10913_v3, 4  ;;  %v23931_v32 = vld [vmem:[#allocation2 + $0xac] sm:$0xf] }
 0xa35   : > { %v10874_v2 = vshrl.u32 %v18433_v58, 16  ;;  %v10877_v62 = vshll.u32 %v18433_v58, 16  ;;  %v18438_v58 = vcombine.low %v23920_v10, %v23921_v11 }
 0xa36   : > { %v10916_v55 = vor.u32 %v10915_v41, %v10912_v18 }
 0xa37   : > { %v10876_v60 = vrot.slane %v10874_v2, 3  ;;  %v10879_v16 = vrot.slane %v10877_v62, 4  ;;  %v23923_v2 = vld [vmem:[#allocation2 + $0x8c] sm:$0xf] }
 0xa39   : > { %v10880_v50 = vor.u32 %v10879_v16, %v10876_v60 }
 0xa3a   : > { %21584 = vmatmul.mubr.bf16.vlgmr.msra.gmra.mrb[32].mxu1 %v10818_v56  ;;  %v10871_v56 = vor.u32 %v10870_v59, %v10867_v54  ;;  %v10919_v54 = vshrl.u32 %v18438_v58, 16  ;;  %v10922_v59 = vshll.u32 %v18438_v58, 16 }
 0xa3b   : > { %21632 = vmatpush3.bf16.msra.mxu1 %v11611_v5  ;;  %21587 = vmatprep.mubr.bf16.mxu1 %v10827_v39  ;;  %v18435_v5 = vcombine.low %v23914_v31, %v23915_v53  ;;  %v23924_v31 = vld [vmem:[#allocation2 + $0x90] sm:$0xf]  ;;  %v23925_v53 = vld [vmem:[#allocation2 + $0x94] sm:$0xf] }
 0xa3c   : > { %21681 = vmatprep.subr.bf16.mxu1 %v28580_v13  ;;  %v10872_v39 = vsel %vm7262_vm5, %v10862_v26, %v10871_v56  ;;  %v10881_v22 = vsel %vm7262_vm5, %v10871_v56, %v10880_v50  ;;  %v23922_v26 = vld [vmem:[#allocation2 + $0x88] sm:$0xf]  ;;  %v10921_v60 = vrot.slane %v10919_v54, 3  ;;  %v10924_v16 = vrot.slane %v10922_v59, 4 }
 0xa3d   : > { %v10892_v35 = vshrl.u32 %v18435_v5, 16  ;;  %v10895_v30 = vshll.u32 %v18435_v5, 16  ;;  %v18439_v62 = vcombine.low %v23922_v26, %v23923_v2  ;;  %v18440_v5 = vcombine.low %v23924_v31, %v23925_v53  ;;  %v23932_v26 = vld [vmem:[#allocation2 + $0xb0] sm:$0xf]  ;;  %v23933_v2 = vld [vmem:[#allocation2 + $0xb4] sm:$0xf] }
 0xa3f   : > { %v10894_v63 = vrot.slane %v10892_v35, 3  ;;  %v10897_v61 = vrot.slane %v10895_v30, 4  ;;  %v10928_v4 = vshrl.u32 %v18439_v62, 16  ;;  %v10931_v42 = vshll.u32 %v18439_v62, 16  ;;  %v23927_v35 = vld [vmem:[#allocation2 + $0x9c] sm:$0xf] }
 0xa40   : > { %v18444_v62 = vcombine.low %v23932_v26, %v23933_v2 }
 0xa41   : > { %v10898_v21 = vor.u32 %v10897_v61, %v10894_v63  ;;  %v10930_v6 = vrot.slane %v10928_v4, 3  ;;  %v10933_v33 = vrot.slane %v10931_v42, 4  ;;  %v23935_v4 = vld [vmem:[#allocation2 + $0xbc] sm:$0xf] }
 0xa42   : > { %21588 = vmatmul.mubr.bf16.gmra.mrb[36].mxu1 %v10836_v24  ;;  %v10889_v24 = vor.u32 %v10888_v20, %v10885_v27  ;;  %v10937_v27 = vshrl.u32 %v18440_v5, 16  ;;  %v10940_v20 = vshll.u32 %v18440_v5, 16 }
 0xa43   : > { %21591 = vmatprep.mubr.bf16.mxu1 %v10845_v46  ;;  %v10934_v49 = vor.u32 %v10933_v33, %v10930_v6 }
 0xa44   : > { %v10890_v46 = vsel %vm7262_vm5, %v10880_v50, %v10889_v24  ;;  %v10899_v15 = vsel %vm7262_vm5, %v10889_v24, %v10898_v21  ;;  %v23926_v50 = vld [vmem:[#allocation2 + $0x98] sm:$0xf]  ;;  %v10939_v63 = vrot.slane %v10937_v27, 3  ;;  %v10942_v61 = vrot.slane %v10940_v20, 4 }
 0xa45   : > { %v18441_v30 = vcombine.low %v23926_v50, %v23927_v35  ;;  %v23936_v50 = vld [vmem:[#allocation2 + $0xc0] sm:$0xf]  ;;  %v23937_v35 = vld [vmem:[#allocation2 + $0xc4] sm:$0xf] }
 0xa47   : > { %v10946_v1 = vshrl.u32 %v18441_v30, 16  ;;  %v10949_v37 = vshll.u32 %v18441_v30, 16  ;;  %v18446_v30 = vcombine.low %v23936_v50, %v23937_v35  ;;  %v23634_v50 = vld [vmem:[%s29593_s4 + $0x20] sm:$0x1f]  }
 0xa48   : > { %v23613_v35 = vld [vmem:[%s24214_s25 + $0x60] sm:$0xff]  }
 0xa49   : > { %v10948_v38 = vrot.slane %v10946_v1, 3  ;;  %v10951_v9 = vrot.slane %v10949_v37, 4  ;;  %v23939_v1 = vld [vmem:[#allocation2 + $0xcc] sm:$0xf] }
 0xa4a   : > { %21592 = vmatmul.mubr.bf16.gmra.mrb[40].mxu1 %v10854_v34  ;;  %v10907_v34 = vor.u32 %v10906_v52, %v10903_v44  ;;  %v10955_v44 = vshrl.u32 %v18442_v36, 16  ;;  %v10958_v52 = vshll.u32 %v18442_v36, 16 }
 0xa4b   : > { %21595 = vmatprep.mubr.bf16.mxu1 %v10863_v14  ;;  %v10952_v10 = vor.u32 %v10951_v9, %v10948_v38 }
 0xa4c   : > { %v10908_v14 = vsel %vm7262_vm5, %v10898_v21, %v10907_v34  ;;  %v10917_v56 = vsel %vm7262_vm5, %v10907_v34, %v10916_v55  ;;  %v23930_v21 = vld [vmem:[#allocation2 + $0xa8] sm:$0xf]  ;;  %v10957_v18 = vrot.slane %v10955_v44, 3  ;;  %v10960_v41 = vrot.slane %v10958_v52, 4 }
 0xa4d   : > { %v18443_v3 = vcombine.low %v23930_v21, %v23931_v32  ;;  %v23940_v21 = vld [vmem:[#allocation2 + $0xd0] sm:$0xf] }
 0xa4e   : > { %v18448_v32 = vcombine.low %v23940_v21, %v23940_v21 }
 0xa4f   : > { %v10964_v11 = vshrl.u32 %v18443_v3, 16  ;;  %v10967_v58 = vshll.u32 %v18443_v3, 16 }
 0xa51   : > { %v10966_v54 = vrot.slane %v10964_v11, 3  ;;  %v10969_v59 = vrot.slane %v10967_v58, 4  ;;  %v11012_v11 = vshll.u32 %v18448_v32, 16 }
 0xa52   : > { %21596 = vmatmul.mubr.bf16.gmra.mrb[44].mxu1 %v10872_v39  ;;  %v10925_v39 = vor.u32 %v10924_v16, %v10921_v60  ;;  %v10973_v60 = vshrl.u32 %v18444_v62, 16  ;;  %v10976_v16 = vshll.u32 %v18444_v62, 16  ;;  %v23601_v62 = vld [vmem:[%s24214_s25 + $0x18] sm:$0xff]  }
 0xa53   : > { %21599 = vmatprep.mubr.bf16.mxu1 %v10881_v22  ;;  %v10970_v31 = vor.u32 %v10969_v59, %v10966_v54  ;;  %v23603_v54 = vld [vmem:[%s24214_s25 + $0x20] sm:$0xff]   ;;  %v23604_v59 = vld [vmem:[%s24214_s25 + $0x28] sm:$0xff]  }
 0xa54   : > { %v10926_v22 = vsel %vm7262_vm5, %v10916_v55, %v10925_v39  ;;  %v10935_v24 = vsel %vm7262_vm5, %v10925_v39, %v10934_v49  ;;  %v23934_v55 = vld [vmem:[#allocation2 + $0xb8] sm:$0xf]  ;;  %v10975_v6 = vrot.slane %v10973_v60, 3  ;;  %v10978_v33 = vrot.slane %v10976_v16, 4  ;;  %v23608_v16 = vld [vmem:[%s24214_s25 + $0x40] sm:$0xff]  }
 0xa55   : > { %v18445_v42 = vcombine.low %v23934_v55, %v23935_v4  ;;  %v23606_v55 = vld [vmem:[%s29592_s3 + $0x108] sm:$0xff]   ;;  %v23610_v4 = vld [vmem:[%s29592_s3 + $0x110] sm:$0xff]   ;;  %v23614_v60 = vld [vmem:[%s29592_s3 + $0x118] sm:$0xff]  }
 0xa57   : > { %v10982_v53 = vshrl.u32 %v18445_v42, 16  ;;  %v10985_v5 = vshll.u32 %v18445_v42, 16  ;;  %v23605_v42 = vld [vmem:[%s24214_s25 + $0x30] sm:$0xff]  }
 0xa59   : > { %v10984_v27 = vrot.slane %v10982_v53, 3  ;;  %v10987_v20 = vrot.slane %v10985_v5, 4  ;;  %v23622_v53 = vld [vmem:[%s29592_s3 + $0x128] sm:$0xff]   ;;  %v23626_v5 = vld [vmem:[%s29592_s3 + $0x130] sm:$0xff]  }
 0xa5a   : > { %21600 = vmatmul.mubr.bf16.gmra.mrb[48].mxu1 %v10890_v46  ;;  %v10943_v46 = vor.u32 %v10942_v61, %v10939_v63  ;;  %v10991_v63 = vshrl.u32 %v18446_v30, 16  ;;  %v10994_v61 = vshll.u32 %v18446_v30, 16  ;;  %v23615_v30 = vld [vmem:[%s24214_s25 + $0x68] sm:$0xff]  }
 0xa5b   : > { %21603 = vmatprep.mubr.bf16.mxu1 %v10899_v15  ;;  %v10988_v12 = vor.u32 %v10987_v20, %v10984_v27  ;;  %v23617_v27 = vld [vmem:[%s24214_s25 + $0x78] sm:$0xff]   ;;  %v23619_v20 = vld [vmem:[%s24214_s25 + $0x80] sm:$0xff]  }
 0xa5c   : > { %v10944_v15 = vsel %vm7262_vm5, %v10934_v49, %v10943_v46  ;;  %v10953_v34 = vsel %vm7262_vm5, %v10943_v46, %v10952_v10  ;;  %v23938_v49 = vld [vmem:[#allocation2 + $0xc8] sm:$0xf]  ;;  %v10993_v38 = vrot.slane %v10991_v63, 3  ;;  %v10996_v9 = vrot.slane %v10994_v61, 4  ;;  %v23627_v61 = vld [vmem:[%s24214_s25 + $0xb0] sm:$0xff]  }
 0xa5d   : > { %v18447_v37 = vcombine.low %v23938_v49, %v23939_v1  ;;  %v23620_v49 = vld [vmem:[%s24214_s25 + $0x88] sm:$0xff]   ;;  %v23621_v1 = vld [vmem:[%s24214_s25 + $0x90] sm:$0xff]  }
 0xa5e   : > { %v10997_v52 = vor.u32 %v10996_v9, %v10993_v38  ;;  %v23625_v63 = vld [vmem:[%s24214_s25 + $0xa8] sm:$0xff]  }
 0xa5f   : > { %v11000_v57 = vshrl.u32 %v18447_v37, 16  ;;  %v11003_v36 = vshll.u32 %v18447_v37, 16  ;;  %v23623_v37 = vld [vmem:[%s24214_s25 + $0x98] sm:$0xff]   ;;  %v30145_v38 = vld [vmem:[#allocation41_spill] sm:$0xff] }
 0xa60   : > { %v30146_v9 = vld [vmem:[#allocation13_spill] sm:$0xff] }
 0xa61   : > { %v11002_v46 = vrot.slane %v11000_v57, 3  ;;  %v11005_v44 = vrot.slane %v11003_v36, 4  ;;  %v23629_v57 = vld [vmem:[%s24214_s25 + $0xc0] sm:$0xff]   ;;  %v23631_v36 = vld [vmem:[%s24214_s25 + $0xc8] sm:$0xff]   ;;  %v30147_v21 = vcombine.low %v30145_v38, %v30146_v9 }
 0xa62   : > { %21604 = vmatmul.mubr.bf16.gmra.mrb[52].mxu1 %v10908_v14  ;;  %v10961_v14 = vor.u32 %v10960_v41, %v10957_v18  ;;  %v11014_v41 = vrot.slane %v11012_v11, 4  ;;  %v30152_v11 = vld [vmem:[#allocation51_spill] sm:$0xff]  ;;  %v30193_v9 = vld [vmem:[#allocation42_spill] sm:$0xff] }
 0xa63   : > { %21607 = vmatprep.mubr.bf16.mxu1 %v10917_v56  ;;  %v11006_v58 = vor.u32 %v11005_v44, %v11002_v46  ;;  %v30148_v46 = vld [vmem:[#allocation11_spill] sm:$0xff]  ;;  %v30149_v44 = vld [vmem:[#allocation14_spill] sm:$0xff] }
 0xa64   : > { %v10962_v56 = vsel %vm7262_vm5, %v10952_v10, %v10961_v14  ;;  %v10971_v39 = vsel %vm7262_vm5, %v10961_v14, %v10970_v31  ;;  %v11009_v10 = vshrl.u32 %v18448_v32, 16  ;;  %v23607_v14 = vld [vmem:[%s24214_s25 + $0x38] sm:$0xff]   ;;  %v12281_v32 = vsel %vm859_vm0, %v23634_v50, 0 }
 0xa65   : > { %v11007_v26 = vsel %vm7262_vm5, %v10997_v52, %v11006_v58 }
 0xa66   : > { %v11011_v18 = vrot.slane %v11009_v10, 3  ;;  %v30151_v10 = vld [vmem:[#allocation39_spill] sm:$0xff] }
 0xa68   : > { %v11015_v2 = vor.u32 %v11014_v41, %v11011_v18  ;;  %v30155_v18 = vld [vmem:[#allocation53_spill] sm:$0xff] }
 0xa6a   : > { %21608 = vmatmul.mubr.bf16.gmra.mrb[56].mxu1 %v10926_v22  ;;  %v10979_v22 = vor.u32 %v10978_v33, %v10975_v6  ;;  %v23612_v6 = vld [vmem:[%s24214_s25 + $0x58] sm:$0xff]  }
 0xa6b   : > { %21611 = vmatprep.mubr.bf16.mxu1 %v10935_v24  ;;  %v23630_v33 = vld [vmem:[%s29592_s3 + $0x138] sm:$0xff]  }
 0xa6c   : > { %v10980_v24 = vsel %vm7262_vm5, %v10970_v31, %v10979_v22  ;;  %v10989_v3 = vsel %vm7262_vm5, %v10979_v22, %v10988_v12  ;;  %v23609_v31 = vld [vmem:[%s24214_s25 + $0x48] sm:$0xff]   ;;  %v23624_v22 = vld [vmem:[%s24214_s25 + $0xa0] sm:$0xff]  }
 0xa72   : > { %21612 = vmatmul.mubr.bf16.gmra.mrb[60].mxu1 %v10944_v15  ;;  %v10998_v15 = vsel %vm7262_vm5, %v10988_v12, %v10997_v52  ;;  %v23628_v12 = vld [vmem:[%s24214_s25 + $0xb8] sm:$0xff]   ;;  %v30150_v52 = vcombine.low %v30148_v46, %v30149_v44 }
 0xa73   : > { %21615 = vmatprep.mubr.bf16.mxu1 %v10953_v34  ;;  %v11016_v34 = vsel %vm7262_vm5, %v11006_v58, %v11015_v2  ;;  %v30153_v58 = vcombine.low %v30151_v10, %v30152_v11  ;;  %v30158_v2 = vld [vmem:[#allocation55_spill] sm:$0xff]  ;;  %v30196_v46 = vld [vmem:[#allocation44_spill] sm:$0xff]  ;;  %v30199_v10 = vld [vmem:[#allocation45_spill] sm:$0xff] }
 0xa74   : > { %v30197_v44 = vld [vmem:[#allocation95_spill] sm:$0xff] }
 0xa75   : > { %v30200_v11 = vld [vmem:[#allocation99_spill] sm:$0xff] }
 0xa7a   : > { %21616 = vmatmul.mubr.bf16.gmra.mrb[64].mxu1 %v10962_v56  ;;  %v23611_v56 = vld [vmem:[%s24214_s25 + $0x50] sm:$0xff]  }
 0xa7b   : > { %21619 = vmatprep.mubr.bf16.mxu1 %v10971_v39  ;;  %v23616_v39 = vld [vmem:[%s24214_s25 + $0x70] sm:$0xff]  }
 0xa82   : > { %21620 = vmatmul.mubr.bf16.gmra.mrb[68].mxu1 %v10980_v24  ;;  %v23632_v24 = vld [vmem:[%s24214_s25 + $0xd0] sm:$0xff]  }
 0xa83   : > { %21623 = vmatprep.mubr.bf16.mxu1 %v10989_v3  ;;  %v23658_v3 = vld [vmem:[%s29592_s3 + $0x140] sm:$0xff]  }
 0xa8a   : > { %21624 = vmatmul.mubr.bf16.gmra.mrb[72].mxu1 %v10998_v15  ;;  %v30154_v15 = vld [vmem:[#allocation52_spill] sm:$0xff] }
 0xa8b   : > { %21627 = vmatprep.mubr.bf16.mxu1 %v11007_v26  ;;  %v30156_v41 = vcombine.low %v30154_v15, %v30155_v18  ;;  %v30157_v26 = vld [vmem:[#allocation54_spill] sm:$0xff]  ;;  %v30203_v18 = vld [vmem:[#allocation103_spill] sm:$0xff] }
 0xa8c   : > { %v30202_v15 = vld [vmem:[#allocation18_spill] sm:$0xff] }
 0xa92   : > { %21628 = vmatmul.mubr.bf16.gmra.mrb[76].mxu1 %v11016_v34  ;;  %v30160_v34 = vld [vmem:[#allocation56_spill] sm:$0xff] }
 0xa93   : > { %21633 = vmatprep.mubr.msk.bf16.mxu1 %vm777_vm3, %v23601_v62  ;;  %v30159_v62 = vcombine.low %v30157_v26, %v30158_v2  ;;  %v30205_v26 = vld [vmem:[#allocation35_spill] sm:$0xff]  ;;  %v30206_v2 = vld [vmem:[#allocation105_spill] sm:$0xff] }
 0xa9a   : > { %21634 = vmatmul.mubr.msk.bf16.vlgmr.msra.gmra.mrb[32].mxu1 %vm777_vm3, %v23603_v54  ;;  %v30161_v54 = vld [vmem:[#allocation57_spill] sm:$0xff] }
 0xa9b   : > { %21682 = vmatpush3.bf16.msra.mxu1 %v28580_v13  ;;  %21637 = vmatprep.mubr.msk.bf16.mxu1 %vm777_vm3, %v23604_v59  ;;  %v23618_v13 = vld [vmem:[%s29592_s3 + $0x120] sm:$0xff]   ;;  %v30162_v59 = vcombine.low %v30160_v34, %v30161_v54  ;;  %v30208_v34 = vcombine.low %v27993_v40, %v27988_v47  ;;  %v30209_v54 = vcombine.low %v27995_v0, %v27990_v43  ;;  %v30215_v47 = vld [vmem:[#allocation27_spill] sm:$0xff]  ;;  %v30216_v0 = vld [vmem:[#allocation22_spill] sm:$0xff] }
 0xa9c   : > { %21683 = vmatprep.subr.bf16.mxu1 %v23606_v55  ;;  %v23660_v43 = vld [vmem:[%s29592_s3 + $0x150] sm:$0xff]   ;;  %v23661_v40 = vld [vmem:[%s29592_s3 + $0x158] sm:$0xff]  }
 0xa9f   : > { %21684 = vmatpush3.bf16.msra.mxu1 %v23606_v55  ;;  %v30163_v55 = vld [vmem:[#allocation58_spill] sm:$0xff] }
 0xaa0   : > { %21685 = vmatprep.subr.bf16.mxu1 %v23610_v4 }
 0xaa2   : > { %21638 = vmatmul.mubr.msk.bf16.gmra.mrb[36].mxu1 %vm777_vm3, %v23605_v42 }
 0xaa3   : > { %21641 = vmatprep.mubr.msk.bf16.mxu1 %vm777_vm3, %v23607_v14  ;;  %21686 = vmatpush3.bf16.msra.mxu1 %v23610_v4  ;;  %v30164_v4 = vld [vmem:[#allocation59_spill] sm:$0xff]  ;;  %v30166_v14 = vld [vmem:[#allocation60_spill] sm:$0xff] }
 0xaa4   : > { %21687 = vmatprep.subr.bf16.mxu1 %v23614_v60  ;;  %v30165_v42 = vcombine.low %v30163_v55, %v30164_v4  ;;  %v30211_v55 = vld [vmem:[#allocation49_spill] sm:$0xff] }
 0xaa7   : > { %21688 = vmatpush3.bf16.msra.mxu1 %v23614_v60  ;;  %v30167_v60 = vld [vmem:[#allocation61_spill] sm:$0xff] }
 0xaa8   : > { %21689 = vmatprep.subr.bf16.mxu1 %v23618_v13 }
 0xaaa   : > { %21642 = vmatmul.mubr.msk.bf16.gmra.mrb[40].mxu1 %vm777_vm3, %v23608_v16  ;;  %v30169_v16 = vld [vmem:[#allocation62_spill] sm:$0xff] }
 0xaab   : > { %21645 = vmatprep.mubr.msk.bf16.mxu1 %vm777_vm3, %v23609_v31  ;;  %21690 = vmatpush3.bf16.msra.mxu1 %v23618_v13  ;;  %v30168_v13 = vcombine.low %v30166_v14, %v30167_v60  ;;  %v30170_v31 = vld [vmem:[#allocation63_spill] sm:$0xff]  ;;  %v23659_v14 = vld [vmem:[%s29592_s3 + $0x148] sm:$0xff]  }
 0xaac   : > { %21691 = vmatprep.subr.bf16.mxu1 %v23622_v53  ;;  %v30214_v60 = vld [vmem:[#allocation46_spill] sm:$0xff] }
 0xaaf   : > { %21692 = vmatpush3.bf16.msra.mxu1 %v23622_v53  ;;  %v30171_v53 = vcombine.low %v30169_v16, %v30170_v31  ;;  %v23663_v16 = vld [vmem:[%s29592_s3 + $0x168] sm:$0xff]  }
 0xab0   : > { %21693 = vmatprep.subr.bf16.mxu1 %v23626_v5  ;;  %v30218_v31 = vld [vmem:[#allocation30_spill] sm:$0xff] }
 0xab2   : > { %21646 = vmatmul.mubr.msk.bf16.gmra.mrb[44].mxu1 %vm777_vm3, %v23611_v56  ;;  %v30173_v56 = vld [vmem:[#allocation65_spill] sm:$0xff] }
 0xab3   : > { %21649 = vmatprep.mubr.msk.bf16.mxu1 %vm777_vm3, %v23612_v6  ;;  %21694 = vmatpush3.bf16.msra.mxu1 %v23626_v5  ;;  %v30172_v5 = vld [vmem:[#allocation64_spill] sm:$0xff] }
 0xab4   : > { %21695 = vmatprep.subr.bf16.mxu1 %v23630_v33  ;;  %v30174_v6 = vcombine.low %v30172_v5, %v30173_v56  ;;  %v23664_v5 = vld [vmem:[%s29592_s3 + $0x170] sm:$0xff]   ;;  %v23665_v56 = vld [vmem:[%s29592_s3 + $0x178] sm:$0xff]  }
 0xab7   : > { %21696 = vmatpush3.bf16.msra.mxu1 %v23630_v33  ;;  %v30175_v33 = vld [vmem:[#allocation71_spill] sm:$0xff] }
 0xab8   : > { %23170 = vmatprep.subr.msk.bf16.mxu1 %vm859_vm0, %v23634_v50  ;;  %v30176_v50 = vld [vmem:[#allocation69_spill] sm:$0xff] }
 0xaba   : > { %21650 = vmatmul.mubr.msk.bf16.gmra.mrb[48].mxu1 %vm777_vm3, %v23613_v35  ;;  %v30177_v35 = vcombine.low %v30175_v33, %v30176_v50  ;;  %v30221_v33 = vld [vmem:[#allocation33_spill] sm:$0xff] }
 0xabb   : > { %21653 = vmatprep.mubr.msk.bf16.mxu1 %vm777_vm3, %v23615_v30  ;;  %v30178_v30 = vld [vmem:[#allocation72_spill] sm:$0xff]  ;;  %v23668_v50 = vld [vmem:[%s29593_s4 + $0x28] sm:$0x1f]  }
 0xac2   : > { %21654 = vmatmul.mubr.msk.bf16.gmra.mrb[52].mxu1 %vm777_vm3, %v23616_v39  ;;  %v30179_v39 = vld [vmem:[#allocation73_spill] sm:$0xff] }
 0xac3   : > { %21657 = vmatprep.mubr.msk.bf16.mxu1 %vm777_vm3, %v23617_v27  ;;  %v30180_v27 = vcombine.low %v30178_v30, %v30179_v39  ;;  %v30223_v30 = vld [vmem:[#allocation29_spill] sm:$0xff]  ;;  %v30224_v39 = vld [vmem:[#allocation31_spill] sm:$0xff] }
 0xaca   : > { %21658 = vmatmul.mubr.msk.bf16.gmra.mrb[56].mxu1 %vm777_vm3, %v23619_v20  ;;  %v30181_v20 = vld [vmem:[#allocation75_spill] sm:$0xff] }
 0xacb   : > { %21661 = vmatprep.mubr.msk.bf16.mxu1 %vm777_vm3, %v23620_v49  ;;  %v30182_v49 = vld [vmem:[#allocation77_spill] sm:$0xff] }
 0xad2   : > { %21662 = vmatmul.mubr.msk.bf16.gmra.mrb[60].mxu1 %vm777_vm3, %v23621_v1  ;;  %v30183_v1 = vcombine.low %v30181_v20, %v30182_v49  ;;  %v30226_v20 = vld [vmem:[#allocation6_spill] sm:$0xff]  ;;  %v30227_v49 = vld [vmem:[#allocation7_spill] sm:$0xff] }
 0xad3   : > { %21665 = vmatprep.mubr.msk.bf16.mxu1 %vm777_vm3, %v23623_v37  ;;  %v30184_v37 = vld [vmem:[#allocation79_spill] sm:$0xff] }
 0xada   : > { %21666 = vmatmul.mubr.msk.bf16.gmra.mrb[64].mxu1 %vm777_vm3, %v23624_v22  ;;  %v30185_v22 = vld [vmem:[#allocation81_spill] sm:$0xff] }
 0xadb   : > { %21669 = vmatprep.mubr.msk.bf16.mxu1 %vm777_vm3, %v23625_v63  ;;  %v30186_v63 = vcombine.low %v30184_v37, %v30185_v22  ;;  %v30229_v37 = vld [vmem:[#allocation34_spill] sm:$0xff]  ;;  %v30230_v22 = vld [vmem:[#allocation37_spill] sm:$0xff] }
 0xae2   : > { %21670 = vmatmul.mubr.msk.bf16.gmra.mrb[68].mxu1 %vm777_vm3, %v23627_v61  ;;  %v30187_v61 = vld [vmem:[#allocation83_spill] sm:$0xff] }
 0xae3   : > { %21673 = vmatprep.mubr.msk.bf16.mxu1 %vm777_vm3, %v23628_v12  ;;  %v30188_v12 = vld [vmem:[#allocation85_spill] sm:$0xff] }
 0xaea   : > { %21674 = vmatmul.mubr.msk.bf16.gmra.mrb[72].mxu1 %vm777_vm3, %v23629_v57  ;;  %v30189_v57 = vcombine.low %v30187_v61, %v30188_v12  ;;  %v30232_v61 = vld [vmem:[#allocation8_spill] sm:$0xff]  ;;  %v30233_v12 = vld [vmem:[#allocation15_spill] sm:$0xff] }
 0xaeb   : > { %21677 = vmatprep.mubr.msk.bf16.mxu1 %vm777_vm3, %v23631_v36  ;;  %v30190_v36 = vld [vmem:[#allocation16_spill] sm:$0xff] }
 0xaf2   : > { %21678 = vmatmul.mubr.msk.bf16.gmra.mrb[76].mxu1 %vm777_vm3, %v23632_v24  ;;  %v30191_v24 = vld [vmem:[#allocation87_spill] sm:$0xff] }
 0xaf3   : > { %21697 = vmatprep.mubr.bf16.mxu1 %v30147_v21  ;;  %v30192_v38 = vcombine.low %v30190_v36, %v30191_v24  ;;  %v30194_v21 = vld [vmem:[#allocation91_spill] sm:$0xff]  ;;  %v23667_v36 = vld [vmem:[#allocation2 + $0x1c] sm:$0xff]  }
 0xafa   : > { %21698 = vmatmul.mubr.bf16.vlgmr.msra.gmra.mrb[32].mxu1 %v30150_v52  ;;  %v30198_v52 = vcombine.low %v30196_v46, %v30197_v44  ;;  %v23669_v46 = vld [vmem:[#allocation2 + $0x24] sm:$0xff]  }
 0xafb   : > { %21746 = vmatpush3.bf16.msra.mxu1 %v12281_v32  ;;  %21701 = vmatprep.mubr.bf16.mxu1 %v30153_v58  ;;  %v30195_v32 = vcombine.low %v30193_v9, %v30194_v21  ;;  %v30201_v58 = vcombine.low %v30199_v10, %v30200_v11  ;;  %v12753_v9 = vshll.u32 %v23667_v36, 16  ;;  %v30235_v21 = vld [vmem:[#allocation10_spill] sm:$0xff] }
 0xafc   : > { %21795 = vmatprep.subr.bf16.mxu1 %v23658_v3  ;;  %v23670_v10 = vld [vmem:[#allocation2 + $0x2c] sm:$0xff]  }
 0xb02   : > { %21702 = vmatmul.mubr.bf16.gmra.mrb[36].mxu1 %v30156_v41  ;;  %v30204_v41 = vcombine.low %v30202_v15, %v30203_v18  ;;  %v30236_v15 = vld [vmem:[#allocation40_spill] sm:$0xff] }
 0xb03   : > { %21705 = vmatprep.mubr.bf16.mxu1 %v30159_v62  ;;  %v30207_v62 = vcombine.low %v30205_v26, %v30206_v2  ;;  %v23671_v2 = vld [vmem:[#allocation2 + $0x34] sm:$0xff]  }
 0xb0a   : > { %21706 = vmatmul.mubr.bf16.gmra.mrb[40].mxu1 %v30162_v59  ;;  %v30210_v59 = vld [vmem:[#allocation9_spill] sm:$0xff] }
 0xb0b   : > { %21709 = vmatprep.mubr.bf16.mxu1 %v30165_v42  ;;  %v30212_v4 = vcombine.low %v30210_v59, %v30211_v55  ;;  %v30213_v42 = vld [vmem:[#allocation20_spill] sm:$0xff] }
 0xb0c   : > { %v23672_v59 = vld [vmem:[#allocation2 + $0x3c] sm:$0xff]  }
 0xb12   : > { %21710 = vmatmul.mubr.bf16.gmra.mrb[44].mxu1 %v30168_v13  ;;  %v30217_v13 = vld [vmem:[#allocation23_spill] sm:$0xff] }
 0xb13   : > { %21713 = vmatprep.mubr.bf16.mxu1 %v30171_v53  ;;  %v30219_v53 = vld [vmem:[#allocation25_spill] sm:$0xff] }
 0xb1a   : > { %21714 = vmatmul.mubr.bf16.gmra.mrb[48].mxu1 %v30174_v6  ;;  %v30220_v6 = vld [vmem:[#allocation26_spill] sm:$0xff] }
 0xb1b   : > { %21717 = vmatprep.mubr.bf16.mxu1 %v30177_v35  ;;  %v30222_v35 = vld [vmem:[#allocation28_spill] sm:$0xff] }
 0xb22   : > { %21718 = vmatmul.mubr.bf16.gmra.mrb[52].mxu1 %v30180_v27  ;;  %v30225_v27 = vld [vmem:[#allocation32_spill] sm:$0xff] }
 0xb23   : > { %21721 = vmatprep.mubr.bf16.mxu1 %v30183_v1  ;;  %v30228_v1 = vld [vmem:[#allocation12_spill] sm:$0xff] }
 0xb2a   : > { %21722 = vmatmul.mubr.bf16.gmra.mrb[56].mxu1 %v30186_v63  ;;  %v30231_v63 = vld [vmem:[#allocation36_spill] sm:$0xff] }
 0xb2b   : > { %21725 = vmatprep.mubr.bf16.mxu1 %v30189_v57  ;;  %v23666_v57 = vld [vmem:[#allocation2 + $0x14] sm:$0xff]  }
 0xb2c   : > { %v12748_v24 = vshll.u32 %v23666_v57, 16  ;;  %v12746_v44 = vshrl.u32 %v23666_v57, 16 }
 0xb32   : > { %21726 = vmatmul.mubr.bf16.gmra.mrb[60].mxu1 %v30192_v38  ;;  %v30234_v38 = vld [vmem:[#allocation50_spill] sm:$0xff] }
 0xb33   : > { %21729 = vmatprep.mubr.bf16.mxu1 %v30195_v32  ;;  %v12750_v32 = vrot.slane %v12748_v24, 1  ;;  %v23677_v24 = vld [vmem:[#allocation2 + $0x64] sm:$0xff]  }
 0xb35   : > { %v12751_v11 = vor.u32 %v12750_v32, %v12746_v44  ;;  %v23678_v32 = vld [vmem:[#allocation2 + $0x6c] sm:$0xff]  }
 0xb3a   : > { %21730 = vmatmul.mubr.bf16.gmra.mrb[64].mxu1 %v30198_v52  ;;  %v12755_v52 = vrot.slane %v12753_v9, 1 }
 0xb3b   : > { %21733 = vmatprep.mubr.bf16.mxu1 %v30201_v58  ;;  %v12761_v58 = vshll.u32 %v23669_v46, 16 }
 0xb3c   : > { %v12756_v18 = vsel %vm551_vm2, %v12751_v11, %v12755_v52 }
 0xb3d   : > { %v12763_v26 = vrot.slane %v12761_v58, 1  ;;  %v12833_v58 = vshll.u32 %v23678_v32, 16 }
 0xb42   : > { %21734 = vmatmul.mubr.bf16.gmra.mrb[68].mxu1 %v30204_v41  ;;  %v12769_v41 = vshll.u32 %v23670_v10, 16 }
 0xb43   : > { %21737 = vmatprep.mubr.bf16.mxu1 %v30207_v62  ;;  %v12757_v62 = vshrl.u32 %v23667_v36, 16 }
 0xb45   : > { %v12759_v55 = vor.u32 %v12757_v62, %v12755_v52  ;;  %v12825_v52 = vshll.u32 %v23677_v24, 16  ;;  %v23680_v62 = vld [vmem:[#allocation2 + $0x7c] sm:$0xff]  }
 0xb4a   : > { %21738 = vmatmul.mubr.bf16.gmra.mrb[72].mxu1 %v30208_v34  ;;  %v12765_v34 = vshrl.u32 %v23669_v46, 16 }
 0xb4b   : > { %21741 = vmatprep.mubr.bf16.mxu1 %v30209_v54  ;;  %v12771_v54 = vrot.slane %v12769_v41, 1 }
 0xb52   : > { %21742 = vmatmul.mubr.bf16.gmra.mrb[76].mxu1 %v30212_v4  ;;  %v13420_v4 = vsel %vm859_vm0, %v23668_v50, 0 }
 0xb53   : > { %21747 = vmatprep.mubr.msk.bf16.mxu1 %vm777_vm3, %v30213_v42  ;;  %v12767_v42 = vor.u32 %v12765_v34, %v12763_v26 }
 0xb5a   : > { %21748 = vmatmul.mubr.msk.bf16.vlgmr.msra.gmra.mrb[32].mxu1 %vm777_vm3, %v30214_v60  ;;  %v28834_v60 = vld [vmem:[%s29592_s3 + $0x180] sm:$0xff]  }
 0xb5b   : > { %21796 = vmatpush3.bf16.msra.mxu1 %v23658_v3  ;;  %21751 = vmatprep.mubr.msk.bf16.mxu1 %vm777_vm3, %v30215_v47  ;;  %v23662_v3 = vld [vmem:[%s29592_s3 + $0x160] sm:$0xff]   ;;  %v12764_v47 = vsel %vm551_vm2, %v12759_v55, %v12763_v26  ;;  %v12829_v26 = vshrl.u32 %v23677_v24, 16  ;;  %v23686_v24 = vld [vmem:[#allocation2 + $0xac] sm:$0xff]  }
 0xb5c   : > { %21797 = vmatprep.subr.bf16.mxu1 %v23659_v14 }
 0xb5f   : > { %21798 = vmatpush3.bf16.msra.mxu1 %v23659_v14  ;;  %v12777_v14 = vshll.u32 %v23671_v2, 16 }
 0xb60   : > { %21799 = vmatprep.subr.bf16.mxu1 %v23660_v43 }
 0xb62   : > { %21752 = vmatmul.mubr.msk.bf16.gmra.mrb[36].mxu1 %vm777_vm3, %v30216_v0  ;;  %v12779_v0 = vrot.slane %v12777_v14, 1 }
 0xb63   : > { %21755 = vmatprep.mubr.msk.bf16.mxu1 %vm777_vm3, %v30217_v13  ;;  %21800 = vmatpush3.bf16.msra.mxu1 %v23660_v43  ;;  %v12772_v43 = vsel %vm551_vm2, %v12767_v42, %v12771_v54  ;;  %v23673_v13 = vld [vmem:[#allocation2 + $0x44] sm:$0xff]   ;;  %v12849_v42 = vshll.u32 %v23680_v62, 16 }
 0xb64   : > { %21801 = vmatprep.subr.bf16.mxu1 %v23661_v40 }
 0xb67   : > { %21802 = vmatpush3.bf16.msra.mxu1 %v23661_v40  ;;  %v12785_v40 = vshll.u32 %v23672_v59, 16 }
 0xb68   : > { %21803 = vmatprep.subr.bf16.mxu1 %v23662_v3 }
 0xb6a   : > { %21756 = vmatmul.mubr.msk.bf16.gmra.mrb[40].mxu1 %vm777_vm3, %v30218_v31  ;;  %v12787_v31 = vrot.slane %v12785_v40, 1 }
 0xb6b   : > { %21759 = vmatprep.mubr.msk.bf16.mxu1 %vm777_vm3, %v30219_v53  ;;  %21804 = vmatpush3.bf16.msra.mxu1 %v23662_v3  ;;  %v12773_v3 = vshrl.u32 %v23670_v10, 16  ;;  %v23674_v53 = vld [vmem:[#allocation2 + $0x4c] sm:$0xff]  }
 0xb6c   : > { %21805 = vmatprep.subr.bf16.mxu1 %v23663_v16 }
 0xb6f   : > { %21806 = vmatpush3.bf16.msra.mxu1 %v23663_v16  ;;  %v12781_v16 = vshrl.u32 %v23671_v2, 16  ;;  %v12835_v2 = vrot.slane %v12833_v58, 1 }
 0xb70   : > { %21807 = vmatprep.subr.bf16.mxu1 %v23664_v5 }
 0xb72   : > { %21760 = vmatmul.mubr.msk.bf16.gmra.mrb[44].mxu1 %vm777_vm3, %v30220_v6  ;;  %v12793_v6 = vshll.u32 %v23673_v13, 16 }
 0xb73   : > { %21763 = vmatprep.mubr.msk.bf16.mxu1 %vm777_vm3, %v30221_v33  ;;  %21808 = vmatpush3.bf16.msra.mxu1 %v23664_v5  ;;  %v12775_v5 = vor.u32 %v12773_v3, %v12771_v54 }
 0xb74   : > { %21809 = vmatprep.subr.bf16.mxu1 %v23665_v56 }
 0xb75   : > { %v12780_v33 = vsel %vm551_vm2, %v12775_v5, %v12779_v0 }
 0xb77   : > { %21810 = vmatpush3.bf16.msra.mxu1 %v23665_v56  ;;  %v12783_v56 = vor.u32 %v12781_v16, %v12779_v0  ;;  %v12851_v0 = vrot.slane %v12849_v42, 1 }
 0xb78   : > { %23171 = vmatprep.subr.msk.bf16.mxu1 %vm859_vm0, %v23668_v50 }
 0xb79   : > { %v12788_v50 = vsel %vm551_vm2, %v12783_v56, %v12787_v31 }
 0xb7a   : > { %21764 = vmatmul.mubr.msk.bf16.gmra.mrb[48].mxu1 %vm777_vm3, %v30222_v35  ;;  %v12801_v35 = vshll.u32 %v23674_v53, 16 }
 0xb7b   : > { %21767 = vmatprep.mubr.msk.bf16.mxu1 %vm777_vm3, %v30223_v30  ;;  %v12795_v30 = vrot.slane %v12793_v6, 1 }
 0xb82   : > { %21768 = vmatmul.mubr.msk.bf16.gmra.mrb[52].mxu1 %vm777_vm3, %v30224_v39  ;;  %v23675_v39 = vld [vmem:[#allocation2 + $0x54] sm:$0xff]  }
 0xb83   : > { %21771 = vmatprep.mubr.msk.bf16.mxu1 %vm777_vm3, %v30225_v27  ;;  %v12789_v27 = vshrl.u32 %v23672_v59, 16  ;;  %v12813_v9 = vshrl.u32 %v23675_v39, 16 }
 0xb8a   : > { %21772 = vmatmul.mubr.msk.bf16.gmra.mrb[56].mxu1 %vm777_vm3, %v30226_v20  ;;  %v12797_v20 = vshrl.u32 %v23673_v13, 16  ;;  %v23682_v13 = vld [vmem:[#allocation2 + $0x8c] sm:$0xff]  }
 0xb8b   : > { %21775 = vmatprep.mubr.msk.bf16.mxu1 %vm777_vm3, %v30227_v49  ;;  %v12803_v49 = vrot.slane %v12801_v35, 1  ;;  %v12865_v56 = vshll.u32 %v23682_v13, 16 }
 0xb92   : > { %21776 = vmatmul.mubr.msk.bf16.gmra.mrb[60].mxu1 %vm777_vm3, %v30228_v1  ;;  %v23676_v1 = vld [vmem:[#allocation2 + $0x5c] sm:$0xff]  }
 0xb93   : > { %21779 = vmatprep.mubr.msk.bf16.mxu1 %vm777_vm3, %v30229_v37  ;;  %v12791_v37 = vor.u32 %v12789_v27, %v12787_v31  ;;  %v12817_v57 = vshll.u32 %v23676_v1, 16  ;;  %v12821_v41 = vshrl.u32 %v23676_v1, 16 }
 0xb9a   : > { %21780 = vmatmul.mubr.msk.bf16.gmra.mrb[64].mxu1 %vm777_vm3, %v30230_v22  ;;  %v12799_v22 = vor.u32 %v12797_v20, %v12795_v30 }
 0xb9b   : > { %21783 = vmatprep.mubr.msk.bf16.mxu1 %vm777_vm3, %v30231_v63  ;;  %v12809_v63 = vshll.u32 %v23675_v39, 16  ;;  %v23684_v39 = vld [vmem:[#allocation2 + $0x9c] sm:$0xff]  }
 0xb9d   : > { %v12811_v36 = vrot.slane %v12809_v63, 1 }
 0xb9f   : > { %v12815_v44 = vor.u32 %v12813_v9, %v12811_v36 }
 0xba2   : > { %21784 = vmatmul.mubr.msk.bf16.gmra.mrb[68].mxu1 %vm777_vm3, %v30232_v61  ;;  %v12796_v61 = vsel %vm551_vm2, %v12791_v37, %v12795_v30  ;;  %v12867_v30 = vrot.slane %v12865_v56, 1 }
 0xba3   : > { %21787 = vmatprep.mubr.msk.bf16.mxu1 %vm777_vm3, %v30233_v12  ;;  %v12804_v12 = vsel %vm551_vm2, %v12799_v22, %v12803_v49  ;;  %v12881_v22 = vshll.u32 %v23684_v39, 16 }
 0xbaa   : > { %21788 = vmatmul.mubr.msk.bf16.gmra.mrb[72].mxu1 %vm777_vm3, %v30234_v38  ;;  %v12805_v38 = vshrl.u32 %v23674_v53, 16 }
 0xbab   : > { %21791 = vmatprep.mubr.msk.bf16.mxu1 %vm777_vm3, %v30235_v21  ;;  %v12819_v21 = vrot.slane %v12817_v57, 1 }
 0xbac   : > { %v12807_v46 = vor.u32 %v12805_v38, %v12803_v49 }
 0xbad   : > { %v12820_v11 = vsel %vm551_vm2, %v12815_v44, %v12819_v21  ;;  %v12823_v34 = vor.u32 %v12821_v41, %v12819_v21  ;;  %v12897_v44 = vshll.u32 %v23686_v24, 16 }
 0xbae   : > { %v12812_v10 = vsel %vm551_vm2, %v12807_v46, %v12811_v36  ;;  %v12883_v36 = vrot.slane %v12881_v22, 1  ;;  %v23942_v22 = vld [vmem:[%s24214_s25 + $0x20] sm:$0xff]  }
 0xbb2   : > { %21792 = vmatmul.mubr.msk.bf16.gmra.mrb[76].mxu1 %vm777_vm3, %v30236_v15  ;;  %v12827_v15 = vrot.slane %v12825_v52, 1 }
 0xbb3   : > { %21811 = vmatprep.mubr.bf16.mxu1 %v12756_v18  ;;  %v23679_v18 = vld [vmem:[#allocation2 + $0x74] sm:$0xff]  }
 0xbb4   : > { %v12831_v54 = vor.u32 %v12829_v26, %v12827_v15  ;;  %v12841_v59 = vshll.u32 %v23679_v18, 16  ;;  %v12828_v55 = vsel %vm551_vm2, %v12823_v34, %v12827_v15  ;;  %v12845_v40 = vshrl.u32 %v23679_v18, 16  ;;  %v23688_v18 = vld [vmem:[#allocation2 + $0xbc] sm:$0xff]  }
 0xbb5   : > { %v12899_v15 = vrot.slane %v12897_v44, 1  ;;  %v23694_v44 = vld [vmem:[%s29592_s3 + $0x188] sm:$0xff]  }
 0xbb6   : > { %v12843_v14 = vrot.slane %v12841_v59, 1 }
 0xbb8   : > { %v12847_v16 = vor.u32 %v12845_v40, %v12843_v14 }
 0xbba   : > { %21812 = vmatmul.mubr.bf16.vlgmr.msra.gmra.mrb[32].mxu1 %v12764_v47  ;;  %v23681_v47 = vld [vmem:[#allocation2 + $0x84] sm:$0xff]   ;;  %v12852_v5 = vsel %vm551_vm2, %v12847_v16, %v12851_v0 }
 0xbbb   : > { %21860 = vmatpush3.bf16.msra.mxu1 %v13420_v4  ;;  %21815 = vmatprep.mubr.bf16.mxu1 %v12772_v43  ;;  %v12836_v4 = vsel %vm551_vm2, %v12831_v54, %v12835_v2  ;;  %v12837_v43 = vshrl.u32 %v23678_v32, 16  ;;  %v12857_v31 = vshll.u32 %v23681_v47, 16  ;;  %v12861_v35 = vshrl.u32 %v23681_v47, 16  ;;  %v23690_v47 = vld [vmem:[#allocation2 + $0xcc] sm:$0xff]  }
 0xbbc   : > { %21909 = vmatprep.subr.bf16.mxu1 %v28834_v60  ;;  %v12913_v54 = vshll.u32 %v23688_v18, 16  ;;  %v12929_v16 = vshll.u32 %v23690_v47, 16 }
 0xbbd   : > { %v12839_v3 = vor.u32 %v12837_v43, %v12835_v2  ;;  %v12859_v6 = vrot.slane %v12857_v31, 1 }
 0xbbf   : > { %v12844_v53 = vsel %vm551_vm2, %v12839_v3, %v12843_v14  ;;  %v12863_v20 = vor.u32 %v12861_v35, %v12859_v6  ;;  %v12915_v14 = vrot.slane %v12913_v54, 1  ;;  %v23697_v54 = vld [vmem:[%s29592_s3 + $0x1a0] sm:$0xff]  }
 0xbc1   : > { %v12868_v37 = vsel %vm551_vm2, %v12863_v20, %v12867_v30 }
 0xbc2   : > { %21816 = vmatmul.mubr.bf16.gmra.mrb[36].mxu1 %v12780_v33  ;;  %v23683_v33 = vld [vmem:[#allocation2 + $0x94] sm:$0xff]  }
 0xbc3   : > { %21819 = vmatprep.mubr.bf16.mxu1 %v12788_v50  ;;  %v12853_v50 = vshrl.u32 %v23680_v62, 16  ;;  %v12873_v49 = vshll.u32 %v23683_v33, 16  ;;  %v12877_v57 = vshrl.u32 %v23683_v33, 16 }
 0xbc5   : > { %v12855_v27 = vor.u32 %v12853_v50, %v12851_v0  ;;  %v12875_v63 = vrot.slane %v12873_v49, 1  ;;  %v23691_v50 = vld [vmem:[#allocation2 + $0xd4] ss:$0 sps:$4 sm:$0x11]   ;;  %v12933_v49 = vshrl.u32 %v23690_v47, 16  ;;  %v23950_v47 = vld [vmem:[%s24214_s25 + $0x60] sm:$0xff]  }
 0xbc7   : > { %v12860_v1 = vsel %vm551_vm2, %v12855_v27, %v12859_v6  ;;  %v12879_v9 = vor.u32 %v12877_v57, %v12875_v63  ;;  %v12931_v6 = vrot.slane %v12929_v16, 1  ;;  %v23951_v16 = vld [vmem:[%s24214_s25 + $0x68] sm:$0xff]  }
 0xbc9   : > { %v12884_v46 = vsel %vm551_vm2, %v12879_v9, %v12883_v36  ;;  %v23944_v9 = vld [vmem:[%s24214_s25 + $0x30] sm:$0xff]  }
 0xbca   : > { %21820 = vmatmul.mubr.bf16.gmra.mrb[40].mxu1 %v12796_v61  ;;  %v23685_v61 = vld [vmem:[#allocation2 + $0xa4] sm:$0xff]  }
 0xbcb   : > { %21823 = vmatprep.mubr.bf16.mxu1 %v12804_v12  ;;  %v12869_v12 = vshrl.u32 %v23682_v13, 16  ;;  %v12889_v21 = vshll.u32 %v23685_v61, 16  ;;  %v12893_v58 = vshrl.u32 %v23685_v61, 16  ;;  %v12935_v61 = vor.u32 %v12933_v49, %v12931_v6  ;;  %v23955_v49 = vld [vmem:[%s24214_s25 + $0x88] sm:$0xff]  }
 0xbcd   : > { %v12871_v38 = vor.u32 %v12869_v12, %v12867_v30  ;;  %v12891_v52 = vrot.slane %v12889_v21, 1  ;;  %v23941_v30 = vld [vmem:[%s24214_s25 + $0x1c] sm:$0xf]  ;;  %v13298_v21 = vrot.slane %v23944_v9, 1 }
 0xbcf   : > { %v12876_v32 = vsel %vm551_vm2, %v12871_v38, %v12875_v63  ;;  %v12895_v26 = vor.u32 %v12893_v58, %v12891_v52  ;;  %v13294_v63 = vrot.slane %v23942_v22, 1 }
 0xbd1   : > { %v12900_v34 = vsel %vm551_vm2, %v12895_v26, %v12899_v15  ;;  %v23947_v26 = vld [vmem:[%s24214_s25 + $0x48] sm:$0xff]  }
 0xbd2   : > { %21824 = vmatmul.mubr.bf16.gmra.mrb[44].mxu1 %v12812_v10  ;;  %v23687_v10 = vld [vmem:[#allocation2 + $0xb4] sm:$0xff]  }
 0xbd3   : > { %21827 = vmatprep.mubr.bf16.mxu1 %v12820_v11  ;;  %v12885_v11 = vshrl.u32 %v23684_v39, 16  ;;  %v12905_v2 = vshll.u32 %v23687_v10, 16  ;;  %v12909_v42 = vshrl.u32 %v23687_v10, 16 }
 0xbd5   : > { %v12887_v41 = vor.u32 %v12885_v11, %v12883_v36  ;;  %v12907_v59 = vrot.slane %v12905_v2, 1  ;;  %v23946_v11 = vld [vmem:[%s24214_s25 + $0x40] sm:$0xff]   ;;  %v13304_v2 = vrot.slane %v23947_v26, 1 }
 0xbd6   : > { %v13302_v58 = vrot.slane %v23946_v11, 1  ;;  %v23961_v11 = vld [vmem:[%s24214_s25 + $0xb8] sm:$0xff]   ;;  %v23963_v26 = vld [vmem:[#allocation2 + $0x24] sm:$0xf] }
 0xbd7   : > { %v12892_v62 = vsel %vm551_vm2, %v12887_v41, %v12891_v52  ;;  %v12911_v40 = vor.u32 %v12909_v42, %v12907_v59  ;;  %v23945_v52 = vld [vmem:[%s24214_s25 + $0x38] sm:$0xff]  }
 0xbd8   : > { %v13300_v10 = vrot.slane %v23945_v52, 1  ;;  %v23949_v42 = vld [vmem:[%s24214_s25 + $0x58] sm:$0xff]  }
 0xbd9   : > { %v12916_v3 = vsel %vm551_vm2, %v12911_v40, %v12915_v14  ;;  %v23699_v40 = vld [vmem:[%s29592_s3 + $0x1b0] sm:$0xff]  }
 0xbda   : > { %21828 = vmatmul.mubr.bf16.gmra.mrb[48].mxu1 %v12828_v55  ;;  %v23689_v55 = vld [vmem:[#allocation2 + $0xc4] sm:$0xff]   ;;  %v13303_v41 = vsel %vm1430_vm4, %v13300_v10, %v13302_v58 }
 0xbdb   : > { %21831 = vmatprep.mubr.bf16.mxu1 %v12836_v4  ;;  %v12901_v4 = vshrl.u32 %v23686_v24, 16  ;;  %v12921_v0 = vshll.u32 %v23689_v55, 16  ;;  %v12925_v56 = vshrl.u32 %v23689_v55, 16  ;;  %v23943_v24 = vld [vmem:[%s24214_s25 + $0x28] sm:$0xff]  }
 0xbdc   : > { %v13296_v38 = vrot.slane %v23943_v24, 1 }
 0xbdd   : > { %v12903_v43 = vor.u32 %v12901_v4, %v12899_v15  ;;  %v12923_v31 = vrot.slane %v12921_v0, 1  ;;  %v23695_v15 = vld [vmem:[%s29592_s3 + $0x190] sm:$0xff]   ;;  %v23698_v4 = vld [vmem:[%s29592_s3 + $0x1a8] sm:$0xff]  }
 0xbdf   : > { %v12908_v13 = vsel %vm551_vm2, %v12903_v43, %v12907_v59  ;;  %v12927_v35 = vor.u32 %v12925_v56, %v12923_v31  ;;  %v13305_v59 = vsel %vm1430_vm4, %v13302_v58, %v13304_v2  ;;  %v13310_v43 = vrot.slane %v23950_v47, 1  ;;  %v28916_v56 = vld [vmem:[%s29593_s4 + $0x30] sm:$0x1f]  }
 0xbe0   : > { %v13332_v58 = vrot.slane %v23961_v11, 1 }
 0xbe1   : > { %v12932_v20 = vsel %vm551_vm2, %v12927_v35, %v12931_v6 }
 0xbe2   : > { %21832 = vmatmul.mubr.bf16.gmra.mrb[52].mxu1 %v12844_v53  ;;  %v12917_v53 = vshrl.u32 %v23688_v18, 16  ;;  %v13301_v18 = vsel %vm1430_vm4, %v13298_v21, %v13300_v10 }
 0xbe3   : > { %21835 = vmatprep.mubr.bf16.mxu1 %v12852_v5  ;;  %v13286_v5 = vld [vmem:[%s24214_s25 + $0x18] sm:$0xe] }
 0xbe4   : > { %v12919_v33 = vor.u32 %v12917_v53, %v12915_v14  ;;  %v18634_v39 = vcombine.low %v13286_v5, %v23941_v30  ;;  %v13308_v14 = vrot.slane %v23949_v42, 1  ;;  %v23952_v53 = vld [vmem:[%s24214_s25 + $0x70] sm:$0xff]   ;;  %v23954_v30 = vld [vmem:[%s24214_s25 + $0x80] sm:$0xff]  }
 0xbe5   : > { %v13314_v5 = vrot.slane %v23952_v53, 1  ;;  %v23967_v42 = vld [vmem:[#allocation2 + $0x20] sm:$0xf] }
 0xbe6   : > { %v12924_v27 = vsel %vm551_vm2, %v12919_v33, %v12923_v31  ;;  %v13312_v31 = vrot.slane %v23951_v16, 1  ;;  %v23968_v16 = vld [vmem:[#allocation2 + $0x2c] sm:$0xf] }
 0xbe8   : > { %v13313_v6 = vsel %vm1430_vm4, %v13310_v43, %v13312_v31  ;;  %v13315_v33 = vsel %vm1430_vm4, %v13312_v31, %v13314_v5  ;;  %v23969_v31 = vld [vmem:[#allocation2 + $0x30] sm:$0xf] }
 0xbe9   : > { %v18678_v53 = vcombine.low %v23968_v16, %v23969_v31 }
 0xbea   : > { %21836 = vmatmul.mubr.bf16.gmra.mrb[56].mxu1 %v12860_v1  ;;  %v12937_v1 = vshll.u32 %v23691_v50, 16  ;;  %v23953_v50 = vld [vmem:[%s24214_s25 + $0x78] sm:$0xff]  }
 0xbeb   : > { %21839 = vmatprep.mubr.bf16.mxu1 %v12868_v37  ;;  %v13293_v37 = vrot.slane %v18634_v39, 1  ;;  %v13316_v35 = vrot.slane %v23953_v50, 1  ;;  %v13318_v39 = vrot.slane %v23954_v30, 1  ;;  %v23971_v50 = vld [vmem:[#allocation2 + $0x38] sm:$0xf] }
 0xbec   : > { %v12939_v12 = vrot.slane %v12937_v1, 1  ;;  %v13320_v1 = vrot.slane %v23955_v49, 1  ;;  %v23972_v30 = vld [vmem:[%s24214_s25 + $0xd8] ss:$0 sps:$4 sm:$0x11]   ;;  %v13902_v49 = vshrl.u32 %v18678_v53, 16 }
 0xbed   : > { %v13295_v57 = vsel %vm1430_vm4, %v13293_v37, %v13294_v63  ;;  %v23956_v37 = vld [vmem:[%s24214_s25 + $0x90] sm:$0xff]  }
 0xbee   : > { %v12940_v36 = vsel %vm551_vm2, %v12935_v61, %v12939_v12  ;;  %v13322_v22 = vrot.slane %v23956_v37, 1  ;;  %v23957_v12 = vld [vmem:[%s24214_s25 + $0x98] sm:$0xff]  }
 0xbf0   : > { %v13323_v61 = vsel %vm1430_vm4, %v13320_v1, %v13322_v22 }
 0xbf2   : > { %21840 = vmatmul.mubr.bf16.gmra.mrb[60].mxu1 %v12876_v32  ;;  %v13297_v32 = vsel %vm1430_vm4, %v13294_v63, %v13296_v38  ;;  %v13321_v63 = vsel %vm1430_vm4, %v13318_v39, %v13320_v1  ;;  %v13905_v1 = vshll.u32 %v18678_v53, 16 }
 0xbf3   : > { %21843 = vmatprep.mubr.bf16.mxu1 %v12884_v46  ;;  %v13299_v46 = vsel %vm1430_vm4, %v13296_v38, %v13298_v21  ;;  %v23959_v21 = vld [vmem:[%s24214_s25 + $0xa8] sm:$0xff]  }
 0xbfa   : > { %21844 = vmatmul.mubr.bf16.gmra.mrb[64].mxu1 %v12892_v62  ;;  %v23948_v62 = vld [vmem:[%s24214_s25 + $0x50] sm:$0xff]  }
 0xbfb   : > { %21847 = vmatprep.mubr.bf16.mxu1 %v12900_v34  ;;  %v13306_v34 = vrot.slane %v23948_v62, 1 }
 0xbfd   : > { %v13307_v55 = vsel %vm1430_vm4, %v13304_v2, %v13306_v34  ;;  %v13309_v0 = vsel %vm1430_vm4, %v13306_v34, %v13308_v14  ;;  %v23964_v2 = vld [vmem:[#allocation2 + $0x28] sm:$0xf] }
 0xbfe   : > { %v18677_v62 = vcombine.low %v23963_v26, %v23964_v2  ;;  %v23965_v34 = vld [vmem:[%s24214_s25 + $0xc8] sm:$0xff]   ;;  %v14702_v26 = vsel %vm859_vm0, %v28916_v56, 0  ;;  %v28969_v2 = vld [vmem:[%s29592_s3 + $0x1c0] sm:$0xff]  }
 0xc00   : > { %v13893_v47 = vshrl.u32 %v18677_v62, 16 }
 0xc02   : > { %21848 = vmatmul.mubr.bf16.gmra.mrb[68].mxu1 %v12908_v13  ;;  %v13311_v13 = vsel %vm1430_vm4, %v13308_v14, %v13310_v43  ;;  %v13896_v43 = vshll.u32 %v18677_v62, 16 }
 0xc03   : > { %21851 = vmatprep.mubr.bf16.mxu1 %v12916_v3  ;;  %v23700_v3 = vld [vmem:[%s29592_s3 + $0x1b8] sm:$0xff]  }
 0xc0a   : > { %21852 = vmatmul.mubr.bf16.gmra.mrb[72].mxu1 %v12924_v27  ;;  %v13317_v27 = vsel %vm1430_vm4, %v13314_v5, %v13316_v35  ;;  %v13895_v5 = vrot.slane %v13893_v47, 3 }
 0xc0b   : > { %21855 = vmatprep.mubr.bf16.mxu1 %v12932_v20  ;;  %v13319_v20 = vsel %vm1430_vm4, %v13316_v35, %v13318_v39  ;;  %v13340_v39 = vrot.slane %v23972_v30, 1 }
 0xc12   : > { %21856 = vmatmul.mubr.bf16.gmra.mrb[76].mxu1 %v12940_v36  ;;  %v23958_v36 = vld [vmem:[%s24214_s25 + $0xa0] sm:$0xff]  }
 0xc13   : > { %21861 = vmatprep.mubr.msk.bf16.mxu1 %vm777_vm3, %v13295_v57  ;;  %v13324_v57 = vrot.slane %v23957_v12, 1  ;;  %v13326_v24 = vrot.slane %v23958_v36, 1  ;;  %v13907_v36 = vrot.slane %v13905_v1, 4  ;;  %v23984_v1 = vld [vmem:[#allocation2 + $0x68] sm:$0xf] }
 0xc15   : > { %v13325_v38 = vsel %vm1430_vm4, %v13322_v22, %v13324_v57  ;;  %v13327_v9 = vsel %vm1430_vm4, %v13324_v57, %v13326_v24  ;;  %v13904_v57 = vrot.slane %v13902_v49, 3  ;;  %v23983_v49 = vld [vmem:[#allocation2 + $0x64] sm:$0xf] }
 0xc17   : > { %v13908_v11 = vor.u32 %v13907_v36, %v13904_v57 }
 0xc1a   : > { %21862 = vmatmul.mubr.msk.bf16.vlgmr.msra.gmra.mrb[32].mxu1 %vm777_vm3, %v13297_v32  ;;  %v13328_v32 = vrot.slane %v23959_v21, 1 }
 0xc1b   : > { %21910 = vmatpush3.bf16.msra.mxu1 %v28834_v60  ;;  %21865 = vmatprep.mubr.msk.bf16.mxu1 %vm777_vm3, %v13299_v46  ;;  %v23696_v60 = vld [vmem:[%s29592_s3 + $0x198] sm:$0xff]   ;;  %v23960_v46 = vld [vmem:[%s24214_s25 + $0xb0] sm:$0xff]  }
 0xc1c   : > { %21911 = vmatprep.subr.bf16.mxu1 %v23694_v44  ;;  %v13329_v52 = vsel %vm1430_vm4, %v13326_v24, %v13328_v32  ;;  %v23973_v24 = vld [vmem:[#allocation2 + $0x3c] sm:$0xf] }
 0xc1f   : > { %21912 = vmatpush3.bf16.msra.mxu1 %v23694_v44  ;;  %v13330_v44 = vrot.slane %v23960_v46, 1 }
 0xc20   : > { %21913 = vmatprep.subr.bf16.mxu1 %v23695_v15 }
 0xc21   : > { %v13331_v10 = vsel %vm1430_vm4, %v13328_v32, %v13330_v44 }
 0xc22   : > { %21866 = vmatmul.mubr.msk.bf16.gmra.mrb[36].mxu1 %vm777_vm3, %v13301_v18 }
 0xc23   : > { %21869 = vmatprep.mubr.msk.bf16.mxu1 %vm777_vm3, %v13303_v41  ;;  %21914 = vmatpush3.bf16.msra.mxu1 %v23695_v15  ;;  %v23962_v15 = vld [vmem:[%s24214_s25 + $0xc0] sm:$0xff]   ;;  %v13333_v41 = vsel %vm1430_vm4, %v13330_v44, %v13332_v58 }
 0xc24   : > { %21915 = vmatprep.subr.bf16.mxu1 %v23696_v60  ;;  %v13334_v18 = vrot.slane %v23962_v15, 1  ;;  %v23975_v44 = vld [vmem:[#allocation2 + $0x44] sm:$0xf] }
 0xc27   : > { %21916 = vmatpush3.bf16.msra.mxu1 %v23696_v60  ;;  %v13335_v60 = vsel %vm1430_vm4, %v13332_v58, %v13334_v18 }
 0xc28   : > { %21917 = vmatprep.subr.bf16.mxu1 %v23697_v54 }
 0xc2a   : > { %21870 = vmatmul.mubr.msk.bf16.gmra.mrb[40].mxu1 %vm777_vm3, %v13305_v59  ;;  %v13695_v59 = vld [vmem:[#allocation2 + $0x1c] sm:$0x8] }
 0xc2b   : > { %21873 = vmatprep.mubr.msk.bf16.mxu1 %vm777_vm3, %v13307_v55  ;;  %21918 = vmatpush3.bf16.msra.mxu1 %v23697_v54  ;;  %v13336_v54 = vrot.slane %v23965_v34, 1  ;;  %v23966_v55 = vld [vmem:[%s24214_s25 + $0xd0] sm:$0xff]   ;;  %v18676_v14 = vcombine.low %v13695_v59, %v23967_v42  ;;  %v23977_v59 = vld [vmem:[#allocation2 + $0x4c] sm:$0xf] }
 0xc2c   : > { %21919 = vmatprep.subr.bf16.mxu1 %v23698_v4 }
 0xc2f   : > { %21920 = vmatpush3.bf16.msra.mxu1 %v23698_v4  ;;  %v13338_v4 = vrot.slane %v23966_v55, 1  ;;  %v23978_v55 = vld [vmem:[#allocation2 + $0x50] sm:$0xf] }
 0xc30   : > { %21921 = vmatprep.subr.bf16.mxu1 %v23699_v40 }
 0xc32   : > { %21874 = vmatmul.mubr.msk.bf16.gmra.mrb[44].mxu1 %vm777_vm3, %v13309_v0  ;;  %v13339_v0 = vsel %vm1430_vm4, %v13336_v54, %v13338_v4 }
 0xc33   : > { %21877 = vmatprep.mubr.msk.bf16.mxu1 %vm777_vm3, %v13311_v13  ;;  %21922 = vmatpush3.bf16.msra.mxu1 %v23699_v40  ;;  %v13337_v40 = vsel %vm1430_vm4, %v13334_v18, %v13336_v54  ;;  %v13885_v13 = vshrl.u32 %v18676_v14, 16 }
 0xc34   : > { %21923 = vmatprep.subr.bf16.mxu1 %v23700_v3 }
 0xc37   : > { %21924 = vmatpush3.bf16.msra.mxu1 %v23700_v3  ;;  %v13888_v3 = vshll.u32 %v18676_v14, 16 }
 0xc38   : > { %23172 = vmatprep.subr.msk.bf16.mxu1 %vm859_vm0, %v28916_v56 }
 0xc3a   : > { %21878 = vmatmul.mubr.msk.bf16.gmra.mrb[48].mxu1 %vm777_vm3, %v13313_v6  ;;  %v13898_v6 = vrot.slane %v13896_v43, 4  ;;  %v23979_v43 = vld [vmem:[#allocation2 + $0x54] sm:$0xf] }
 0xc3b   : > { %21881 = vmatprep.mubr.msk.bf16.mxu1 %vm777_vm3, %v13315_v33  ;;  %v23970_v33 = vld [vmem:[#allocation2 + $0x34] sm:$0xf] }
 0xc3c   : > { %v18679_v35 = vcombine.low %v23970_v33, %v23971_v50  ;;  %v13899_v37 = vor.u32 %v13898_v6, %v13895_v5  ;;  %v23981_v50 = vld [vmem:[#allocation2 + $0x5c] sm:$0xf] }
 0xc3e   : > { %v13911_v22 = vshrl.u32 %v18679_v35, 16  ;;  %v13909_v62 = vsel %vm7262_vm5, %v13899_v37, %v13908_v11 }
 0xc40   : > { %v13913_v32 = vrot.slane %v13911_v22, 3 }
 0xc42   : > { %21882 = vmatmul.mubr.msk.bf16.gmra.mrb[52].mxu1 %vm777_vm3, %v13317_v27  ;;  %v13887_v27 = vrot.slane %v13885_v13, 3 }
 0xc43   : > { %21885 = vmatprep.mubr.msk.bf16.mxu1 %vm777_vm3, %v13319_v20  ;;  %v13890_v20 = vrot.slane %v13888_v3, 4 }
 0xc45   : > { %v13891_v12 = vor.u32 %v13890_v20, %v13887_v27 }
 0xc47   : > { %v13900_v21 = vsel %vm7262_vm5, %v13891_v12, %v13899_v37  ;;  %v18685_v37 = vcombine.low %v23983_v49, %v23984_v1 }
 0xc49   : > { %v13965_v57 = vshrl.u32 %v18685_v37, 16  ;;  %v13968_v36 = vshll.u32 %v18685_v37, 16  ;;  %v23993_v37 = vld [vmem:[#allocation2 + $0x94] sm:$0xf] }
 0xc4a   : > { %21886 = vmatmul.mubr.msk.bf16.gmra.mrb[56].mxu1 %vm777_vm3, %v13321_v63  ;;  %v13914_v63 = vshll.u32 %v18679_v35, 16  ;;  %v23982_v35 = vld [vmem:[#allocation2 + $0x60] sm:$0xf] }
 0xc4b   : > { %21889 = vmatprep.mubr.msk.bf16.mxu1 %vm777_vm3, %v13323_v61  ;;  %v13341_v61 = vsel %vm1430_vm4, %v13338_v4, %v13340_v39  ;;  %v18682_v4 = vcombine.low %v23977_v59, %v23978_v55  ;;  %v18684_v30 = vcombine.low %v23981_v50, %v23982_v35 }
 0xc4c   : > { %v13916_v46 = vrot.slane %v13914_v63, 4 }
 0xc4d   : > { %v13938_v13 = vshrl.u32 %v18682_v4, 16  ;;  %v13941_v3 = vshll.u32 %v18682_v4, 16  ;;  %v13956_v63 = vshrl.u32 %v18684_v30, 16  ;;  %v23987_v4 = vld [vmem:[#allocation2 + $0x7c] sm:$0xf] }
 0xc4e   : > { %v13917_v18 = vor.u32 %v13916_v46, %v13913_v32  ;;  %v23985_v32 = vld [vmem:[#allocation2 + $0x6c] sm:$0xf] }
 0xc4f   : > { %v13940_v6 = vrot.slane %v13938_v13, 3  ;;  %v13943_v33 = vrot.slane %v13941_v3, 4 }
 0xc50   : > { %v13918_v42 = vsel %vm7262_vm5, %v13908_v11, %v13917_v18  ;;  %v13970_v11 = vrot.slane %v13968_v36, 4 }
 0xc51   : > { %v13944_v22 = vor.u32 %v13943_v33, %v13940_v6 }
 0xc52   : > { %21890 = vmatmul.mubr.msk.bf16.gmra.mrb[60].mxu1 %vm777_vm3, %v13325_v38  ;;  %v23974_v38 = vld [vmem:[#allocation2 + $0x40] sm:$0xf] }
 0xc53   : > { %21893 = vmatprep.mubr.msk.bf16.mxu1 %vm777_vm3, %v13327_v9  ;;  %v18680_v9 = vcombine.low %v23973_v24, %v23974_v38  ;;  %v28976_v24 = vld [vmem:[#allocation2 + $0x70] sm:$0xf] }
 0xc54   : > { %v18686_v46 = vcombine.low %v23985_v32, %v28976_v24 }
 0xc55   : > { %v13920_v58 = vshrl.u32 %v18680_v9, 16  ;;  %v13923_v15 = vshll.u32 %v18680_v9, 16  ;;  %v13958_v9 = vrot.slane %v13956_v63, 3 }
 0xc57   : > { %v13922_v34 = vrot.slane %v13920_v58, 3  ;;  %v13925_v54 = vrot.slane %v13923_v15, 4  ;;  %v23986_v58 = vld [vmem:[#allocation2 + $0x78] sm:$0xf] }
 0xc5a   : > { %21894 = vmatmul.mubr.msk.bf16.gmra.mrb[64].mxu1 %vm777_vm3, %v13329_v52  ;;  %v23976_v52 = vld [vmem:[#allocation2 + $0x48] sm:$0xf] }
 0xc5b   : > { %21897 = vmatprep.mubr.msk.bf16.mxu1 %vm777_vm3, %v13331_v10  ;;  %v18681_v10 = vcombine.low %v23975_v44, %v23976_v52  ;;  %v28980_v44 = vld [vmem:[#allocation2 + $0x74] sm:$0xf] }
 0xc5c   : > { %v18687_v15 = vcombine.low %v28980_v44, %v23986_v58 }
 0xc62   : > { %21898 = vmatmul.mubr.msk.bf16.gmra.mrb[68].mxu1 %vm777_vm3, %v13333_v41  ;;  %v13929_v41 = vshrl.u32 %v18681_v10, 16 }
 0xc63   : > { %21901 = vmatprep.mubr.msk.bf16.mxu1 %vm777_vm3, %v13335_v60  ;;  %v13932_v60 = vshll.u32 %v18681_v10, 16  ;;  %v13967_v10 = vrot.slane %v13965_v57, 3 }
 0xc64   : > { %v13931_v14 = vrot.slane %v13929_v41, 3  ;;  %v13974_v41 = vshrl.u32 %v18686_v46, 16 }
 0xc65   : > { %v13934_v47 = vrot.slane %v13932_v60, 4  ;;  %v13977_v60 = vshll.u32 %v18686_v46, 16 }
 0xc66   : > { %v13976_v59 = vrot.slane %v13974_v41, 3  ;;  %v23997_v41 = vld [vmem:[#allocation2 + $0xa4] sm:$0xf] }
 0xc67   : > { %v13935_v16 = vor.u32 %v13934_v47, %v13931_v14  ;;  %v13979_v55 = vrot.slane %v13977_v60, 4  ;;  %v23998_v60 = vld [vmem:[#allocation2 + $0xa8] sm:$0xf] }
 0xc69   : > { %v13945_v38 = vsel %vm7262_vm5, %v13935_v16, %v13944_v22  ;;  %v13980_v3 = vor.u32 %v13979_v55, %v13976_v59 }
 0xc6a   : > { %21902 = vmatmul.mubr.msk.bf16.gmra.mrb[72].mxu1 %vm777_vm3, %v13337_v40  ;;  %v23980_v40 = vld [vmem:[#allocation2 + $0x58] sm:$0xf] }
 0xc6b   : > { %21905 = vmatprep.mubr.msk.bf16.mxu1 %vm777_vm3, %v13339_v0  ;;  %v18683_v56 = vcombine.low %v23979_v43, %v23980_v40  ;;  %v13926_v0 = vor.u32 %v13925_v54, %v13922_v34  ;;  %v13986_v34 = vshll.u32 %v18687_v15, 16 }
 0xc6d   : > { %v13947_v31 = vshrl.u32 %v18683_v56, 16  ;;  %v13950_v53 = vshll.u32 %v18683_v56, 16  ;;  %v13927_v5 = vsel %vm7262_vm5, %v13917_v18, %v13926_v0  ;;  %v13936_v39 = vsel %vm7262_vm5, %v13926_v0, %v13935_v16  ;;  %v23989_v56 = vld [vmem:[#allocation2 + $0x84] sm:$0xf]  ;;  %v23990_v0 = vld [vmem:[#allocation2 + $0x88] sm:$0xf] }
 0xc6e   : > { %v13988_v40 = vrot.slane %v13986_v34, 4  ;;  %v18689_v13 = vcombine.low %v23989_v56, %v23990_v0 }
 0xc6f   : > { %v13949_v27 = vrot.slane %v13947_v31, 3  ;;  %v13952_v20 = vrot.slane %v13950_v53, 4 }
 0xc70   : > { %v14004_v6 = vshll.u32 %v18689_v13, 16 }
 0xc71   : > { %v13953_v12 = vor.u32 %v13952_v20, %v13949_v27 }
 0xc72   : > { %21906 = vmatmul.mubr.msk.bf16.gmra.mrb[76].mxu1 %vm777_vm3, %v13341_v61  ;;  %v13959_v61 = vshll.u32 %v18684_v30, 16  ;;  %v23991_v30 = vld [vmem:[#allocation2 + $0x8c] sm:$0xf]  ;;  %v14006_v1 = vrot.slane %v14004_v6, 4 }
 0xc73   : > { %21925 = vmatprep.mubr.bf16.mxu1 %v13900_v21  ;;  %v13954_v52 = vsel %vm7262_vm5, %v13944_v22, %v13953_v12  ;;  %v23994_v22 = vld [vmem:[#allocation2 + $0x98] sm:$0xf] }
 0xc74   : > { %v13961_v21 = vrot.slane %v13959_v61, 4  ;;  %v18691_v63 = vcombine.low %v23993_v37, %v23994_v22 }
 0xc76   : > { %v13962_v18 = vor.u32 %v13961_v21, %v13958_v9  ;;  %v14022_v9 = vshll.u32 %v18691_v63, 16 }
 0xc78   : > { %v13963_v54 = vsel %vm7262_vm5, %v13953_v12, %v13962_v18 }
 0xc7a   : > { %21926 = vmatmul.mubr.bf16.vlgmr.msra.gmra.mrb[32].mxu1 %v13909_v62  ;;  %v13983_v62 = vshrl.u32 %v18687_v15, 16 }
 0xc7b   : > { %21974 = vmatpush3.bf16.msra.mxu1 %v14702_v26  ;;  %21929 = vmatprep.mubr.bf16.mxu1 %v13918_v42  ;;  %v13971_v26 = vor.u32 %v13970_v11, %v13967_v10  ;;  %v23988_v42 = vld [vmem:[#allocation2 + $0x80] sm:$0xf] }
 0xc7c   : > { %22023 = vmatprep.subr.bf16.mxu1 %v28969_v2  ;;  %v18688_v14 = vcombine.low %v23987_v4, %v23988_v42  ;;  %v13985_v43 = vrot.slane %v13983_v62, 3  ;;  %v23996_v10 = vld [vmem:[#allocation2 + $0xa0] sm:$0xf] }
 0xc7d   : > { %v13972_v47 = vsel %vm7262_vm5, %v13962_v18, %v13971_v26  ;;  %v13981_v33 = vsel %vm7262_vm5, %v13971_v26, %v13980_v3  ;;  %v14024_v18 = vrot.slane %v14022_v9, 4  ;;  %v18693_v26 = vcombine.low %v23997_v41, %v23998_v60 }
 0xc7e   : > { %v13992_v16 = vshrl.u32 %v18688_v14, 16  ;;  %v13995_v31 = vshll.u32 %v18688_v14, 16  ;;  %v13989_v53 = vor.u32 %v13988_v40, %v13985_v43  ;;  %v23999_v43 = vld [vmem:[#allocation2 + $0xac] sm:$0xf]  ;;  %v24000_v40 = vld [vmem:[#allocation2 + $0xb0] sm:$0xf] }
 0xc7f   : > { %v14037_v55 = vshrl.u32 %v18693_v26, 16  ;;  %v14040_v4 = vshll.u32 %v18693_v26, 16  ;;  %v18694_v56 = vcombine.low %v23999_v43, %v24000_v40 }
 0xc80   : > { %v13994_v50 = vrot.slane %v13992_v16, 3  ;;  %v13997_v35 = vrot.slane %v13995_v31, 4  ;;  %v13990_v20 = vsel %vm7262_vm5, %v13980_v3, %v13989_v53  ;;  %v24001_v16 = vld [vmem:[#allocation2 + $0xb4] sm:$0xf]  ;;  %v24002_v31 = vld [vmem:[#allocation2 + $0xb8] sm:$0xf] }
 0xc81   : > { %v14042_v3 = vrot.slane %v14040_v4, 4  ;;  %v14046_v6 = vshrl.u32 %v18694_v56, 16 }
 0xc82   : > { %21930 = vmatmul.mubr.bf16.gmra.mrb[36].mxu1 %v13927_v5  ;;  %v14001_v5 = vshrl.u32 %v18689_v13, 16  ;;  %v13998_v61 = vor.u32 %v13997_v35, %v13994_v50  ;;  %v14039_v13 = vrot.slane %v14037_v55, 3 }
 0xc83   : > { %21933 = vmatprep.mubr.bf16.mxu1 %v13936_v39  ;;  %v23992_v39 = vld [vmem:[#allocation2 + $0x90] sm:$0xf] }
 0xc84   : > { %v18690_v27 = vcombine.low %v23991_v30, %v23992_v39  ;;  %v14003_v49 = vrot.slane %v14001_v5, 3  ;;  %v13999_v21 = vsel %vm7262_vm5, %v13989_v53, %v13998_v61  ;;  %v18695_v53 = vcombine.low %v24001_v16, %v24002_v31 }
 0xc85   : > { %v14043_v50 = vor.u32 %v14042_v3, %v14039_v13  ;;  %v24011_v13 = vld [vmem:[#allocation2 + $0xdc] sm:$0xf] }
 0xc86   : > { %v14010_v12 = vshrl.u32 %v18690_v27, 16  ;;  %v14013_v57 = vshll.u32 %v18690_v27, 16  ;;  %v14007_v36 = vor.u32 %v14006_v1, %v14003_v49  ;;  %v14055_v35 = vshrl.u32 %v18695_v53, 16  ;;  %v24003_v49 = vld [vmem:[#allocation2 + $0xbc] sm:$0xf] }
 0xc87   : > { %v14058_v30 = vshll.u32 %v18695_v53, 16  ;;  %v14048_v27 = vrot.slane %v14046_v6, 3  ;;  %v24004_v1 = vld [vmem:[#allocation2 + $0xc0] sm:$0xf]  ;;  %v18700_v3 = vcombine.low %v24011_v13, %v24011_v13 }
 0xc88   : > { %v14012_v32 = vrot.slane %v14010_v12, 3  ;;  %v14015_v46 = vrot.slane %v14013_v57, 4  ;;  %v14008_v58 = vsel %vm7262_vm5, %v13998_v61, %v14007_v36  ;;  %v18696_v37 = vcombine.low %v24003_v49, %v24004_v1  ;;  %v24005_v12 = vld [vmem:[#allocation2 + $0xc4] sm:$0xf]  ;;  %v24006_v57 = vld [vmem:[#allocation2 + $0xc8] sm:$0xf] }
 0xc89   : > { %v14060_v61 = vrot.slane %v14058_v30, 4  ;;  %v14100_v6 = vshrl.u32 %v18700_v3, 16  ;;  %v23727_v49 = vld [vmem:[%s24214_s25 + $0x24] sm:$0xff]  }
 0xc8a   : > { %21934 = vmatmul.mubr.bf16.gmra.mrb[40].mxu1 %v13945_v38  ;;  %v14019_v38 = vshrl.u32 %v18691_v63, 16  ;;  %v14016_v62 = vor.u32 %v14015_v46, %v14012_v32  ;;  %v14057_v63 = vrot.slane %v14055_v35, 3  ;;  %v14064_v9 = vshrl.u32 %v18696_v37, 16  ;;  %v23786_v13 = vld [vmem:[%s29592_s3 + $0x200] sm:$0xff]  }
 0xc8b   : > { %21937 = vmatprep.mubr.bf16.mxu1 %v13954_v52  ;;  %v23995_v52 = vld [vmem:[#allocation2 + $0x9c] sm:$0xf]  ;;  %v14102_v30 = vrot.slane %v14100_v6, 3 }
 0xc8c   : > { %v18692_v11 = vcombine.low %v23995_v52, %v23996_v10  ;;  %v14021_v15 = vrot.slane %v14019_v38, 3  ;;  %v14017_v42 = vsel %vm7262_vm5, %v14007_v36, %v14016_v62  ;;  %v18697_v36 = vcombine.low %v24005_v12, %v24006_v57  ;;  %v23731_v12 = vld [vmem:[%s24214_s25 + $0x3c] sm:$0xff]   ;;  %v23733_v57 = vld [vmem:[%s24214_s25 + $0x44] sm:$0xff]  }
 0xc8d   : > { %v14061_v32 = vor.u32 %v14060_v61, %v14057_v63  ;;  %v23732_v63 = vld [vmem:[%s29592_s3 + $0x1c8] sm:$0xff]   ;;  %v23736_v61 = vld [vmem:[%s29592_s3 + $0x1d0] sm:$0xff]  }
 0xc8e   : > { %v14028_v34 = vshrl.u32 %v18692_v11, 16  ;;  %v14025_v59 = vor.u32 %v14024_v18, %v14021_v15  ;;  %v14073_v46 = vshrl.u32 %v18697_v36, 16  ;;  %v14076_v52 = vshll.u32 %v18697_v36, 16  ;;  %v24007_v15 = vld [vmem:[#allocation2 + $0xcc] sm:$0xf]  ;;  %v23740_v36 = vld [vmem:[%s29592_s3 + $0x1d8] sm:$0xff]  }
 0xc8f   : > { %v24008_v18 = vld [vmem:[#allocation2 + $0xd0] sm:$0xf] }
 0xc90   : > { %v14030_v14 = vrot.slane %v14028_v34, 3  ;;  %v14026_v0 = vsel %vm7262_vm5, %v14016_v62, %v14025_v59  ;;  %v18698_v41 = vcombine.low %v24007_v15, %v24008_v18  ;;  %v14075_v26 = vrot.slane %v14073_v46, 3  ;;  %v24009_v34 = vld [vmem:[#allocation2 + $0xd4] sm:$0xf]  ;;  %v23737_v46 = vld [vmem:[%s24214_s25 + $0x5c] sm:$0xff]  }
 0xc91   : > { %v14078_v62 = vrot.slane %v14076_v52, 4  ;;  %v23738_v52 = vld [vmem:[%s24214_s25 + $0x64] sm:$0xff]   ;;  %v23741_v15 = vld [vmem:[%s24214_s25 + $0x74] sm:$0xff]   ;;  %v23742_v18 = vld [vmem:[%s24214_s25 + $0x7c] sm:$0xff]  }
 0xc92   : > { %21938 = vmatmul.mubr.bf16.gmra.mrb[44].mxu1 %v13963_v54  ;;  %v14031_v54 = vshll.u32 %v18692_v11, 16  ;;  %v14066_v11 = vrot.slane %v14064_v9, 3  ;;  %v14082_v4 = vshrl.u32 %v18698_v41, 16  ;;  %v23735_v9 = vld [vmem:[%s24214_s25 + $0x54] sm:$0xff]  }
 0xc93   : > { %21941 = vmatprep.mubr.bf16.mxu1 %v13972_v47 }
 0xc94   : > { %v14033_v47 = vrot.slane %v14031_v54, 4  ;;  %v24010_v54 = vld [vmem:[#allocation2 + $0xd8] sm:$0xf] }
 0xc96   : > { %v14034_v5 = vor.u32 %v14033_v47, %v14030_v14  ;;  %v14079_v14 = vor.u32 %v14078_v62, %v14075_v26  ;;  %v23746_v26 = vld [vmem:[%s24214_s25 + $0x94] sm:$0xff]   ;;  %v23747_v62 = vld [vmem:[%s24214_s25 + $0x9c] sm:$0xff]  }
 0xc98   : > { %v14035_v39 = vsel %vm7262_vm5, %v14025_v59, %v14034_v5  ;;  %v14044_v22 = vsel %vm7262_vm5, %v14034_v5, %v14043_v50  ;;  %v18699_v59 = vcombine.low %v24009_v34, %v24010_v54  ;;  %v23749_v34 = vld [vmem:[%s24214_s25 + $0xa4] sm:$0xff]   ;;  %v23750_v54 = vld [vmem:[%s24214_s25 + $0xac] sm:$0xff]  }
 0xc9a   : > { %21942 = vmatmul.mubr.bf16.gmra.mrb[48].mxu1 %v13981_v33  ;;  %v14049_v33 = vshll.u32 %v18694_v56, 16  ;;  %v14091_v47 = vshrl.u32 %v18699_v59, 16  ;;  %v14094_v43 = vshll.u32 %v18699_v59, 16  ;;  %v14084_v56 = vrot.slane %v14082_v4, 3  ;;  %v23751_v59 = vld [vmem:[%s24214_s25 + $0xb4] sm:$0xff]   ;;  %v23754_v4 = vld [vmem:[%s24214_s25 + $0xc4] sm:$0xff]  }
 0xc9b   : > { %21945 = vmatprep.mubr.bf16.mxu1 %v13990_v20 }
 0xc9c   : > { %v14051_v20 = vrot.slane %v14049_v33, 4  ;;  %v14093_v31 = vrot.slane %v14091_v47, 3  ;;  %v14096_v53 = vrot.slane %v14094_v43, 4  ;;  %v14103_v33 = vshll.u32 %v18700_v3, 16  ;;  %v23758_v47 = vld [vmem:[%s24214_s25 + $0xdc] sm:$0xff]   ;;  %v30237_v43 = vld [vmem:[#allocation66_spill] sm:$0xff] }
 0xc9d   : > { %v30240_v3 = vld [vmem:[#allocation68_spill] sm:$0xff] }
 0xc9e   : > { %v14052_v38 = vor.u32 %v14051_v20, %v14048_v27 }
 0xca0   : > { %v14053_v10 = vsel %vm7262_vm5, %v14043_v50, %v14052_v38  ;;  %v14062_v60 = vsel %vm7262_vm5, %v14052_v38, %v14061_v32  ;;  %v14097_v50 = vor.u32 %v14096_v53, %v14093_v31  ;;  %v23734_v38 = vld [vmem:[%s24214_s25 + $0x4c] sm:$0xff]  }
 0xca1   : > { %v30243_v53 = vld [vmem:[#allocation74_spill] sm:$0xff] }
 0xca2   : > { %21946 = vmatmul.mubr.bf16.gmra.mrb[52].mxu1 %v13999_v21  ;;  %v14067_v21 = vshll.u32 %v18696_v37, 16  ;;  %v23729_v37 = vld [vmem:[%s24214_s25 + $0x2c] sm:$0xff]  }
 0xca3   : > { %21949 = vmatprep.mubr.bf16.mxu1 %v14008_v58 }
 0xca4   : > { %v14069_v58 = vrot.slane %v14067_v21, 4  ;;  %v23748_v21 = vld [vmem:[%s29592_s3 + $0x1e8] sm:$0xff]  }
 0xca6   : > { %v14070_v55 = vor.u32 %v14069_v58, %v14066_v11  ;;  %v23760_v11 = vld [vmem:[%s29593_s4 + $0x38] sm:$0x1f]   ;;  %v23739_v58 = vld [vmem:[%s24214_s25 + $0x6c] sm:$0xff]  }
 0xca8   : > { %v14071_v40 = vsel %vm7262_vm5, %v14061_v32, %v14070_v55  ;;  %v14080_v16 = vsel %vm7262_vm5, %v14070_v55, %v14079_v14  ;;  %v23752_v32 = vld [vmem:[%s29592_s3 + $0x1f0] sm:$0xff]   ;;  %v23753_v55 = vld [vmem:[%s24214_s25 + $0xbc] sm:$0xff]  }
 0xcaa   : > { %21950 = vmatmul.mubr.bf16.gmra.mrb[56].mxu1 %v14017_v42  ;;  %v14085_v42 = vshll.u32 %v18698_v41, 16  ;;  %v23743_v41 = vld [vmem:[%s24214_s25 + $0x84] sm:$0xff]  }
 0xcab   : > { %21953 = vmatprep.mubr.bf16.mxu1 %v14026_v0 }
 0xcac   : > { %v14087_v0 = vrot.slane %v14085_v42, 4  ;;  %v23755_v42 = vld [vmem:[%s24214_s25 + $0xcc] sm:$0xff]  }
 0xcae   : > { %v14088_v5 = vor.u32 %v14087_v0, %v14084_v56  ;;  %v15812_v0 = vsel %vm859_vm0, %v23760_v11, 0 }
 0xcb0   : > { %v14089_v35 = vsel %vm7262_vm5, %v14079_v14, %v14088_v5  ;;  %v14098_v27 = vsel %vm7262_vm5, %v14088_v5, %v14097_v50  ;;  %v23757_v14 = vld [vmem:[%s24214_s25 + $0xd4] sm:$0xff]   ;;  %v30244_v5 = vld [vmem:[#allocation76_spill] sm:$0xff] }
 0xcb1   : > { %v30245_v6 = vcombine.low %v30243_v53, %v30244_v5  ;;  %v29160_v53 = vld [vmem:[%s24214_s25 + $0x3c] sm:$0xff]  }
 0xcb2   : > { %21954 = vmatmul.mubr.bf16.gmra.mrb[60].mxu1 %v14035_v39  ;;  %v14105_v39 = vrot.slane %v14103_v33, 4  ;;  %v30246_v33 = vld [vmem:[#allocation78_spill] sm:$0xff] }
 0xcb3   : > { %21957 = vmatprep.mubr.bf16.mxu1 %v14044_v22  ;;  %v23730_v22 = vld [vmem:[%s24214_s25 + $0x34] sm:$0xff]  }
 0xcb4   : > { %v14106_v20 = vor.u32 %v14105_v39, %v14102_v30  ;;  %v30249_v30 = vld [vmem:[#allocation82_spill] sm:$0xff]  ;;  %v30250_v39 = vld [vmem:[#allocation84_spill] sm:$0xff] }
 0xcb6   : > { %v14107_v1 = vsel %vm7262_vm5, %v14097_v50, %v14106_v20  ;;  %v30247_v50 = vld [vmem:[#allocation80_spill] sm:$0xff]  ;;  %v30252_v20 = vld [vmem:[#allocation21_spill] sm:$0xff] }
 0xcba   : > { %21958 = vmatmul.mubr.bf16.gmra.mrb[64].mxu1 %v14053_v10  ;;  %v23756_v10 = vld [vmem:[%s29592_s3 + $0x1f8] sm:$0xff]  }
 0xcbb   : > { %21961 = vmatprep.mubr.bf16.mxu1 %v14062_v60  ;;  %v23745_v60 = vld [vmem:[%s24214_s25 + $0x8c] sm:$0xff]  }
 0xcc2   : > { %21962 = vmatmul.mubr.bf16.gmra.mrb[68].mxu1 %v14071_v40  ;;  %v30238_v40 = vld [vmem:[#allocation67_spill] sm:$0xff] }
 0xcc3   : > { %21965 = vmatprep.mubr.bf16.mxu1 %v14080_v16  ;;  %v30239_v56 = vcombine.low %v30237_v43, %v30238_v40  ;;  %v30241_v16 = vld [vmem:[#allocation70_spill] sm:$0xff]  ;;  %v30286_v43 = vcombine.low %v28111_v51, %v28115_v45  ;;  %v30289_v45 = vld [vmem:[#allocation117_spill] sm:$0xff] }
 0xcc4   : > { %v30242_v31 = vcombine.low %v30240_v3, %v30241_v16  ;;  %v30288_v3 = vcombine.low %v28124_v48, %v28130_v7  ;;  %v29154_v16 = vld [vmem:[%s24214_s25 + $0x34] sm:$0xff]   ;;  %v30290_v51 = vld [vmem:[#allocation118_spill] sm:$0xff]  ;;  %v15562_v48 = vshll.u32 %v29160_v53, 16 }
 0xcc5   : > { %v15554_v5 = vshll.u32 %v29154_v16, 16  ;;  %v15558_v7 = vshrl.u32 %v29154_v16, 16 }
 0xcca   : > { %21966 = vmatmul.mubr.bf16.gmra.mrb[72].mxu1 %v14089_v35  ;;  %v30248_v35 = vcombine.low %v30246_v33, %v30247_v50  ;;  %v30292_v50 = vld [vmem:[#allocation119_spill] sm:$0xff] }
 0xccb   : > { %21969 = vmatprep.mubr.bf16.mxu1 %v14098_v27  ;;  %v30251_v27 = vcombine.low %v30249_v30, %v30250_v39  ;;  %v15556_v39 = vrot.slane %v15554_v5, 1 }
 0xcd2   : > { %21970 = vmatmul.mubr.bf16.gmra.mrb[76].mxu1 %v14107_v1 }
 0xcd3   : > { %21975 = vmatprep.mubr.msk.bf16.mxu1 %vm777_vm3, %v23727_v49  ;;  %v30253_v49 = vld [vmem:[#allocation86_spill] sm:$0xff] }
 0xcd4   : > { %v30254_v1 = vcombine.low %v30252_v20, %v30253_v49  ;;  %v15560_v49 = vor.u32 %v15558_v7, %v15556_v39 }
 0xcda   : > { %21976 = vmatmul.mubr.msk.bf16.vlgmr.msra.gmra.mrb[32].mxu1 %vm777_vm3, %v23729_v37  ;;  %v30255_v37 = vld [vmem:[#allocation17_spill] sm:$0xff] }
 0xcdb   : > { %22024 = vmatpush3.bf16.msra.mxu1 %v28969_v2  ;;  %21979 = vmatprep.mubr.msk.bf16.mxu1 %vm777_vm3, %v23730_v22  ;;  %v23744_v2 = vld [vmem:[%s29592_s3 + $0x1e0] sm:$0xff]  }
 0xcdc   : > { %22025 = vmatprep.subr.bf16.mxu1 %v23732_v63  ;;  %v30256_v22 = vld [vmem:[#allocation88_spill] sm:$0xff] }
 0xcdf   : > { %22026 = vmatpush3.bf16.msra.mxu1 %v23732_v63  ;;  %v30257_v63 = vcombine.low %v30255_v37, %v30256_v22  ;;  %v29175_v37 = vld [vmem:[%s24214_s25 + $0x4c] sm:$0xff]  }
 0xce0   : > { %22027 = vmatprep.subr.bf16.mxu1 %v23736_v61 }
 0xce2   : > { %21980 = vmatmul.mubr.msk.bf16.gmra.mrb[36].mxu1 %vm777_vm3, %v23731_v12  ;;  %v30259_v12 = vld [vmem:[#allocation92_spill] sm:$0xff] }
 0xce3   : > { %21983 = vmatprep.mubr.msk.bf16.mxu1 %vm777_vm3, %v23733_v57  ;;  %22028 = vmatpush3.bf16.msra.mxu1 %v23736_v61  ;;  %v30258_v61 = vld [vmem:[#allocation43_spill] sm:$0xff] }
 0xce4   : > { %22029 = vmatprep.subr.bf16.mxu1 %v23740_v36  ;;  %v30260_v57 = vcombine.low %v30258_v61, %v30259_v12  ;;  %v15566_v61 = vshrl.u32 %v29160_v53, 16 }
 0xce7   : > { %22030 = vmatpush3.bf16.msra.mxu1 %v23740_v36  ;;  %v30261_v36 = vld [vmem:[#allocation24_spill] sm:$0xff] }
 0xce8   : > { %22031 = vmatprep.subr.bf16.mxu1 %v23744_v2 }
 0xcea   : > { %21984 = vmatmul.mubr.msk.bf16.gmra.mrb[40].mxu1 %vm777_vm3, %v23734_v38 }
 0xceb   : > { %21987 = vmatprep.mubr.msk.bf16.mxu1 %vm777_vm3, %v23735_v9  ;;  %22032 = vmatpush3.bf16.msra.mxu1 %v23744_v2  ;;  %v30262_v2 = vld [vmem:[#allocation96_spill] sm:$0xff]  ;;  %v18786_v9 = vcombine.low %v28976_v24, %v28980_v44 }
 0xcec   : > { %22033 = vmatprep.subr.bf16.mxu1 %v23748_v21  ;;  %v30263_v38 = vcombine.low %v30261_v36, %v30262_v2  ;;  %v30276_v24 = vld [vmem:[#allocation112_spill] sm:$0xff]  ;;  %v15578_v2 = vshll.u32 %v29175_v37, 16 }
 0xced   : > { %v30277_v44 = vcombine.low %v28085_v19, %v30276_v24  ;;  %v15363_v19 = vld [vmem:[%s24214_s25 + $0x24] sm:$0xf] }
 0xcee   : > { %v29208_v24 = vld [vmem:[%s24214_s25 + $0x64] sm:$0xff]  }
 0xcef   : > { %22034 = vmatpush3.bf16.msra.mxu1 %v23748_v21  ;;  %v30264_v21 = vld [vmem:[#allocation19_spill] sm:$0xff] }
 0xcf0   : > { %22035 = vmatprep.subr.bf16.mxu1 %v23752_v32 }
 0xcf2   : > { %21988 = vmatmul.mubr.msk.bf16.gmra.mrb[44].mxu1 %vm777_vm3, %v23737_v46 }
 0xcf3   : > { %21991 = vmatprep.mubr.msk.bf16.mxu1 %vm777_vm3, %v23738_v52  ;;  %22036 = vmatpush3.bf16.msra.mxu1 %v23752_v32  ;;  %v30265_v32 = vld [vmem:[#allocation100_spill] sm:$0xff]  ;;  %v30267_v52 = vld [vmem:[#allocation106_spill] sm:$0xff] }
 0xcf4   : > { %22037 = vmatprep.subr.bf16.mxu1 %v23756_v10  ;;  %v30266_v46 = vcombine.low %v30264_v21, %v30265_v32 }
 0xcf7   : > { %22038 = vmatpush3.bf16.msra.mxu1 %v23756_v10  ;;  %v30268_v10 = vld [vmem:[#allocation107_spill] sm:$0xff] }
 0xcf8   : > { %23173 = vmatprep.subr.msk.bf16.mxu1 %vm859_vm0, %v23760_v11  ;;  %v30269_v11 = vcombine.low %v30267_v52, %v30268_v10  ;;  %v29192_v52 = vld [vmem:[%s24214_s25 + $0x5c] sm:$0xff]   ;;  %v23794_v10 = vld [vmem:[%s29592_s3 + $0x210] sm:$0xff]  }
 0xcfa   : > { %21992 = vmatmul.mubr.msk.bf16.gmra.mrb[48].mxu1 %vm777_vm3, %v23739_v58  ;;  %v30270_v58 = vld [vmem:[#allocation108_spill] sm:$0xff] }
 0xcfb   : > { %21995 = vmatprep.mubr.msk.bf16.mxu1 %vm777_vm3, %v23741_v15  ;;  %v30271_v15 = vld [vmem:[#allocation109_spill] sm:$0xff] }
 0xd02   : > { %21996 = vmatmul.mubr.msk.bf16.gmra.mrb[52].mxu1 %vm777_vm3, %v23742_v18  ;;  %v30272_v18 = vcombine.low %v30270_v58, %v30271_v15 }
 0xd03   : > { %21999 = vmatprep.mubr.msk.bf16.mxu1 %vm777_vm3, %v23743_v41  ;;  %v30273_v41 = vld [vmem:[#allocation110_spill] sm:$0xff] }
 0xd0a   : > { %22000 = vmatmul.mubr.msk.bf16.gmra.mrb[56].mxu1 %vm777_vm3, %v23745_v60  ;;  %v30274_v60 = vld [vmem:[#allocation111_spill] sm:$0xff] }
 0xd0b   : > { %22003 = vmatprep.mubr.msk.bf16.mxu1 %vm777_vm3, %v23746_v26  ;;  %v30275_v26 = vcombine.low %v30273_v41, %v30274_v60  ;;  %v15594_v41 = vshll.u32 %v29192_v52, 16  ;;  %v23798_v60 = vld [vmem:[%s29592_s3 + $0x218] sm:$0xff]  }
 0xd12   : > { %22004 = vmatmul.mubr.msk.bf16.gmra.mrb[60].mxu1 %vm777_vm3, %v23747_v62  ;;  %v30278_v62 = vld [vmem:[#allocation113_spill] sm:$0xff] }
 0xd13   : > { %22007 = vmatprep.mubr.msk.bf16.mxu1 %vm777_vm3, %v23749_v34  ;;  %v30279_v34 = vcombine.low %v28092_v17, %v30278_v62 }
 0xd1a   : > { %22008 = vmatmul.mubr.msk.bf16.gmra.mrb[64].mxu1 %vm777_vm3, %v23750_v54  ;;  %v30280_v54 = vld [vmem:[#allocation114_spill] sm:$0xff] }
 0xd1b   : > { %22011 = vmatprep.mubr.msk.bf16.mxu1 %vm777_vm3, %v23751_v59  ;;  %v30281_v59 = vcombine.low %v28096_v8, %v30280_v54  ;;  %v30287_v8 = vcombine.low %v28117_v25, %v28119_v28  ;;  %v29212_v54 = vld [vmem:[%s24214_s25 + $0x6c] sm:$0xff]  }
 0xd22   : > { %22012 = vmatmul.mubr.msk.bf16.gmra.mrb[68].mxu1 %vm777_vm3, %v23753_v55  ;;  %v30282_v55 = vld [vmem:[#allocation115_spill] sm:$0xff] }
 0xd23   : > { %22015 = vmatprep.mubr.msk.bf16.mxu1 %vm777_vm3, %v23754_v4  ;;  %v30283_v4 = vcombine.low %v28101_v23, %v30282_v55  ;;  %v29147_v23 = vld [vmem:[%s24214_s25 + $0x2c] sm:$0xff]   ;;  %v15602_v55 = vshll.u32 %v29208_v24, 16 }
 0xd2a   : > { %22016 = vmatmul.mubr.msk.bf16.gmra.mrb[72].mxu1 %vm777_vm3, %v23755_v42  ;;  %v30284_v42 = vld [vmem:[#allocation116_spill] sm:$0xff] }
 0xd2b   : > { %22019 = vmatprep.mubr.msk.bf16.mxu1 %vm777_vm3, %v23757_v14  ;;  %v30285_v14 = vcombine.low %v28107_v29, %v30284_v42  ;;  %v15598_v42 = vshrl.u32 %v29192_v52, 16 }
 0xd32   : > { %22020 = vmatmul.mubr.msk.bf16.gmra.mrb[76].mxu1 %vm777_vm3, %v23758_v47  ;;  %v29137_v47 = vld [vmem:[%s24214_s25 + $0x28] sm:$0xf] }
 0xd33   : > { %22039 = vmatprep.mubr.bf16.mxu1 %v30239_v56  ;;  %v18810_v17 = vcombine.low %v15363_v19, %v29137_v47  ;;  %v15606_v19 = vshrl.u32 %v29208_v24, 16 }
 0xd35   : > { %v15541_v40 = vshll.u32 %v18810_v17, 16  ;;  %v15539_v56 = vshrl.u32 %v18810_v17, 16  ;;  %v15610_v17 = vshll.u32 %v29212_v54, 16 }
 0xd37   : > { %v15543_v29 = vrot.slane %v15541_v40, 1  ;;  %v29228_v40 = vld [vmem:[%s24214_s25 + $0x74] sm:$0xff]  }
 0xd38   : > { %v15622_v5 = vshrl.u32 %v29228_v40, 16 }
 0xd39   : > { %v15544_v28 = vor.u32 %v15543_v29, %v15539_v56 }
 0xd3a   : > { %22040 = vmatmul.mubr.bf16.vlgmr.msra.gmra.mrb[32].mxu1 %v30242_v31  ;;  %v30291_v31 = vcombine.low %v30289_v45, %v30290_v51  ;;  %v23810_v45 = vld [vmem:[%s29592_s3 + $0x230] sm:$0xff]   ;;  %v15618_v51 = vshll.u32 %v29228_v40, 16 }
 0xd3b   : > { %22088 = vmatpush3.bf16.msra.mxu1 %v15812_v0  ;;  %22043 = vmatprep.mubr.bf16.mxu1 %v30245_v6  ;;  %v15546_v0 = vshll.u32 %v29147_v23, 16  ;;  %v15550_v6 = vshrl.u32 %v29147_v23, 16 }
 0xd3c   : > { %22137 = vmatprep.subr.bf16.mxu1 %v23786_v13  ;;  %v15620_v7 = vrot.slane %v15618_v51, 1 }
 0xd3d   : > { %v15548_v25 = vrot.slane %v15546_v0, 1  ;;  %v15612_v0 = vrot.slane %v15610_v17, 1  ;;  %v29297_v17 = vld [vmem:[%s24214_s25 + $0xb4] sm:$0xff]  }
 0xd3f   : > { %v15549_v33 = vsel %vm551_vm2, %v15544_v28, %v15548_v25  ;;  %v15552_v20 = vor.u32 %v15550_v6, %v15548_v25  ;;  %v15614_v28 = vshrl.u32 %v29212_v54, 16 }
 0xd42   : > { %22044 = vmatmul.mubr.bf16.gmra.mrb[36].mxu1 %v30248_v35  ;;  %v30293_v35 = vld [vmem:[#allocation120_spill] sm:$0xff] }
 0xd43   : > { %22047 = vmatprep.mubr.bf16.mxu1 %v30251_v27  ;;  %v30294_v30 = vcombine.low %v30292_v50, %v30293_v35  ;;  %v29171_v27 = vld [vmem:[%s24214_s25 + $0x44] sm:$0xff]   ;;  %v15616_v50 = vor.u32 %v15614_v28, %v15612_v0  ;;  %v15624_v35 = vor.u32 %v15622_v5, %v15620_v7  ;;  %v15686_v28 = vshrl.u32 %v29297_v17, 16 }
 0xd44   : > { %v15570_v22 = vshll.u32 %v29171_v27, 16  ;;  %v15574_v36 = vshrl.u32 %v29171_v27, 16 }
 0xd4a   : > { %22048 = vmatmul.mubr.bf16.gmra.mrb[40].mxu1 %v30254_v1  ;;  %v15564_v1 = vrot.slane %v15562_v48, 1  ;;  %v29248_v48 = vld [vmem:[%s24214_s25 + $0x84] sm:$0xff]  }
 0xd4b   : > { %22051 = vmatprep.mubr.bf16.mxu1 %v30257_v63  ;;  %v15557_v63 = vsel %vm551_vm2, %v15552_v20, %v15556_v39  ;;  %v29252_v39 = vld [vmem:[%s24214_s25 + $0x8c] sm:$0xff]   ;;  %v29257_v20 = vld [vmem:[%s29593_s4 + $0x40] sm:$0x1f]  }
 0xd4c   : > { %v15565_v12 = vsel %vm551_vm2, %v15560_v49, %v15564_v1  ;;  %v15568_v21 = vor.u32 %v15566_v61, %v15564_v1  ;;  %v15634_v49 = vshll.u32 %v29248_v48, 16  ;;  %v15621_v1 = vsel %vm551_vm2, %v15616_v50, %v15620_v7 }
 0xd4d   : > { %v15638_v61 = vshrl.u32 %v29248_v48, 16 }
 0xd52   : > { %22052 = vmatmul.mubr.bf16.gmra.mrb[44].mxu1 %v30260_v57  ;;  %v23790_v57 = vld [vmem:[%s29592_s3 + $0x208] sm:$0xff]  }
 0xd53   : > { %22055 = vmatprep.mubr.bf16.mxu1 %v30263_v38  ;;  %v15572_v38 = vrot.slane %v15570_v22, 1 }
 0xd55   : > { %v15576_v32 = vor.u32 %v15574_v36, %v15572_v38  ;;  %v15573_v58 = vsel %vm551_vm2, %v15568_v21, %v15572_v38  ;;  %v29269_v36 = vld [vmem:[%s24214_s25 + $0x94] sm:$0xff]  }
 0xd5a   : > { %22056 = vmatmul.mubr.bf16.gmra.mrb[48].mxu1 %v30266_v46  ;;  %v15580_v46 = vrot.slane %v15578_v2, 1 }
 0xd5b   : > { %22059 = vmatprep.mubr.bf16.mxu1 %v18786_v9  ;;  %v29188_v9 = vld [vmem:[%s24214_s25 + $0x54] sm:$0xff]  }
 0xd5c   : > { %v15581_v15 = vsel %vm551_vm2, %v15576_v32, %v15580_v46  ;;  %v29273_v32 = vld [vmem:[%s24214_s25 + $0x9c] sm:$0xff]  }
 0xd62   : > { %22060 = vmatmul.mubr.bf16.gmra.mrb[52].mxu1 %v30269_v11  ;;  %v15586_v11 = vshll.u32 %v29188_v9, 16 }
 0xd63   : > { %22063 = vmatprep.mubr.bf16.mxu1 %v30272_v18  ;;  %v15590_v18 = vshrl.u32 %v29188_v9, 16 }
 0xd6a   : > { %22064 = vmatmul.mubr.bf16.gmra.mrb[56].mxu1 %v30275_v26  ;;  %v15588_v26 = vrot.slane %v15586_v11, 1  ;;  %v15646_v11 = vshrl.u32 %v29252_v39, 16 }
 0xd6b   : > { %22067 = vmatprep.mubr.bf16.mxu1 %v30277_v44 }
 0xd6c   : > { %v15592_v62 = vor.u32 %v15590_v18, %v15588_v26 }
 0xd72   : > { %22068 = vmatmul.mubr.bf16.gmra.mrb[60].mxu1 %v30279_v34  ;;  %v15596_v34 = vrot.slane %v15594_v41, 1  ;;  %v29283_v41 = vld [vmem:[%s24214_s25 + $0xa4] sm:$0xff]  }
 0xd73   : > { %22071 = vmatprep.mubr.bf16.mxu1 %v30281_v59  ;;  %v23802_v59 = vld [vmem:[%s29592_s3 + $0x220] sm:$0xff]  }
 0xd74   : > { %v15600_v56 = vor.u32 %v15598_v42, %v15596_v34  ;;  %v15670_v42 = vshrl.u32 %v29283_v41, 16 }
 0xd7a   : > { %22072 = vmatmul.mubr.bf16.gmra.mrb[64].mxu1 %v30283_v4 }
 0xd7b   : > { %22075 = vmatprep.mubr.bf16.mxu1 %v30285_v14  ;;  %v15597_v14 = vsel %vm551_vm2, %v15592_v62, %v15596_v34  ;;  %v29287_v62 = vld [vmem:[%s24214_s25 + $0xac] sm:$0xff]   ;;  %v15666_v34 = vshll.u32 %v29283_v41, 16 }
 0xd7c   : > { %v15678_v51 = vshrl.u32 %v29287_v62, 16 }
 0xd82   : > { %22076 = vmatmul.mubr.bf16.gmra.mrb[68].mxu1 %v30286_v43  ;;  %v23806_v43 = vld [vmem:[%s29592_s3 + $0x228] sm:$0xff]  }
 0xd83   : > { %22079 = vmatprep.mubr.bf16.mxu1 %v30287_v8  ;;  %v15604_v8 = vrot.slane %v15602_v55, 1  ;;  %v15662_v55 = vshrl.u32 %v29273_v32, 16 }
 0xd85   : > { %v15608_v29 = vor.u32 %v15606_v19, %v15604_v8  ;;  %v15668_v19 = vrot.slane %v15666_v34, 1 }
 0xd87   : > { %v15613_v25 = vsel %vm551_vm2, %v15608_v29, %v15612_v0  ;;  %v29301_v29 = vld [vmem:[%s24214_s25 + $0xbc] sm:$0xff]   ;;  %v15682_v0 = vshll.u32 %v29297_v17, 16 }
 0xd89   : > { %v15684_v5 = vrot.slane %v15682_v0, 1 }
 0xd8a   : > { %22080 = vmatmul.mubr.bf16.gmra.mrb[72].mxu1 %v30288_v3  ;;  %v29232_v3 = vld [vmem:[%s24214_s25 + $0x7c] sm:$0xff]  }
 0xd8b   : > { %22083 = vmatprep.mubr.bf16.mxu1 %v30291_v31  ;;  %v15605_v31 = vsel %vm551_vm2, %v15600_v56, %v15604_v8  ;;  %v15626_v6 = vshll.u32 %v29232_v3, 16  ;;  %v15630_v22 = vshrl.u32 %v29232_v3, 16  ;;  %v15672_v8 = vor.u32 %v15670_v42, %v15668_v19 }
 0xd8c   : > { %v15688_v7 = vor.u32 %v15686_v28, %v15684_v5 }
 0xd92   : > { %22084 = vmatmul.mubr.bf16.gmra.mrb[76].mxu1 %v30294_v30  ;;  %v15628_v30 = vrot.slane %v15626_v6, 1  ;;  %v29311_v6 = vld [vmem:[%s24214_s25 + $0xc4] sm:$0xff]  }
 0xd93   : > { %22089 = vmatprep.mubr.msk.bf16.mxu1 %vm777_vm3, %v15549_v33  ;;  %v23814_v33 = vld [vmem:[%s29592_s3 + $0x238] sm:$0xff]  }
 0xd94   : > { %v15632_v2 = vor.u32 %v15630_v22, %v15628_v30 }
 0xd9a   : > { %22090 = vmatmul.mubr.msk.bf16.vlgmr.msra.gmra.mrb[32].mxu1 %vm777_vm3, %v15557_v63  ;;  %v15629_v63 = vsel %vm551_vm2, %v15624_v35, %v15628_v30  ;;  %v29315_v35 = vld [vmem:[%s24214_s25 + $0xcc] sm:$0xff]   ;;  %v15698_v30 = vshll.u32 %v29311_v6, 16 }
 0xd9b   : > { %22138 = vmatpush3.bf16.msra.mxu1 %v23786_v13  ;;  %22093 = vmatprep.mubr.msk.bf16.mxu1 %vm777_vm3, %v15565_v12  ;;  %v15582_v13 = vshrl.u32 %v29175_v37, 16  ;;  %v15642_v12 = vshll.u32 %v29252_v39, 16 }
 0xd9c   : > { %22139 = vmatprep.subr.bf16.mxu1 %v23790_v57 }
 0xd9d   : > { %v15584_v44 = vor.u32 %v15582_v13, %v15580_v46  ;;  %v15644_v21 = vrot.slane %v15642_v12, 1  ;;  %v15650_v46 = vshll.u32 %v29269_v36, 16  ;;  %v15654_v13 = vshrl.u32 %v29269_v36, 16 }
 0xd9e   : > { %v15700_v12 = vrot.slane %v15698_v30, 1 }
 0xd9f   : > { %22140 = vmatpush3.bf16.msra.mxu1 %v23790_v57  ;;  %v15589_v4 = vsel %vm551_vm2, %v15584_v44, %v15588_v26  ;;  %v15636_v57 = vrot.slane %v15634_v49, 1  ;;  %v15652_v18 = vrot.slane %v15650_v46, 1  ;;  %v29329_v46 = vld [vmem:[%s24214_s25 + $0xdc] sm:$0xff]  }
 0xda0   : > { %22141 = vmatprep.subr.bf16.mxu1 %v23794_v10 }
 0xda1   : > { %v15640_v38 = vor.u32 %v15638_v61, %v15636_v57  ;;  %v15656_v26 = vor.u32 %v15654_v13, %v15652_v18  ;;  %v15706_v61 = vshll.u32 %v29315_v35, 16 }
 0xda2   : > { %22094 = vmatmul.mubr.msk.bf16.gmra.mrb[36].mxu1 %vm777_vm3, %v15573_v58 }
 0xda3   : > { %22097 = vmatprep.mubr.msk.bf16.mxu1 %vm777_vm3, %v15581_v15  ;;  %22142 = vmatpush3.bf16.msra.mxu1 %v23794_v10  ;;  %v15637_v10 = vsel %vm551_vm2, %v15632_v2, %v15636_v57  ;;  %v15645_v58 = vsel %vm551_vm2, %v15640_v38, %v15644_v21  ;;  %v15658_v15 = vshll.u32 %v29273_v32, 16  ;;  %v29325_v57 = vld [vmem:[%s24214_s25 + $0xd4] sm:$0xff]  }
 0xda4   : > { %22143 = vmatprep.subr.bf16.mxu1 %v23798_v60 }
 0xda5   : > { %v15660_v44 = vrot.slane %v15658_v15, 1  ;;  %v15718_v15 = vshrl.u32 %v29325_v57, 16 }
 0xda7   : > { %22144 = vmatpush3.bf16.msra.mxu1 %v23798_v60  ;;  %v15648_v60 = vor.u32 %v15646_v11, %v15644_v21  ;;  %v15708_v21 = vrot.slane %v15706_v61, 1 }
 0xda8   : > { %22145 = vmatprep.subr.bf16.mxu1 %v23802_v59 }
 0xdaa   : > { %22098 = vmatmul.mubr.msk.bf16.gmra.mrb[40].mxu1 %vm777_vm3, %v15589_v4  ;;  %v15661_v4 = vsel %vm551_vm2, %v15656_v26, %v15660_v44 }
 0xdab   : > { %22101 = vmatprep.mubr.msk.bf16.mxu1 %vm777_vm3, %v15597_v14  ;;  %22146 = vmatpush3.bf16.msra.mxu1 %v23802_v59  ;;  %v15653_v59 = vsel %vm551_vm2, %v15648_v60, %v15652_v18  ;;  %v15674_v14 = vshll.u32 %v29287_v62, 16  ;;  %v15722_v18 = vshll.u32 %v29329_v46, 16 }
 0xdac   : > { %22147 = vmatprep.subr.bf16.mxu1 %v23806_v43 }
 0xdad   : > { %v15676_v56 = vrot.slane %v15674_v14, 1  ;;  %v15726_v14 = vshrl.u32 %v29329_v46, 16 }
 0xdaf   : > { %22148 = vmatpush3.bf16.msra.mxu1 %v23806_v43  ;;  %v15664_v43 = vor.u32 %v15662_v55, %v15660_v44  ;;  %v29340_v44 = vld [vmem:[%s24214_s25 + $0xe4] ss:$0 sps:$4 sm:$0x11]  }
 0xdb0   : > { %22149 = vmatprep.subr.bf16.mxu1 %v23810_v45  ;;  %v23817_v55 = vld [vmem:[#allocation2 + $0x20] sm:$0xff]  }
 0xdb1   : > { %v16277_v28 = vshrl.u32 %v23817_v55, 16 }
 0xdb2   : > { %22102 = vmatmul.mubr.msk.bf16.gmra.mrb[44].mxu1 %vm777_vm3, %v15605_v31  ;;  %v15677_v31 = vsel %vm551_vm2, %v15672_v8, %v15676_v56  ;;  %v16279_v8 = vshll.u32 %v23817_v55, 16  ;;  %v23825_v55 = vld [vmem:[#allocation2 + $0x58] sm:$0xff]  }
 0xdb3   : > { %22105 = vmatprep.mubr.msk.bf16.mxu1 %vm777_vm3, %v15613_v25  ;;  %22150 = vmatpush3.bf16.msra.mxu1 %v23810_v45  ;;  %v15669_v45 = vsel %vm551_vm2, %v15664_v43, %v15668_v19  ;;  %v15690_v25 = vshll.u32 %v29301_v29, 16  ;;  %v15730_v19 = vshll.u32 %v29340_v44, 16 }
 0xdb4   : > { %22151 = vmatprep.subr.bf16.mxu1 %v23814_v33 }
 0xdb5   : > { %v15692_v50 = vrot.slane %v15690_v25, 1 }
 0xdb7   : > { %22152 = vmatpush3.bf16.msra.mxu1 %v23814_v33  ;;  %v15680_v33 = vor.u32 %v15678_v51, %v15676_v56  ;;  %v15693_v22 = vsel %vm551_vm2, %v15688_v7, %v15692_v50  ;;  %v16281_v51 = vrot.slane %v16279_v8, 1 }
 0xdb8   : > { %23174 = vmatprep.subr.msk.bf16.mxu1 %vm859_vm0, %v29257_v20 }
 0xdb9   : > { %v15685_v49 = vsel %vm551_vm2, %v15680_v33, %v15684_v5  ;;  %v23821_v5 = vld [vmem:[#allocation2 + $0x38] sm:$0xff]   ;;  %v16282_v7 = vor.u32 %v16281_v51, %v16277_v28 }
 0xdba   : > { %22106 = vmatmul.mubr.msk.bf16.gmra.mrb[48].mxu1 %vm777_vm3, %v15621_v1  ;;  %v15694_v1 = vshrl.u32 %v29301_v29, 16 }
 0xdbb   : > { %22109 = vmatprep.mubr.msk.bf16.mxu1 %vm777_vm3, %v15629_v63  ;;  %v15702_v63 = vshrl.u32 %v29311_v6, 16 }
 0xdbc   : > { %v15696_v2 = vor.u32 %v15694_v1, %v15692_v50 }
 0xdbd   : > { %v15704_v38 = vor.u32 %v15702_v63, %v15700_v12 }
 0xdbe   : > { %v15701_v11 = vsel %vm551_vm2, %v15696_v2, %v15700_v12  ;;  %v23823_v2 = vld [vmem:[#allocation2 + $0x48] sm:$0xff]  }
 0xdbf   : > { %v15709_v13 = vsel %vm551_vm2, %v15704_v38, %v15708_v21 }
 0xdc2   : > { %22110 = vmatmul.mubr.msk.bf16.gmra.mrb[52].mxu1 %vm777_vm3, %v15637_v10  ;;  %v15714_v10 = vshll.u32 %v29325_v57, 16 }
 0xdc3   : > { %22113 = vmatprep.mubr.msk.bf16.mxu1 %vm777_vm3, %v15645_v58  ;;  %v15710_v58 = vshrl.u32 %v29315_v35, 16 }
 0xdc4   : > { %v15716_v60 = vrot.slane %v15714_v10, 1 }
 0xdc5   : > { %v15712_v26 = vor.u32 %v15710_v58, %v15708_v21  ;;  %v16951_v21 = vsel %vm859_vm0, %v29257_v20, 0 }
 0xdc6   : > { %v15720_v34 = vor.u32 %v15718_v15, %v15716_v60  ;;  %v16316_v15 = vshll.u32 %v23823_v2, 16 }
 0xdc7   : > { %v15717_v42 = vsel %vm551_vm2, %v15712_v26, %v15716_v60  ;;  %v23824_v60 = vld [vmem:[#allocation2 + $0x50] sm:$0xff]   ;;  %v16304_v26 = vshrl.u32 %v23821_v5, 16 }
 0xdca   : > { %22114 = vmatmul.mubr.msk.bf16.gmra.mrb[56].mxu1 %vm777_vm3, %v15653_v59  ;;  %v15724_v59 = vrot.slane %v15722_v18, 1 }
 0xdcb   : > { %22117 = vmatprep.mubr.msk.bf16.mxu1 %vm777_vm3, %v15661_v4  ;;  %v23818_v4 = vld [vmem:[#allocation2 + $0x28] sm:$0xff]  }
 0xdcc   : > { %v15725_v43 = vsel %vm551_vm2, %v15720_v34, %v15724_v59  ;;  %v16284_v56 = vshll.u32 %v23818_v4, 16  ;;  %v15728_v0 = vor.u32 %v15726_v14, %v15724_v59  ;;  %v16288_v63 = vshrl.u32 %v23818_v4, 16 }
 0xdcd   : > { %v16318_v59 = vrot.slane %v16316_v15, 1  ;;  %v16324_v14 = vshll.u32 %v23824_v60, 16 }
 0xdce   : > { %v16286_v25 = vrot.slane %v16284_v56, 1  ;;  %v23826_v56 = vld [vmem:[#allocation2 + $0x60] sm:$0xff]  }
 0xdcf   : > { %v16326_v8 = vrot.slane %v16324_v14, 1 }
 0xdd0   : > { %v16287_v30 = vsel %vm551_vm2, %v16282_v7, %v16286_v25  ;;  %v16290_v38 = vor.u32 %v16288_v63, %v16286_v25 }
 0xdd2   : > { %22118 = vmatmul.mubr.msk.bf16.gmra.mrb[60].mxu1 %vm777_vm3, %v15669_v45  ;;  %v15732_v45 = vrot.slane %v15730_v19, 1 }
 0xdd3   : > { %22121 = vmatprep.mubr.msk.bf16.mxu1 %vm777_vm3, %v15677_v31  ;;  %v23820_v31 = vld [vmem:[#allocation2 + $0x30] sm:$0xff]  }
 0xdd4   : > { %v15733_v33 = vsel %vm551_vm2, %v15728_v0, %v15732_v45  ;;  %v16292_v50 = vshll.u32 %v23820_v31, 16  ;;  %v16296_v61 = vshrl.u32 %v23820_v31, 16  ;;  %v16320_v0 = vshrl.u32 %v23823_v2, 16  ;;  %v23827_v31 = vld [vmem:[#allocation2 + $0x68] sm:$0xff]  }
 0xdd5   : > { %v16328_v45 = vshrl.u32 %v23824_v60, 16  ;;  %v16352_v15 = vshrl.u32 %v23827_v31, 16 }
 0xdd6   : > { %v16294_v1 = vrot.slane %v16292_v50, 1  ;;  %v16322_v28 = vor.u32 %v16320_v0, %v16318_v59  ;;  %v16348_v50 = vshll.u32 %v23827_v31, 16  ;;  %v23833_v0 = vld [vmem:[#allocation2 + $0x98] sm:$0xff]  }
 0xdd7   : > { %v16330_v25 = vor.u32 %v16328_v45, %v16326_v8 }
 0xdd8   : > { %v16298_v10 = vor.u32 %v16296_v61, %v16294_v1  ;;  %v16295_v58 = vsel %vm551_vm2, %v16290_v38, %v16294_v1  ;;  %v16336_v1 = vshrl.u32 %v23825_v55, 16  ;;  %v16350_v63 = vrot.slane %v16348_v50, 1  ;;  %v23829_v61 = vld [vmem:[#allocation2 + $0x78] sm:$0xff]  }
 0xdda   : > { %22122 = vmatmul.mubr.msk.bf16.gmra.mrb[64].mxu1 %vm777_vm3, %v15685_v49  ;;  %v16300_v49 = vshll.u32 %v23821_v5, 16  ;;  %v16340_v5 = vshll.u32 %v23826_v56, 16 }
 0xddb   : > { %22125 = vmatprep.mubr.msk.bf16.mxu1 %vm777_vm3, %v15693_v22  ;;  %v23822_v22 = vld [vmem:[#allocation2 + $0x40] sm:$0xff]  }
 0xddc   : > { %v16302_v12 = vrot.slane %v16300_v49, 1  ;;  %v16312_v34 = vshrl.u32 %v23822_v22, 16  ;;  %v23828_v49 = vld [vmem:[#allocation2 + $0x70] sm:$0xff]  }
 0xddd   : > { %v16356_v38 = vshll.u32 %v23828_v49, 16 }
 0xdde   : > { %v16306_v4 = vor.u32 %v16304_v26, %v16302_v12  ;;  %v23831_v26 = vld [vmem:[#allocation2 + $0x88] sm:$0xff]  }
 0xddf   : > { %v16380_v14 = vshll.u32 %v23831_v26, 16  ;;  %v16384_v50 = vshrl.u32 %v23831_v26, 16 }
 0xde2   : > { %22126 = vmatmul.mubr.msk.bf16.gmra.mrb[68].mxu1 %vm777_vm3, %v15701_v11  ;;  %v16308_v11 = vshll.u32 %v23822_v22, 16  ;;  %v16344_v22 = vshrl.u32 %v23826_v56, 16  ;;  %v16382_v56 = vrot.slane %v16380_v14, 1 }
 0xde3   : > { %22129 = vmatprep.mubr.msk.bf16.mxu1 %vm777_vm3, %v15709_v13  ;;  %v16303_v13 = vsel %vm551_vm2, %v16298_v10, %v16302_v12 }
 0xde4   : > { %v16310_v18 = vrot.slane %v16308_v11, 1  ;;  %v16364_v11 = vshll.u32 %v23829_v61, 16 }
 0xde6   : > { %v16311_v20 = vsel %vm551_vm2, %v16306_v4, %v16310_v18  ;;  %v16366_v60 = vrot.slane %v16364_v11, 1  ;;  %v16400_v11 = vshrl.u32 %v23833_v0, 16 }
 0xdea   : > { %22130 = vmatmul.mubr.msk.bf16.gmra.mrb[72].mxu1 %vm777_vm3, %v15717_v42  ;;  %v16314_v42 = vor.u32 %v16312_v34, %v16310_v18  ;;  %v16360_v18 = vshrl.u32 %v23828_v49, 16  ;;  %v16354_v34 = vor.u32 %v16352_v15, %v16350_v63  ;;  %v23837_v15 = vld [vmem:[#allocation2 + $0xb8] sm:$0xff]  }
 0xdeb   : > { %22133 = vmatprep.mubr.msk.bf16.mxu1 %vm777_vm3, %v15725_v43  ;;  %v16332_v43 = vshll.u32 %v23825_v55, 16 }
 0xdec   : > { %v16319_v19 = vsel %vm551_vm2, %v16314_v42, %v16318_v59 }
 0xded   : > { %v16334_v51 = vrot.slane %v16332_v43, 1  ;;  %v16368_v43 = vshrl.u32 %v23829_v61, 16 }
 0xdef   : > { %v16335_v7 = vsel %vm551_vm2, %v16330_v25, %v16334_v51  ;;  %v16338_v12 = vor.u32 %v16336_v1, %v16334_v51  ;;  %v16370_v45 = vor.u32 %v16368_v43, %v16366_v60  ;;  %v23835_v1 = vld [vmem:[#allocation2 + $0xa8] sm:$0xff]  }
 0xdf0   : > { %v16416_v14 = vshrl.u32 %v23835_v1, 16  ;;  %v23839_v43 = vld [vmem:[#allocation2 + $0xc8] sm:$0xff]  }
 0xdf2   : > { %22134 = vmatmul.mubr.msk.bf16.gmra.mrb[76].mxu1 %vm777_vm3, %v15733_v33  ;;  %v16327_v33 = vsel %vm551_vm2, %v16322_v28, %v16326_v8 }
 0xdf3   : > { %22153 = vmatprep.mubr.bf16.mxu1 %v16287_v30  ;;  %v16342_v30 = vrot.slane %v16340_v5, 1  ;;  %v16396_v5 = vshll.u32 %v23833_v0, 16 }
 0xdf5   : > { %v16346_v2 = vor.u32 %v16344_v22, %v16342_v30  ;;  %v16398_v49 = vrot.slane %v16396_v5, 1  ;;  %v16386_v22 = vor.u32 %v16384_v50, %v16382_v56  ;;  %v16432_v5 = vshrl.u32 %v23837_v15, 16  ;;  %v23841_v50 = vld [vmem:[#allocation2 + $0xd8] sm:$0xff]  }
 0xdf7   : > { %v16351_v10 = vsel %vm551_vm2, %v16346_v2, %v16350_v63 }
 0xdfa   : > { %22154 = vmatmul.mubr.bf16.vlgmr.msra.gmra.mrb[32].mxu1 %v16295_v58  ;;  %v16358_v58 = vrot.slane %v16356_v38, 1  ;;  %v16412_v38 = vshll.u32 %v23835_v1, 16 }
 0xdfb   : > { %22202 = vmatpush3.bf16.msra.mxu1 %v16951_v21  ;;  %22157 = vmatprep.mubr.bf16.mxu1 %v16303_v13  ;;  %v16343_v21 = vsel %vm551_vm2, %v16338_v12, %v16342_v30  ;;  %v23830_v13 = vld [vmem:[#allocation2 + $0x80] sm:$0xff]  }
 0xdfc   : > { %v16362_v59 = vor.u32 %v16360_v18, %v16358_v58  ;;  %v16372_v55 = vshll.u32 %v23830_v13, 16  ;;  %v16359_v4 = vsel %vm551_vm2, %v16354_v34, %v16358_v58  ;;  %v16376_v8 = vshrl.u32 %v23830_v13, 16 }
 0xdfd   : > { %v16414_v13 = vrot.slane %v16412_v38, 1  ;;  %v16402_v18 = vor.u32 %v16400_v11, %v16398_v49  ;;  %v23842_v38 = vld [vmem:[#allocation2 + $0xe0] ss:$0 sps:$4 sm:$0x11]  }
 0xdfe   : > { %v16367_v42 = vsel %vm551_vm2, %v16362_v59, %v16366_v60 }
 0xe02   : > { %22158 = vmatmul.mubr.bf16.gmra.mrb[36].mxu1 %v16311_v20  ;;  %v16374_v20 = vrot.slane %v16372_v55, 1  ;;  %v16428_v55 = vshll.u32 %v23837_v15, 16 }
 0xe03   : > { %22161 = vmatprep.mubr.bf16.mxu1 %v16319_v19  ;;  %v23832_v19 = vld [vmem:[#allocation2 + $0x90] sm:$0xff]  }
 0xe04   : > { %v16378_v51 = vor.u32 %v16376_v8, %v16374_v20  ;;  %v16388_v31 = vshll.u32 %v23832_v19, 16  ;;  %v16375_v28 = vsel %vm551_vm2, %v16370_v45, %v16374_v20  ;;  %v16392_v30 = vshrl.u32 %v23832_v19, 16 }
 0xe05   : > { %v16430_v19 = vrot.slane %v16428_v55, 1  ;;  %v16418_v8 = vor.u32 %v16416_v14, %v16414_v13  ;;  %v16825_v55 = vrot.slane %v29147_v23, 1  ;;  %v16831_v23 = vrot.slane %v29171_v27, 1 }
 0xe06   : > { %v16383_v25 = vsel %vm551_vm2, %v16378_v51, %v16382_v56  ;;  %v16839_v27 = vrot.slane %v29208_v24, 1  ;;  %v16847_v24 = vrot.slane %v29248_v48, 1  ;;  %v16855_v48 = vrot.slane %v29283_v41, 1 }
 0xe07   : > { %v16863_v41 = vrot.slane %v29311_v6, 1 }
 0xe0a   : > { %22162 = vmatmul.mubr.bf16.gmra.mrb[40].mxu1 %v16327_v33  ;;  %v16390_v33 = vrot.slane %v16388_v31, 1  ;;  %v16444_v31 = vshll.u32 %v23839_v43, 16 }
 0xe0b   : > { %22165 = vmatprep.mubr.bf16.mxu1 %v16335_v7  ;;  %v23834_v7 = vld [vmem:[#allocation2 + $0xa0] sm:$0xff]  }
 0xe0c   : > { %v16394_v63 = vor.u32 %v16392_v30, %v16390_v33  ;;  %v16404_v61 = vshll.u32 %v23834_v7, 16  ;;  %v16391_v12 = vsel %vm551_vm2, %v16386_v22, %v16390_v33  ;;  %v16408_v58 = vshrl.u32 %v23834_v7, 16 }
 0xe0d   : > { %v16446_v7 = vrot.slane %v16444_v31, 1  ;;  %v16434_v30 = vor.u32 %v16432_v5, %v16430_v19 }
 0xe0e   : > { %v16399_v2 = vsel %vm551_vm2, %v16394_v63, %v16398_v49 }
 0xe12   : > { %22166 = vmatmul.mubr.bf16.gmra.mrb[44].mxu1 %v16343_v21  ;;  %v16406_v21 = vrot.slane %v16404_v61, 1  ;;  %v16460_v61 = vshll.u32 %v23841_v50, 16 }
 0xe13   : > { %22169 = vmatprep.mubr.bf16.mxu1 %v16351_v10  ;;  %v23836_v10 = vld [vmem:[#allocation2 + $0xb0] sm:$0xff]  }
 0xe14   : > { %v16410_v60 = vor.u32 %v16408_v58, %v16406_v21  ;;  %v16420_v26 = vshll.u32 %v23836_v10, 16  ;;  %v16407_v34 = vsel %vm551_vm2, %v16402_v18, %v16406_v21  ;;  %v16424_v20 = vshrl.u32 %v23836_v10, 16  ;;  %v16817_v21 = vld [vmem:[%s24214_s25 + $0x24] sm:$0xe]  ;;  %s24016_s25 = sshll.u32 %s24095_s21, 4  ;;  %s24017_s25 = int_to_ptr.vmem [resolvable:$false] %s24016_s25 }
 0xe15   : > { %v16462_v11 = vrot.slane %v16460_v61, 1  ;;  %v18911_v15 = vcombine.low %v16817_v21, %v29137_v47  ;;  %v16827_v47 = vrot.slane %v29154_v16, 1  ;;  %v16835_v16 = vrot.slane %v29188_v9, 1  ;;  %s24018_s22 = scalar_lea.vmem %s24017_s25, 6144  ;;  %p24019_p1 = scmp.lt.s32.totalorder %s29532_s12, %s24017_s25 }
 0xe16   : > { %v16415_v59 = vsel %vm551_vm2, %v16410_v60, %v16414_v13  ;;  %v16468_v60 = vshll.u32 %v23842_v38, 16  ;;  %v16843_v9 = vrot.slane %v29228_v40, 1  ;;  %v16851_v40 = vrot.slane %v29269_v36, 1  ;;  %p24020_p2 = scmp.lt.s32.totalorder %s24018_s22, %s24012_s20 }
 0xe17   : > { %v16859_v36 = vrot.slane %v29297_v17, 1  ;;  %v16867_v17 = vrot.slane %v29325_v57, 1  ;;  %v29453_v57 = vld [vmem:[%s29595_s6] ss:$0 sm:$0xff] }
 0xe18   : > { %p24021_p3 = por %p24020_p2, %p24019_p1 }
 0xe1a   : > { %22170 = vmatmul.mubr.bf16.gmra.mrb[48].mxu1 %v16359_v4  ;;  %v16422_v4 = vrot.slane %v16420_v26, 1  ;;  %p24022_p5 = pnand %p24021_p3, %p24015_p0 }
 0xe1b   : > { %22173 = vmatprep.mubr.bf16.mxu1 %v16367_v42  ;;  %v23838_v42 = vld [vmem:[#allocation2 + $0xc0] sm:$0xff]  }
 0xe1c   : > { %v16426_v56 = vor.u32 %v16424_v20, %v16422_v4  ;;  %v16436_v0 = vshll.u32 %v23838_v42, 16  ;;  %v16423_v45 = vsel %vm551_vm2, %v16418_v8, %v16422_v4  ;;  %v16440_v33 = vshrl.u32 %v23838_v42, 16 }
 0xe1d   : > { %v16470_v42 = vrot.slane %v16468_v60, 1 }
 0xe1e   : > { %v16431_v51 = vsel %vm551_vm2, %v16426_v56, %v16430_v19  ;;  %v16829_v19 = vrot.slane %v29160_v53, 1  ;;  %v16833_v56 = vrot.slane %v29175_v37, 1  ;;  %v16837_v53 = vrot.slane %v29192_v52, 1 }
 0xe1f   : > { %v16841_v37 = vrot.slane %v29212_v54, 1  ;;  %v16845_v52 = vrot.slane %v29232_v3, 1  ;;  %v16849_v54 = vrot.slane %v29252_v39, 1  ;;  %v16853_v3 = vrot.slane %v29273_v32, 1 }
 0xe20   : > { %v16830_v8 = vsel %vm1430_vm4, %v16827_v47, %v16829_v19  ;;  %v16838_v31 = vsel %vm1430_vm4, %v16835_v16, %v16837_v53  ;;  %v16857_v39 = vrot.slane %v29287_v62, 1  ;;  %v16861_v32 = vrot.slane %v29301_v29, 1 }
 0xe21   : > { %v16844_v5 = vsel %vm1430_vm4, %v16841_v37, %v16843_v9  ;;  %v16865_v62 = vrot.slane %v29315_v35, 1  ;;  %v16869_v29 = vrot.slane %v29329_v46, 1  ;;  %v16871_v35 = vrot.slane %v29340_v44, 1 }
 0xe22   : > { %22174 = vmatmul.mubr.bf16.gmra.mrb[52].mxu1 %v16375_v28  ;;  %v16438_v28 = vrot.slane %v16436_v0, 1  ;;  %v16832_v0 = vsel %vm1430_vm4, %v16829_v19, %v16831_v23  ;;  %v16862_v61 = vsel %vm1430_vm4, %v16859_v36, %v16861_v32 }
 0xe23   : > { %22177 = vmatprep.mubr.bf16.mxu1 %v16383_v25  ;;  %v23840_v25 = vld [vmem:[#allocation2 + $0xd0] sm:$0xff]   ;;  %v16868_v38 = vsel %vm1430_vm4, %v16865_v62, %v16867_v17  ;;  %v16870_v6 = vsel %vm1430_vm4, %v16867_v17, %v16869_v29  ;;  %v16872_v21 = vsel %vm1430_vm4, %v16869_v29, %v16871_v35 }
 0xe24   : > { %v16442_v49 = vor.u32 %v16440_v33, %v16438_v28  ;;  %v16452_v1 = vshll.u32 %v23840_v25, 16  ;;  %v16439_v22 = vsel %vm551_vm2, %v16434_v30, %v16438_v28  ;;  %v16456_v10 = vshrl.u32 %v23840_v25, 16 }
 0xe25   : > { %v16840_v28 = vsel %vm1430_vm4, %v16837_v53, %v16839_v27  ;;  %v16842_v25 = vsel %vm1430_vm4, %v16839_v27, %v16841_v37  ;;  %v16846_v33 = vsel %vm1430_vm4, %v16843_v9, %v16845_v52  ;;  %v16852_v30 = vsel %vm1430_vm4, %v16849_v54, %v16851_v40 }
 0xe26   : > { %v16447_v63 = vsel %vm551_vm2, %v16442_v49, %v16446_v7  ;;  %v16854_v49 = vsel %vm1430_vm4, %v16851_v40, %v16853_v3 }
 0xe2a   : > { %22178 = vmatmul.mubr.bf16.gmra.mrb[56].mxu1 %v16391_v12  ;;  %v16454_v12 = vrot.slane %v16452_v1, 1  ;;  %v16856_v1 = vsel %vm1430_vm4, %v16853_v3, %v16855_v48 }
 0xe2b   : > { %22181 = vmatprep.mubr.bf16.mxu1 %v16399_v2  ;;  %v16448_v2 = vshrl.u32 %v23839_v43, 16  ;;  %v16828_v43 = vsel %vm1430_vm4, %v16825_v55, %v16827_v47 }
 0xe2c   : > { %v16458_v13 = vor.u32 %v16456_v10, %v16454_v12 }
 0xe2d   : > { %v16450_v58 = vor.u32 %v16448_v2, %v16446_v7  ;;  %v16848_v7 = vsel %vm1430_vm4, %v16845_v52, %v16847_v24  ;;  %v16866_v2 = vsel %vm1430_vm4, %v16863_v41, %v16865_v62 }
 0xe2e   : > { %v16463_v26 = vsel %vm551_vm2, %v16458_v13, %v16462_v11 }
 0xe2f   : > { %v16455_v18 = vsel %vm551_vm2, %v16450_v58, %v16454_v12  ;;  %v16864_v12 = vsel %vm1430_vm4, %v16861_v32, %v16863_v41 }
 0xe32   : > { %22182 = vmatmul.mubr.bf16.gmra.mrb[60].mxu1 %v16407_v34  ;;  %v16464_v34 = vshrl.u32 %v23841_v50, 16  ;;  %v16850_v50 = vsel %vm1430_vm4, %v16847_v24, %v16849_v54 }
 0xe33   : > { %22185 = vmatprep.mubr.bf16.mxu1 %v16415_v59  ;;  %v16824_v59 = vrot.slane %v18911_v15, 1 }
 0xe34   : > { %v16466_v4 = vor.u32 %v16464_v34, %v16462_v11 }
 0xe35   : > { %v16826_v14 = vsel %vm1430_vm4, %v16824_v59, %v16825_v55 }
 0xe36   : > { %v16471_v20 = vsel %vm551_vm2, %v16466_v4, %v16470_v42 }
 0xe3a   : > { %22186 = vmatmul.mubr.bf16.gmra.mrb[64].mxu1 %v16423_v45  ;;  %v16834_v45 = vsel %vm1430_vm4, %v16831_v23, %v16833_v56 }
 0xe3b   : > { %22189 = vmatprep.mubr.bf16.mxu1 %v16431_v51  ;;  %v16836_v51 = vsel %vm1430_vm4, %v16833_v56, %v16835_v16 }
 0xe42   : > { %22190 = vmatmul.mubr.bf16.gmra.mrb[68].mxu1 %v16439_v22  ;;  %v16858_v22 = vsel %vm1430_vm4, %v16855_v48, %v16857_v39 }
 0xe43   : > { %22193 = vmatprep.mubr.bf16.mxu1 %v16447_v63  ;;  %v16860_v63 = vsel %vm1430_vm4, %v16857_v39, %v16859_v36 }
 0xe4a   : > { %22194 = vmatmul.mubr.bf16.gmra.mrb[72].mxu1 %v16455_v18 }
 0xe4b   : > { %22197 = vmatprep.mubr.bf16.mxu1 %v16463_v26 }
 0xe52   : > { %22198 = vmatmul.mubr.bf16.gmra.mrb[76].mxu1 %v16471_v20 }
 0xe53   : > { %22203 = vmatprep.mubr.msk.bf16.mxu1 %vm777_vm3, %v16826_v14 }
 0xe5a   : > { %22204 = vmatmul.mubr.msk.bf16.vlgmr.msra.gmra.mrb[32].mxu1 %vm777_vm3, %v16828_v43 }
 0xe5b   : > { %22207 = vmatprep.mubr.msk.bf16.mxu1 %vm777_vm3, %v16830_v8 }
 0xe62   : > { %22208 = vmatmul.mubr.msk.bf16.gmra.mrb[36].mxu1 %vm777_vm3, %v16832_v0 }
 0xe63   : > { %22211 = vmatprep.mubr.msk.bf16.mxu1 %vm777_vm3, %v16834_v45 }
 0xe6a   : > { %22212 = vmatmul.mubr.msk.bf16.gmra.mrb[40].mxu1 %vm777_vm3, %v16836_v51 }
 0xe6b   : > { %22215 = vmatprep.mubr.msk.bf16.mxu1 %vm777_vm3, %v16838_v31 }
 0xe72   : > { %22216 = vmatmul.mubr.msk.bf16.gmra.mrb[44].mxu1 %vm777_vm3, %v16840_v28 }
 0xe73   : > { %22219 = vmatprep.mubr.msk.bf16.mxu1 %vm777_vm3, %v16842_v25 }
 0xe7a   : > { %22220 = vmatmul.mubr.msk.bf16.gmra.mrb[48].mxu1 %vm777_vm3, %v16844_v5 }
 0xe7b   : > { %22223 = vmatprep.mubr.msk.bf16.mxu1 %vm777_vm3, %v16846_v33 }
 0xe82   : > { %22224 = vmatmul.mubr.msk.bf16.gmra.mrb[52].mxu1 %vm777_vm3, %v16848_v7 }
 0xe83   : > { %22227 = vmatprep.mubr.msk.bf16.mxu1 %vm777_vm3, %v16850_v50 }
 0xe8a   : > { %22228 = vmatmul.mubr.msk.bf16.gmra.mrb[56].mxu1 %vm777_vm3, %v16852_v30 }
 0xe8b   : > { %22231 = vmatprep.mubr.msk.bf16.mxu1 %vm777_vm3, %v16854_v49 }
 0xe92   : > { %22232 = vmatmul.mubr.msk.bf16.gmra.mrb[60].mxu1 %vm777_vm3, %v16856_v1 }
 0xe93   : > { %22235 = vmatprep.mubr.msk.bf16.mxu1 %vm777_vm3, %v16858_v22 }
 0xe9a   : > { %22236 = vmatmul.mubr.msk.bf16.gmra.mrb[64].mxu1 %vm777_vm3, %v16860_v63 }
 0xe9b   : > { %22239 = vmatprep.mubr.msk.bf16.mxu1 %vm777_vm3, %v16862_v61 }
 0xea2   : > { %22240 = vmatmul.mubr.msk.bf16.gmra.mrb[68].mxu1 %vm777_vm3, %v16864_v12 }
 0xea3   : > { %22243 = vmatprep.mubr.msk.bf16.mxu1 %vm777_vm3, %v16866_v2 }
 0xeaa   : > { %22244 = vmatmul.mubr.msk.bf16.gmra.mrb[72].mxu1 %vm777_vm3, %v16868_v38 }
 0xeab   : > { %22247 = vmatprep.mubr.msk.bf16.mxu1 %vm777_vm3, %v16870_v6 }
 0xeb2   : > { %22248 = vmatmul.mubr.msk.bf16.gmra.mrb[76].mxu1 %vm777_vm3, %v16872_v21 }
 0xf2d   : > { %v22205_v46 = vpop.f32.mrb[32].mxu1 }
 0xf2e   : > { %v22253_v10 = vadd.f32 %v22205_v46, %v29453_v57  ;;  %v16987_v11 = vpop.f32.mrb[33].mxu1 }
 0xf2f   : > { %v22254_v58 = vadd.f32 %v29453_v57, %v16987_v11  ;;  %v22206_v13 = vpop.f32.mrb[34].mxu1 }
 0xf30   : > { %v22255_v44 = vadd.f32 %v22206_v13, %v29453_v57  ;;  %v16990_v15 = vpop.f32.mrb[35].mxu1  ;;  %v17228_v60 = vmax.f32 %v22253_v10, 0.0 }
 0xf31   : > { %v22256_v18 = vadd.f32 %v29453_v57, %v16990_v15  ;;  %v17226_v34 = vmax.f32 %v22254_v58, 0.0 }
 0xf32   : > { %v17229_v26 = vmax.f32 %v22255_v44, 0.0 }
 0xf33   : > { %v17227_v59 = vmax.f32 %v22256_v18, 0.0 }
 0xf34   : > { %v19233_v55 = vpack.c.bf16 %v17229_v26, %v17228_v60 }
 0xf35   : > { %v19228_v4 = vpack.c.bf16 %v17227_v59, %v17226_v34  ;;  %v22209_v42 = vpop.f32.mrb[36].mxu1 }
 0xf36   : > { %19372 = vst [vmem:[%s29462_s26 + $0x8] sm:$0xff] %v19233_v55   ;;  %v22257_v14 = vadd.f32 %v22209_v42, %v29453_v57  ;;  %v17003_v20 = vpop.f32.mrb[37].mxu1 }
 0xf37   : > { %19229 = vst [vmem:[%s29462_s26] sm:$0xff] %v19228_v4   ;;  %v22258_v47 = vadd.f32 %v29453_v57, %v17003_v20  ;;  %v22210_v19 = vpop.f32.mrb[38].mxu1 }
 0xf38   : > { %v22259_v43 = vadd.f32 %v22210_v19, %v29453_v57  ;;  %v17006_v8 = vpop.f32.mrb[39].mxu1  ;;  %v17232_v56 = vmax.f32 %v22257_v14, 0.0 }
 0xf39   : > { %v22260_v23 = vadd.f32 %v29453_v57, %v17006_v8  ;;  %v17230_v45 = vmax.f32 %v22258_v47, 0.0 }
 0xf3a   : > { %v17233_v0 = vmax.f32 %v22259_v43, 0.0 }
 0xf3b   : > { %v17231_v16 = vmax.f32 %v22260_v23, 0.0 }
 0xf3c   : > { %v19243_v53 = vpack.c.bf16 %v17233_v0, %v17232_v56 }
 0xf3d   : > { %v19238_v51 = vpack.c.bf16 %v17231_v16, %v17230_v45  ;;  %v22213_v31 = vpop.f32.mrb[40].mxu1 }
 0xf3e   : > { %19374 = vst [vmem:[%s29462_s26 + $0x18] sm:$0xff] %v19243_v53   ;;  %v22261_v27 = vadd.f32 %v22213_v31, %v29453_v57  ;;  %v17019_v37 = vpop.f32.mrb[41].mxu1 }
 0xf3f   : > { %19373 = vst [vmem:[%s29462_s26 + $0x10] sm:$0xff] %v19238_v51   ;;  %v22262_v28 = vadd.f32 %v29453_v57, %v17019_v37  ;;  %v22214_v25 = vpop.f32.mrb[42].mxu1 }
 0xf40   : > { %v22263_v9 = vadd.f32 %v22214_v25, %v29453_v57  ;;  %v17022_v52 = vpop.f32.mrb[43].mxu1  ;;  %v17236_v33 = vmax.f32 %v22261_v27, 0.0 }
 0xf41   : > { %v22264_v5 = vadd.f32 %v29453_v57, %v17022_v52  ;;  %v17234_v54 = vmax.f32 %v22262_v28, 0.0 }
 0xf42   : > { %v17237_v24 = vmax.f32 %v22263_v9, 0.0 }
 0xf43   : > { %v17235_v7 = vmax.f32 %v22264_v5, 0.0 }
 0xf44   : > { %v19253_v50 = vpack.c.bf16 %v17237_v24, %v17236_v33 }
 0xf45   : > { %v19248_v40 = vpack.c.bf16 %v17235_v7, %v17234_v54  ;;  %v22217_v3 = vpop.f32.mrb[44].mxu1 }
 0xf46   : > { %19376 = vst [vmem:[%s29462_s26 + $0x28] sm:$0xff] %v19253_v50   ;;  %v22265_v30 = vadd.f32 %v22217_v3, %v29453_v57  ;;  %v17035_v49 = vpop.f32.mrb[45].mxu1 }
 0xf47   : > { %19375 = vst [vmem:[%s29462_s26 + $0x20] sm:$0xff] %v19248_v40   ;;  %v22266_v48 = vadd.f32 %v29453_v57, %v17035_v49  ;;  %v22218_v39 = vpop.f32.mrb[46].mxu1 }
 0xf48   : > { %v22267_v1 = vadd.f32 %v22218_v39, %v29453_v57  ;;  %v17038_v22 = vpop.f32.mrb[47].mxu1  ;;  %v17240_v32 = vmax.f32 %v22265_v30, 0.0 }
 0xf49   : > { %v22268_v36 = vadd.f32 %v29453_v57, %v17038_v22  ;;  %v17238_v61 = vmax.f32 %v22266_v48, 0.0 }
 0xf4a   : > { %v17241_v63 = vmax.f32 %v22267_v1, 0.0 }
 0xf4b   : > { %v17239_v41 = vmax.f32 %v22268_v36, 0.0 }
 0xf4c   : > { %v19263_v62 = vpack.c.bf16 %v17241_v63, %v17240_v32 }
 0xf4d   : > { %v19258_v12 = vpack.c.bf16 %v17239_v41, %v17238_v61  ;;  %v22221_v2 = vpop.f32.mrb[48].mxu1 }
 0xf4e   : > { %19378 = vst [vmem:[%s29462_s26 + $0x38] sm:$0xff] %v19263_v62   ;;  %v22269_v17 = vadd.f32 %v22221_v2, %v29453_v57  ;;  %v17051_v29 = vpop.f32.mrb[49].mxu1 }
 0xf4f   : > { %19377 = vst [vmem:[%s29462_s26 + $0x30] sm:$0xff] %v19258_v12   ;;  %v22270_v38 = vadd.f32 %v29453_v57, %v17051_v29  ;;  %v22222_v6 = vpop.f32.mrb[50].mxu1 }
 0xf50   : > { %v22271_v35 = vadd.f32 %v22222_v6, %v29453_v57  ;;  %v17054_v21 = vpop.f32.mrb[51].mxu1  ;;  %v17244_v10 = vmax.f32 %v22269_v17, 0.0 }
 0xf51   : > { %v22272_v46 = vadd.f32 %v29453_v57, %v17054_v21  ;;  %v17242_v58 = vmax.f32 %v22270_v38, 0.0 }
 0xf52   : > { %v17245_v11 = vmax.f32 %v22271_v35, 0.0 }
 0xf53   : > { %v17243_v13 = vmax.f32 %v22272_v46, 0.0 }
 0xf54   : > { %v19273_v44 = vpack.c.bf16 %v17245_v11, %v17244_v10 }
 0xf55   : > { %v19268_v15 = vpack.c.bf16 %v17243_v13, %v17242_v58  ;;  %v22225_v18 = vpop.f32.mrb[52].mxu1 }
 0xf56   : > { %19380 = vst [vmem:[%s29462_s26 + $0x48] sm:$0xff] %v19273_v44   ;;  %v22273_v60 = vadd.f32 %v22225_v18, %v29453_v57  ;;  %v17067_v26 = vpop.f32.mrb[53].mxu1 }
 0xf57   : > { %19379 = vst [vmem:[%s29462_s26 + $0x40] sm:$0xff] %v19268_v15   ;;  %v22274_v34 = vadd.f32 %v29453_v57, %v17067_v26  ;;  %v22226_v59 = vpop.f32.mrb[54].mxu1 }
 0xf58   : > { %v22275_v55 = vadd.f32 %v22226_v59, %v29453_v57  ;;  %v17070_v4 = vpop.f32.mrb[55].mxu1  ;;  %v17248_v14 = vmax.f32 %v22273_v60, 0.0 }
 0xf59   : > { %v22276_v42 = vadd.f32 %v29453_v57, %v17070_v4  ;;  %v17246_v47 = vmax.f32 %v22274_v34, 0.0 }
 0xf5a   : > { %v17249_v20 = vmax.f32 %v22275_v55, 0.0 }
 0xf5b   : > { %v17247_v19 = vmax.f32 %v22276_v42, 0.0 }
 0xf5c   : > { %v19283_v43 = vpack.c.bf16 %v17249_v20, %v17248_v14 }
 0xf5d   : > { %v19278_v8 = vpack.c.bf16 %v17247_v19, %v17246_v47  ;;  %v22229_v23 = vpop.f32.mrb[56].mxu1 }
 0xf5e   : > { %19382 = vst [vmem:[%s29462_s26 + $0x58] sm:$0xff] %v19283_v43   ;;  %v22277_v56 = vadd.f32 %v22229_v23, %v29453_v57  ;;  %v17083_v0 = vpop.f32.mrb[57].mxu1 }
 0xf5f   : > { %19381 = vst [vmem:[%s29462_s26 + $0x50] sm:$0xff] %v19278_v8   ;;  %v22278_v45 = vadd.f32 %v29453_v57, %v17083_v0  ;;  %v22230_v16 = vpop.f32.mrb[58].mxu1 }
 0xf60   : > { %v22279_v53 = vadd.f32 %v22230_v16, %v29453_v57  ;;  %v17086_v51 = vpop.f32.mrb[59].mxu1  ;;  %v17252_v27 = vmax.f32 %v22277_v56, 0.0 }
 0xf61   : > { %v22280_v31 = vadd.f32 %v29453_v57, %v17086_v51  ;;  %v17250_v28 = vmax.f32 %v22278_v45, 0.0 }
 0xf62   : > { %v17253_v37 = vmax.f32 %v22279_v53, 0.0 }
 0xf63   : > { %v17251_v25 = vmax.f32 %v22280_v31, 0.0 }
 0xf64   : > { %v19293_v9 = vpack.c.bf16 %v17253_v37, %v17252_v27 }
 0xf65   : > { %v19288_v52 = vpack.c.bf16 %v17251_v25, %v17250_v28  ;;  %v22233_v5 = vpop.f32.mrb[60].mxu1 }
 0xf66   : > { %19384 = vst [vmem:[%s29462_s26 + $0x68] sm:$0xff] %v19293_v9   ;;  %v22281_v33 = vadd.f32 %v22233_v5, %v29453_v57  ;;  %v17099_v24 = vpop.f32.mrb[61].mxu1 }
 0xf67   : > { %19383 = vst [vmem:[%s29462_s26 + $0x60] sm:$0xff] %v19288_v52   ;;  %v22282_v54 = vadd.f32 %v29453_v57, %v17099_v24  ;;  %v22234_v7 = vpop.f32.mrb[62].mxu1 }
 0xf68   : > { %v22283_v50 = vadd.f32 %v22234_v7, %v29453_v57  ;;  %v17102_v40 = vpop.f32.mrb[63].mxu1  ;;  %v17256_v30 = vmax.f32 %v22281_v33, 0.0 }
 0xf69   : > { %v22284_v3 = vadd.f32 %v29453_v57, %v17102_v40  ;;  %v17254_v48 = vmax.f32 %v22282_v54, 0.0 }
 0xf6a   : > { %v17257_v49 = vmax.f32 %v22283_v50, 0.0 }
 0xf6b   : > { %v17255_v39 = vmax.f32 %v22284_v3, 0.0 }
 0xf6c   : > { %v19303_v1 = vpack.c.bf16 %v17257_v49, %v17256_v30 }
 0xf6d   : > { %v19298_v22 = vpack.c.bf16 %v17255_v39, %v17254_v48  ;;  %v22237_v36 = vpop.f32.mrb[64].mxu1 }
 0xf6e   : > { %19386 = vst [vmem:[%s29462_s26 + $0x78] sm:$0xff] %v19303_v1   ;;  %v22285_v32 = vadd.f32 %v22237_v36, %v29453_v57  ;;  %v17115_v63 = vpop.f32.mrb[65].mxu1 }
 0xf6f   : > { %19385 = vst [vmem:[%s29462_s26 + $0x70] sm:$0xff] %v19298_v22   ;;  %v22286_v61 = vadd.f32 %v29453_v57, %v17115_v63  ;;  %v22238_v41 = vpop.f32.mrb[66].mxu1 }
 0xf70   : > { %v22287_v62 = vadd.f32 %v22238_v41, %v29453_v57  ;;  %v17118_v12 = vpop.f32.mrb[67].mxu1  ;;  %v17260_v17 = vmax.f32 %v22285_v32, 0.0 }
 0xf71   : > { %v22288_v2 = vadd.f32 %v29453_v57, %v17118_v12  ;;  %v17258_v38 = vmax.f32 %v22286_v61, 0.0 }
 0xf72   : > { %v17261_v29 = vmax.f32 %v22287_v62, 0.0 }
 0xf73   : > { %v17259_v6 = vmax.f32 %v22288_v2, 0.0 }
 0xf74   : > { %v19313_v35 = vpack.c.bf16 %v17261_v29, %v17260_v17 }
 0xf75   : > { %v19308_v21 = vpack.c.bf16 %v17259_v6, %v17258_v38  ;;  %v22241_v46 = vpop.f32.mrb[68].mxu1 }
 0xf76   : > { %19388 = vst [vmem:[%s29462_s26 + $0x88] sm:$0xff] %v19313_v35   ;;  %v22289_v10 = vadd.f32 %v22241_v46, %v29453_v57  ;;  %v17131_v11 = vpop.f32.mrb[69].mxu1 }
 0xf77   : > { %19387 = vst [vmem:[%s29462_s26 + $0x80] sm:$0xff] %v19308_v21   ;;  %v22290_v58 = vadd.f32 %v29453_v57, %v17131_v11  ;;  %v22242_v13 = vpop.f32.mrb[70].mxu1 }
 0xf78   : > { %v22291_v44 = vadd.f32 %v22242_v13, %v29453_v57  ;;  %v17134_v15 = vpop.f32.mrb[71].mxu1  ;;  %v17264_v60 = vmax.f32 %v22289_v10, 0.0 }
 0xf79   : > { %v22292_v18 = vadd.f32 %v29453_v57, %v17134_v15  ;;  %v17262_v34 = vmax.f32 %v22290_v58, 0.0 }
 0xf7a   : > { %v17265_v26 = vmax.f32 %v22291_v44, 0.0 }
 0xf7b   : > { %v17263_v59 = vmax.f32 %v22292_v18, 0.0 }
 0xf7c   : > { %v19323_v55 = vpack.c.bf16 %v17265_v26, %v17264_v60 }
 0xf7d   : > { %v19318_v4 = vpack.c.bf16 %v17263_v59, %v17262_v34  ;;  %v22245_v42 = vpop.f32.mrb[72].mxu1 }
 0xf7e   : > { %19390 = vst [vmem:[%s29462_s26 + $0x98] sm:$0xff] %v19323_v55   ;;  %v22293_v14 = vadd.f32 %v22245_v42, %v29453_v57  ;;  %v17147_v20 = vpop.f32.mrb[73].mxu1 }
 0xf7f   : > { %19389 = vst [vmem:[%s29462_s26 + $0x90] sm:$0xff] %v19318_v4   ;;  %v22294_v47 = vadd.f32 %v29453_v57, %v17147_v20  ;;  %v22246_v19 = vpop.f32.mrb[74].mxu1 }
 0xf80   : > { %v22295_v43 = vadd.f32 %v22246_v19, %v29453_v57  ;;  %v17150_v8 = vpop.f32.mrb[75].mxu1  ;;  %v17268_v56 = vmax.f32 %v22293_v14, 0.0 }
 0xf81   : > { %v22296_v23 = vadd.f32 %v29453_v57, %v17150_v8  ;;  %v17266_v45 = vmax.f32 %v22294_v47, 0.0 }
 0xf82   : > { %v17269_v0 = vmax.f32 %v22295_v43, 0.0 }
 0xf83   : > { %v17267_v16 = vmax.f32 %v22296_v23, 0.0 }
 0xf84   : > { %v19333_v53 = vpack.c.bf16 %v17269_v0, %v17268_v56 }
 0xf85   : > { %v19328_v51 = vpack.c.bf16 %v17267_v16, %v17266_v45  ;;  %v22249_v31 = vpop.f32.mrb[76].mxu1 }
 0xf86   : > { %19392 = vst [vmem:[%s29462_s26 + $0xa8] sm:$0xff] %v19333_v53   ;;  %v22297_v27 = vadd.f32 %v22249_v31, %v29453_v57  ;;  %v17163_v37 = vpop.f32.mrb[77].mxu1 }
 0xf87   : > { %19391 = vst [vmem:[%s29462_s26 + $0xa0] sm:$0xff] %v19328_v51   ;;  %v22298_v28 = vadd.f32 %v29453_v57, %v17163_v37  ;;  %v22250_v25 = vpop.f32.mrb[78].mxu1 }
 0xf88   : > { %v22299_v9 = vadd.f32 %v22250_v25, %v29453_v57  ;;  %v17166_v52 = vpop.f32.mrb[79].mxu1  ;;  %v17272_v33 = vmax.f32 %v22297_v27, 0.0 }
 0xf89   : > { %v22300_v5 = vadd.f32 %v29453_v57, %v17166_v52  ;;  %v17270_v54 = vmax.f32 %v22298_v28, 0.0 }
 0xf8a   : > { %v17273_v24 = vmax.f32 %v22299_v9, 0.0 }
 0xf8b   : > { %v17271_v7 = vmax.f32 %v22300_v5, 0.0 }
 0xf8c   : > { %v19343_v50 = vpack.c.bf16 %v17273_v24, %v17272_v33 }
 0xf8d   : > { %v19338_v40 = vpack.c.bf16 %v17271_v7, %v17270_v54 }
 0xf8e   : > { %19394 = vst [vmem:[%s29462_s26 + $0xb8] sm:$0xff] %v19343_v50  }
 0xf8f   : > { %19393 = vst [vmem:[%s29462_s26 + $0xb0] sm:$0xff] %v19338_v40  }
 0xf90   : > { %24025 = shalt.err (!%p24022_p5)
}
 0xf91   : > { %s24026_s23 = scalar_lea.hbm %s29537_s19, 3072  ;;  %s24030_s11 = scalar_lea.hbm %s29597_s8, 6144 }
 0xf92   : > { %p24027_p6 = scmp.ne.s32.totalorder %s29537_s19, %s24026_s23  ;;  %p24031_p10 = scmp.lt.u32.totalorder %s29537_s19, %s29597_s8 }
 0xf93   : > { %p24032_p11 = scmp.lt.u32.totalorder %s24030_s11, %s24026_s23  ;;  %p24034_p13 = scmp.lt.u32.totalorder %s24026_s23, %s29537_s19 }
 0xf94   : > { %p24028_p7 = pnand %p24027_p6, %p24183_p4 }
 0xf95   : > { %p24033_p12 = por %p24032_p11, %p24031_p10 }
 0xf96   : > { %p24029_p9 = pneg %p24028_p7 }
 0xf97   : > { %p24035_p0 = por %p24034_p13, %p24033_p12 }
 0xf99   : > { %p24036_p1 = pnand %p24035_p0, %p24029_p9 }
 0xf9b   : > { %24039 = shalt.err (!%p24036_p1)
}
 0xf9c   : > { %s24096_s20 = smov 64   ;;  %s24097_s21 = smov 4  }
 0xf9d   : > { %23178 = dma.vmem_to_hbm [thread:$0]  (%p24183_p4), %s29532_s12, 3072, %s29537_s19, %s29543_s30, %s24096_s20, %s24096_s20, %s24097_s21  }
 0xf9e PF: > { %p23184_p2 = scmp.ge.s32.totalorder %s24090_s10, 2  ;;  %s17545_s25 = sand.u32 1, %s24070_s27  }
 0xf9f   : > { %s17546_s22 = scalar_lea.sflag [#allocation4], %s17545_s25 }
 0xfa0   : > { %p23181_p3 = pnand %p23184_p2, %p24190_p8 }
 0xfa2   : > { %24065 = dma.done.wait (!%p23181_p3), %s17546_s22, 3072  }
 0xfa3   : > { %24067 = vsyncadd (!%p23181_p3), %s17546_s22, 4294964224  ;;  %s21_s10 = sadd.s32 1, %s24090_s10   ;;  %s30295_s27 = smov %s24074_s28 }
 0xfa4   : > { %p18_p5 = scmp.ge.s32.totalorder %s21_s10, 4   ;;  %s30296_s28 = smov %s24078_s29 }
 0xfa5   : > { %s30297_s29 = smov %s24196_s18  ;;  %s30298_s30 = smov %s24086_s9 }
 0xfa6   : > { %s30299_s9 = smov %s30301_s13  ;;  %20 = sbr.rel (!%p18_p5) target bundleno = 4 (0x4), region = 114 }
 0xfad   :  { %17551 = vsyncpa [#allocation4], 1 }
 0xfae   :  { %17553 = vsyncpa [#allocation4 + $0x1], 1 }

</bundles_post_ra>
